<compile_context>
chip_gen: v5e
topology: v5e:2x2
jax: 0.10.0
libtpu: 0.0.40
codegen_flags: <defaults>
</compile_context>

<pallas_src>
import jax
import jax.numpy as jnp
from jax.experimental import pallas as pl
from jax.experimental.pallas import tpu as pltpu

EPS = 1e-5


# ----------------------------- Pallas kernel --------------------------------
def _convlstm_kernel(px_ref, ph_ref, wxt_ref, wht_ref,
                     bx_ref, bh_ref, gammax_ref, betax_ref,
                     gammah_ref, betah_ref, c_ref,
                     h_out_ref, c_out_ref):
    Cout, M = c_ref.shape
    inv_m = 1.0 / M

    def conv_bn(w_ref, p_ref, b_ref, gamma_ref, beta_ref):
        # Fused 4-gate convolution: one lane-dense matmul, bf16 in / f32 accumulate.
        acc = jnp.dot(w_ref[...], p_ref[...],
                      preferred_element_type=jnp.float32)      # (4*Cout, M) f32
        acc = acc + b_ref[...]                                  # conv bias (4*Cout, 1)
        # BatchNorm2d (training mode): one-pass per-channel stats over all pixels.
        mean = jnp.sum(acc, axis=-1, keepdims=True) * inv_m
        ex2 = jnp.sum(acc * acc, axis=-1, keepdims=True) * inv_m
        var = ex2 - mean * mean
        return (acc - mean) * jax.lax.rsqrt(var + EPS) * gamma_ref[...] + beta_ref[...]

    z = (conv_bn(wxt_ref, px_ref, bx_ref, gammax_ref, betax_ref)
         + conv_bn(wht_ref, ph_ref, bh_ref, gammah_ref, betah_ref))   # (4*Cout, M)

    # gate order along the fused-channel axis: 0=i, 1=f, 2=c, 3=o
    i_gate = jax.nn.sigmoid(z[0 * Cout:1 * Cout, :])
    f_gate = jax.nn.sigmoid(z[1 * Cout:2 * Cout, :])
    c_inter = jnp.tanh(z[2 * Cout:3 * Cout, :])
    o_gate = jax.nn.sigmoid(z[3 * Cout:4 * Cout, :])

    c_next = f_gate * c_ref[...] + i_gate * c_inter
    h_next = o_gate * jnp.tanh(c_next)

    c_out_ref[...] = c_next.astype(c_out_ref.dtype)
    h_out_ref[...] = h_next.astype(h_out_ref.dtype)


# ------------------------- wrapper-side layout plumbing ----------------------
def _im2col_t(x_nchw, k):
    """Transposed im2col: (k*k*C [padded to mult of 16], N*H*W) bf16.

    Row index = (dy*k + dx)*C + ci ; column index = n*H*W + y*W + x.
    """
    N, C, H, W = x_nchw.shape
    p = k // 2
    xp = jnp.pad(x_nchw, ((0, 0), (0, 0), (p, p), (p, p)))
    taps = [xp[:, :, dy:dy + H, dx:dx + W] for dy in range(k) for dx in range(k)]
    t = jnp.stack(taps, axis=0)                 # (k*k, N, C, H, W)
    t = jnp.transpose(t, (0, 2, 1, 3, 4))       # (k*k, C, N, H, W)
    cols = t.reshape(k * k * C, N * H * W)
    pad_rows = (-(k * k * C)) % 16              # bf16 sublane tile alignment (zeros)
    if pad_rows:
        cols = jnp.pad(cols, ((0, pad_rows), (0, 0)))
    return cols.astype(jnp.bfloat16)


def _fuse_weights_t(w):
    """(4, k, k, Cin, Cout) -> (4*Cout, k*k*Cin [padded to mult of 16]) bf16.

    Row index = g*Cout + co ; column index = (dy*k + dx)*Cin + ci  (matches _im2col_t).
    """
    g, kh, kw, ci, co = w.shape
    wt = jnp.transpose(w, (0, 4, 1, 2, 3)).reshape(g * co, kh * kw * ci)
    pad_cols = (-(kh * kw * ci)) % 16
    if pad_cols:
        wt = jnp.pad(wt, ((0, 0), (0, pad_cols)))
    return wt.astype(jnp.bfloat16)


def convlstm_forward(x_nchw, h_nchw, c_nchw, params):
    """One ConvLSTMCell step. Inputs are NCHW (PyTorch convention)."""
    N, Cin, H, W = x_nchw.shape
    Cout = params["wh"].shape[-1]
    kx = params["wx"].shape[1]
    kh = params["wh"].shape[1]
    # Only odd kernel sizes give PyTorch-matching 'same' output with pad = floor(k/2).
    assert kx % 2 == 1 and kh % 2 == 1, "only odd kernel sizes are supported"
    M = N * H * W

    px = _im2col_t(x_nchw, kx)                       # (~kx*kx*Cin,  M) bf16
    ph = _im2col_t(h_nchw, kh)                       # (~kh*kh*Cout, M) bf16
    wxt = _fuse_weights_t(params["wx"])              # (4*Cout, ~kx*kx*Cin)  bf16
    wht = _fuse_weights_t(params["wh"])              # (4*Cout, ~kh*kh*Cout) bf16
    bx = params["bx"].reshape(4 * Cout, 1).astype(jnp.float32)
    bh = params["bh"].reshape(4 * Cout, 1).astype(jnp.float32)
    gammax = params["gx"].reshape(4 * Cout, 1).astype(jnp.float32)
    betax = params["betax"].reshape(4 * Cout, 1).astype(jnp.float32)
    gammah = params["gh"].reshape(4 * Cout, 1).astype(jnp.float32)
    betah = params["betah"].reshape(4 * Cout, 1).astype(jnp.float32)
    c = jnp.transpose(c_nchw, (1, 0, 2, 3)).reshape(Cout, M).astype(jnp.float32)

    vmem = pl.BlockSpec(memory_space=pltpu.MemorySpace.VMEM)
    out_shape = (jax.ShapeDtypeStruct((Cout, M), jnp.float32),
                 jax.ShapeDtypeStruct((Cout, M), jnp.float32))

    h_t, c_t = pl.pallas_call(
        _convlstm_kernel,
        out_shape=out_shape,
        in_specs=[vmem] * 11,
        out_specs=(vmem, vmem),
        compiler_params=pltpu.CompilerParams(vmem_limit_bytes=32 * 1024 * 1024),
    )(px, ph, wxt, wht, bx, bh, gammax, betax, gammah, betah, c)

    # channel-major (Cout, N*H*W) -> NCHW
    h_next = jnp.transpose(h_t.reshape(Cout, N, H, W), (1, 0, 2, 3))
    c_next = jnp.transpose(c_t.reshape(Cout, N, H, W), (1, 0, 2, 3))
    return h_next, c_next


def make_params(key, input_size, output_size, x_kernel_size, h_kernel_size):
    ks = jax.random.split(key, 4)
    # Stacked weights for the 4 gates (order: i, f, c, o), HWIO layout.
    wx = 0.1 * jax.random.normal(
        ks[0], (4, x_kernel_size, x_kernel_size, input_size, output_size), jnp.float32)
    wh = 0.1 * jax.random.normal(
        ks[1], (4, h_kernel_size, h_kernel_size, output_size, output_size), jnp.float32)
    bx = 0.05 * jax.random.normal(ks[2], (4, 1, output_size), jnp.float32)
    bx = bx.at[1].set(1.0)  # conv_f_x.bias.data.fill_(1)
    bh = 0.05 * jax.random.normal(ks[3], (4, 1, output_size), jnp.float32)
    gx = jnp.ones((4, 1, output_size), jnp.float32)      # BN weight init = 1
    betax = jnp.zeros((4, 1, output_size), jnp.float32)  # BN bias init = 0
    gh = jnp.ones((4, 1, output_size), jnp.float32)
    betah = jnp.zeros((4, 1, output_size), jnp.float32)
    return dict(wx=wx, bx=bx, wh=wh, bh=bh, gx=gx, betax=betax, gh=gh, betah=betah)


# ---------------- pure-JAX reference (correctness sanity check) --------------
def _ref_conv_bn(inp, w, b, gamma, beta, pad):
    y = jax.lax.conv_general_dilated(
        inp, w, window_strides=(1, 1),
        padding=[(pad, pad), (pad, pad)],
        dimension_numbers=("NHWC", "HWIO", "NHWC"),
        precision=jax.lax.Precision.HIGHEST)
    y = y + b.reshape(1, 1, 1, -1)
    mean = jnp.mean(y, axis=(0, 1, 2), keepdims=True)
    var = jnp.mean((y - mean) ** 2, axis=(0, 1, 2), keepdims=True)
    return (y - mean) * jax.lax.rsqrt(var + EPS) * gamma.reshape(1, 1, 1, -1) \
        + beta.reshape(1, 1, 1, -1)


def reference_forward(x_nchw, h_nchw, c_nchw, params):
    x = jnp.transpose(x_nchw, (0, 2, 3, 1))
    h = jnp.transpose(h_nchw, (0, 2, 3, 1))
    c = jnp.transpose(c_nchw, (0, 2, 3, 1))
    kx = params["wx"].shape[1]
    kh = params["wh"].shape[1]
    px, ph = kx // 2, kh // 2

    gx = [_ref_conv_bn(x, params["wx"][g], params["bx"][g, 0],
                       params["gx"][g, 0], params["betax"][g, 0], px) for g in range(4)]
    gh = [_ref_conv_bn(h, params["wh"][g], params["bh"][g, 0],
                       params["gh"][g, 0], params["betah"][g, 0], ph) for g in range(4)]

    i_g = jax.nn.sigmoid(gx[0] + gh[0])
    f_g = jax.nn.sigmoid(gx[1] + gh[1])
    c_i = jnp.tanh(gx[2] + gh[2])
    o_g = jax.nn.sigmoid(gx[3] + gh[3])
    c_next = f_g * c + i_g * c_i
    h_next = o_g * jnp.tanh(c_next)
    return (jnp.transpose(h_next, (0, 3, 1, 2)),
            jnp.transpose(c_next, (0, 3, 1, 2)))


if __name__ == "__main__":
    # Small shapes consistent with the module's forward.
    N, Cin, H, W = 2, 4, 16, 16
    Cout = 32
    x_kernel_size, h_kernel_size = 3, 5   # stride = 1 (module default)

    key = jax.random.PRNGKey(0)
    kx_, kp_ = jax.random.split(key)
    x = jax.random.normal(kx_, (N, Cin, H, W), jnp.float32)     # NCHW, like PyTorch
    h0 = jnp.zeros((N, Cout, H, W), jnp.float32)                 # first-call state
    c0 = jnp.zeros((N, Cout, H, W), jnp.float32)
    params = make_params(kp_, Cin, Cout, x_kernel_size, h_kernel_size)

    fwd = jax.jit(convlstm_forward)
    next_h, next_c = fwd(x, h0, c0, params)
    jax.block_until_ready((next_h, next_c))

    ref_h, ref_c = reference_forward(x, h0, c0, params)
    assert next_h.shape == (N, Cout, H, W) and next_c.shape == (N, Cout, H, W)
    # Kernel uses bf16 matmul operands (f32 accumulate); tolerance set accordingly
    # (outputs are sigmoid/tanh-bounded, so this is an absolute-scale check).
    assert jnp.allclose(next_h, ref_h, atol=3e-2, rtol=3e-2)
    assert jnp.allclose(next_c, ref_c, atol=3e-2, rtol=3e-2)

    print("KERNEL_OK")
</pallas_src>

<mosaic_0001>
module attributes {stable_mosaic.version = 11 : i64} {
  func.func @_convlstm_kernel(%arg0: memref<48x512xbf16, #tpu.memory_space<vmem>>, %arg1: memref<800x512xbf16, #tpu.memory_space<vmem>>, %arg2: memref<128x48xbf16, #tpu.memory_space<vmem>>, %arg3: memref<128x800xbf16, #tpu.memory_space<vmem>>, %arg4: memref<128x1xf32, #tpu.memory_space<vmem>>, %arg5: memref<128x1xf32, #tpu.memory_space<vmem>>, %arg6: memref<128x1xf32, #tpu.memory_space<vmem>>, %arg7: memref<128x1xf32, #tpu.memory_space<vmem>>, %arg8: memref<128x1xf32, #tpu.memory_space<vmem>>, %arg9: memref<128x1xf32, #tpu.memory_space<vmem>>, %arg10: memref<32x512xf32, #tpu.memory_space<vmem>>, %arg11: memref<32x512xf32, #tpu.memory_space<vmem>>, %arg12: memref<32x512xf32, #tpu.memory_space<vmem>>) attributes {dimension_semantics = [], scalar_prefetch = 0 : i64, scratch_operands = 0 : i64, tpu.core_type = #tpu.core_type<tc>} {
    %c0 = arith.constant 0 : index
    %c0_0 = arith.constant 0 : index
    %0 = vector.load %arg2[%c0, %c0_0] : memref<128x48xbf16, #tpu.memory_space<vmem>>, vector<128x48xbf16>
    %c0_1 = arith.constant 0 : index
    %c0_2 = arith.constant 0 : index
    %1 = vector.load %arg0[%c0_1, %c0_2] : memref<48x512xbf16, #tpu.memory_space<vmem>>, vector<48x512xbf16>
    %cst = arith.constant dense<0.000000e+00> : vector<128x512xf32>
    %2 = tpu.matmul %0, %1, %cst {dimension_numbers = #tpu.dot_dimension_numbers<[1], [0], [0], [1], [0, 0, 1, 1], [], []>} : vector<128x48xbf16>, vector<48x512xbf16>, vector<128x512xf32> -> vector<128x512xf32>
    %c0_3 = arith.constant 0 : index
    %c0_4 = arith.constant 0 : index
    %3 = vector.load %arg4[%c0_3, %c0_4] : memref<128x1xf32, #tpu.memory_space<vmem>>, vector<128x1xf32>
    %4 = vector.broadcast %3 : vector<128x1xf32> to vector<128x512xf32>
    %5 = arith.addf %2, %4 : vector<128x512xf32>
    %cst_5 = arith.constant dense<0.000000e+00> : vector<128xf32>
    %6 = vector.multi_reduction <add>, %5, %cst_5 [1] : vector<128x512xf32> to vector<128xf32>
    %7 = vector.shape_cast %6 : vector<128xf32> to vector<128x1xf32>
    %cst_6 = arith.constant 0.001953125 : f32
    %8 = vector.broadcast %cst_6 : f32 to vector<128x1xf32>
    %9 = arith.mulf %7, %8 : vector<128x1xf32>
    %10 = arith.mulf %5, %5 : vector<128x512xf32>
    %cst_7 = arith.constant dense<0.000000e+00> : vector<128xf32>
    %11 = vector.multi_reduction <add>, %10, %cst_7 [1] : vector<128x512xf32> to vector<128xf32>
    %12 = vector.shape_cast %11 : vector<128xf32> to vector<128x1xf32>
    %cst_8 = arith.constant 0.001953125 : f32
    %13 = vector.broadcast %cst_8 : f32 to vector<128x1xf32>
    %14 = arith.mulf %12, %13 : vector<128x1xf32>
    %15 = arith.mulf %9, %9 : vector<128x1xf32>
    %16 = arith.subf %14, %15 : vector<128x1xf32>
    %17 = vector.broadcast %9 : vector<128x1xf32> to vector<128x512xf32>
    %18 = arith.subf %5, %17 : vector<128x512xf32>
    %cst_9 = arith.constant 9.99999974E-6 : f32
    %19 = vector.broadcast %cst_9 : f32 to vector<128x1xf32>
    %20 = arith.addf %16, %19 : vector<128x1xf32>
    %21 = math.rsqrt %20 : vector<128x1xf32>
    %22 = vector.broadcast %21 : vector<128x1xf32> to vector<128x512xf32>
    %23 = arith.mulf %18, %22 : vector<128x512xf32>
    %c0_10 = arith.constant 0 : index
    %c0_11 = arith.constant 0 : index
    %24 = vector.load %arg6[%c0_10, %c0_11] : memref<128x1xf32, #tpu.memory_space<vmem>>, vector<128x1xf32>
    %25 = vector.broadcast %24 : vector<128x1xf32> to vector<128x512xf32>
    %26 = arith.mulf %23, %25 : vector<128x512xf32>
    %c0_12 = arith.constant 0 : index
    %c0_13 = arith.constant 0 : index
    %27 = vector.load %arg7[%c0_12, %c0_13] : memref<128x1xf32, #tpu.memory_space<vmem>>, vector<128x1xf32>
    %28 = vector.broadcast %27 : vector<128x1xf32> to vector<128x512xf32>
    %29 = arith.addf %26, %28 : vector<128x512xf32>
    %c0_14 = arith.constant 0 : index
    %c0_15 = arith.constant 0 : index
    %30 = vector.load %arg3[%c0_14, %c0_15] : memref<128x800xbf16, #tpu.memory_space<vmem>>, vector<128x800xbf16>
    %c0_16 = arith.constant 0 : index
    %c0_17 = arith.constant 0 : index
    %31 = vector.load %arg1[%c0_16, %c0_17] : memref<800x512xbf16, #tpu.memory_space<vmem>>, vector<800x512xbf16>
    %cst_18 = arith.constant dense<0.000000e+00> : vector<128x512xf32>
    %32 = tpu.matmul %30, %31, %cst_18 {dimension_numbers = #tpu.dot_dimension_numbers<[1], [0], [0], [1], [0, 0, 1, 1], [], []>} : vector<128x800xbf16>, vector<800x512xbf16>, vector<128x512xf32> -> vector<128x512xf32>
    %c0_19 = arith.constant 0 : index
    %c0_20 = arith.constant 0 : index
    %33 = vector.load %arg5[%c0_19, %c0_20] : memref<128x1xf32, #tpu.memory_space<vmem>>, vector<128x1xf32>
    %34 = vector.broadcast %33 : vector<128x1xf32> to vector<128x512xf32>
    %35 = arith.addf %32, %34 : vector<128x512xf32>
    %cst_21 = arith.constant dense<0.000000e+00> : vector<128xf32>
    %36 = vector.multi_reduction <add>, %35, %cst_21 [1] : vector<128x512xf32> to vector<128xf32>
    %37 = vector.shape_cast %36 : vector<128xf32> to vector<128x1xf32>
    %cst_22 = arith.constant 0.001953125 : f32
    %38 = vector.broadcast %cst_22 : f32 to vector<128x1xf32>
    %39 = arith.mulf %37, %38 : vector<128x1xf32>
    %40 = arith.mulf %35, %35 : vector<128x512xf32>
    %cst_23 = arith.constant dense<0.000000e+00> : vector<128xf32>
    %41 = vector.multi_reduction <add>, %40, %cst_23 [1] : vector<128x512xf32> to vector<128xf32>
    %42 = vector.shape_cast %41 : vector<128xf32> to vector<128x1xf32>
    %cst_24 = arith.constant 0.001953125 : f32
    %43 = vector.broadcast %cst_24 : f32 to vector<128x1xf32>
    %44 = arith.mulf %42, %43 : vector<128x1xf32>
    %45 = arith.mulf %39, %39 : vector<128x1xf32>
    %46 = arith.subf %44, %45 : vector<128x1xf32>
    %47 = vector.broadcast %39 : vector<128x1xf32> to vector<128x512xf32>
    %48 = arith.subf %35, %47 : vector<128x512xf32>
    %cst_25 = arith.constant 9.99999974E-6 : f32
    %49 = vector.broadcast %cst_25 : f32 to vector<128x1xf32>
    %50 = arith.addf %46, %49 : vector<128x1xf32>
    %51 = math.rsqrt %50 : vector<128x1xf32>
    %52 = vector.broadcast %51 : vector<128x1xf32> to vector<128x512xf32>
    %53 = arith.mulf %48, %52 : vector<128x512xf32>
    %c0_26 = arith.constant 0 : index
    %c0_27 = arith.constant 0 : index
    %54 = vector.load %arg8[%c0_26, %c0_27] : memref<128x1xf32, #tpu.memory_space<vmem>>, vector<128x1xf32>
    %55 = vector.broadcast %54 : vector<128x1xf32> to vector<128x512xf32>
    %56 = arith.mulf %53, %55 : vector<128x512xf32>
    %c0_28 = arith.constant 0 : index
    %c0_29 = arith.constant 0 : index
    %57 = vector.load %arg9[%c0_28, %c0_29] : memref<128x1xf32, #tpu.memory_space<vmem>>, vector<128x1xf32>
    %58 = vector.broadcast %57 : vector<128x1xf32> to vector<128x512xf32>
    %59 = arith.addf %56, %58 : vector<128x512xf32>
    %60 = arith.addf %29, %59 : vector<128x512xf32>
    %61 = vector.extract_strided_slice %60 {offsets = [0, 0], sizes = [32, 512], strides = [1, 1]} : vector<128x512xf32> to vector<32x512xf32>
    %62 = arith.negf %61 : vector<32x512xf32>
    %63 = math.exp %62 : vector<32x512xf32>
    %cst_30 = arith.constant 1.000000e+00 : f32
    %64 = vector.broadcast %cst_30 : f32 to vector<32x512xf32>
    %65 = arith.addf %64, %63 : vector<32x512xf32>
    %66 = arith.divf %64, %65 : vector<32x512xf32>
    %67 = vector.extract_strided_slice %60 {offsets = [32, 0], sizes = [32, 512], strides = [1, 1]} : vector<128x512xf32> to vector<32x512xf32>
    %68 = arith.negf %67 : vector<32x512xf32>
    %69 = math.exp %68 : vector<32x512xf32>
    %cst_31 = arith.constant 1.000000e+00 : f32
    %70 = vector.broadcast %cst_31 : f32 to vector<32x512xf32>
    %71 = arith.addf %70, %69 : vector<32x512xf32>
    %72 = arith.divf %70, %71 : vector<32x512xf32>
    %73 = vector.extract_strided_slice %60 {offsets = [64, 0], sizes = [32, 512], strides = [1, 1]} : vector<128x512xf32> to vector<32x512xf32>
    %74 = math.tanh %73 : vector<32x512xf32>
    %75 = vector.extract_strided_slice %60 {offsets = [96, 0], sizes = [32, 512], strides = [1, 1]} : vector<128x512xf32> to vector<32x512xf32>
    %76 = arith.negf %75 : vector<32x512xf32>
    %77 = math.exp %76 : vector<32x512xf32>
    %cst_32 = arith.constant 1.000000e+00 : f32
    %78 = vector.broadcast %cst_32 : f32 to vector<32x512xf32>
    %79 = arith.addf %78, %77 : vector<32x512xf32>
    %80 = arith.divf %78, %79 : vector<32x512xf32>
    %c0_33 = arith.constant 0 : index
    %c0_34 = arith.constant 0 : index
    %81 = vector.load %arg10[%c0_33, %c0_34] : memref<32x512xf32, #tpu.memory_space<vmem>>, vector<32x512xf32>
    %82 = arith.mulf %72, %81 : vector<32x512xf32>
    %83 = arith.mulf %66, %74 : vector<32x512xf32>
    %84 = arith.addf %82, %83 : vector<32x512xf32>
    %85 = math.tanh %84 : vector<32x512xf32>
    %86 = arith.mulf %80, %85 : vector<32x512xf32>
    %c0_35 = arith.constant 0 : index
    %c0_36 = arith.constant 0 : index
    %87 = vector.load %arg12[%c0_35, %c0_36] : memref<32x512xf32, #tpu.memory_space<vmem>>, vector<32x512xf32>
    tpu.vector_store %arg12[%c0_35, %c0_36], %84 {strides = array<i32>} : memref<32x512xf32, #tpu.memory_space<vmem>>, vector<32x512xf32>,
    %c0_37 = arith.constant 0 : index
    %c0_38 = arith.constant 0 : index
    %88 = vector.load %arg11[%c0_37, %c0_38] : memref<32x512xf32, #tpu.memory_space<vmem>>, vector<32x512xf32>
    tpu.vector_store %arg11[%c0_37, %c0_38], %86 {strides = array<i32>} : memref<32x512xf32, #tpu.memory_space<vmem>>, vector<32x512xf32>,
    return
  }
}

</mosaic_0001>

<bundles_post_ra>
// kernel: convlstm_forward.1
= control target key start
LH: loop header
LB: loop body
LE: loop exit
PB: predicated region body
PF: predicated region fallthrough
CT: control target
= control target key end

     0   :  { %v8291_v3 = vmov 0   ;;  %vm265_vm0 = vcmask 392192   ;;  %vm3038_vm1 = vcmask 261120   ;;  %s15512_s0 = inlined_call_operand.vmem [shape: bf16[48,512], index: 0, kind: input, shape index: {}]   ;;  %s15513_s2 = inlined_call_operand.vmem [shape: bf16[128,48], index: 2, kind: input, shape index: {}]   ;;  %s15514_s1 = inlined_call_operand.vmem [shape: bf16[800,512], index: 1, kind: input, shape index: {}]   ;;  %s15515_s4 = inlined_call_operand.vmem [shape: f32[128,1], index: 4, kind: input, shape index: {}]   ;;  %s15516_s6 = inlined_call_operand.vmem [shape: f32[128,1], index: 6, kind: input, shape index: {}]   ;;  %s15517_s7 = inlined_call_operand.vmem [shape: f32[128,1], index: 7, kind: input, shape index: {}]   ;;  %s15518_s3 = inlined_call_operand.vmem [shape: bf16[128,800], index: 3, kind: input, shape index: {}]   ;;  %s15519_s5 = inlined_call_operand.vmem [shape: f32[128,1], index: 5, kind: input, shape index: {}]   ;;  %s15520_s8 = inlined_call_operand.vmem [shape: f32[128,1], index: 8, kind: input, shape index: {}]   ;;  %s15521_s9 = inlined_call_operand.vmem [shape: f32[128,1], index: 9, kind: input, shape index: {}]   ;;  %s15522_s10 = inlined_call_operand.vmem [shape: f32[32,512], index: 10, kind: input, shape index: {}]   ;;  %s15523_s12 = inlined_call_operand.vmem [shape: f32[32,512], index: 12, kind: output, shape index: {1}]   ;;  %s15524_s11 = inlined_call_operand.vmem [shape: f32[32,512], index: 11, kind: output, shape index: {0}]  }
   0x1   :  { %v6541_v0 = vld [vmem:[%s15512_s0 + $0x40] sm:$0xf]  ;;  %v7709_v1 = vld [vmem:[%s15512_s0 + $0x4c] sm:$0xf0]  ;;  %v7707_v2 = vld [vmem:[%s15512_s0 + $0x44] sm:$0xf]  ;;  %7969 = vset.pattern.permute.xlu1 %v8291_v3  ;;  %7968 = vset.pattern.permute.xlu0 %v8291_v3 }
   0x2   :  { %v6542_v4 = vor.u32 %v7709_v1, %v6541_v0  ;;  %v6543_v5 = vld [vmem:[%s15512_s0 + $0x50] sm:$0xf0]  ;;  %v6549_v6 = vld [vmem:[%s15512_s0 + $0x48] sm:$0xf]  ;;  %v7710_v7 = vld [vmem:[%s15512_s0 + $0x54] sm:$0xf0]  ;;  %7970 = vset.pattern.permute.xlu2 %v8291_v3 }
   0x3   :  { %v6546_v8 = vor.u32 %v7707_v2, %v6543_v5  ;;  %v6550_v9 = vor.u32 %v7710_v7, %v6549_v6  ;;  %v7708_v10 = vld [vmem:[%s15512_s0 + $0x4c] sm:$0xf]  ;;  %v6551_v11 = vld [vmem:[%s15512_s0 + $0x58] sm:$0xf0]  ;;  %v6525_v12 = vld [vmem:[%s15512_s0 + $0x20] sm:$0xf] }
   0x4   :  { %295 = vmatpush.bf16.msra.mxu0 %v6542_v4  ;;  %v6554_v13 = vor.u32 %v7708_v10, %v6551_v11  ;;  %v7705_v14 = vld [vmem:[%s15512_s0 + $0x2c] sm:$0xf0]  ;;  %v7703_v15 = vld [vmem:[%s15512_s0 + $0x24] sm:$0xf]  ;;  %v6527_v16 = vld [vmem:[%s15512_s0 + $0x30] sm:$0xf0] }
   0x5   :  { %344 = vmatpush.bf16.msra.mxu1 %v6546_v8  ;;  %393 = vmatpush.bf16.msra.mxu2 %v6550_v9  ;;  %v6526_v17 = vor.u32 %v7705_v14, %v6525_v12  ;;  %v6530_v18 = vor.u32 %v7703_v15, %v6527_v16  ;;  %v6533_v19 = vld [vmem:[%s15512_s0 + $0x28] sm:$0xf]  ;;  %v7706_v20 = vld [vmem:[%s15512_s0 + $0x34] sm:$0xf0]  ;;  %v7704_v21 = vld [vmem:[%s15512_s0 + $0x2c] sm:$0xf] }
   0x6   :  { %442 = vmatpush.bf16.msra.mxu3 %v6554_v13  ;;  %v6534_v22 = vor.u32 %v7706_v20, %v6533_v19  ;;  %v6535_v23 = vld [vmem:[%s15512_s0 + $0x38] sm:$0xf0]  ;;  %v6509_v24 = vld [vmem:[%s15512_s0] sm:$0xf]  ;;  %v7701_v25 = vld [vmem:[%s15512_s0 + $0xc] sm:$0xf0] }
   0x7   :  { %v6538_v26 = vor.u32 %v7704_v21, %v6535_v23  ;;  %v7699_v27 = vld [vmem:[%s15512_s0 + $0x4] sm:$0xf]  ;;  %v6511_v28 = vld [vmem:[%s15512_s0 + $0x10] sm:$0xf0]  ;;  %v6517_v29 = vld [vmem:[%s15512_s0 + $0x8] sm:$0xf]  ;;  %v6510_v30 = vor.u32 %v7701_v25, %v6509_v24 }
   0x8   :  { %296 = vmatpush.bf16.msra.mxu0 %v6526_v17  ;;  %v7702_v31 = vld [vmem:[%s15512_s0 + $0x14] sm:$0xf0]  ;;  %v7700_v32 = vld [vmem:[%s15512_s0 + $0xc] sm:$0xf]  ;;  %v6519_v33 = vld [vmem:[%s15512_s0 + $0x18] sm:$0xf0]  ;;  %v6514_v34 = vor.u32 %v7699_v27, %v6511_v28 }
   0x9   :  { %345 = vmatpush.bf16.msra.mxu1 %v6530_v18  ;;  %394 = vmatpush.bf16.msra.mxu2 %v6534_v22  ;;  %v6518_v35 = vor.u32 %v7702_v31, %v6517_v29  ;;  %v7691_v36 = vld [vmem:[%s15513_s2] sm:$0xff]  ;;  %v7861_v38 = vld [vmem:[%s15514_s1 + $0x2ec] sm:$0xf0]  ;;  %v6522_v39 = vor.u32 %v7700_v32, %v6519_v33  ;;  %v72_v13 = vld [vmem:[%s15515_s4 + $0x18] sm:$0xff] }
   0xa   :  { %v7181_v37 = vld [vmem:[%s15514_s1 + $0x2e0] sm:$0xf]  ;;  %443 = vmatpush.bf16.msra.mxu3 %v6538_v26  ;;  %v7797_v42 = vld [vmem:[%s15514_s1 + $0xec] sm:$0xf0]  ;;  %v70_v14 = vld [vmem:[%s15515_s4 + $0x8] sm:$0xff] }
   0xb   :  { %v7182_v40 = vor.u32 %v7861_v38, %v7181_v37  ;;  %v6925_v41 = vld [vmem:[%s15514_s1 + $0xe0] sm:$0xf]  ;;  %v7893_v44 = vld [vmem:[%s15514_s1 + $0x3ec] sm:$0xf0]  ;;  %v74_v15 = vld [vmem:[%s15515_s4 + $0x28] sm:$0xff] }
   0xc   :  { %v7309_v43 = vld [vmem:[%s15514_s1 + $0x3e0] sm:$0xf]  ;;  %v7829_v46 = vld [vmem:[%s15514_s1 + $0x1ec] sm:$0xf0]  ;;  %297 = vmatpush.bf16.msra.mxu0 %v6510_v30  ;;  %v6926_v48 = vor.u32 %v7797_v42, %v6925_v41  ;;  %v7692_v16 = vld [vmem:[%s15513_s2 + $0x8] sm:$0xff] }
   0xd   :  { %v7053_v45 = vld [vmem:[%s15514_s1 + $0x1e0] sm:$0xf]  ;;  %v7310_v47 = vor.u32 %v7893_v44, %v7309_v43  ;;  %346 = vmatpush.bf16.msra.mxu1 %v6514_v34  ;;  %395 = vmatpush.bf16.msra.mxu2 %v6518_v35  ;;  %v71_v49 = vld [vmem:[%s15515_s4 + $0x10] sm:$0xff]  ;;  %v76_v17 = vld [vmem:[%s15515_s4 + $0x38] sm:$0xff] }
   0xe   :  { %444 = vmatpush.bf16.msra.mxu3 %v6522_v39  ;;  %v7054_v50 = vor.u32 %v7829_v46, %v7053_v45  ;;  %v69_v51 = vld [vmem:[%s15515_s4] sm:$0xff]  ;;  %v7857_v54 = vld [vmem:[%s15514_s1 + $0x2cc] sm:$0xf0]  ;;  %97 = vperm.xlu1 %7969, %v71_v49   ;;  %v78_v33 = vld [vmem:[%s15515_s4 + $0x48] sm:$0xff] }
   0xf   :  { %v73_v52 = vld [vmem:[%s15515_s4 + $0x20] sm:$0xff]  ;;  %6555 = vmatmul.msk.bf16.vlgmr.msra.gmra.mxu0 %vm265_vm0, %v7691_v36  ;;  %v7793_v56 = vld [vmem:[%s15514_s1 + $0xcc] sm:$0xf0]  ;;  %87 = vperm.xlu0 %7968, %v69_v51   ;;  %v80_v34 = vld [vmem:[%s15515_s4 + $0x58] sm:$0xff] }
  0x10   :  { %v7165_v53 = vld [vmem:[%s15514_s1 + $0x2c0] sm:$0xf]  ;;  %6563 = vmatmul.msk.bf16.vlgmr.msra.gmra.mxu1 %vm265_vm0, %v7691_v36  ;;  %6571 = vmatmul.msk.bf16.vlgmr.msra.gmra.mxu2 %vm265_vm0, %v7691_v36  ;;  %v7889_v59 = vld [vmem:[%s15514_s1 + $0x3cc] sm:$0xf0] }
  0x11   :  { %3161 = vmatpush.bf16.msrb.mxu2 %v7182_v40  ;;  %v6909_v55 = vld [vmem:[%s15514_s1 + $0xc0] sm:$0xf]  ;;  %v7166_v58 = vor.u32 %v7857_v54, %v7165_v53  ;;  %v7825_v61 = vld [vmem:[%s15514_s1 + $0x1cc] sm:$0xf0]  ;;  %6579 = vmatmul.msk.bf16.vlgmr.msra.gmra.mxu3 %vm265_vm0, %v7691_v36  ;;  %v82_v36 = vld [vmem:[%s15515_s4 + $0x68] sm:$0xff] }
  0x12   :  { %3210 = vmatpush.bf16.msrb.mxu3 %v7310_v47  ;;  %v7293_v57 = vld [vmem:[%s15514_s1 + $0x3c0] sm:$0xf]  ;;  %3063 = vmatpush.bf16.msrb.mxu0 %v6926_v48  ;;  %v6910_v62 = vor.u32 %v7793_v56, %v6909_v55  ;;  %v7853_v2 = vld [vmem:[%s15514_s1 + $0x2ac] sm:$0xf0]  ;;  %v7694_v54 = vld [vmem:[%s15513_s2 + $0x18] sm:$0xff] }
  0x13   :  { %v7037_v60 = vld [vmem:[%s15514_s1 + $0x1c0] sm:$0xf]  ;;  %v7294_v63 = vor.u32 %v7889_v59, %v7293_v57  ;;  %3112 = vmatpush.bf16.msrb.mxu1 %v7054_v50  ;;  %107 = vperm.xlu2 %7970, %v73_v52   ;;  %v7789_v5 = vld [vmem:[%s15514_s1 + $0xac] sm:$0xf0]  ;;  %v84_v52 = vld [vmem:[%s15515_s4 + $0x78] sm:$0xff] }
  0x14   :  { %v7038_v0 = vor.u32 %v7825_v61, %v7037_v60  ;;  %v7149_v1 = vld [vmem:[%s15514_s1 + $0x2a0] sm:$0xf]  ;;  %v7885_v8 = vld [vmem:[%s15514_s1 + $0x3ac] sm:$0xf0]  ;;  %v1083_v55 = vld [vmem:[%s15516_s6 + $0x28] sm:$0xff] }
  0x15   :  { %3162 = vmatpush.bf16.msrb.mxu2 %v7166_v58  ;;  %v7150_v3 = vor.u32 %v7853_v2, %v7149_v1  ;;  %v6893_v4 = vld [vmem:[%s15514_s1 + $0xa0] sm:$0xf]  ;;  %v7821_v10 = vld [vmem:[%s15514_s1 + $0x1ac] sm:$0xf0]  ;;  %v1079_v56 = vld [vmem:[%s15516_s6 + $0x8] sm:$0xff] }
  0x16   :  { %3211 = vmatpush.bf16.msrb.mxu3 %v7294_v63  ;;  %v7277_v6 = vld [vmem:[%s15514_s1 + $0x3a0] sm:$0xf]  ;;  %3064 = vmatpush.bf16.msrb.mxu0 %v6910_v62  ;;  %v6894_v7 = vor.u32 %v7789_v5, %v6893_v4  ;;  %v75_v18 = vld [vmem:[%s15515_s4 + $0x30] sm:$0xff] }
  0x17   :  { %v7021_v9 = vld [vmem:[%s15514_s1 + $0x1a0] sm:$0xf]  ;;  %3113 = vmatpush.bf16.msrb.mxu1 %v7038_v0  ;;  %v7278_v11 = vor.u32 %v7885_v8, %v7277_v6  ;;  %102 = vperm.xlu1 %7969, %v72_v13   ;;  %v7849_v21 = vld [vmem:[%s15514_s1 + $0x28c] sm:$0xf0]  ;;  %v1085_v8 = vld [vmem:[%s15516_s6 + $0x38] sm:$0xff] }
  0x18   :  { %v7022_v12 = vor.u32 %v7821_v10, %v7021_v9  ;;  %92 = vperm.xlu0 %7968, %v70_v14   ;;  %v77_v19 = vld [vmem:[%s15515_s4 + $0x40] sm:$0xff]  ;;  %v7785_v24 = vld [vmem:[%s15514_s1 + $0x8c] sm:$0xf0]  ;;  %v1089_v10 = vld [vmem:[%s15516_s6 + $0x58] sm:$0xff] }
  0x19   :  { %3163 = vmatpush.bf16.msrb.mxu2 %v7150_v3  ;;  %v7133_v20 = vld [vmem:[%s15514_s1 + $0x280] sm:$0xf]  ;;  %v7881_v27 = vld [vmem:[%s15514_s1 + $0x38c] sm:$0xf0] }
  0x1a   :  { %3212 = vmatpush.bf16.msrb.mxu3 %v7278_v11  ;;  %3065 = vmatpush.bf16.msrb.mxu0 %v6894_v7  ;;  %v7134_v22 = vor.u32 %v7849_v21, %v7133_v20  ;;  %v6877_v23 = vld [vmem:[%s15514_s1 + $0x80] sm:$0xf]  ;;  %v7817_v29 = vld [vmem:[%s15514_s1 + $0x18c] sm:$0xf0]  ;;  %v1081_v7 = vld [vmem:[%s15516_s6 + $0x18] sm:$0xff] }
  0x1b   :  { %3114 = vmatpush.bf16.msrb.mxu1 %v7022_v12  ;;  %112 = vperm.xlu2 %7970, %v74_v15   ;;  %v7261_v25 = vld [vmem:[%s15514_s1 + $0x380] sm:$0xf]  ;;  %v6878_v26 = vor.u32 %v7785_v24, %v6877_v23  ;;  %v79_v32 = vld [vmem:[%s15515_s4 + $0x50] sm:$0xff] }
  0x1c   :  { %v7005_v28 = vld [vmem:[%s15514_s1 + $0x180] sm:$0xf]  ;;  %v7262_v30 = vor.u32 %v7881_v27, %v7261_v25  ;;  %v7693_v35 = vld [vmem:[%s15513_s2 + $0x10] sm:$0xff]  ;;  %v1091_v27 = vld [vmem:[%s15516_s6 + $0x68] sm:$0xff] }
  0x1d   :  { %3164 = vmatpush.bf16.msrb.mxu2 %v7134_v22  ;;  %v7006_v31 = vor.u32 %v7817_v29, %v7005_v28  ;;  %v81_v37 = vld [vmem:[%s15515_s4 + $0x60] sm:$0xff]  ;;  %v83_v38 = vld [vmem:[%s15515_s4 + $0x70] sm:$0xff]  ;;  %v7696_v28 = vld [vmem:[%s15513_s2 + $0x28] sm:$0xff] }
  0x1e   :  { %3066 = vmatpush.bf16.msrb.mxu0 %v6878_v26  ;;  %3213 = vmatpush.bf16.msrb.mxu3 %v7262_v30  ;;  %v7117_v39 = vld [vmem:[%s15514_s1 + $0x260] sm:$0xf]  ;;  %v7845_v40 = vld [vmem:[%s15514_s1 + $0x26c] sm:$0xf0]  ;;  %v1087_v26 = vld [vmem:[%s15516_s6 + $0x48] sm:$0xff] }
  0x1f   :  { %6556 = vmatmul.msk.bf16.gmra.mxu0 %vm265_vm0, %v7692_v16  ;;  %122 = vperm.xlu1 %7969, %v76_v17   ;;  %v7118_v41 = vor.u32 %v7845_v40, %v7117_v39  ;;  %v6861_v42 = vld [vmem:[%s15514_s1 + $0x60] sm:$0xf]  ;;  %v7781_v43 = vld [vmem:[%s15514_s1 + $0x6c] sm:$0xf0]  ;;  %v1239_v29 = vld [vmem:[%s15517_s7 + $0x8] sm:$0xff] }
  0x20   :  { %6564 = vmatmul.msk.bf16.gmra.mxu1 %vm265_vm0, %v7692_v16  ;;  %6572 = vmatmul.msk.bf16.gmra.mxu2 %vm265_vm0, %v7692_v16  ;;  %v7245_v44 = vld [vmem:[%s15514_s1 + $0x360] sm:$0xf]  ;;  %v6862_v45 = vor.u32 %v7781_v43, %v6861_v42  ;;  %v7877_v46 = vld [vmem:[%s15514_s1 + $0x36c] sm:$0xf0] }
  0x21   :  { %6580 = vmatmul.msk.bf16.gmra.mxu3 %vm265_vm0, %v7692_v16  ;;  %117 = vperm.xlu0 %7968, %v75_v18   ;;  %v6989_v47 = vld [vmem:[%s15514_s1 + $0x160] sm:$0xf]  ;;  %v7813_v48 = vld [vmem:[%s15514_s1 + $0x16c] sm:$0xf0]  ;;  %v7246_v49 = vor.u32 %v7877_v46, %v7245_v44  ;;  %v1241_v46 = vld [vmem:[%s15517_s7 + $0x18] sm:$0xff] }
  0x22   :  { %3115 = vmatpush.bf16.msrb.mxu1 %v7006_v31  ;;  %3165 = vmatpush.bf16.msrb.mxu2 %v7118_v41  ;;  %v6990_v50 = vor.u32 %v7813_v48, %v6989_v47  ;;  %v1080_v51 = vld [vmem:[%s15516_s6 + $0x10] sm:$0xff]  ;;  %v1078_v53 = vld [vmem:[%s15516_s6] sm:$0xff] }
  0x23   :  { %127 = vperm.xlu2 %7970, %v77_v19   ;;  %3067 = vmatpush.bf16.msrb.mxu0 %v6862_v45  ;;  %v1082_v57 = vld [vmem:[%s15516_s6 + $0x20] sm:$0xff]  ;;  %v7841_v59 = vld [vmem:[%s15514_s1 + $0x24c] sm:$0xf0]  ;;  %v1093_v45 = vld [vmem:[%s15516_s6 + $0x78] sm:$0xff] }
  0x24   :  { %3214 = vmatpush.bf16.msrb.mxu3 %v7246_v49  ;;  %v7101_v58 = vld [vmem:[%s15514_s1 + $0x240] sm:$0xf]  ;;  %v7777_v62 = vld [vmem:[%s15514_s1 + $0x4c] sm:$0xf0] }
  0x25   :  { %v7102_v60 = vor.u32 %v7841_v59, %v7101_v58  ;;  %v6845_v61 = vld [vmem:[%s15514_s1 + $0x40] sm:$0xf]  ;;  %v7873_v1 = vld [vmem:[%s15514_s1 + $0x34c] sm:$0xf0] }
  0x26   :  { %3116 = vmatpush.bf16.msrb.mxu1 %v6990_v50  ;;  %v7229_v63 = vld [vmem:[%s15514_s1 + $0x340] sm:$0xf]  ;;  %v6846_v0 = vor.u32 %v7777_v62, %v6845_v61  ;;  %v7809_v3 = vld [vmem:[%s15514_s1 + $0x14c] sm:$0xf0]  ;;  %v1243_v62 = vld [vmem:[%s15517_s7 + $0x28] sm:$0xff] }
  0x27   :  { %137 = vperm.xlu1 %7969, %v79_v32   ;;  %v6973_v2 = vld [vmem:[%s15514_s1 + $0x140] sm:$0xf]  ;;  %3166 = vmatpush.bf16.msrb.mxu2 %v7102_v60  ;;  %v7230_v4 = vor.u32 %v7873_v1, %v7229_v63  ;;  %v1084_v11 = vld [vmem:[%s15516_s6 + $0x30] sm:$0xff]  ;;  %v7698_v63 = vld [vmem:[%s15513_s2 + $0x38] sm:$0xff] }
  0x28   :  { %v6974_v5 = vor.u32 %v7809_v3, %v6973_v2  ;;  %3068 = vmatpush.bf16.msrb.mxu0 %v6846_v0  ;;  %v1086_v6 = vld [vmem:[%s15516_s6 + $0x40] sm:$0xff]  ;;  %v1088_v12 = vld [vmem:[%s15516_s6 + $0x50] sm:$0xff] }
  0x29   :  { %132 = vperm.xlu0 %7968, %v78_v33   ;;  %3215 = vmatpush.bf16.msrb.mxu3 %v7230_v4  ;;  %v7695_v9 = vld [vmem:[%s15513_s2 + $0x20] sm:$0xff]  ;;  %v7837_v14 = vld [vmem:[%s15514_s1 + $0x22c] sm:$0xf0]  ;;  %v6911_v4 = vld [vmem:[%s15514_s1 + $0xd0] sm:$0xf0] }
  0x2a   :  { %3117 = vmatpush.bf16.msrb.mxu1 %v6974_v5  ;;  %v7085_v13 = vld [vmem:[%s15514_s1 + $0x220] sm:$0xf]  ;;  %v7773_v17 = vld [vmem:[%s15514_s1 + $0x2c] sm:$0xf0]  ;;  %v7791_v2 = vld [vmem:[%s15514_s1 + $0xc4] sm:$0xf] }
  0x2b   :  { %142 = vperm.xlu2 %7970, %v80_v34   ;;  %v7086_v15 = vor.u32 %v7837_v14, %v7085_v13  ;;  %v6829_v16 = vld [vmem:[%s15514_s1 + $0x20] sm:$0xf]  ;;  %v7869_v20 = vld [vmem:[%s15514_s1 + $0x32c] sm:$0xf0]  ;;  %v6914_v5 = vor.u32 %v7791_v2, %v6911_v4  ;;  %v6597_v13 = vld [vmem:[%s15518_s3 + $0x8] sm:$0xf] }
  0x2c   :  { %v7213_v18 = vld [vmem:[%s15514_s1 + $0x320] sm:$0xf]  ;;  %v6830_v19 = vor.u32 %v7773_v17, %v6829_v16  ;;  %v7805_v22 = vld [vmem:[%s15514_s1 + $0x12c] sm:$0xf0]  ;;  %v7715_v14 = vld [vmem:[%s15518_s3 + $0x20] sm:$0xf0] }
  0x2d   :  { %v6957_v21 = vld [vmem:[%s15514_s1 + $0x120] sm:$0xf]  ;;  %3167 = vmatpush.bf16.msrb.mxu2 %v7086_v15  ;;  %v7214_v23 = vor.u32 %v7869_v20, %v7213_v18  ;;  %v1092_v25 = vld [vmem:[%s15516_s6 + $0x70] sm:$0xff]  ;;  %v7712_v15 = vld [vmem:[%s15518_s3 + $0xc] sm:$0xf] }
  0x2e   :  { %v6958_v24 = vor.u32 %v7805_v22, %v6957_v21  ;;  %3069 = vmatpush.bf16.msrb.mxu0 %v6830_v19  ;;  %v1090_v30 = vld [vmem:[%s15516_s6 + $0x60] sm:$0xff]  ;;  %v7833_v33 = vld [vmem:[%s15514_s1 + $0x20c] sm:$0xf0]  ;;  %v6599_v16 = vld [vmem:[%s15518_s3 + $0x24] sm:$0xf0]  ;;  %v8864_v21 = vor.u32 %v7715_v14, %v6597_v13 }
  0x2f   :  { %6557 = vmatmul.msk.bf16.gmra.mxu0 %vm265_vm0, %v7693_v35  ;;  %152 = vperm.xlu1 %7969, %v82_v36   ;;  %v1238_v31 = vld [vmem:[%s15517_s7] sm:$0xff]  ;;  %v7769_v36 = vld [vmem:[%s15514_s1 + $0xc] sm:$0xf0] }
  0x30   :  { %6565 = vmatmul.msk.bf16.gmra.mxu1 %vm265_vm0, %v7693_v35  ;;  %6573 = vmatmul.msk.bf16.gmra.mxu2 %vm265_vm0, %v7693_v35  ;;  %v7069_v32 = vld [vmem:[%s15514_s1 + $0x200] sm:$0xf]  ;;  %v7801_v42 = vld [vmem:[%s15514_s1 + $0x10c] sm:$0xf0]  ;;  %15926 = vst [vmem:[#allocation4_spill] sm:$0xff] %v8864_v21 }
  0x31   :  { %6581 = vmatmul.msk.bf16.gmra.mxu3 %vm265_vm0, %v7693_v35  ;;  %147 = vperm.xlu0 %7968, %v81_v37   ;;  %v6813_v34 = vld [vmem:[%s15514_s1] sm:$0xf]  ;;  %v7070_v35 = vor.u32 %v7833_v33, %v7069_v32  ;;  %v7697_v47 = vld [vmem:[%s15513_s2 + $0x30] sm:$0xff] }
  0x32   :  { %3216 = vmatpush.bf16.msrb.mxu3 %v7214_v23  ;;  %3118 = vmatpush.bf16.msrb.mxu1 %v6958_v24  ;;  %v7197_v37 = vld [vmem:[%s15514_s1 + $0x300] sm:$0xf]  ;;  %v6814_v39 = vor.u32 %v7769_v36, %v6813_v34  ;;  %v1240_v48 = vld [vmem:[%s15517_s7 + $0x10] sm:$0xff]  ;;  %v8866_v23 = vor.u32 %v7712_v15, %v6599_v16 }
  0x33   :  { %157 = vperm.xlu2 %7970, %v83_v38   ;;  %v7865_v38 = vld [vmem:[%s15514_s1 + $0x30c] sm:$0xf0]  ;;  %v6941_v41 = vld [vmem:[%s15514_s1 + $0x100] sm:$0xf]  ;;  %3168 = vmatpush.bf16.msrb.mxu2 %v7070_v35 }
  0x34   :  { %v7198_v40 = vor.u32 %v7865_v38, %v7197_v37  ;;  %v6942_v43 = vor.u32 %v7801_v42, %v6941_v41  ;;  %3070 = vmatpush.bf16.msrb.mxu0 %v6814_v39  ;;  %v1242_v44 = vld [vmem:[%s15517_s7 + $0x20] sm:$0xff]  ;;  %v1244_v49 = vld [vmem:[%s15517_s7 + $0x30] sm:$0xff]  ;;  %15927 = vst [vmem:[#allocation5_spill] sm:$0xff] %v8866_v23 }
  0x35   :  { %v7597_v50 = vld [vmem:[%s15514_s1 + $0x620] sm:$0xf]  ;;  %v7957_v60 = vld [vmem:[%s15514_s1 + $0x5ec] sm:$0xf0] }
  0x36   :  { %3217 = vmatpush.bf16.msrb.mxu3 %v7198_v40  ;;  %3119 = vmatpush.bf16.msrb.mxu1 %v6942_v43  ;;  %v7565_v59 = vld [vmem:[%s15514_s1 + $0x5e0] sm:$0xf]  ;;  %v7921_v1 = vld [vmem:[%s15514_s1 + $0x4cc] sm:$0xf0] }
  0x37   :  { %1106 = vperm.xlu1 %7969, %v1080_v51   ;;  %v7965_v51 = vld [vmem:[%s15514_s1 + $0x62c] sm:$0xf0]  ;;  %v7566_v61 = vor.u32 %v7957_v60, %v7565_v59  ;;  %v7421_v0 = vld [vmem:[%s15514_s1 + $0x4c0] sm:$0xf]  ;;  %v7719_v59 = vld [vmem:[%s15518_s3 + $0x44] sm:$0xf] }
  0x38   :  { %v7422_v3 = vor.u32 %v7921_v1, %v7421_v0  ;;  %v6627_v60 = vld [vmem:[%s15518_s3 + $0x5c] sm:$0xf0] }
  0x39   :  { %162 = vperm.xlu0 %7968, %v84_v52   ;;  %v7437_v52 = vld [vmem:[%s15514_s1 + $0x4e0] sm:$0xf] }
  0x3a   :  { %3308 = vmatpush.bf16.msra.mxu1 %v7566_v61 }
  0x3b   :  { %1096 = vperm.xlu2 %7970, %v1078_v53   ;;  %v7598_v53 = vor.u32 %v7965_v51, %v7597_v50 }
  0x3d   :  { %3363 = vmatpush.bf16.msra.mxu2 %v7598_v53  ;;  %v7721_v53 = vld [vmem:[%s15518_s3 + $0x50] sm:$0xf0] }
  0x3f   :  { %6558 = vmatmul.msk.bf16.gmra.mxu0 %vm265_vm0, %v7694_v54  ;;  %1121 = vperm.xlu1 %7969, %v1083_v55   ;;  %v7795_v55 = vld [vmem:[%s15514_s1 + $0xe4] sm:$0xf] }
  0x40   :  { %6566 = vmatmul.msk.bf16.gmra.mxu1 %vm265_vm0, %v7694_v54  ;;  %6574 = vmatmul.msk.bf16.gmra.mxu2 %vm265_vm0, %v7694_v54 }
  0x41   :  { %6582 = vmatmul.msk.bf16.gmra.mxu3 %vm265_vm0, %v7694_v54  ;;  %1101 = vperm.xlu0 %7968, %v1079_v56   ;;  %v7925_v54 = vld [vmem:[%s15514_s1 + $0x4ec] sm:$0xf0]  ;;  %v6927_v56 = vld [vmem:[%s15514_s1 + $0xf0] sm:$0xf0] }
  0x42   :  { %v6930_v58 = vor.u32 %v7795_v55, %v6927_v56  ;;  %v6619_v55 = vld [vmem:[%s15518_s3 + $0x54] sm:$0xf0]  ;;  %v6625_v56 = vld [vmem:[%s15518_s3 + $0x40] sm:$0xf] }
  0x43   :  { %1116 = vperm.xlu2 %7970, %v1082_v57   ;;  %v7438_v57 = vor.u32 %v7925_v54, %v7437_v52  ;;  %v6617_v52 = vld [vmem:[%s15518_s3 + $0x38] sm:$0xf]  ;;  %v7718_v54 = vld [vmem:[%s15518_s3 + $0x3c] sm:$0xf] }
  0x44   :  { %3406 = vmatpush.bf16.msra.mxu3 %v6930_v58  ;;  %v8944_v4 = vor.u32 %v7718_v54, %v6619_v55 }
  0x45   :  { %3259 = vmatpush.bf16.msra.mxu0 %v7438_v57  ;;  %v7722_v57 = vld [vmem:[%s15518_s3 + $0x58] sm:$0xf0] }
  0x46   :  { %15929 = vst [vmem:[#allocation7_spill] sm:$0xff] %v8944_v4 }
  0x47   :  { %1136 = vperm.xlu1 %7969, %v1086_v6   ;;  %v7549_v6 = vld [vmem:[%s15514_s1 + $0x5c0] sm:$0xf] }
  0x48   :  { %3407 = vmatpush.bf16.msra.mxu3 %v6914_v5  ;;  %v8946_v5 = vor.u32 %v7722_v57, %v6625_v56 }
  0x49   :  { %1111 = vperm.xlu0 %7968, %v1081_v7   ;;  %3260 = vmatpush.bf16.msra.mxu0 %v7422_v3  ;;  %v7953_v7 = vld [vmem:[%s15514_s1 + $0x5cc] sm:$0xf0] }
  0x4a   :  { %15930 = vst [vmem:[#allocation8_spill] sm:$0xff] %v8946_v5 }
  0x4b   :  { %1131 = vperm.xlu2 %7970, %v1085_v8   ;;  %v7550_v8 = vor.u32 %v7953_v7, %v7549_v6 }
  0x4d   :  { %3309 = vmatpush.bf16.msra.mxu1 %v7550_v8  ;;  %v8950_v8 = vor.u32 %v7719_v59, %v6627_v60  ;;  %v7728_v59 = vld [vmem:[%s15518_s3 + $0x88] sm:$0xf0]  ;;  %v7725_v60 = vld [vmem:[%s15518_s3 + $0x74] sm:$0xf] }
  0x4f   :  { %6559 = vmatmul.msk.bf16.gmra.mxu0 %vm265_vm0, %v7695_v9  ;;  %1151 = vperm.xlu1 %7969, %v1089_v10   ;;  %v7714_v10 = vld [vmem:[%s15518_s3 + $0x18] sm:$0xf0]  ;;  %15931 = vst [vmem:[#allocation9_spill] sm:$0xff] %v8950_v8 }
  0x50   :  { %6567 = vmatmul.msk.bf16.gmra.mxu1 %vm265_vm0, %v7695_v9  ;;  %6575 = vmatmul.msk.bf16.gmra.mxu2 %vm265_vm0, %v7695_v9 }
  0x51   :  { %6583 = vmatmul.msk.bf16.gmra.mxu3 %vm265_vm0, %v7695_v9  ;;  %1126 = vperm.xlu0 %7968, %v1084_v11   ;;  %v6589_v9 = vld [vmem:[%s15518_s3] sm:$0xf]  ;;  %v7711_v11 = vld [vmem:[%s15518_s3 + $0x4] sm:$0xf] }
  0x52   :  { %v8860_v18 = vor.u32 %v7714_v10, %v6589_v9 }
  0x53   :  { %1146 = vperm.xlu2 %7970, %v1088_v12   ;;  %v6591_v12 = vld [vmem:[%s15518_s3 + $0x1c] sm:$0xf0] }
  0x54   :  { %15924 = vst [vmem:[#allocation2_spill] sm:$0xff] %v8860_v18  ;;  %v8862_v20 = vor.u32 %v7711_v11, %v6591_v12 }
  0x56   :  { %15925 = vst [vmem:[#allocation3_spill] sm:$0xff] %v8862_v20 }
  0x57   :  { %1166 = vperm.xlu1 %7969, %v1092_v25  }
  0x59   :  { %1141 = vperm.xlu0 %7968, %v1087_v26   ;;  %v7405_v26 = vld [vmem:[%s15514_s1 + $0x4a0] sm:$0xf] }
  0x5b   :  { %1161 = vperm.xlu2 %7970, %v1091_v27   ;;  %v7917_v27 = vld [vmem:[%s15514_s1 + $0x4ac] sm:$0xf0] }
  0x5f   :  { %6560 = vmatmul.msk.bf16.gmra.mxu0 %vm265_vm0, %v7696_v28  ;;  %1261 = vperm.xlu1 %7969, %v1239_v29   ;;  %v7406_v29 = vor.u32 %v7917_v27, %v7405_v26  ;;  %v7389_v26 = vld [vmem:[%s15514_s1 + $0x480] sm:$0xf]  ;;  %v7913_v27 = vld [vmem:[%s15514_s1 + $0x48c] sm:$0xf0] }
  0x60   :  { %6568 = vmatmul.msk.bf16.gmra.mxu1 %vm265_vm0, %v7696_v28  ;;  %6576 = vmatmul.msk.bf16.gmra.mxu2 %vm265_vm0, %v7696_v28 }
  0x61   :  { %6584 = vmatmul.msk.bf16.gmra.mxu3 %vm265_vm0, %v7696_v28  ;;  %1156 = vperm.xlu0 %7968, %v1090_v30   ;;  %v7787_v28 = vld [vmem:[%s15514_s1 + $0xa4] sm:$0xf]  ;;  %v6895_v30 = vld [vmem:[%s15514_s1 + $0xb0] sm:$0xf0] }
  0x62   :  { %v6898_v33 = vor.u32 %v7787_v28, %v6895_v30  ;;  %3261 = vmatpush.bf16.msra.mxu0 %v7406_v29  ;;  %v7783_v28 = vld [vmem:[%s15514_s1 + $0x84] sm:$0xf]  ;;  %v7390_v30 = vor.u32 %v7913_v27, %v7389_v26 }
  0x63   :  { %1256 = vperm.xlu2 %7970, %v1238_v31  }
  0x64   :  { %3408 = vmatpush.bf16.msra.mxu3 %v6898_v33 }
  0x66   :  { %3262 = vmatpush.bf16.msra.mxu0 %v7390_v30 }
  0x67   :  { %1276 = vperm.xlu1 %7969, %v1242_v44   ;;  %v7533_v44 = vld [vmem:[%s15514_s1 + $0x5a0] sm:$0xf] }
  0x69   :  { %1171 = vperm.xlu0 %7968, %v1093_v45   ;;  %v7949_v45 = vld [vmem:[%s15514_s1 + $0x5ac] sm:$0xf0] }
  0x6b   :  { %1271 = vperm.xlu2 %7970, %v1241_v46  }
  0x6d   :  { %v8888_v32 = vpop.permute.xlu2 %107 }
  0x6f   :  { %6561 = vmatmul.msk.bf16.gmra.mxu0 %vm265_vm0, %v7697_v47 }
  0x70   :  { %6569 = vmatmul.msk.bf16.gmra.mxu1 %vm265_vm0, %v7697_v47  ;;  %6577 = vmatmul.msk.bf16.gmra.mxu2 %vm265_vm0, %v7697_v47 }
  0x71   :  { %6585 = vmatmul.msk.bf16.gmra.mxu3 %vm265_vm0, %v7697_v47  ;;  %1266 = vperm.xlu0 %7968, %v1240_v48   ;;  %v7534_v48 = vor.u32 %v7949_v45, %v7533_v44 }
  0x73   :  { %1286 = vperm.xlu2 %7970, %v1244_v49   ;;  %3310 = vmatpush.bf16.msra.mxu1 %v7534_v48 }
  0x75   :  { %v8952_v9 = vpop.permute.xlu2 %112 }
  0x79   :  { %1281 = vperm.xlu0 %7968, %v1243_v62   ;;  %v8938_v62 = vor.u32 %v7721_v53, %v6617_v52  ;;  %v7945_v52 = vld [vmem:[%s15514_s1 + $0x58c] sm:$0xf0] }
  0x7b   :  { %15928 = vst [vmem:[#allocation6_spill] sm:$0xff] %v8938_v62 }
  0x7d   :  { %v9011_v53 = vpop.permute.xlu2 %127 }
  0x7f   :  { %6562 = vmatmul.msk.bf16.gmra.mxu0 %vm265_vm0, %v7698_v63 }
  0x80   :  { %6570 = vmatmul.msk.bf16.gmra.mxu1 %vm265_vm0, %v7698_v63  ;;  %6578 = vmatmul.msk.bf16.gmra.mxu2 %vm265_vm0, %v7698_v63  ;;  %v98_v47 = vpop.permute.xlu1 %97 }
  0x81   :  { %6586 = vmatmul.msk.bf16.gmra.mxu3 %vm265_vm0, %v7698_v63  ;;  %v88_v17 = vpop.permute.xlu0 %87 }
  0x8a   :  { %v93_v41 = vpop.permute.xlu0 %92 }
  0x8c   :  { %v299_v19 = vpop.f32.mrf.mxu0 }
  0x8d   :  { %v348_v22 = vpop.f32.mrf.mxu1  ;;  %v8869_v24 = vadd.f32 %v299_v19, %v88_v17 }
  0x8e   :  { %v8871_v25 = vadd.f32 %v348_v22, %v88_v17  ;;  %v8972_v22 = vpop.permute.xlu1 %102 }
  0x8f   :  { %3071 = vmatmul.bf16.vlgmr.msrb.gmra.mxu0 %v8860_v18  ;;  %v582_v38 = vmul.f32 %v8869_v24, %v8869_v24 }
  0x90   :  { %3120 = vmatmul.bf16.vlgmr.msrb.gmra.mxu1 %v8862_v20  ;;  %3169 = vmatmul.bf16.vlgmr.msrb.gmra.mxu2 %v8864_v21  ;;  %v486_v34 = vadd.f32 %v8871_v25, %v8869_v24  ;;  %v583_v39 = vmul.f32 %v8871_v25, %v8871_v25  ;;  %v7747_v20 = vld [vmem:[%s15518_s3 + $0x124] sm:$0xf] }
  0x91   :  { %3218 = vmatmul.bf16.vlgmr.msrb.gmra.mxu3 %v8866_v23 }
  0x92   :  { %v646_v58 = vadd.f32 %v583_v39, %v582_v38 }
  0x93   :  { %v397_v31 = vpop.f32.mrf.mxu2  ;;  %v8996_v44 = vpop.permute.xlu0 %117 }
  0x94   :  { %v8892_v35 = vadd.f32 %v397_v31, %v88_v17  ;;  %v446_v36 = vpop.f32.mrf.mxu3  ;;  %v301_v37 = vpop.f32.mrf.mxu0  ;;  %v6879_v31 = vld [vmem:[%s15514_s1 + $0x90] sm:$0xf0] }
  0x95   :  { %v8898_v40 = vadd.f32 %v446_v36, %v88_v17  ;;  %v350_v42 = vpop.f32.mrf.mxu1  ;;  %v8909_v49 = vadd.f32 %v301_v37, %v93_v41 }
  0x96   :  { %v487_v43 = vadd.f32 %v486_v34, %v8892_v35  ;;  %v584_v46 = vmul.f32 %v8892_v35, %v8892_v35  ;;  %v8911_v50 = vadd.f32 %v350_v42, %v93_v41  ;;  %v6882_v34 = vor.u32 %v7783_v28, %v6879_v31 }
  0x97   :  { %v585_v63 = vmul.f32 %v8898_v40, %v8898_v40  ;;  %v586_v10 = vmul.f32 %v8909_v49, %v8909_v49 }
  0x98   :  { %v488_v51 = vadd.f32 %v487_v43, %v8898_v40  ;;  %v647_v0 = vadd.f32 %v646_v58, %v584_v46  ;;  %v491_v6 = vadd.f32 %v8911_v50, %v8909_v49  ;;  %v587_v11 = vmul.f32 %v8911_v50, %v8911_v50  ;;  %3409 = vmatpush.bf16.msra.mxu3 %v6882_v34  ;;  %v6645_v58 = vld [vmem:[%s15518_s3 + $0x70] sm:$0xf]  ;;  %v7581_v34 = vld [vmem:[%s15514_s1 + $0x600] sm:$0xf] }
  0x9a   :  { %489 = vadd.xlane.f32.xlu1 %v488_v51  ;;  %v648_v15 = vadd.f32 %v647_v0, %v585_v63  ;;  %v651_v29 = vadd.f32 %v587_v11, %v586_v10  ;;  %v6653_v63 = vld [vmem:[%s15518_s3 + $0x78] sm:$0xf]  ;;  %v7729_v0 = vld [vmem:[%s15518_s3 + $0x90] sm:$0xf0]  ;;  %v9044_v11 = vor.u32 %v7728_v59, %v6645_v58  ;;  %v7501_v58 = vld [vmem:[%s15514_s1 + $0x560] sm:$0xf] }
  0x9b   :  { %v399_v61 = vpop.f32.mrf.mxu2  ;;  %v9061_v30 = vpop.permute.xlu0 %132  ;;  %v7941_v59 = vld [vmem:[%s15514_s1 + $0x56c] sm:$0xf0] }
  0x9c   :  { %v8942_v1 = vadd.f32 %v399_v61, %v93_v41  ;;  %v448_v2 = vpop.f32.mrf.mxu3  ;;  %v304_v3 = vpop.f32.mrf.mxu0  ;;  %v6647_v61 = vld [vmem:[%s15518_s3 + $0x8c] sm:$0xf0]  ;;  %15936 = vst [vmem:[#allocation14_spill] sm:$0xff] %v9044_v11 }
  0x9d   :  { %v353_v7 = vpop.f32.mrf.mxu1  ;;  %v8958_v12 = vadd.f32 %v448_v2, %v93_v41  ;;  %v8961_v14 = vadd.f32 %v304_v3, %v98_v47  ;;  %v9034_v2 = vpop.permute.xlu1 %122  ;;  %v7726_v3 = vld [vmem:[%s15518_s3 + $0x7c] sm:$0xf] }
  0x9e   :  { %v492_v13 = vadd.f32 %v491_v6, %v8942_v1  ;;  %v8964_v16 = vadd.f32 %v353_v7, %v98_v47  ;;  %v588_v19 = vmul.f32 %v8942_v1, %v8942_v1  ;;  %v6655_v6 = vld [vmem:[%s15518_s3 + $0x94] sm:$0xf0] }
  0x9f   :  { %15932 = vst [vmem:[#allocation10_spill] sm:$0xff] %v8961_v14  ;;  %3076 = vmatmul.bf16.gmra.mxu0 %v8938_v62  ;;  %v590_v45 = vmul.f32 %v8961_v14, %v8961_v14  ;;  %v589_v51 = vmul.f32 %v8958_v12, %v8958_v12 }
  0xa0   :  { %15933 = vst [vmem:[#allocation11_spill] sm:$0xff] %v8964_v16  ;;  %3125 = vmatmul.bf16.gmra.mxu1 %v8944_v4  ;;  %3174 = vmatmul.bf16.gmra.mxu2 %v8946_v5  ;;  %v493_v17 = vadd.f32 %v492_v13, %v8958_v12  ;;  %v496_v36 = vadd.f32 %v8964_v16, %v8961_v14 }
  0xa1   :  { %3223 = vmatmul.bf16.gmra.mxu3 %v8950_v8  ;;  %v652_v41 = vadd.f32 %v651_v29, %v588_v19  ;;  %v591_v46 = vmul.f32 %v8964_v16, %v8964_v16  ;;  %v9052_v19 = vor.u32 %v7729_v0, %v6653_v63  ;;  %v9058_v29 = vor.u32 %v7726_v3, %v6655_v6  ;;  %v6673_v63 = vld [vmem:[%s15518_s3 + $0xa8] sm:$0xf]  ;;  %v7735_v0 = vld [vmem:[%s15518_s3 + $0xc0] sm:$0xf0]  ;;  %v7732_v3 = vld [vmem:[%s15518_s3 + $0xac] sm:$0xf] }
  0xa2   :  { %494 = vadd.xlane.f32.xlu2 %v493_v17  ;;  %649 = vadd.xlane.f32.xlu1 %v648_v15  ;;  %v9050_v17 = vor.u32 %v7725_v60, %v6647_v61  ;;  %v1245_v60 = vld [vmem:[%s15517_s7 + $0x38] sm:$0xff]  ;;  %v7502_v61 = vor.u32 %v7941_v59, %v7501_v58  ;;  %v6675_v6 = vld [vmem:[%s15518_s3 + $0xc4] sm:$0xf0] }
  0xa3   :  { %v402_v33 = vpop.f32.mrf.mxu2  ;;  %v653_v57 = vadd.f32 %v652_v41, %v589_v51  ;;  %v656_v7 = vadd.f32 %v591_v46, %v590_v45  ;;  %15938 = vst [vmem:[#allocation16_spill] sm:$0xff] %v9052_v19  ;;  %v7909_v45 = vld [vmem:[%s15514_s1 + $0x46c] sm:$0xf0]  ;;  %v7779_v46 = vld [vmem:[%s15514_s1 + $0x64] sm:$0xf] }
  0xa4   :  { %v8988_v37 = vadd.f32 %v402_v33, %v98_v47  ;;  %v451_v38 = vpop.f32.mrf.mxu3  ;;  %v8990_v39 = vpop.f32.mrf.mxu0  ;;  %15937 = vst [vmem:[#allocation15_spill] sm:$0xff] %v9050_v17 }
  0xa5   :  { %v8992_v42 = vadd.f32 %v451_v38, %v98_v47  ;;  %v8994_v43 = vpop.f32.mrf.mxu1  ;;  %v7517_v47 = vld [vmem:[%s15514_s1 + $0x580] sm:$0xf]  ;;  %15939 = vst [vmem:[#allocation17_spill] sm:$0xff] %v9058_v29  ;;  %v9066_v33 = vpop.permute.xlu2 %142 }
  0xa6   :  { %15934 = vst [vmem:[#allocation12_spill] sm:$0xff] %v8988_v37  ;;  %v497_v48 = vadd.f32 %v496_v36, %v8988_v37  ;;  %v7518_v54 = vor.u32 %v7945_v52, %v7517_v47  ;;  %v592_v55 = vmul.f32 %v8988_v37, %v8988_v37  ;;  %v7961_v36 = vld [vmem:[%s15514_s1 + $0x60c] sm:$0xf0]  ;;  %v7373_v38 = vld [vmem:[%s15514_s1 + $0x460] sm:$0xf]  ;;  %v9088_v47 = vpop.permute.xlu1 %137 }
  0xa7   :  { %15935 = vst [vmem:[#allocation13_spill] sm:$0xff] %v8992_v42  ;;  %v593_v26 = vmul.f32 %v8992_v42, %v8992_v42  ;;  %v7582_v41 = vor.u32 %v7961_v36, %v7581_v34  ;;  %v7374_v52 = vor.u32 %v7909_v45, %v7373_v38  ;;  %v6683_v34 = vld [vmem:[%s15518_s3 + $0xcc] sm:$0xf0]  ;;  %v9133_v38 = vor.u32 %v7735_v0, %v6673_v63  ;;  %v7775_v0 = vld [vmem:[%s15514_s1 + $0x44] sm:$0xf] }
  0xa8   :  { %v498_v56 = vadd.f32 %v497_v48, %v8992_v42  ;;  %3311 = vmatpush.bf16.msra.mxu1 %v7518_v54  ;;  %v657_v27 = vadd.f32 %v656_v7, %v592_v55  ;;  %15940 = vst [vmem:[#allocation18_spill] sm:$0xff] %v9066_v33  ;;  %v6863_v48 = vld [vmem:[%s15514_s1 + $0x70] sm:$0xf0]  ;;  %v6681_v7 = vld [vmem:[%s15518_s3 + $0xb0] sm:$0xf] }
  0xa9   :  { %15941 = vst [vmem:[#allocation19_spill] sm:$0xff] %v9088_v47  ;;  %v6866_v54 = vor.u32 %v7779_v46, %v6863_v48  ;;  %3364 = vmatpush.bf16.msra.mxu2 %v7582_v41  ;;  %3263 = vmatpush.bf16.msra.mxu0 %v7374_v52  ;;  %v9141_v48 = vor.u32 %v7732_v3, %v6675_v6  ;;  %v7905_v63 = vld [vmem:[%s15514_s1 + $0x44c] sm:$0xf0]  ;;  %v6847_v6 = vld [vmem:[%s15514_s1 + $0x50] sm:$0xf0] }
  0xaa   :  { %499 = vadd.xlane.f32.xlu0 %v498_v56  ;;  %654 = vadd.xlane.f32.xlu2 %v653_v57  ;;  %v658_v31 = vadd.f32 %v657_v27, %v593_v26  ;;  %v7736_v26 = vld [vmem:[%s15518_s3 + $0xc8] sm:$0xf0]  ;;  %v9123_v27 = vpop.permute.xlu0 %147  ;;  %15943 = vst [vmem:[#allocation21_spill] sm:$0xff] %v9133_v38 }
  0xab   :  { %v9042_v10 = vpop.f32.mrf.mxu2  ;;  %3410 = vmatpush.bf16.msra.mxu3 %v6866_v54  ;;  %15942 = vst [vmem:[#allocation20_spill] sm:$0xff] %v9123_v27  ;;  %v9143_v52 = vor.u32 %v7736_v26, %v6681_v7  ;;  %v1246_v26 = vld [vmem:[%s15517_s7 + $0x40] sm:$0xff] }
  0xac   :  { %v9046_v13 = vpop.f32.mrf.mxu3  ;;  %v9048_v15 = vpop.f32.mrf.mxu0  ;;  %3312 = vmatpush.bf16.msra.mxu1 %v7502_v61  ;;  %15945 = vst [vmem:[#allocation23_spill] sm:$0xff] %v9141_v48  ;;  %v7357_v61 = vld [vmem:[%s15514_s1 + $0x440] sm:$0xf] }
  0xad   :  { %v9056_v28 = vpop.f32.mrf.mxu1  ;;  %v9135_v41 = vpop.permute.xlu2 %157  ;;  %15946 = vst [vmem:[#allocation24_spill] sm:$0xff] %v9143_v52  ;;  %v7358_v3 = vor.u32 %v7905_v63, %v7357_v61  ;;  %v7485_v63 = vld [vmem:[%s15514_s1 + $0x540] sm:$0xf]  ;;  %v9334_v16 = vadd.f32 %v9046_v13, %v8972_v22 }
  0xae   :  { %15944 = vst [vmem:[#allocation22_spill] sm:$0xff] %v9135_v41  ;;  %v9149_v59 = vpop.permute.xlu1 %152  ;;  %v6739_v27 = vld [vmem:[%s15518_s3 + $0x13c] sm:$0xf0] }
  0xaf   :  { %3081 = vmatmul.bf16.gmra.mxu0 %v9044_v11  ;;  %15948 = vst [vmem:[#allocation26_spill] sm:$0xff] %v9149_v59  ;;  %v1249_v59 = vld [vmem:[%s15517_s7 + $0x58] sm:$0xff]  ;;  %v7325_v13 = vld [vmem:[%s15514_s1 + $0x400] sm:$0xf] }
  0xb0   :  { %3130 = vmatmul.bf16.gmra.mxu1 %v9050_v17  ;;  %3179 = vmatmul.bf16.gmra.mxu2 %v9052_v19  ;;  %15968 = vst [vmem:[#allocation46_spill] sm:$0xff] %v9334_v16 }
  0xb1   :  { %3228 = vmatmul.bf16.gmra.mxu3 %v9058_v29  ;;  %3264 = vmatpush.bf16.msra.mxu0 %v7358_v3  ;;  %v6701_v3 = vld [vmem:[%s15518_s3 + $0xe0] sm:$0xf] }
  0xb2   :  { %659 = vadd.xlane.f32.xlu0 %v658_v31  ;;  %v7733_v31 = vld [vmem:[%s15518_s3 + $0xb4] sm:$0xf] }
  0xb3   :  { %v9086_v51 = vpop.f32.mrf.mxu2  ;;  %v9147_v58 = vor.u32 %v7733_v31, %v6683_v34  ;;  %v9175_v31 = vpop.permute.xlu0 %162  ;;  %v6850_v34 = vor.u32 %v7775_v0, %v6847_v6 }
  0xb4   :  { %v9090_v55 = vpop.f32.mrf.mxu3  ;;  %v9092_v56 = vpop.f32.mrf.mxu0  ;;  %15949 = vst [vmem:[#allocation27_spill] sm:$0xff] %v9175_v31  ;;  %v7937_v31 = vld [vmem:[%s15514_s1 + $0x54c] sm:$0xf0] }
  0xb5   :  { %v9094_v57 = vpop.f32.mrf.mxu1  ;;  %15947 = vst [vmem:[#allocation25_spill] sm:$0xff] %v9147_v58  ;;  %v9183_v61 = vpop.permute.xlu2 %1096  ;;  %3411 = vmatpush.bf16.msra.mxu3 %v6850_v34  ;;  %v7486_v6 = vor.u32 %v7937_v31, %v7485_v63  ;;  %v7742_v34 = vld [vmem:[%s15518_s3 + $0xf8] sm:$0xf0]  ;;  %v6709_v31 = vld [vmem:[%s15518_s3 + $0xe8] sm:$0xf] }
  0xb6   :  { %15950 = vst [vmem:[#allocation28_spill] sm:$0xff] %v9183_v61  ;;  %v9191_v0 = vpop.permute.xlu1 %1106  ;;  %v6703_v61 = vld [vmem:[%s15518_s3 + $0xfc] sm:$0xf0]  ;;  %v7743_v63 = vld [vmem:[%s15518_s3 + $0x100] sm:$0xf0]  ;;  %v9222_v29 = vor.u32 %v7742_v34, %v6701_v3 }
  0xb7   :  { %15951 = vst [vmem:[#allocation29_spill] sm:$0xff] %v9191_v0  ;;  %3313 = vmatpush.bf16.msra.mxu1 %v7486_v6  ;;  %v7740_v0 = vld [vmem:[%s15518_s3 + $0xec] sm:$0xf]  ;;  %v9230_v8 = vor.u32 %v7743_v63, %v6709_v31  ;;  %v6831_v34 = vld [vmem:[%s15514_s1 + $0x30] sm:$0xf0] }
  0xb8   :  { %15952 = vst [vmem:[#allocation30_spill] sm:$0xff] %v9222_v29 }
  0xb9   :  { %15954 = vst [vmem:[#allocation32_spill] sm:$0xff] %v9230_v8 }
  0xbb   :  { %v9131_v36 = vpop.f32.mrf.mxu2  ;;  %1291 = vperm.xlu1 %7969, %v1245_v60   ;;  %v1247_v60 = vld [vmem:[%s15517_s7 + $0x48] sm:$0xff]  ;;  %v9236_v23 = vpop.permute.xlu0 %1101 }
  0xbc   :  { %v9137_v45 = vpop.f32.mrf.mxu3  ;;  %v9139_v46 = vpop.f32.mrf.mxu0  ;;  %15956 = vst [vmem:[#allocation34_spill] sm:$0xff] %v9236_v23  ;;  %v9270_v23 = vadd.f32 %v8994_v43, %v8972_v22  ;;  %v6729_v43 = vld [vmem:[%s15518_s3 + $0x118] sm:$0xf] }
  0xbd   :  { %v9145_v54 = vpop.f32.mrf.mxu1  ;;  %v9239_v21 = vpop.permute.xlu2 %1116 }
  0xbe   :  { %15957 = vst [vmem:[#allocation35_spill] sm:$0xff] %v9239_v21  ;;  %v9266_v21 = vadd.f32 %v8990_v39, %v8972_v22 }
  0xbf   :  { %3086 = vmatmul.bf16.gmra.mxu0 %v9133_v38  ;;  %15960 = vst [vmem:[#allocation38_spill] sm:$0xff] %v9270_v23 }
  0xc0   :  { %3135 = vmatmul.bf16.gmra.mxu1 %v9141_v48  ;;  %3184 = vmatmul.bf16.gmra.mxu2 %v9143_v52  ;;  %v6711_v48 = vld [vmem:[%s15518_s3 + $0x104] sm:$0xf0]  ;;  %15959 = vst [vmem:[#allocation37_spill] sm:$0xff] %v9266_v21 }
  0xc1   :  { %3233 = vmatmul.bf16.gmra.mxu3 %v9147_v58  ;;  %v9234_v4 = vor.u32 %v7740_v0, %v6711_v48  ;;  %v7341_v48 = vld [vmem:[%s15514_s1 + $0x420] sm:$0xf]  ;;  %v7771_v0 = vld [vmem:[%s15514_s1 + $0x24] sm:$0xf] }
  0xc2   :  { %1301 = vperm.xlu2 %7970, %v1247_v60   ;;  %v6834_v31 = vor.u32 %v7771_v0, %v6831_v34  ;;  %v7933_v0 = vld [vmem:[%s15514_s1 + $0x52c] sm:$0xf0] }
  0xc3   :  { %v9170_v7 = vpop.f32.mrf.mxu2  ;;  %15955 = vst [vmem:[#allocation33_spill] sm:$0xff] %v9234_v4  ;;  %v9284_v39 = vpop.permute.xlu0 %1111 }
  0xc4   :  { %v9177_v58 = vpop.f32.mrf.mxu3  ;;  %v9179_v52 = vpop.f32.mrf.mxu0  ;;  %3412 = vmatpush.bf16.msra.mxu3 %v6834_v31  ;;  %15962 = vst [vmem:[#allocation40_spill] sm:$0xff] %v9284_v39  ;;  %v7749_v31 = vld [vmem:[%s15518_s3 + $0x130] sm:$0xf0]  ;;  %v7750_v39 = vld [vmem:[%s15518_s3 + $0x138] sm:$0xf0] }
  0xc5   :  { %v9181_v60 = vpop.f32.mrf.mxu1  ;;  %v9318_v47 = vor.u32 %v7749_v31, %v6729_v43  ;;  %v9338_v43 = vor.u32 %v7747_v20, %v6739_v27  ;;  %v597_v20 = vmul.f32 %v9334_v16, %v9334_v16 }
  0xc6   :  { %1296 = vperm.xlu0 %7968, %v1246_v26   ;;  %v7739_v26 = vld [vmem:[%s15518_s3 + $0xe4] sm:$0xf] }
  0xc7   :  { %v9228_v6 = vor.u32 %v7739_v26, %v6703_v61  ;;  %v9244_v61 = vpop.permute.xlu1 %1121  ;;  %15964 = vst [vmem:[#allocation42_spill] sm:$0xff] %v9318_v47 }
  0xc8   :  { %15958 = vst [vmem:[#allocation36_spill] sm:$0xff] %v9244_v61 }
  0xc9   :  { %15953 = vst [vmem:[#allocation31_spill] sm:$0xff] %v9228_v6 }
  0xca   :  { %15969 = vst [vmem:[#allocation47_spill] sm:$0xff] %v9338_v43 }
  0xcb   :  { %v9217_v41 = vpop.f32.mrf.mxu2 }
  0xcc   :  { %v9224_v19 = vpop.f32.mrf.mxu3  ;;  %v9226_v17 = vpop.f32.mrf.mxu0 }
  0xcd   :  { %v9232_v5 = vpop.f32.mrf.mxu1 }
  0xce   :  { %1311 = vperm.xlu0 %7968, %v1249_v59   ;;  %v7901_v59 = vld [vmem:[%s15514_s1 + $0x42c] sm:$0xf0] }
  0xcf   :  { %3091 = vmatmul.bf16.gmra.mxu0 %v9222_v29  ;;  %v7342_v3 = vor.u32 %v7901_v59, %v7341_v48  ;;  %v7469_v59 = vld [vmem:[%s15514_s1 + $0x520] sm:$0xf]  ;;  %v9320_v29 = vpop.permute.xlu1 %1136 }
  0xd0   :  { %3140 = vmatmul.bf16.gmra.mxu1 %v9228_v6  ;;  %3189 = vmatmul.bf16.gmra.mxu2 %v9230_v8  ;;  %v7470_v34 = vor.u32 %v7933_v0, %v7469_v59  ;;  %v594_v8 = vmul.f32 %v9266_v21, %v9266_v21  ;;  %v6731_v59 = vld [vmem:[%s15518_s3 + $0x134] sm:$0xf0]  ;;  %v6737_v0 = vld [vmem:[%s15518_s3 + $0x120] sm:$0xf]  ;;  %v9308_v6 = vpop.permute.xlu2 %1131  ;;  %15965 = vst [vmem:[#allocation43_spill] sm:$0xff] %v9320_v29 }
  0xd1   :  { %3238 = vmatmul.bf16.gmra.mxu3 %v9234_v4  ;;  %3265 = vmatpush.bf16.msra.mxu0 %v7342_v3  ;;  %v9282_v3 = vadd.f32 %v9042_v10, %v8972_v22  ;;  %v7746_v4 = vld [vmem:[%s15518_s3 + $0x11c] sm:$0xf]  ;;  %v595_v10 = vmul.f32 %v9270_v23, %v9270_v23  ;;  %15963 = vst [vmem:[#allocation41_spill] sm:$0xff] %v9308_v6 }
  0xd2   :  { %3314 = vmatpush.bf16.msra.mxu1 %v7470_v34  ;;  %v9328_v6 = vor.u32 %v7746_v4, %v6731_v59  ;;  %v9330_v37 = vor.u32 %v7750_v39, %v6737_v0  ;;  %v9345_v4 = vadd.f32 %v9048_v15, %v8888_v32  ;;  %v9349_v22 = vadd.f32 %v9056_v28, %v8888_v32  ;;  %v7897_v15 = vld [vmem:[%s15514_s1 + $0x40c] sm:$0xf0]  ;;  %v7767_v28 = vld [vmem:[%s15514_s1 + $0x4] sm:$0xf] }
  0xd3   :  { %v9258_v26 = vpop.f32.mrf.mxu2  ;;  %15961 = vst [vmem:[#allocation39_spill] sm:$0xff] %v9282_v3  ;;  %v596_v38 = vmul.f32 %v9282_v3, %v9282_v3  ;;  %v661_v31 = vadd.f32 %v595_v10, %v594_v8  ;;  %v9354_v8 = vpop.permute.xlu0 %1126  ;;  %v7326_v27 = vor.u32 %v7897_v15, %v7325_v13  ;;  %v9370_v39 = vadd.f32 %v9086_v51, %v8888_v32 }
  0xd4   :  { %v9260_v63 = vpop.f32.mrf.mxu3  ;;  %v9262_v61 = vpop.f32.mrf.mxu0  ;;  %15966 = vst [vmem:[#allocation44_spill] sm:$0xff] %v9328_v6  ;;  %v501_v0 = vadd.f32 %v9270_v23, %v9266_v21  ;;  %v506_v15 = vadd.f32 %v9349_v22, %v9345_v4 }
  0xd5   :  { %v9272_v48 = vpop.f32.mrf.mxu1  ;;  %15967 = vst [vmem:[#allocation45_spill] sm:$0xff] %v9330_v37  ;;  %v662_v29 = vadd.f32 %v661_v31, %v596_v38  ;;  %v6815_v38 = vld [vmem:[%s15514_s1 + $0x10] sm:$0xf0]  ;;  %3266 = vmatpush.bf16.msra.mxu0 %v7326_v27  ;;  %v7929_v27 = vld [vmem:[%s15514_s1 + $0x50c] sm:$0xf0] }
  0xd6   :  { %15970 = vst [vmem:[#allocation48_spill] sm:$0xff] %v9345_v4  ;;  %v502_v51 = vadd.f32 %v501_v0, %v9282_v3 }
  0xd7   :  { %15971 = vst [vmem:[#allocation49_spill] sm:$0xff] %v9349_v22  ;;  %v663_v59 = vadd.f32 %v662_v29, %v597_v20  ;;  %v9387_v29 = vpop.permute.xlu1 %1151  ;;  %v598_v20 = vmul.f32 %v9345_v4, %v9345_v4 }
  0xd8   :  { %15972 = vst [vmem:[#allocation50_spill] sm:$0xff] %v9354_v8  ;;  %v9376_v31 = vpop.permute.xlu2 %1146  ;;  %v6818_v8 = vor.u32 %v7767_v28, %v6815_v38  ;;  %v7453_v28 = vld [vmem:[%s15514_s1 + $0x500] sm:$0xf]  ;;  %v599_v38 = vmul.f32 %v9349_v22, %v9349_v22  ;;  %v9435_v22 = vadd.f32 %v9131_v36, %v8952_v9 }
  0xd9   :  { %15973 = vst [vmem:[#allocation51_spill] sm:$0xff] %v9370_v39  ;;  %v7454_v0 = vor.u32 %v7929_v27, %v7453_v28  ;;  %v6765_v28 = vld [vmem:[%s15518_s3 + $0x158] sm:$0xf]  ;;  %v7757_v27 = vld [vmem:[%s15518_s3 + $0x170] sm:$0xf0] }
  0xda   :  { %15974 = vst [vmem:[#allocation52_spill] sm:$0xff] %v9376_v31  ;;  %3413 = vmatpush.bf16.msra.mxu3 %v6818_v8  ;;  %v507_v8 = vadd.f32 %v506_v15, %v9370_v39  ;;  %v9406_v31 = vadd.f32 %v9092_v56, %v8952_v9  ;;  %v600_v56 = vmul.f32 %v9370_v39, %v9370_v39  ;;  %v6767_v39 = vld [vmem:[%s15518_s3 + $0x174] sm:$0xf0] }
  0xdb   :  { %v9316_v33 = vpop.f32.mrf.mxu2  ;;  %15978 = vst [vmem:[#allocation56_spill] sm:$0xff] %v9387_v29  ;;  %v9410_v29 = vadd.f32 %v9094_v57, %v8952_v9  ;;  %v503_v15 = vadd.f32 %v502_v51, %v9334_v16  ;;  %v6759_v57 = vld [vmem:[%s15518_s3 + $0x16c] sm:$0xf0]  ;;  %3315 = vmatpush.bf16.msra.mxu1 %v7454_v0  ;;  %v7754_v51 = vld [vmem:[%s15518_s3 + $0x15c] sm:$0xf]  ;;  %v666_v0 = vadd.f32 %v599_v38, %v598_v20  ;;  %v9448_v23 = vpop.permute.xlu0 %1141 }
  0xdc   :  { %v9324_v42 = vpop.f32.mrf.mxu3  ;;  %v9326_v34 = vpop.f32.mrf.mxu0  ;;  %15979 = vst [vmem:[#allocation57_spill] sm:$0xff] %v9406_v31  ;;  %v602_v36 = vmul.f32 %v9406_v31, %v9406_v31 }
  0xdd   :  { %v9336_v14 = vpop.f32.mrf.mxu1  ;;  %15980 = vst [vmem:[#allocation58_spill] sm:$0xff] %v9410_v29  ;;  %v603_v21 = vmul.f32 %v9410_v29, %v9410_v29  ;;  %v667_v38 = vadd.f32 %v666_v0, %v600_v56  ;;  %v7891_v56 = vld [vmem:[%s15514_s1 + $0x3e4] sm:$0xf]  ;;  %v7439_v0 = vld [vmem:[%s15514_s1 + $0x4f0] sm:$0xf0] }
  0xde   :  { %15981 = vst [vmem:[#allocation59_spill] sm:$0xff] %v9435_v22 }
  0xdf   :  { %3096 = vmatmul.bf16.gmra.mxu0 %v9318_v47  ;;  %15983 = vst [vmem:[#allocation61_spill] sm:$0xff] %v9448_v23  ;;  %v604_v23 = vmul.f32 %v9435_v22, %v9435_v22 }
  0xe0   :  { %3145 = vmatmul.bf16.gmra.mxu1 %v9328_v6  ;;  %3194 = vmatmul.bf16.gmra.mxu2 %v9330_v37  ;;  %v6757_v6 = vld [vmem:[%s15518_s3 + $0x150] sm:$0xf] }
  0xe1   :  { %3243 = vmatmul.bf16.gmra.mxu3 %v9338_v43 }
  0xe3   :  { %v9372_v10 = vpop.f32.mrf.mxu2 }
  0xe4   :  { %v9378_v43 = vpop.f32.mrf.mxu3  ;;  %v9380_v13 = vpop.f32.mrf.mxu0 }
  0xe5   :  { %15975 = vst [vmem:[#allocation53_spill] sm:$0xff] %v9378_v43  ;;  %v9384_v37 = vpop.f32.mrf.mxu1  ;;  %664 = vadd.xlane.f32.xlu1 %v663_v59  ;;  %v9401_v59 = vadd.f32 %v9090_v55, %v8888_v32  ;;  %v7756_v32 = vld [vmem:[%s15518_s3 + $0x168] sm:$0xf0]  ;;  %v7753_v55 = vld [vmem:[%s15518_s3 + $0x154] sm:$0xf] }
  0xe6   :  { %15976 = vst [vmem:[#allocation54_spill] sm:$0xff] %v9380_v13  ;;  %v9446_v3 = vor.u32 %v7756_v32, %v6757_v6  ;;  %v9458_v13 = vor.u32 %v7753_v55, %v6759_v57  ;;  %v9464_v6 = vor.u32 %v7754_v51, %v6767_v39  ;;  %v9468_v32 = vpop.permute.xlu2 %1161  ;;  %v9473_v55 = vpop.permute.xlu1 %1166  ;;  %v9477_v57 = vadd.f32 %v9137_v45, %v8952_v9  ;;  %v7827_v9 = vld [vmem:[%s15514_s1 + $0x1e4] sm:$0xf] }
  0xe7   :  { %15977 = vst [vmem:[#allocation55_spill] sm:$0xff] %v9384_v37  ;;  %v508_v16 = vadd.f32 %v507_v8, %v9401_v59  ;;  %v601_v20 = vmul.f32 %v9401_v59, %v9401_v59  ;;  %v7923_v51 = vld [vmem:[%s15514_s1 + $0x4e4] sm:$0xf] }
  0xe8   :  { %15982 = vst [vmem:[#allocation60_spill] sm:$0xff] %v9446_v3 }
  0xe9   :  { %15984 = vst [vmem:[#allocation62_spill] sm:$0xff] %v9458_v13  ;;  %v668_v39 = vadd.f32 %v667_v38, %v601_v20  ;;  %v511_v20 = vadd.f32 %v9410_v29, %v9406_v31  ;;  %v7442_v38 = vor.u32 %v7923_v51, %v7439_v0  ;;  %v9527_v0 = vpop.permute.xlu0 %1156 }
  0xea   :  { %15986 = vst [vmem:[#allocation64_spill] sm:$0xff] %v9464_v6 }
  0xeb   :  { %v9443_v4 = vpop.f32.mrf.mxu2  ;;  %504 = vadd.xlane.f32.xlu2 %v503_v15  ;;  %v9460_v15 = vor.u32 %v7757_v27, %v6765_v28  ;;  %15987 = vst [vmem:[#allocation65_spill] sm:$0xff] %v9468_v32  ;;  %v7311_v28 = vld [vmem:[%s15514_s1 + $0x3f0] sm:$0xf0]  ;;  %v512_v51 = vadd.f32 %v511_v20, %v9435_v22  ;;  %3602 = vmatpush.bf16.msrb.mxu3 %v7442_v38  ;;  %v7763_v20 = vld [vmem:[%s15518_s3 + $0x1a0] sm:$0xf0] }
  0xec   :  { %v9454_v43 = vpop.f32.mrf.mxu3  ;;  %v9456_v37 = vpop.f32.mrf.mxu0  ;;  %15988 = vst [vmem:[#allocation66_spill] sm:$0xff] %v9473_v55  ;;  %v7314_v27 = vor.u32 %v7891_v56, %v7311_v28  ;;  %v605_v55 = vmul.f32 %v9477_v57, %v9477_v57  ;;  %v6793_v38 = vld [vmem:[%s15518_s3 + $0x190] sm:$0xf] }
  0xed   :  { %15985 = vst [vmem:[#allocation63_spill] sm:$0xff] %v9460_v15  ;;  %v9462_v8 = vpop.f32.mrf.mxu1  ;;  %509 = vadd.xlane.f32.xlu1 %v508_v16  ;;  %v671_v16 = vadd.f32 %v603_v21, %v602_v36  ;;  %v7055_v21 = vld [vmem:[%s15514_s1 + $0x1f0] sm:$0xf0] }
  0xee   :  { %15989 = vst [vmem:[#allocation67_spill] sm:$0xff] %v9477_v57  ;;  %3553 = vmatpush.bf16.msrb.mxu2 %v7314_v27 }
  0xef   :  { %3101 = vmatmul.bf16.gmra.mxu0 %v9446_v3  ;;  %v672_v45 = vadd.f32 %v671_v16, %v604_v23  ;;  %v7058_v23 = vor.u32 %v7827_v9, %v7055_v21  ;;  %v9506_v16 = vadd.f32 %v9139_v46, %v8996_v44  ;;  %v7183_v9 = vld [vmem:[%s15514_s1 + $0x2f0] sm:$0xf0]  ;;  %v9522_v46 = vadd.f32 %v9145_v54, %v8996_v44  ;;  %v6785_v54 = vld [vmem:[%s15518_s3 + $0x188] sm:$0xf] }
  0xf0   :  { %3150 = vmatmul.bf16.gmra.mxu1 %v9458_v13  ;;  %3199 = vmatmul.bf16.gmra.mxu2 %v9460_v15  ;;  %15995 = vst [vmem:[#allocation73_spill] sm:$0xff] %v9527_v0  ;;  %v9533_v15 = vpop.permute.xlu2 %1256 }
  0xf1   :  { %3248 = vmatmul.bf16.gmra.mxu3 %v9464_v6  ;;  %15990 = vst [vmem:[#allocation68_spill] sm:$0xff] %v9506_v16  ;;  %3455 = vmatpush.bf16.msrb.mxu0 %v7058_v23  ;;  %v673_v32 = vadd.f32 %v672_v45, %v605_v55  ;;  %v9531_v6 = vadd.f32 %v9170_v7, %v8996_v44  ;;  %v7760_v55 = vld [vmem:[%s15518_s3 + $0x18c] sm:$0xf]  ;;  %v9547_v23 = vpop.permute.xlu1 %1261 }
  0xf2   :  { %15993 = vst [vmem:[#allocation71_spill] sm:$0xff] %v9522_v46  ;;  %v516_v7 = vadd.f32 %v9522_v46, %v9506_v16  ;;  %v513_v45 = vadd.f32 %v512_v51, %v9477_v57  ;;  %v6795_v51 = vld [vmem:[%s15518_s3 + $0x1ac] sm:$0xf0] }
  0xf3   :  { %v9500_v36 = vpop.f32.mrf.mxu2  ;;  %669 = vadd.xlane.f32.xlu2 %v668_v39  ;;  %v7859_v39 = vld [vmem:[%s15514_s1 + $0x2e4] sm:$0xf]  ;;  %15996 = vst [vmem:[#allocation74_spill] sm:$0xff] %v9531_v6 }
  0xf4   :  { %v9508_v56 = vpop.f32.mrf.mxu3  ;;  %v9510_v28 = vpop.f32.mrf.mxu0  ;;  %v7186_v27 = vor.u32 %v7859_v39, %v7183_v9  ;;  %15997 = vst [vmem:[#allocation75_spill] sm:$0xff] %v9533_v15  ;;  %v7764_v39 = vld [vmem:[%s15518_s3 + $0x1a8] sm:$0xf0]  ;;  %v7761_v9 = vld [vmem:[%s15518_s3 + $0x194] sm:$0xf]  ;;  %v517_v15 = vadd.f32 %v516_v7, %v9531_v6 }
  0xf5   :  { %15991 = vst [vmem:[#allocation69_spill] sm:$0xff] %v9508_v56  ;;  %v9524_v21 = vpop.f32.mrf.mxu1  ;;  %v9579_v57 = vor.u32 %v7764_v39, %v6793_v38  ;;  %v9583_v29 = vor.u32 %v7761_v9, %v6795_v51  ;;  %v1248_v7 = vld [vmem:[%s15517_s7 + $0x50] sm:$0xff]  ;;  %v7716_v39 = vld [vmem:[%s15518_s3 + $0x28] sm:$0xf0] }
  0xf6   :  { %15992 = vst [vmem:[#allocation70_spill] sm:$0xff] %v9510_v28  ;;  %3504 = vmatpush.bf16.msrb.mxu1 %v7186_v27  ;;  %v9566_v27 = vadd.f32 %v9177_v58, %v8996_v44  ;;  %v9587_v58 = vpop.permute.xlu0 %1171  ;;  %v6605_v38 = vld [vmem:[%s15518_s3 + $0x10] sm:$0xf]  ;;  %v7713_v51 = vld [vmem:[%s15518_s3 + $0x14] sm:$0xf] }
  0xf7   :  { %15994 = vst [vmem:[#allocation72_spill] sm:$0xff] %v9524_v21 }
  0xf8   :  { %674 = vadd.xlane.f32.xlu0 %v673_v32  ;;  %15998 = vst [vmem:[#allocation76_spill] sm:$0xff] %v9547_v23  ;;  %v6787_v32 = vld [vmem:[%s15518_s3 + $0x1a4] sm:$0xf0]  ;;  %v9570_v23 = vor.u32 %v7763_v20, %v6785_v54  ;;  %v518_v44 = vadd.f32 %v517_v15, %v9566_v27  ;;  %v9592_v54 = vpop.permute.xlu2 %1271 }
  0xf9   :  { %15999 = vst [vmem:[#allocation77_spill] sm:$0xff] %v9566_v27  ;;  %v9577_v28 = vor.u32 %v7760_v55, %v6787_v32  ;;  %v9596_v55 = vpop.permute.xlu1 %1276 }
  0xfa   :  { %16001 = vst [vmem:[#allocation79_spill] sm:$0xff] %v9570_v23 }
  0xfb   :  { %v9568_v0 = vpop.f32.mrf.mxu2  ;;  %514 = vadd.xlane.f32.xlu2 %v513_v45  ;;  %16004 = vst [vmem:[#allocation82_spill] sm:$0xff] %v9577_v28 }
  0xfc   :  { %16000 = vst [vmem:[#allocation78_spill] sm:$0xff] %v9568_v0  ;;  %v9573_v13 = vpop.f32.mrf.mxu3  ;;  %v9575_v21 = vpop.f32.mrf.mxu0  ;;  %v9741_v0 = vadd.f32 %v9181_v60, %v9034_v2 }
  0xfd   :  { %16002 = vst [vmem:[#allocation80_spill] sm:$0xff] %v9573_v13  ;;  %v9581_v22 = vpop.f32.mrf.mxu1 }
  0xfe   :  { %16003 = vst [vmem:[#allocation81_spill] sm:$0xff] %v9575_v21  ;;  %v9613_v9 = vpop.permute.xlu0 %1266 }
  0xff   :  { %16005 = vst [vmem:[#allocation83_spill] sm:$0xff] %v9579_v57  ;;  %3106 = vmatmul.bf16.gmra.mxu0 %v9570_v23 }
 0x100   :  { %16006 = vst [vmem:[#allocation84_spill] sm:$0xff] %v9581_v22  ;;  %3155 = vmatmul.bf16.gmra.mxu1 %v9577_v28  ;;  %3204 = vmatmul.bf16.gmra.mxu2 %v9579_v57  ;;  %v7167_v22 = vld [vmem:[%s15514_s1 + $0x2d0] sm:$0xf0] }
 0x101   :  { %16007 = vst [vmem:[#allocation85_spill] sm:$0xff] %v9583_v29  ;;  %3253 = vmatmul.bf16.gmra.mxu3 %v9583_v29  ;;  %519 = vadd.xlane.f32.xlu0 %v518_v44  ;;  %v6607_v44 = vld [vmem:[%s15518_s3 + $0x2c] sm:$0xf0] }
 0x102   :  { %16008 = vst [vmem:[#allocation86_spill] sm:$0xff] %v9587_v58  ;;  %v7717_v58 = vld [vmem:[%s15518_s3 + $0x30] sm:$0xf0]  ;;  %v9637_v28 = vor.u32 %v7713_v51, %v6607_v44 }
 0x103   :  { %16009 = vst [vmem:[#allocation87_spill] sm:$0xff] %v9592_v54  ;;  %v9594_v20 = vpop.f32.mrf.mxu2  ;;  %v9629_v54 = vpop.permute.xlu2 %1286 }
 0x104   :  { %16010 = vst [vmem:[#allocation88_spill] sm:$0xff] %v9594_v20  ;;  %v9601_v15 = vpop.f32.mrf.mxu3  ;;  %v9603_v45 = vpop.f32.mrf.mxu0 }
 0x105   :  { %16011 = vst [vmem:[#allocation89_spill] sm:$0xff] %v9596_v55  ;;  %v9605_v32 = vpop.f32.mrf.mxu1 }
 0x106   :  { %16012 = vst [vmem:[#allocation90_spill] sm:$0xff] %v9601_v15  ;;  %1306 = vperm.xlu1 %7969, %v1248_v7   ;;  %v6613_v7 = vld [vmem:[%s15518_s3 + $0x18] sm:$0xf]  ;;  %v9658_v44 = vpop.permute.xlu0 %1281  ;;  %v7887_v15 = vld [vmem:[%s15514_s1 + $0x3c4] sm:$0xf] }
 0x107   :  { %16013 = vst [vmem:[#allocation91_spill] sm:$0xff] %v9603_v45  ;;  %v9641_v13 = vor.u32 %v7717_v58, %v6613_v7 }
 0x108   :  { %16014 = vst [vmem:[#allocation92_spill] sm:$0xff] %v9605_v32 }
 0x109   :  { %16015 = vst [vmem:[#allocation93_spill] sm:$0xff] %v9613_v9  ;;  %v9631_v9 = vor.u32 %v7716_v39, %v6605_v38  ;;  %v1250_v38 = vld [vmem:[%s15517_s7 + $0x60] sm:$0xff]  ;;  %v1252_v39 = vld [vmem:[%s15517_s7 + $0x70] sm:$0xff] }
 0x10a   :  { %16017 = vst [vmem:[#allocation95_spill] sm:$0xff] %v9629_v54 }
 0x10b   :  { %v9627_v55 = vpop.f32.mrf.mxu2  ;;  %16018 = vst [vmem:[#allocation96_spill] sm:$0xff] %v9631_v9 }
 0x10c   :  { %16016 = vst [vmem:[#allocation94_spill] sm:$0xff] %v9627_v55  ;;  %v9633_v29 = vpop.f32.mrf.mxu3  ;;  %v9635_v57 = vpop.f32.mrf.mxu0 }
 0x10d   :  { %16019 = vst [vmem:[#allocation97_spill] sm:$0xff] %v9633_v29  ;;  %v9639_v32 = vpop.f32.mrf.mxu1  ;;  %v490_v45 = vpop.xlane.xlu1 %489 }
 0x10e   :  { %16020 = vst [vmem:[#allocation98_spill] sm:$0xff] %v9635_v57  ;;  %v9654_v58 = vmul.f32 0.001953125, %v490_v45  ;;  %v6633_v45 = vld [vmem:[%s15518_s3 + $0x48] sm:$0xf] }
 0x10f   :  { %16021 = vst [vmem:[#allocation99_spill] sm:$0xff] %v9637_v28  ;;  %3267 = vmatmul.bf16.vlgmr.msra.gmra.mxu0 %v9631_v9 }
 0x110   :  { %16022 = vst [vmem:[#allocation100_spill] sm:$0xff] %v9639_v32  ;;  %3316 = vmatmul.bf16.vlgmr.msra.gmra.mxu1 %v9637_v28  ;;  %7611 = vmatmul.msk.bf16.vlgmr.msra.gmra.mxu2 %vm3038_vm1, %v9641_v13 }
 0x111   :  { %16023 = vst [vmem:[#allocation101_spill] sm:$0xff] %v9641_v13  ;;  %3414 = vmatmul.bf16.vlgmr.msra.gmra.mxu3 %v8860_v18  ;;  %v742_v13 = vmul.f32 %v9654_v58, %v9654_v58 }
 0x112   :  { %16025 = vst [vmem:[#allocation103_spill] sm:$0xff] %v9658_v44 }
 0x113   :  { %v9656_v51 = vpop.f32.mrf.mxu2  ;;  %1316 = vperm.xlu2 %7970, %v1250_v38   ;;  %v7723_v38 = vld [vmem:[%s15518_s3 + $0x60] sm:$0xf0]  ;;  %16037 = vst [vmem:[#allocation115_spill] sm:$0xff] %v9741_v0 }
 0x114   :  { %16024 = vst [vmem:[#allocation102_spill] sm:$0xff] %v9656_v51  ;;  %v9660_v7 = vpop.f32.mrf.mxu3  ;;  %v9662_v54 = vpop.f32.mrf.mxu0  ;;  %v607_v51 = vmul.f32 %v9522_v46, %v9522_v46  ;;  %v9696_v55 = vor.u32 %v7723_v38, %v6633_v45  ;;  %v7823_v45 = vld [vmem:[%s15514_s1 + $0x1c4] sm:$0xf]  ;;  %v7039_v38 = vld [vmem:[%s15514_s1 + $0x1d0] sm:$0xf0] }
 0x115   :  { %16026 = vst [vmem:[#allocation104_spill] sm:$0xff] %v9660_v7  ;;  %1326 = vperm.xlu0 %7968, %v1252_v39   ;;  %v9664_v32 = vpop.f32.mrf.mxu1  ;;  %v495_v57 = vpop.xlane.xlu2 %494  ;;  %v7720_v39 = vld [vmem:[%s15518_s3 + $0x4c] sm:$0xf]  ;;  %v6635_v7 = vld [vmem:[%s15518_s3 + $0x64] sm:$0xf0] }
 0x116   :  { %16027 = vst [vmem:[#allocation105_spill] sm:$0xff] %v9662_v54  ;;  %v650_v18 = vpop.xlane.xlu1 %649 }
 0x117   :  { %16028 = vst [vmem:[#allocation106_spill] sm:$0xff] %v9664_v32  ;;  %v726_v28 = vmul.f32 0.001953125, %v650_v18  ;;  %v606_v18 = vmul.f32 %v9506_v16, %v9506_v16  ;;  %v9684_v32 = vmul.f32 0.001953125, %v495_v57  ;;  %v7295_v57 = vld [vmem:[%s15514_s1 + $0x3d0] sm:$0xf0]  ;;  %v9708_v16 = vor.u32 %v7720_v39, %v6635_v7 }
 0x118   :  { %16030 = vst [vmem:[#allocation108_spill] sm:$0xff] %v9696_v55 }
 0x119   :  { %v758_v44 = vsub.f32 %v726_v28, %v742_v13  ;;  %v6641_v13 = vld [vmem:[%s15518_s3 + $0x50] sm:$0xf]  ;;  %v7724_v28 = vld [vmem:[%s15518_s3 + $0x68] sm:$0xf0]  ;;  %16033 = vst [vmem:[#allocation111_spill] sm:$0xff] %v9708_v16  ;;  %v676_v21 = vadd.f32 %v607_v51, %v606_v18  ;;  %v743_v9 = vmul.f32 %v9684_v32, %v9684_v32 }
 0x11a   :  { %v9724_v39 = vor.u32 %v7724_v28, %v6641_v13  ;;  %v7042_v13 = vor.u32 %v7823_v45, %v7039_v38 }
 0x11b   :  { %v9692_v29 = vadd.f32 1e-05, %v758_v44  ;;  %v9694_v54 = vpop.f32.mrf.mxu2  ;;  %v7298_v44 = vor.u32 %v7887_v15, %v7295_v57  ;;  %v7423_v57 = vld [vmem:[%s15514_s1 + $0x4d0] sm:$0xf0] }
 0x11c   :  { %16029 = vst [vmem:[#allocation107_spill] sm:$0xff] %v9694_v54  ;;  %v9704_v20 = vpop.f32.mrf.mxu3  ;;  %v9706_v46 = vpop.f32.mrf.mxu0  ;;  %v7919_v54 = vld [vmem:[%s15514_s1 + $0x4c4] sm:$0xf]  ;;  %3456 = vmatpush.bf16.msrb.mxu0 %v7042_v13 }
 0x11d   :  { %16031 = vst [vmem:[#allocation109_spill] sm:$0xff] %v9704_v20  ;;  %v608_v20 = vmul.f32 %v9531_v6, %v9531_v6  ;;  %7971 = vrsqrt.f32 %v9692_v29  ;;  %v9722_v7 = vpop.f32.mrf.mxu1  ;;  %v500_v15 = vpop.xlane.xlu0 %499  ;;  %v9737_v6 = vadd.f32 %v9179_v52, %v9034_v2  ;;  %3554 = vmatpush.bf16.msrb.mxu2 %v7298_v44  ;;  %v7426_v28 = vor.u32 %v7919_v54, %v7423_v57  ;;  %v7915_v57 = vld [vmem:[%s15514_s1 + $0x4a4] sm:$0xf] }
 0x11e   :  { %16032 = vst [vmem:[#allocation110_spill] sm:$0xff] %v9706_v46  ;;  %v7855_v46 = vld [vmem:[%s15514_s1 + $0x2c4] sm:$0xf]  ;;  %v609_v54 = vmul.f32 %v9566_v27, %v9566_v27  ;;  %v9752_v51 = vmul.f32 0.001953125, %v500_v15  ;;  %v7023_v15 = vld [vmem:[%s15514_s1 + $0x1b0] sm:$0xf0]  ;;  %vm860_vm3 = vweird.f32 %v9692_v29 }
 0x11f   :  { %16034 = vst [vmem:[#allocation112_spill] sm:$0xff] %v9722_v7  ;;  %v655_v7 = vpop.xlane.xlu2 %654  ;;  %3272 = vmatmul.bf16.gmra.mxu0 %v9696_v55  ;;  %v7170_v56 = vor.u32 %v7855_v46, %v7167_v22  ;;  %v677_v60 = vadd.f32 %v676_v21, %v608_v20  ;;  %3603 = vmatpush.bf16.msrb.mxu3 %v7426_v28  ;;  %v7883_v21 = vld [vmem:[%s15514_s1 + $0x3a4] sm:$0xf]  ;;  %v7279_v20 = vld [vmem:[%s15514_s1 + $0x3b0] sm:$0xf0] }
 0x120   :  { %16035 = vst [vmem:[#allocation113_spill] sm:$0xff] %v9724_v39  ;;  %v727_v31 = vmul.f32 0.001953125, %v655_v7  ;;  %3321 = vmatmul.bf16.gmra.mxu1 %v9708_v16  ;;  %7612 = vmatmul.msk.bf16.gmra.mxu2 %vm3038_vm1, %v9724_v39  ;;  %v610_v22 = vmul.f32 %v9737_v6, %v9737_v6  ;;  %v7282_v7 = vor.u32 %v7883_v21, %v7279_v20 }
 0x121   :  { %16036 = vst [vmem:[#allocation114_spill] sm:$0xff] %v9737_v6  ;;  %3419 = vmatmul.bf16.gmra.mxu3 %v8938_v62  ;;  %3505 = vmatpush.bf16.msrb.mxu1 %v7170_v56  ;;  %v7819_v56 = vld [vmem:[%s15514_s1 + $0x1a4] sm:$0xf]  ;;  %v521_v13 = vadd.f32 %v9741_v0, %v9737_v6  ;;  %v9789_v28 = vadd.f32 %v9217_v41, %v9034_v2 }
 0x122   :  { %v759_v52 = vsub.f32 %v727_v31, %v743_v9  ;;  %v611_v31 = vmul.f32 %v9741_v0, %v9741_v0  ;;  %v9794_v20 = vadd.f32 %v677_v60, %v609_v54  ;;  %v744_v41 = vmul.f32 %v9752_v51, %v9752_v51  ;;  %v6661_v54 = vld [vmem:[%s15518_s3 + $0x80] sm:$0xf]  ;;  %v7730_v60 = vld [vmem:[%s15518_s3 + $0x98] sm:$0xf0]  ;;  %3555 = vmatpush.bf16.msrb.mxu2 %v7282_v7 }
 0x123   :  { %v9754_v18 = vpop.eup %7971  ;;  %v9762_v9 = vpop.f32.mrf.mxu2  ;;  %v9825_v16 = vadd.f32 %v9224_v19, %v9034_v2  ;;  %v9829_v0 = vadd.f32 %v9226_v17, %v9011_v53  ;;  %v7007_v2 = vld [vmem:[%s15514_s1 + $0x190] sm:$0xf0] }
 0x124   :  { %v9760_v46 = vadd.f32 1e-05, %v759_v52  ;;  %16038 = vst [vmem:[#allocation116_spill] sm:$0xff] %v9762_v9  ;;  %v855_v44 = vmul.f32 %v9754_v18, %v9692_v29  ;;  %v9772_v45 = vpop.f32.mrf.mxu3  ;;  %v9774_v38 = vpop.f32.mrf.mxu0  ;;  %v7851_v9 = vld [vmem:[%s15514_s1 + $0x2a4] sm:$0xf]  ;;  %v681_v7 = vadd.f32 %v611_v31, %v610_v22  ;;  %vm861_vm2 = vweird.f32 %v9754_v18 }
 0x125   :  { %16039 = vst [vmem:[#allocation117_spill] sm:$0xff] %v9772_v45  ;;  %v9792_v52 = vpop.f32.mrf.mxu1  ;;  %v660_v21 = vpop.xlane.xlu0 %659  ;;  %v7026_v45 = vor.u32 %v7819_v56, %v7023_v15  ;;  %v7727_v56 = vld [vmem:[%s15518_s3 + $0x84] sm:$0xf]  ;;  %v7391_v31 = vld [vmem:[%s15514_s1 + $0x490] sm:$0xf0]  ;;  %vm862_vm4 = vmor %vm860_vm3, %vm861_vm2 }
 0x126   :  { %16040 = vst [vmem:[#allocation118_spill] sm:$0xff] %v9774_v38  ;;  %7973 = vrsqrt.f32 %v9760_v46  ;;  %v7407_v38 = vld [vmem:[%s15514_s1 + $0x4b0] sm:$0xf0]  ;;  %v856_v62 = vmul.f32 %v9754_v18, %v855_v44  ;;  %v728_v39 = vmul.f32 0.001953125, %v660_v21  ;;  %v6663_v44 = vld [vmem:[%s15518_s3 + $0x9c] sm:$0xf0]  ;;  %vm870_vm6 = vweird.f32 %v9760_v46 }
 0x127   :  { %16041 = vst [vmem:[#allocation119_spill] sm:$0xff] %v9792_v52  ;;  %v7410_v15 = vor.u32 %v7915_v57, %v7407_v38  ;;  %v7151_v21 = vld [vmem:[%s15514_s1 + $0x2b0] sm:$0xf0]  ;;  %v7879_v52 = vld [vmem:[%s15514_s1 + $0x384] sm:$0xf]  ;;  %3457 = vmatpush.bf16.msrb.mxu0 %v7026_v45  ;;  %v612_v45 = vmul.f32 %v9789_v28, %v9789_v28 }
 0x128   :  { %v7154_v6 = vor.u32 %v7851_v9, %v7151_v21  ;;  %v7263_v38 = vld [vmem:[%s15514_s1 + $0x390] sm:$0xf0]  ;;  %v7815_v57 = vld [vmem:[%s15514_s1 + $0x184] sm:$0xf]  ;;  %v857_v19 = vmul.f32 0.5, %v856_v62  ;;  %v760_v27 = vsub.f32 %v728_v39, %v744_v41  ;;  %v9848_v9 = vadd.f32 %v9232_v5, %v9011_v53 }
 0x129   :  { %3604 = vmatpush.bf16.msrb.mxu3 %v7410_v15  ;;  %v7266_v17 = vor.u32 %v7879_v52, %v7263_v38  ;;  %v7010_v55 = vor.u32 %v7815_v57, %v7007_v2  ;;  %v7911_v22 = vld [vmem:[%s15514_s1 + $0x484] sm:$0xf]  ;;  %v6669_v62 = vld [vmem:[%s15518_s3 + $0x88] sm:$0xf]  ;;  %v522_v39 = vadd.f32 %v521_v13, %v9789_v28  ;;  %v7135_v5 = vld [vmem:[%s15514_s1 + $0x290] sm:$0xf0]  ;;  %v614_v57 = vmul.f32 %v9829_v0, %v9829_v0 }
 0x12a   :  { %3506 = vmatpush.bf16.msrb.mxu1 %v7154_v6  ;;  %v7394_v52 = vor.u32 %v7911_v22, %v7391_v31  ;;  %v7847_v41 = vld [vmem:[%s15514_s1 + $0x284] sm:$0xf]  ;;  %v858_v15 = vsub.f32 1.5, %v857_v19  ;;  %v9863_v21 = vadd.f32 1e-05, %v760_v27  ;;  %v774_v2 = vsub.f32 %v8869_v24, %v9654_v58 }
 0x12b   :  { %v7731_v6 = vld [vmem:[%s15518_s3 + $0xa0] sm:$0xf0]  ;;  %3556 = vmatpush.bf16.msrb.mxu2 %v7266_v17  ;;  %v7138_v13 = vor.u32 %v7847_v41, %v7135_v5  ;;  %v9874_v22 = vpop.f32.mrf.mxu2  ;;  %v9876_v19 = vor.u32 %v7730_v60, %v6661_v54  ;;  %v9878_v27 = vor.u32 %v7727_v56, %v6663_v44  ;;  %3458 = vmatpush.bf16.msrb.mxu0 %v7010_v55 }
 0x12c   :  { %v9868_v38 = vpop.eup %7973  ;;  %16042 = vst [vmem:[#allocation120_spill] sm:$0xff] %v9874_v22  ;;  %v859_v31 = vmul.f32 %v9754_v18, %v858_v15  ;;  %7975 = vrsqrt.f32 %v9863_v21  ;;  %v9885_v41 = vpop.f32.mrf.mxu3  ;;  %v775_v24 = vsub.f32 %v8871_v25, %v9654_v58  ;;  %v776_v55 = vsub.f32 %v8892_v35, %v9654_v58 }
 0x12d   :  { %16043 = vst [vmem:[#allocation121_spill] sm:$0xff] %v9876_v19  ;;  %v865_v17 = vmul.f32 %v9868_v38, %v9760_v46  ;;  %v9887_v5 = vpop.f32.mrf.mxu0  ;;  %3605 = vmatpush.bf16.msrb.mxu3 %v7394_v52  ;;  %v777_v54 = vsub.f32 %v8898_v40, %v9654_v58  ;;  %v9897_v29 = vpop.f32.mrf.mxu1  ;;  %v9899_v60 = vor.u32 %v7731_v6, %v6669_v62  ;;  %vm871_vm5 = vweird.f32 %v9868_v38  ;;  %v7119_v46 = vld [vmem:[%s15514_s1 + $0x270] sm:$0xf0] }
 0x12e   :  { %16044 = vst [vmem:[#allocation122_spill] sm:$0xff] %v9878_v27  ;;  %3507 = vmatpush.bf16.msrb.mxu1 %v7138_v13  ;;  %v615_v56 = vmul.f32 %v9848_v9, %v9848_v9  ;;  %v9905_v25 = vadd.f32 %v9258_v26, %v9011_v53  ;;  %v863_v35 = vsel %vm862_vm4, %v9754_v18, %v859_v31  ;;  %vm872_vm7 = vmor %vm870_vm6, %vm871_vm5  ;;  %vm880_vm9 = vweird.f32 %v9863_v21 }
 0x12f   :  { %16045 = vst [vmem:[#allocation123_spill] sm:$0xff] %v9885_v41  ;;  %v866_v44 = vmul.f32 %v9868_v38, %v865_v17  ;;  %v9909_v40 = vmul.f32 %v863_v35, %v774_v2  ;;  %v9911_v58 = vmul.f32 %v863_v35, %v775_v24  ;;  %v9913_v52 = vmul.f32 %v863_v35, %v776_v55  ;;  %v7811_v55 = vld [vmem:[%s15514_s1 + $0x164] sm:$0xf] }
 0x130   :  { %16046 = vst [vmem:[#allocation124_spill] sm:$0xff] %v9887_v5  ;;  %v9915_v62 = vmul.f32 %v863_v35, %v777_v54  ;;  %3277 = vmatmul.bf16.gmra.mxu0 %v9876_v19  ;;  %3326 = vmatmul.bf16.gmra.mxu1 %v9878_v27  ;;  %v523_v26 = vadd.f32 %v522_v39, %v9825_v16  ;;  %v6991_v54 = vld [vmem:[%s15514_s1 + $0x170] sm:$0xf0] }
 0x131   :  { %16047 = vst [vmem:[#allocation125_spill] sm:$0xff] %v9897_v29  ;;  %v867_v15 = vmul.f32 0.5, %v866_v44  ;;  %679 = vadd.xlane.f32.xlu1 %v9794_v20  ;;  %7613 = vmatmul.msk.bf16.gmra.mxu2 %vm3038_vm1, %v9899_v60  ;;  %v613_v18 = vmul.f32 %v9825_v16, %v9825_v16  ;;  %v682_v6 = vadd.f32 %v681_v7, %v612_v45  ;;  %v7875_v20 = vld [vmem:[%s15514_s1 + $0x364] sm:$0xf]  ;;  %v7247_v7 = vld [vmem:[%s15514_s1 + $0x370] sm:$0xf0] }
 0x132   :  { %16048 = vst [vmem:[#allocation126_spill] sm:$0xff] %v9899_v60  ;;  %v9925_v13 = vpop.eup %7975  ;;  %v616_v2 = vmul.f32 %v9905_v25, %v9905_v25  ;;  %v9931_v31 = vadd.f32 %v9260_v63, %v9011_v53  ;;  %3424 = vmatmul.bf16.gmra.mxu3 %v9044_v11  ;;  %v778_v39 = vsub.f32 %v8909_v49, %v9684_v32  ;;  %v7907_v49 = vld [vmem:[%s15514_s1 + $0x464] sm:$0xf]  ;;  %v7375_v44 = vld [vmem:[%s15514_s1 + $0x470] sm:$0xf0] }
 0x133   :  { %16049 = vst [vmem:[#allocation127_spill] sm:$0xff] %v9909_v40  ;;  %v868_v17 = vsub.f32 1.5, %v867_v15  ;;  %v779_v53 = vsub.f32 %v8911_v50, %v9684_v32  ;;  %v780_v63 = vsub.f32 %v8942_v1, %v9684_v32  ;;  %v9947_v45 = vpop.f32.mrf.mxu2  ;;  %v686_v24 = vadd.f32 %v615_v56, %v614_v57  ;;  %v7843_v15 = vld [vmem:[%s15514_s1 + $0x264] sm:$0xf] }
 0x134   :  { %16050 = vst [vmem:[#allocation128_spill] sm:$0xff] %v9911_v58  ;;  %v875_v1 = vmul.f32 %v9925_v13, %v9863_v21  ;;  %v9962_v57 = vpop.f32.mrf.mxu3  ;;  %v7250_v35 = vor.u32 %v7875_v20, %v7247_v7  ;;  %v6994_v20 = vor.u32 %v7811_v55, %v6991_v54  ;;  %v7378_v7 = vor.u32 %v7907_v49, %v7375_v44 }
 0x135   :  { %16051 = vst [vmem:[#allocation129_spill] sm:$0xff] %v9913_v52  ;;  %v869_v50 = vmul.f32 %v9868_v38, %v868_v17  ;;  %v9964_v56 = vpop.f32.mrf.mxu0  ;;  %v781_v17 = vsub.f32 %v8958_v12, %v9684_v32  ;;  %v7122_v52 = vor.u32 %v7843_v15, %v7119_v46  ;;  %v683_v54 = vadd.f32 %v682_v6, %v613_v18  ;;  %v6697_v6 = vld [vmem:[%s15518_s3 + $0xc0] sm:$0xf] }
 0x136   :  { %16052 = vst [vmem:[#allocation130_spill] sm:$0xff] %v9915_v62  ;;  %v9979_v62 = vpop.f32.mrf.mxu1  ;;  %v876_v40 = vmul.f32 %v9925_v13, %v875_v1  ;;  %3557 = vmatpush.bf16.msrb.mxu2 %v7250_v35  ;;  %3459 = vmatpush.bf16.msrb.mxu0 %v6994_v20  ;;  %vm881_vm8 = vweird.f32 %v9925_v13 }
 0x137   :  { %16053 = vst [vmem:[#allocation131_spill] sm:$0xff] %v9947_v45  ;;  %v873_v58 = vsel %vm872_vm7, %v9868_v38, %v869_v50  ;;  %v6689_v38 = vld [vmem:[%s15518_s3 + $0xb8] sm:$0xf]  ;;  %3606 = vmatpush.bf16.msrb.mxu3 %v7378_v7  ;;  %3508 = vmatpush.bf16.msrb.mxu1 %v7122_v52  ;;  %v526_v52 = vadd.f32 %v9848_v9, %v9829_v0  ;;  %vm882_vm10 = vmor %vm880_vm9, %vm881_vm8 }
 0x138   :  { %16054 = vst [vmem:[#allocation132_spill] sm:$0xff] %v9962_v57  ;;  %v617_v57 = vmul.f32 %v9931_v31, %v9931_v31  ;;  %v9985_v45 = vmul.f32 %v873_v58, %v778_v39  ;;  %v9987_v12 = vmul.f32 %v873_v58, %v779_v53  ;;  %v9989_v32 = vmul.f32 %v873_v58, %v780_v63  ;;  %v7734_v39 = vld [vmem:[%s15518_s3 + $0xbc] sm:$0xf] }
 0x139   :  { %16055 = vst [vmem:[#allocation133_spill] sm:$0xff] %v9964_v56  ;;  %v687_v56 = vadd.f32 %v686_v24, %v616_v2  ;;  %v9991_v41 = vmul.f32 %v873_v58, %v781_v17  ;;  %v877_v55 = vmul.f32 0.5, %v876_v40  ;;  %524 = vadd.xlane.f32.xlu1 %v523_v26  ;;  %v7737_v2 = vld [vmem:[%s15518_s3 + $0xd0] sm:$0xf0]  ;;  %v6691_v58 = vld [vmem:[%s15518_s3 + $0xd4] sm:$0xf0]  ;;  %v10007_v40 = vadd.f32 %v9262_v61, %v9061_v30 }
 0x13a   :  { %16056 = vst [vmem:[#allocation134_spill] sm:$0xff] %v9979_v62  ;;  %v10011_v26 = vadd.f32 %v9272_v48, %v9061_v30  ;;  %v7738_v53 = vld [vmem:[%s15518_s3 + $0xd8] sm:$0xf0]  ;;  %v10024_v61 = vadd.f32 %v9316_v33, %v9061_v30  ;;  %v16061_v48 = vld [vmem:[#allocation10_spill] sm:$0xff]  ;;  %v10036_v44 = vor.u32 %v7737_v2, %v6689_v38  ;;  %v10038_v15 = vor.u32 %v7734_v39, %v6691_v58  ;;  %v16067_v33 = vld [vmem:[#allocation11_spill] sm:$0xff] }
 0x13b   :  { %16057 = vst [vmem:[#allocation135_spill] sm:$0xff] %v9985_v45  ;;  %v878_v18 = vsub.f32 1.5, %v877_v55  ;;  %v782_v63 = vsub.f32 %v16061_v48, %v9752_v51  ;;  %v10028_v24 = vpop.f32.mrf.mxu2  ;;  %v688_v49 = vadd.f32 %v687_v56, %v617_v57  ;;  %v783_v46 = vsub.f32 %v16067_v33, %v9752_v51  ;;  %v16068_v17 = vld [vmem:[#allocation12_spill] sm:$0xff]  ;;  %v16069_v57 = vld [vmem:[#allocation13_spill] sm:$0xff] }
 0x13c   :  { %16058 = vst [vmem:[#allocation136_spill] sm:$0xff] %v9987_v12  ;;  %v10032_v1 = vpop.f32.mrf.mxu3  ;;  %684 = vadd.xlane.f32.xlu2 %v683_v54  ;;  %v784_v20 = vsub.f32 %v16068_v17, %v9752_v51  ;;  %v785_v56 = vsub.f32 %v16069_v57, %v9752_v51  ;;  %v10050_v7 = vor.u32 %v7738_v53, %v6697_v6  ;;  %v6717_v33 = vld [vmem:[%s15518_s3 + $0xf0] sm:$0xf]  ;;  %v6725_v17 = vld [vmem:[%s15518_s3 + $0xf8] sm:$0xf] }
 0x13d   :  { %16059 = vst [vmem:[#allocation137_spill] sm:$0xff] %v9989_v32  ;;  %v879_v50 = vmul.f32 %v9925_v13, %v878_v18  ;;  %v10034_v35 = vpop.f32.mrf.mxu0  ;;  %v527_v38 = vadd.f32 %v526_v52, %v9905_v25  ;;  %v531_v54 = vadd.f32 %v10011_v26, %v10007_v40  ;;  %v16076_v18 = vld [vmem:[#allocation21_spill] sm:$0xff]  ;;  %v10073_v53 = vadd.f32 %v9324_v42, %v9061_v30  ;;  %v7744_v42 = vld [vmem:[%s15518_s3 + $0x108] sm:$0xf0]  ;;  %v7741_v30 = vld [vmem:[%s15518_s3 + $0xf4] sm:$0xf] }
 0x13e   :  { %16060 = vst [vmem:[#allocation138_spill] sm:$0xff] %v9991_v41  ;;  %v10048_v21 = vpop.f32.mrf.mxu1  ;;  %v7748_v41 = vld [vmem:[%s15518_s3 + $0x12c] sm:$0xf]  ;;  %v6747_v32 = vld [vmem:[%s15518_s3 + $0x144] sm:$0xf0] }
 0x13f   :  { %16062 = vst [vmem:[#allocation10_spill] sm:$0xff] %v10028_v24  ;;  %v883_v55 = vsel %vm882_vm10, %v9925_v13, %v879_v50  ;;  %689 = vadd.xlane.f32.xlu0 %v688_v49  ;;  %v532_v13 = vadd.f32 %v531_v54, %v10024_v61  ;;  %v528_v6 = vadd.f32 %v527_v38, %v9931_v31  ;;  %v6753_v12 = vld [vmem:[%s15518_s3 + $0x130] sm:$0xf]  ;;  %v7087_v24 = vld [vmem:[%s15514_s1 + $0x230] sm:$0xf0] }
 0x140   :  { %16063 = vst [vmem:[#allocation139_spill] sm:$0xff] %v10032_v1  ;;  %v10056_v2 = vmul.f32 %v883_v55, %v782_v63  ;;  %v10058_v39 = vmul.f32 %v883_v55, %v783_v46  ;;  %v10060_v58 = vmul.f32 %v883_v55, %v784_v20  ;;  %v10062_v51 = vmul.f32 %v883_v55, %v785_v56  ;;  %v6719_v46 = vld [vmem:[%s15518_s3 + $0x10c] sm:$0xf0]  ;;  %v7745_v20 = vld [vmem:[%s15518_s3 + $0x110] sm:$0xf0] }
 0x141   :  { %16064 = vst [vmem:[#allocation140_spill] sm:$0xff] %v10034_v35  ;;  %3282 = vmatmul.bf16.gmra.mxu0 %v10036_v44  ;;  %3331 = vmatmul.bf16.gmra.mxu1 %v10038_v15  ;;  %v533_v50 = vadd.f32 %v532_v13, %v10073_v53  ;;  %v10108_v38 = vor.u32 %v7744_v42, %v6717_v33  ;;  %v16090_v33 = vld [vmem:[#allocation30_spill] sm:$0xff]  ;;  %v7343_v1 = vld [vmem:[%s15514_s1 + $0x430] sm:$0xf0] }
 0x142   :  { %16065 = vst [vmem:[#allocation141_spill] sm:$0xff] %v10036_v44  ;;  %7614 = vmatmul.msk.bf16.gmra.mxu2 %vm3038_vm1, %v10050_v7  ;;  %3429 = vmatmul.bf16.gmra.mxu3 %v16076_v18  ;;  %v10110_v54 = vor.u32 %v7741_v30, %v6719_v46  ;;  %v10128_v30 = vpop.permute.xlu2 %1301  ;;  %v620_v35 = vmul.f32 %v10024_v61, %v10024_v61 }
 0x143   :  { %16066 = vst [vmem:[#allocation142_spill] sm:$0xff] %v10038_v15  ;;  %v10075_v52 = vpop.f32.mrf.mxu2 }
 0x144   :  { %16070 = vst [vmem:[#allocation11_spill] sm:$0xff] %v10048_v21  ;;  %v10077_v48 = vpop.f32.mrf.mxu3  ;;  %529 = vadd.xlane.f32.xlu2 %v528_v6  ;;  %v10114_v6 = vor.u32 %v7745_v20, %v6725_v17  ;;  %v7899_v21 = vld [vmem:[%s15514_s1 + $0x424] sm:$0xf] }
 0x145   :  { %16071 = vst [vmem:[#allocation12_spill] sm:$0xff] %v10050_v7  ;;  %v10079_v63 = vpop.f32.mrf.mxu0 }
 0x146   :  { %16072 = vst [vmem:[#allocation13_spill] sm:$0xff] %v10056_v2  ;;  %v10081_v49 = vpop.f32.mrf.mxu1  ;;  %v7751_v2 = vld [vmem:[%s15518_s3 + $0x140] sm:$0xf0] }
 0x147   :  { %16073 = vst [vmem:[#allocation143_spill] sm:$0xff] %v10058_v39  ;;  %534 = vadd.xlane.f32.xlu0 %v533_v50  ;;  %v10116_v50 = vpop.permute.xlu1 %1291  ;;  %v6745_v39 = vld [vmem:[%s15518_s3 + $0x128] sm:$0xf] }
 0x148   :  { %16074 = vst [vmem:[#allocation144_spill] sm:$0xff] %v10060_v58  ;;  %v1663_v58 = vld [vmem:[%s15519_s5 + $0x8] sm:$0xff] }
 0x149   :  { %16075 = vst [vmem:[#allocation145_spill] sm:$0xff] %v10062_v51  ;;  %v1251_v51 = vld [vmem:[%s15517_s7 + $0x68] sm:$0xff] }
 0x14a   :  { %16077 = vst [vmem:[#allocation146_spill] sm:$0xff] %v10073_v53 }
 0x14b   :  { %16078 = vst [vmem:[#allocation147_spill] sm:$0xff] %v10075_v52  ;;  %v10102_v57 = vpop.f32.mrf.mxu2 }
 0x14c   :  { %16079 = vst [vmem:[#allocation148_spill] sm:$0xff] %v10077_v48  ;;  %v10104_v56 = vpop.f32.mrf.mxu3 }
 0x14d   :  { %16080 = vst [vmem:[#allocation149_spill] sm:$0xff] %v10079_v63  ;;  %v10106_v55 = vpop.f32.mrf.mxu0 }
 0x14e   :  { %16081 = vst [vmem:[#allocation150_spill] sm:$0xff] %v10081_v49  ;;  %v10112_v13 = vpop.f32.mrf.mxu1  ;;  %v7803_v49 = vld [vmem:[%s15514_s1 + $0x124] sm:$0xf] }
 0x14f   :  { %16082 = vst [vmem:[#allocation151_spill] sm:$0xff] %v10102_v57 }
 0x150   :  { %16083 = vst [vmem:[#allocation152_spill] sm:$0xff] %v10104_v56 }
 0x151   :  { %16084 = vst [vmem:[#allocation153_spill] sm:$0xff] %v10106_v55  ;;  %3287 = vmatmul.bf16.gmra.mxu0 %v10108_v38  ;;  %3336 = vmatmul.bf16.gmra.mxu1 %v10110_v54  ;;  %v7871_v55 = vld [vmem:[%s15514_s1 + $0x344] sm:$0xf] }
 0x152   :  { %16085 = vst [vmem:[#allocation154_spill] sm:$0xff] %v10108_v38  ;;  %7615 = vmatmul.msk.bf16.gmra.mxu2 %vm3038_vm1, %v10114_v6  ;;  %1321 = vperm.xlu1 %7969, %v1251_v51   ;;  %v1253_v51 = vld [vmem:[%s15517_s7 + $0x78] sm:$0xff] }
 0x153   :  { %16086 = vst [vmem:[#allocation155_spill] sm:$0xff] %v10110_v54  ;;  %3434 = vmatmul.bf16.gmra.mxu3 %v16090_v33  ;;  %v10126_v42 = vpop.f32.mrf.mxu2 }
 0x154   :  { %16087 = vst [vmem:[#allocation156_spill] sm:$0xff] %v10112_v13  ;;  %v10130_v46 = vpop.f32.mrf.mxu3 }
 0x155   :  { %16088 = vst [vmem:[#allocation157_spill] sm:$0xff] %v10114_v6  ;;  %v10132_v17 = vpop.f32.mrf.mxu0 }
 0x156   :  { %16089 = vst [vmem:[#allocation158_spill] sm:$0xff] %v10116_v50  ;;  %v10134_v20 = vpop.f32.mrf.mxu1 }
 0x157   :  { %16091 = vst [vmem:[#allocation159_spill] sm:$0xff] %v10126_v42  ;;  %v10170_v42 = vor.u32 %v7748_v41, %v6747_v32  ;;  %v6975_v41 = vld [vmem:[%s15514_s1 + $0x150] sm:$0xf0] }
 0x158   :  { %16092 = vst [vmem:[#allocation160_spill] sm:$0xff] %v10128_v30  ;;  %v665_v50 = vpop.xlane.xlu1 %664  ;;  %v10145_v30 = vpop.permute.xlu0 %1296  ;;  %v7359_v32 = vld [vmem:[%s15514_s1 + $0x450] sm:$0xf0] }
 0x159   :  { %16093 = vst [vmem:[#allocation161_spill] sm:$0xff] %v10130_v46  ;;  %v729_v57 = vmul.f32 0.001953125, %v665_v50 }
 0x15a   :  { %16094 = vst [vmem:[#allocation162_spill] sm:$0xff] %v10132_v17  ;;  %v10168_v17 = vor.u32 %v7751_v2, %v6745_v39 }
 0x15b   :  { %16095 = vst [vmem:[#allocation163_spill] sm:$0xff] %v10134_v20  ;;  %1685 = vperm.xlu0 %7968, %v1663_v58   ;;  %v10162_v45 = vpop.f32.mrf.mxu2  ;;  %v7231_v58 = vld [vmem:[%s15514_s1 + $0x350] sm:$0xf0] }
 0x15c   :  { %16096 = vst [vmem:[#allocation164_spill] sm:$0xff] %v10145_v30  ;;  %v7752_v30 = vld [vmem:[%s15518_s3 + $0x148] sm:$0xf0]  ;;  %v10164_v20 = vpop.f32.mrf.mxu3  ;;  %1331 = vperm.xlu2 %7970, %v1253_v51   ;;  %v7807_v51 = vld [vmem:[%s15514_s1 + $0x144] sm:$0xf]  ;;  %v7234_v39 = vor.u32 %v7871_v55, %v7231_v58 }
 0x15d   :  { %16097 = vst [vmem:[#allocation165_spill] sm:$0xff] %v10162_v45  ;;  %v10166_v46 = vpop.f32.mrf.mxu0  ;;  %v10174_v56 = vor.u32 %v7752_v30, %v6753_v12  ;;  %v7903_v12 = vld [vmem:[%s15514_s1 + $0x444] sm:$0xf]  ;;  %v7103_v58 = vld [vmem:[%s15514_s1 + $0x250] sm:$0xf0] }
 0x15e   :  { %16098 = vst [vmem:[#allocation166_spill] sm:$0xff] %v10164_v20  ;;  %v10172_v13 = vpop.f32.mrf.mxu1  ;;  %v505_v2 = vpop.xlane.xlu2 %504  ;;  %v6978_v20 = vor.u32 %v7807_v51, %v6975_v41  ;;  %v7839_v55 = vld [vmem:[%s15514_s1 + $0x244] sm:$0xf]  ;;  %3558 = vmatpush.bf16.msrb.mxu2 %v7234_v39 }
 0x15f   :  { %16099 = vst [vmem:[#allocation167_spill] sm:$0xff] %v10166_v46  ;;  %v10194_v30 = vmul.f32 0.001953125, %v505_v2  ;;  %v7106_v46 = vor.u32 %v7839_v55, %v7103_v58 }
 0x160   :  { %16100 = vst [vmem:[#allocation168_spill] sm:$0xff] %v10168_v17  ;;  %v510_v45 = vpop.xlane.xlu1 %509  ;;  %3460 = vmatpush.bf16.msrb.mxu0 %v6978_v20  ;;  %v16109_v20 = vld [vmem:[#allocation19_spill] sm:$0xff] }
 0x161   :  { %16101 = vst [vmem:[#allocation169_spill] sm:$0xff] %v10170_v42  ;;  %3292 = vmatmul.bf16.gmra.mxu0 %v10168_v17  ;;  %3341 = vmatmul.bf16.gmra.mxu1 %v10170_v42  ;;  %v745_v2 = vmul.f32 %v10194_v30, %v10194_v30  ;;  %v10209_v41 = vmul.f32 0.001953125, %v510_v45  ;;  %v619_v45 = vmul.f32 %v10011_v26, %v10011_v26 }
 0x162   :  { %16102 = vst [vmem:[#allocation170_spill] sm:$0xff] %v10172_v13  ;;  %v7362_v13 = vor.u32 %v7903_v12, %v7359_v32  ;;  %7616 = vmatmul.msk.bf16.gmra.mxu2 %vm3038_vm1, %v10174_v56  ;;  %v10213_v32 = vpop.permute.xlu0 %1311  ;;  %3509 = vmatpush.bf16.msrb.mxu1 %v7106_v46  ;;  %v10229_v39 = vadd.f32 %v9326_v34, %v16109_v20  ;;  %v6775_v34 = vld [vmem:[%s15518_s3 + $0x17c] sm:$0xf0] }
 0x163   :  { %16103 = vst [vmem:[#allocation171_spill] sm:$0xff] %v10174_v56  ;;  %3439 = vmatmul.bf16.gmra.mxu3 %v9318_v47  ;;  %v761_v51 = vsub.f32 %v729_v57, %v745_v2  ;;  %v10211_v12 = vpop.f32.mrf.mxu2  ;;  %v618_v57 = vmul.f32 %v10007_v40, %v10007_v40  ;;  %v746_v2 = vmul.f32 %v10209_v41, %v10209_v41 }
 0x164   :  { %3607 = vmatpush.bf16.msrb.mxu3 %v7362_v13  ;;  %16104 = vst [vmem:[#allocation172_spill] sm:$0xff] %v10211_v12  ;;  %v10215_v55 = vpop.f32.mrf.mxu3  ;;  %v7215_v12 = vld [vmem:[%s15514_s1 + $0x330] sm:$0xf0]  ;;  %v622_v29 = vmul.f32 %v10229_v39, %v10229_v39 }
 0x165   :  { %16105 = vst [vmem:[#allocation173_spill] sm:$0xff] %v10213_v32  ;;  %v10217_v50 = vpop.f32.mrf.mxu0  ;;  %v10219_v58 = vadd.f32 1e-05, %v761_v51  ;;  %v6773_v51 = vld [vmem:[%s15518_s3 + $0x160] sm:$0xf]  ;;  %v691_v62 = vadd.f32 %v619_v45, %v618_v57 }
 0x166   :  { %16106 = vst [vmem:[#allocation174_spill] sm:$0xff] %v10215_v55  ;;  %v10221_v48 = vpop.f32.mrf.mxu1  ;;  %v670_v13 = vpop.xlane.xlu2 %669  ;;  %v7758_v32 = vld [vmem:[%s15518_s3 + $0x178] sm:$0xf0]  ;;  %v6781_v55 = vld [vmem:[%s15518_s3 + $0x168] sm:$0xf] }
 0x167   :  { %16107 = vst [vmem:[#allocation175_spill] sm:$0xff] %v10217_v50  ;;  %7977 = vrsqrt.f32 %v10219_v58  ;;  %v730_v46 = vmul.f32 0.001953125, %v670_v13  ;;  %v10248_v13 = vadd.f32 %v9336_v14, %v16109_v20  ;;  %v7867_v50 = vld [vmem:[%s15514_s1 + $0x324] sm:$0xf]  ;;  %v6959_v14 = vld [vmem:[%s15514_s1 + $0x130] sm:$0xf0]  ;;  %v10296_v57 = vor.u32 %v7758_v32, %v6773_v51 }
 0x168   :  { %16108 = vst [vmem:[#allocation176_spill] sm:$0xff] %v10221_v48  ;;  %v7755_v48 = vld [vmem:[%s15518_s3 + $0x164] sm:$0xf]  ;;  %v7218_v63 = vor.u32 %v7867_v50, %v7215_v12  ;;  %v6962_v12 = vor.u32 %v7803_v49, %v6959_v14  ;;  %v7346_v50 = vor.u32 %v7899_v21, %v7343_v1  ;;  %v621_v1 = vmul.f32 %v10073_v53, %v10073_v53 }
 0x169   :  { %16110 = vst [vmem:[#allocation19_spill] sm:$0xff] %v10229_v39  ;;  %v762_v52 = vsub.f32 %v730_v46, %v746_v2  ;;  %v7759_v46 = vld [vmem:[%s15518_s3 + $0x180] sm:$0xf0]  ;;  %v623_v21 = vmul.f32 %v10248_v13, %v10248_v13  ;;  %v10298_v45 = vor.u32 %v7755_v48, %v6775_v34  ;;  %v692_v48 = vadd.f32 %v691_v62, %v620_v35 }
 0x16a   :  { %16111 = vst [vmem:[#allocation177_spill] sm:$0xff] %v10248_v13  ;;  %v7835_v2 = vld [vmem:[%s15514_s1 + $0x224] sm:$0xf]  ;;  %3559 = vmatpush.bf16.msrb.mxu2 %v7218_v63  ;;  %3461 = vmatpush.bf16.msrb.mxu0 %v6962_v12  ;;  %v10311_v32 = vor.u32 %v7759_v46, %v6781_v55  ;;  %v6943_v12 = vld [vmem:[%s15514_s1 + $0x110] sm:$0xf0]  ;;  %v536_v42 = vadd.f32 %v10248_v13, %v10229_v39  ;;  %vm890_vm12 = vweird.f32 %v10219_v58 }
 0x16b   :  { %v10284_v22 = vadd.f32 1e-05, %v762_v52  ;;  %v10286_v5 = vpop.f32.mrf.mxu2  ;;  %v7090_v47 = vor.u32 %v7835_v2, %v7087_v24  ;;  %16115 = vst [vmem:[#allocation181_spill] sm:$0xff] %v10296_v57  ;;  %3608 = vmatpush.bf16.msrb.mxu3 %v7346_v50  ;;  %v7863_v24 = vld [vmem:[%s15514_s1 + $0x304] sm:$0xf]  ;;  %v675_v46 = vpop.xlane.xlu0 %674 }
 0x16c   :  { %16112 = vst [vmem:[#allocation178_spill] sm:$0xff] %v10286_v5  ;;  %v10292_v49 = vpop.f32.mrf.mxu3  ;;  %v7199_v52 = vld [vmem:[%s15514_s1 + $0x310] sm:$0xf0]  ;;  %v7799_v34 = vld [vmem:[%s15514_s1 + $0x104] sm:$0xf]  ;;  %v731_v6 = vmul.f32 0.001953125, %v675_v46 }
 0x16d   :  { %16113 = vst [vmem:[#allocation179_spill] sm:$0xff] %v10292_v49  ;;  %v10294_v14 = vpop.f32.mrf.mxu0  ;;  %v10306_v63 = vpop.eup %7977  ;;  %7979 = vrsqrt.f32 %v10284_v22  ;;  %3510 = vmatpush.bf16.msrb.mxu1 %v7090_v47  ;;  %v7202_v51 = vor.u32 %v7863_v24, %v7199_v52  ;;  %v7895_v50 = vld [vmem:[%s15514_s1 + $0x404] sm:$0xf]  ;;  %v6946_v52 = vor.u32 %v7799_v34, %v6943_v12  ;;  %v7327_v49 = vld [vmem:[%s15514_s1 + $0x410] sm:$0xf0]  ;;  %vm900_vm15 = vweird.f32 %v10284_v22 }
 0x16e   :  { %16114 = vst [vmem:[#allocation180_spill] sm:$0xff] %v10294_v14  ;;  %v10309_v2 = vpop.f32.mrf.mxu1  ;;  %v16120_v55 = vld [vmem:[#allocation18_spill] sm:$0xff]  ;;  %v885_v35 = vmul.f32 %v10306_v63, %v10219_v58  ;;  %v515_v24 = vpop.xlane.xlu2 %514  ;;  %v7330_v34 = vor.u32 %v7895_v50, %v7327_v49  ;;  %v10358_v49 = vadd.f32 %v623_v21, %v622_v29  ;;  %v6933_v29 = vld [vmem:[%s15514_s1 + $0xe8] sm:$0xf]  ;;  %vm891_vm11 = vweird.f32 %v10306_v63  ;;  %v6801_v58 = vld [vmem:[%s15518_s3 + $0x198] sm:$0xf] }
 0x16f   :  { %16116 = vst [vmem:[#allocation182_spill] sm:$0xff] %v10298_v45  ;;  %v16121_v47 = vld [vmem:[#allocation54_spill] sm:$0xff]  ;;  %v10345_v56 = vmul.f32 0.001953125, %v515_v24  ;;  %3560 = vmatpush.bf16.msrb.mxu2 %v7202_v51  ;;  %v10356_v24 = vadd.f32 %v692_v48, %v621_v1  ;;  %v16125_v51 = vld [vmem:[#allocation53_spill] sm:$0xff]  ;;  %3462 = vmatpush.bf16.msrb.mxu0 %v6946_v52  ;;  %vm892_vm13 = vmor %vm890_vm12, %vm891_vm11 }
 0x170   :  { %16117 = vst [vmem:[#allocation183_spill] sm:$0xff] %v10309_v2  ;;  %v10324_v2 = vadd.f32 %v9372_v10, %v16109_v20  ;;  %v10328_v62 = vadd.f32 %v16121_v47, %v16120_v55  ;;  %v7831_v14 = vld [vmem:[%s15514_s1 + $0x204] sm:$0xf]  ;;  %v7071_v10 = vld [vmem:[%s15514_s1 + $0x210] sm:$0xf0]  ;;  %v16123_v47 = vld [vmem:[#allocation55_spill] sm:$0xff]  ;;  %v886_v33 = vmul.f32 %v10306_v63, %v885_v35  ;;  %v10364_v50 = vadd.f32 %v16125_v51, %v16109_v20 }
 0x171   :  { %16118 = vst [vmem:[#allocation184_spill] sm:$0xff] %v10311_v32  ;;  %v10343_v5 = vadd.f32 %v16123_v47, %v16120_v55  ;;  %v7074_v12 = vor.u32 %v7831_v14, %v7071_v10  ;;  %3297 = vmatmul.bf16.gmra.mxu0 %v10296_v57  ;;  %3346 = vmatmul.bf16.gmra.mxu1 %v10298_v45  ;;  %v7798_v1 = vld [vmem:[%s15514_s1 + $0xf4] sm:$0xf0]  ;;  %v7955_v52 = vld [vmem:[%s15514_s1 + $0x5e4] sm:$0xf] }
 0x172   :  { %16119 = vst [vmem:[#allocation185_spill] sm:$0xff] %v10324_v2  ;;  %v747_v54 = vmul.f32 %v10345_v56, %v10345_v56  ;;  %7617 = vmatmul.msk.bf16.gmra.mxu2 %vm3038_vm1, %v10311_v32  ;;  %v624_v14 = vmul.f32 %v10324_v2, %v10324_v2  ;;  %v10368_v35 = vmul.f32 %v10328_v62, %v10328_v62  ;;  %v887_v46 = vmul.f32 0.5, %v886_v33  ;;  %v7567_v47 = vld [vmem:[%s15514_s1 + $0x5f0] sm:$0xf0]  ;;  %v7061_v51 = vld [vmem:[%s15514_s1 + $0x1e8] sm:$0xf] }
 0x173   :  { %16122 = vst [vmem:[#allocation18_spill] sm:$0xff] %v10328_v62  ;;  %3444 = vmatmul.bf16.gmra.mxu3 %v9446_v3  ;;  %v10377_v21 = vpop.eup %7979  ;;  %v627_v20 = vmul.f32 %v10343_v5, %v10343_v5  ;;  %v10381_v10 = vpop.f32.mrf.mxu2  ;;  %3511 = vmatpush.bf16.msrb.mxu1 %v7074_v12  ;;  %v6934_v33 = vor.u32 %v7798_v1, %v6933_v29  ;;  %v7830_v12 = vld [vmem:[%s15514_s1 + $0x1f4] sm:$0xf0]  ;;  %v7963_v29 = vld [vmem:[%s15514_s1 + $0x624] sm:$0xf] }
 0x174   :  { %16124 = vst [vmem:[#allocation54_spill] sm:$0xff] %v10343_v5  ;;  %v763_v48 = vsub.f32 %v731_v6, %v747_v54  ;;  %3609 = vmatpush.bf16.msrb.mxu3 %v7330_v34  ;;  %v888_v13 = vsub.f32 1.5, %v887_v46  ;;  %v895_v54 = vmul.f32 %v10377_v21, %v10284_v22  ;;  %v10395_v6 = vpop.f32.mrf.mxu3  ;;  %v7570_v34 = vor.u32 %v7955_v52, %v7567_v47  ;;  %v16130_v46 = vld [vmem:[#allocation37_spill] sm:$0xff] }
 0x175   :  { %16126 = vst [vmem:[#allocation55_spill] sm:$0xff] %v10364_v50  ;;  %v10405_v1 = vadd.f32 %v9443_v4, %v16120_v55  ;;  %v10411_v3 = vpop.f32.mrf.mxu0  ;;  %3749 = vmatpush.bf16.msra.mxu2 %v6934_v33  ;;  %v7062_v47 = vor.u32 %v7830_v12, %v7061_v51  ;;  %v16135_v33 = vld [vmem:[#allocation46_spill] sm:$0xff]  ;;  %vm901_vm14 = vweird.f32 %v10377_v21 }
 0x176   :  { %16127 = vst [vmem:[#allocation53_spill] sm:$0xff] %v10381_v10  ;;  %v786_v10 = vsub.f32 %v16130_v46, %v10194_v30  ;;  %v10409_v39 = vadd.f32 1e-05, %v763_v48  ;;  %v10413_v52 = vpop.f32.mrf.mxu1  ;;  %v889_v32 = vmul.f32 %v10306_v63, %v888_v13  ;;  %v896_v4 = vmul.f32 %v10377_v21, %v895_v54  ;;  %3651 = vmatpush.bf16.msra.mxu0 %v7570_v34  ;;  %v16133_v48 = vld [vmem:[#allocation38_spill] sm:$0xff]  ;;  %vm902_vm0 = vmor %vm900_vm15, %vm901_vm14 }
 0x177   :  { %16128 = vst [vmem:[#allocation186_spill] sm:$0xff] %v10395_v6  ;;  %v7599_v6 = vld [vmem:[%s15514_s1 + $0x630] sm:$0xf0]  ;;  %v787_v45 = vsub.f32 %v16133_v48, %v10194_v30  ;;  %v789_v51 = vsub.f32 %v16135_v33, %v10194_v30  ;;  %v625_v34 = vmul.f32 %v10364_v50, %v10364_v50 }
 0x178   :  { %16129 = vst [vmem:[#allocation187_spill] sm:$0xff] %v10405_v1  ;;  %v7602_v46 = vor.u32 %v7963_v29, %v7599_v6  ;;  %7981 = vrsqrt.f32 %v10409_v39  ;;  %3798 = vmatpush.bf16.msra.mxu3 %v7062_v47  ;;  %v893_v13 = vsel %vm892_vm13, %v10306_v63, %v889_v32  ;;  %v897_v54 = vmul.f32 0.5, %v896_v4  ;;  %v6803_v47 = vld [vmem:[%s15518_s3 + $0x1b4] sm:$0xf0]  ;;  %v7766_v4 = vld [vmem:[%s15518_s3 + $0x1b8] sm:$0xf0] }
 0x179   :  { %16131 = vst [vmem:[#allocation37_spill] sm:$0xff] %v10411_v3  ;;  %v16134_v3 = vld [vmem:[#allocation39_spill] sm:$0xff]  ;;  %v537_v6 = vadd.f32 %v536_v42, %v10324_v2  ;;  %v10443_v12 = vmul.f32 %v893_v13, %v786_v10  ;;  %v10445_v29 = vmul.f32 %v893_v13, %v787_v45  ;;  %v10449_v32 = vmul.f32 %v893_v13, %v789_v51  ;;  %v6809_v42 = vld [vmem:[%s15518_s3 + $0x1a0] sm:$0xf]  ;;  %v16141_v48 = vld [vmem:[#allocation20_spill] sm:$0xff] }
 0x17a   :  { %16132 = vst [vmem:[#allocation188_spill] sm:$0xff] %v10413_v52  ;;  %v788_v52 = vsub.f32 %v16134_v3, %v10194_v30  ;;  %v7765_v3 = vld [vmem:[%s15518_s3 + $0x1b0] sm:$0xf0]  ;;  %v7762_v30 = vld [vmem:[%s15518_s3 + $0x19c] sm:$0xf]  ;;  %3706 = vmatpush.bf16.msra.mxu1 %v7602_v46  ;;  %v898_v10 = vsub.f32 1.5, %v897_v54  ;;  %v628_v45 = vmul.f32 %v10405_v1, %v10405_v1  ;;  %v10466_v46 = vadd.f32 %v9454_v43, %v16120_v55 }
 0x17b   :  { %16136 = vst [vmem:[#allocation38_spill] sm:$0xff] %v10443_v12  ;;  %v10470_v33 = vadd.f32 %v9456_v37, %v16141_v48  ;;  %v10472_v51 = vpop.f32.mrf.mxu2  ;;  %v701_v54 = vadd.f32 %v627_v20, %v10368_v35  ;;  %v10482_v43 = vor.u32 %v7762_v30, %v6803_v47  ;;  %v10484_v55 = vor.u32 %v7766_v4, %v6809_v42  ;;  %v16198_v2 = vld [vmem:[#allocation15_spill] sm:$0xff] }
 0x17c   :  { %16137 = vst [vmem:[#allocation39_spill] sm:$0xff] %v10445_v29  ;;  %v10447_v63 = vmul.f32 %v893_v13, %v788_v52  ;;  %v697_v52 = vadd.f32 %v10358_v49, %v624_v14  ;;  %694 = vadd.xlane.f32.xlu1 %v10356_v24  ;;  %v10475_v13 = vor.u32 %v7765_v3, %v6801_v58  ;;  %v10480_v49 = vpop.f32.mrf.mxu3  ;;  %v16148_v14 = vld [vmem:[#allocation48_spill] sm:$0xff]  ;;  %v16149_v24 = vld [vmem:[#allocation49_spill] sm:$0xff]  ;;  %v16150_v3 = vld [vmem:[#allocation51_spill] sm:$0xff]  ;;  %vm910_vm3 = vweird.f32 %v10409_v39 }
 0x17d   :  { %16139 = vst [vmem:[#allocation189_spill] sm:$0xff] %v10449_v32  ;;  %v899_v32 = vmul.f32 %v10377_v21, %v898_v10  ;;  %v791_v58 = vsub.f32 %v16149_v24, %v10209_v41  ;;  %v792_v35 = vsub.f32 %v16150_v3, %v10209_v41  ;;  %v793_v20 = vsub.f32 %v9401_v59, %v10209_v41  ;;  %v10496_v22 = vpop.f32.mrf.mxu0  ;;  %v16167_v29 = vld [vmem:[#allocation59_spill] sm:$0xff] }
 0x17e   :  { %16138 = vst [vmem:[#allocation46_spill] sm:$0xff] %v10447_v63  ;;  %v7982_v37 = vpop.eup %7981  ;;  %v790_v63 = vsub.f32 %v16148_v14, %v10209_v41  ;;  %v10498_v30 = vpop.f32.mrf.mxu1  ;;  %v10502_v47 = vadd.f32 %v9462_v8, %v16141_v48  ;;  %v702_v10 = vadd.f32 %v701_v54, %v628_v45  ;;  %v538_v8 = vadd.f32 %v537_v6, %v10364_v50  ;;  %v6917_v45 = vld [vmem:[%s15514_s1 + $0xc8] sm:$0xf]  ;;  %v7794_v54 = vld [vmem:[%s15514_s1 + $0xd4] sm:$0xf0] }
 0x17f   :  { %16140 = vst [vmem:[#allocation190_spill] sm:$0xff] %v10466_v46  ;;  %v903_v42 = vsel %vm902_vm0, %v10377_v21, %v899_v32  ;;  %v905_v4 = vmul.f32 %v7982_v37, %v10409_v39  ;;  %v629_v21 = vmul.f32 %v10466_v46, %v10466_v46  ;;  %vm911_vm2 = vweird.f32 %v7982_v37 }
 0x180   :  { %16142 = vst [vmem:[#allocation20_spill] sm:$0xff] %v10470_v33  ;;  %v10506_v14 = vmul.f32 %v903_v42, %v790_v63  ;;  %v10508_v24 = vmul.f32 %v903_v42, %v791_v58  ;;  %v10510_v59 = vmul.f32 %v903_v42, %v792_v35  ;;  %v10512_v41 = vmul.f32 %v903_v42, %v793_v20  ;;  %v7951_v20 = vld [vmem:[%s15514_s1 + $0x5c4] sm:$0xf]  ;;  %v7551_v42 = vld [vmem:[%s15514_s1 + $0x5d0] sm:$0xf0]  ;;  %vm912_vm4 = vmor %vm910_vm3, %vm911_vm2 }
 0x181   :  { %16143 = vst [vmem:[#allocation191_spill] sm:$0xff] %v10472_v51  ;;  %v906_v3 = vmul.f32 %v7982_v37, %v905_v4  ;;  %3302 = vmatmul.bf16.gmra.mxu0 %v10475_v13  ;;  %3351 = vmatmul.bf16.gmra.mxu1 %v10482_v43  ;;  %v10523_v63 = vadd.f32 %v9500_v36, %v16141_v48  ;;  %v7045_v4 = vld [vmem:[%s15514_s1 + $0x1c8] sm:$0xf] }
 0x182   :  { %16144 = vst [vmem:[#allocation192_spill] sm:$0xff] %v10475_v13  ;;  %7618 = vmatmul.msk.bf16.gmra.mxu2 %vm3038_vm1, %v10484_v55  ;;  %v546_v6 = vadd.f32 %v10502_v47, %v10470_v33  ;;  %v703_v35 = vadd.f32 %v702_v10, %v629_v21  ;;  %v698_v36 = vadd.f32 %v697_v52, %v625_v34  ;;  %v7826_v34 = vld [vmem:[%s15514_s1 + $0x1d4] sm:$0xf0] }
 0x183   :  { %16145 = vst [vmem:[#allocation193_spill] sm:$0xff] %v10480_v49  ;;  %v907_v32 = vmul.f32 0.5, %v906_v3  ;;  %3449 = vmatmul.bf16.gmra.mxu3 %v9570_v23  ;;  %v10534_v58 = vpop.f32.mrf.mxu2  ;;  %v541_v21 = vadd.f32 %v10343_v5, %v10328_v62  ;;  %v16204_v62 = vld [vmem:[#allocation72_spill] sm:$0xff] }
 0x184   :  { %16146 = vst [vmem:[#allocation194_spill] sm:$0xff] %v10482_v43  ;;  %539 = vadd.xlane.f32.xlu1 %v538_v8  ;;  %v7554_v8 = vor.u32 %v7951_v20, %v7551_v42  ;;  %v16215_v43 = vld [vmem:[#allocation71_spill] sm:$0xff] }
 0x185   :  { %16147 = vst [vmem:[#allocation195_spill] sm:$0xff] %v10484_v55  ;;  %v908_v3 = vsub.f32 1.5, %v907_v32  ;;  %704 = vadd.xlane.f32.xlu0 %v703_v35  ;;  %v10550_v52 = vpop.f32.mrf.mxu0  ;;  %699 = vadd.xlane.f32.xlu2 %v698_v36  ;;  %v16163_v32 = vld [vmem:[#allocation69_spill] sm:$0xff]  ;;  %v16166_v36 = vld [vmem:[#allocation58_spill] sm:$0xff] }
 0x186   :  { %16151 = vst [vmem:[#allocation48_spill] sm:$0xff] %v10496_v22  ;;  %v10552_v10 = vpop.f32.mrf.mxu1  ;;  %3652 = vmatpush.bf16.msra.mxu0 %v7554_v8  ;;  %v16165_v35 = vld [vmem:[#allocation57_spill] sm:$0xff]  ;;  %v795_v42 = vsub.f32 %v16166_v36, %v10345_v56 }
 0x187   :  { %16152 = vst [vmem:[#allocation49_spill] sm:$0xff] %v10498_v30  ;;  %v794_v20 = vsub.f32 %v16165_v35, %v10345_v56 }
 0x188   :  { %16153 = vst [vmem:[#allocation51_spill] sm:$0xff] %v10502_v47 }
 0x189   :  { %16154 = vst [vmem:[#allocation196_spill] sm:$0xff] %v10506_v14  ;;  %v10558_v14 = vadd.f32 %v16163_v32, %v16141_v48 }
 0x18a   :  { %16155 = vst [vmem:[#allocation197_spill] sm:$0xff] %v10508_v24  ;;  %v7046_v24 = vor.u32 %v7826_v34, %v7045_v4  ;;  %v796_v4 = vsub.f32 %v16167_v29, %v10345_v56  ;;  %v16168_v34 = vld [vmem:[#allocation67_spill] sm:$0xff] }
 0x18b   :  { %16156 = vst [vmem:[#allocation198_spill] sm:$0xff] %v10510_v59  ;;  %v6918_v59 = vor.u32 %v7794_v54, %v6917_v45  ;;  %v909_v45 = vmul.f32 %v7982_v37, %v908_v3  ;;  %v547_v54 = vadd.f32 %v546_v6, %v10523_v63  ;;  %v797_v48 = vsub.f32 %v16168_v34, %v10345_v56  ;;  %v10580_v35 = vpop.f32.mrf.mxu2 }
 0x18c   :  { %16157 = vst [vmem:[#allocation199_spill] sm:$0xff] %v10512_v41  ;;  %v10545_v41 = vpop.f32.mrf.mxu3  ;;  %3799 = vmatpush.bf16.msra.mxu3 %v7046_v24  ;;  %v542_v6 = vadd.f32 %v541_v21, %v10405_v1  ;;  %v16177_v21 = vld [vmem:[#allocation3_spill] sm:$0xff]  ;;  %v631_v1 = vmul.f32 %v10502_v47, %v10502_v47 }
 0x18d   :  { %16158 = vst [vmem:[#allocation200_spill] sm:$0xff] %v10523_v63  ;;  %3750 = vmatpush.bf16.msra.mxu2 %v6918_v59  ;;  %v913_v39 = vsel %vm912_vm4, %v7982_v37, %v909_v45  ;;  %v548_v29 = vadd.f32 %v547_v54, %v10558_v14  ;;  %v10586_v37 = vpop.f32.mrf.mxu0  ;;  %v16178_v45 = vld [vmem:[#allocation4_spill] sm:$0xff] }
 0x18e   :  { %16159 = vst [vmem:[#allocation201_spill] sm:$0xff] %v10534_v58  ;;  %v10572_v59 = vmul.f32 %v913_v39, %v794_v20  ;;  %v10574_v3 = vmul.f32 %v913_v39, %v795_v42  ;;  %v10576_v8 = vmul.f32 %v913_v39, %v796_v4  ;;  %v10578_v32 = vmul.f32 %v913_v39, %v797_v48  ;;  %v10588_v24 = vpop.f32.mrf.mxu1  ;;  %v16179_v20 = vld [vmem:[#allocation5_spill] sm:$0xff]  ;;  %v16180_v42 = vld [vmem:[#allocation96_spill] sm:$0xff]  ;;  %v10602_v39 = vpop.permute.xlu1 %1306 }
 0x18f   :  { %16160 = vst [vmem:[#allocation202_spill] sm:$0xff] %v10545_v41  ;;  %v543_v56 = vadd.f32 %v542_v6, %v10466_v46  ;;  %549 = vadd.xlane.f32.xlu0 %v548_v29  ;;  %v1662_v6 = vld [vmem:[%s15519_s5] sm:$0xff]  ;;  %v520_v29 = vpop.xlane.xlu0 %519  ;;  %v1664_v41 = vld [vmem:[%s15519_s5 + $0x10] sm:$0xff] }
 0x190   :  { %16161 = vst [vmem:[#allocation203_spill] sm:$0xff] %v10550_v52  ;;  %v10618_v12 = vmul.f32 0.001953125, %v520_v29  ;;  %v10627_v52 = vpop.permute.xlu2 %1316  ;;  %v16199_v46 = vld [vmem:[#allocation16_spill] sm:$0xff] }
 0x191   :  { %16162 = vst [vmem:[#allocation204_spill] sm:$0xff] %v10552_v10  ;;  %544 = vadd.xlane.f32.xlu2 %v543_v56  ;;  %3463 = vmatmul.bf16.vlgmr.msrb.gmra.mxu0 %v16177_v21  ;;  %v16188_v10 = vld [vmem:[#allocation108_spill] sm:$0xff] }
 0x192   :  { %16164 = vst [vmem:[#allocation69_spill] sm:$0xff] %v10558_v14  ;;  %3512 = vmatmul.bf16.vlgmr.msrb.gmra.mxu1 %v16178_v45  ;;  %3561 = vmatmul.bf16.vlgmr.msrb.gmra.mxu2 %v16179_v20  ;;  %v748_v30 = vmul.f32 %v10618_v12, %v10618_v12 }
 0x193   :  { %16169 = vst [vmem:[#allocation57_spill] sm:$0xff] %v10572_v59  ;;  %3610 = vmatmul.bf16.vlgmr.msrb.gmra.mxu3 %v16180_v42  ;;  %v10594_v4 = vpop.f32.mrf.mxu2  ;;  %v1666_v59 = vld [vmem:[%s15519_s5 + $0x20] sm:$0xff] }
 0x194   :  { %16170 = vst [vmem:[#allocation58_spill] sm:$0xff] %v10574_v3  ;;  %v10583_v36 = vpop.f32.mrf.mxu3 }
 0x195   :  { %16171 = vst [vmem:[#allocation59_spill] sm:$0xff] %v10576_v8  ;;  %v10598_v34 = vpop.f32.mrf.mxu0 }
 0x196   :  { %16172 = vst [vmem:[#allocation67_spill] sm:$0xff] %v10578_v32  ;;  %v10600_v48 = vpop.f32.mrf.mxu1 }
 0x197   :  { %16173 = vst [vmem:[#allocation205_spill] sm:$0xff] %v10580_v35  ;;  %v16187_v35 = vld [vmem:[#allocation9_spill] sm:$0xff] }
 0x198   :  { %16174 = vst [vmem:[#allocation206_spill] sm:$0xff] %v10583_v36  ;;  %v16186_v36 = vld [vmem:[#allocation8_spill] sm:$0xff] }
 0x199   :  { %16175 = vst [vmem:[#allocation207_spill] sm:$0xff] %v10586_v37 }
 0x19a   :  { %16176 = vst [vmem:[#allocation208_spill] sm:$0xff] %v10588_v24 }
 0x19b   :  { %16181 = vst [vmem:[#allocation209_spill] sm:$0xff] %v10594_v4  ;;  %v10607_v56 = vpop.f32.mrf.mxu2 }
 0x19c   :  { %v10596_v54 = vpop.f32.mrf.mxu3  ;;  %16182 = vst [vmem:[#allocation210_spill] sm:$0xff] %v10602_v39  ;;  %v16185_v39 = vld [vmem:[#allocation7_spill] sm:$0xff] }
 0x19d   :  { %1680 = vperm.xlu1 %7969, %v1662_v6   ;;  %v10611_v8 = vpop.f32.mrf.mxu0  ;;  %16189 = vst [vmem:[#allocation213_spill] sm:$0xff] %v10627_v52 }
 0x19e   :  { %16183 = vst [vmem:[#allocation211_spill] sm:$0xff] %v10611_v8  ;;  %v10613_v3 = vpop.f32.mrf.mxu1 }
 0x19f   :  { %16184 = vst [vmem:[#allocation212_spill] sm:$0xff] %v10613_v3 }
 0x1a1   :  { %3468 = vmatmul.bf16.gmra.mxu0 %v16185_v39 }
 0x1a2   :  { %3517 = vmatmul.bf16.gmra.mxu1 %v16186_v36  ;;  %3566 = vmatmul.bf16.gmra.mxu2 %v16187_v35 }
 0x1a3   :  { %1700 = vperm.xlu0 %7968, %v1666_v59   ;;  %3615 = vmatmul.bf16.gmra.mxu3 %v16188_v10  ;;  %v10629_v58 = vpop.f32.mrf.mxu2 }
 0x1a4   :  { %v10609_v32 = vpop.f32.mrf.mxu3  ;;  %v680_v6 = vpop.xlane.xlu1 %679  ;;  %16190 = vst [vmem:[#allocation214_spill] sm:$0xff] %v10629_v58 }
 0x1a5   :  { %v732_v49 = vmul.f32 0.001953125, %v680_v6  ;;  %v10635_v22 = vpop.f32.mrf.mxu0  ;;  %v6901_v6 = vld [vmem:[%s15514_s1 + $0xa8] sm:$0xf] }
 0x1a6   :  { %16191 = vst [vmem:[#allocation215_spill] sm:$0xff] %v10635_v22  ;;  %v10637_v59 = vpop.f32.mrf.mxu1  ;;  %v10667_v22 = vpop.permute.xlu0 %1326 }
 0x1a7   :  { %16192 = vst [vmem:[#allocation216_spill] sm:$0xff] %v10637_v59  ;;  %v764_v51 = vsub.f32 %v732_v49, %v748_v30  ;;  %v7790_v49 = vld [vmem:[%s15514_s1 + $0xb4] sm:$0xf0]  ;;  %v7029_v59 = vld [vmem:[%s15514_s1 + $0x1a8] sm:$0xf] }
 0x1a8   :  { %16197 = vst [vmem:[#allocation221_spill] sm:$0xff] %v10667_v22  ;;  %v630_v22 = vmul.f32 %v10470_v33, %v10470_v33 }
 0x1a9   :  { %1690 = vperm.xlu2 %7970, %v1664_v41   ;;  %v10639_v3 = vadd.f32 1e-05, %v764_v51  ;;  %v6902_v41 = vor.u32 %v7790_v49, %v6901_v6 }
 0x1ab   :  { %7983 = vrsqrt.f32 %v10639_v3  ;;  %v10642_v52 = vpop.f32.mrf.mxu2  ;;  %3751 = vmatpush.bf16.msra.mxu2 %v6902_v41  ;;  %v16200_v41 = vld [vmem:[#allocation17_spill] sm:$0xff]  ;;  %vm920_vm6 = vweird.f32 %v10639_v3 }
 0x1ac   :  { %v10631_v29 = vpop.f32.mrf.mxu3  ;;  %v525_v8 = vpop.xlane.xlu1 %524  ;;  %16193 = vst [vmem:[#allocation217_spill] sm:$0xff] %v10642_v52  ;;  %v7947_v52 = vld [vmem:[%s15514_s1 + $0x5a4] sm:$0xf] }
 0x1ad   :  { %v10646_v4 = vmul.f32 0.001953125, %v525_v8  ;;  %v10654_v30 = vpop.f32.mrf.mxu0  ;;  %v7535_v8 = vld [vmem:[%s15514_s1 + $0x5b0] sm:$0xf0] }
 0x1ae   :  { %16195 = vst [vmem:[#allocation219_spill] sm:$0xff] %v10654_v30  ;;  %v10656_v51 = vpop.f32.mrf.mxu1  ;;  %v7822_v30 = vld [vmem:[%s15514_s1 + $0x1b4] sm:$0xf0]  ;;  %v7538_v6 = vor.u32 %v7947_v52, %v7535_v8  ;;  %v16201_v52 = vld [vmem:[#allocation26_spill] sm:$0xff]  ;;  %v632_v8 = vmul.f32 %v10523_v63, %v10523_v63 }
 0x1af   :  { %16196 = vst [vmem:[#allocation220_spill] sm:$0xff] %v10656_v51  ;;  %v685_v51 = vpop.xlane.xlu2 %684  ;;  %v7030_v49 = vor.u32 %v7822_v30, %v7029_v59  ;;  %v749_v50 = vmul.f32 %v10646_v4, %v10646_v4  ;;  %v16202_v59 = vld [vmem:[#allocation70_spill] sm:$0xff] }
 0x1b0   :  { %v733_v37 = vmul.f32 0.001953125, %v685_v51  ;;  %3653 = vmatpush.bf16.msra.mxu0 %v7538_v6  ;;  %v10684_v30 = vadd.f32 %v16202_v59, %v16201_v52 }
 0x1b1   :  { %v7984_v24 = vpop.eup %7983  ;;  %3473 = vmatmul.bf16.gmra.mxu0 %v16198_v2  ;;  %3800 = vmatpush.bf16.msra.mxu3 %v7030_v49 }
 0x1b2   :  { %3522 = vmatmul.bf16.gmra.mxu1 %v16199_v46  ;;  %v915_v5 = vmul.f32 %v7984_v24, %v10639_v3  ;;  %3571 = vmatmul.bf16.gmra.mxu2 %v16200_v41  ;;  %16203 = vst [vmem:[#allocation26_spill] sm:$0xff] %v10684_v30  ;;  %v765_v51 = vsub.f32 %v733_v37, %v749_v50  ;;  %vm921_vm5 = vweird.f32 %v7984_v24  ;;  %v690_v45 = vpop.xlane.xlu0 %689 }
 0x1b3   :  { %3620 = vmatmul.bf16.gmra.mxu3 %v9876_v19  ;;  %v10691_v46 = vadd.f32 %v16204_v62, %v16201_v52  ;;  %v706_v50 = vadd.f32 %v631_v1, %v630_v22  ;;  %v634_v37 = vmul.f32 %v10684_v30, %v10684_v30  ;;  %v16211_v22 = vld [vmem:[#allocation22_spill] sm:$0xff]  ;;  %vm922_vm7 = vmor %vm920_vm6, %vm921_vm5  ;;  %v734_v33 = vmul.f32 0.001953125, %v690_v45 }
 0x1b4   :  { %v10644_v58 = vpop.f32.mrf.mxu3  ;;  %v916_v10 = vmul.f32 %v7984_v24, %v915_v5  ;;  %v10693_v35 = vadd.f32 1e-05, %v765_v51  ;;  %v10695_v41 = vpop.f32.mrf.mxu2  ;;  %v633_v5 = vmul.f32 %v10558_v14, %v10558_v14  ;;  %v16216_v14 = vld [vmem:[#allocation74_spill] sm:$0xff] }
 0x1b5   :  { %16194 = vst [vmem:[#allocation218_spill] sm:$0xff] %v10644_v58  ;;  %v10699_v59 = vpop.f32.mrf.mxu0  ;;  %v635_v62 = vmul.f32 %v10691_v46, %v10691_v46  ;;  %v707_v51 = vadd.f32 %v706_v50, %v632_v8  ;;  %v7786_v8 = vld [vmem:[%s15514_s1 + $0x94] sm:$0xf0]  ;;  %v799_v58 = vsub.f32 %v16215_v43, %v10618_v12  ;;  %v800_v63 = vsub.f32 %v16216_v14, %v10618_v12 }
 0x1b6   :  { %16205 = vst [vmem:[#allocation70_spill] sm:$0xff] %v10691_v46  ;;  %v917_v6 = vmul.f32 0.5, %v916_v10  ;;  %7985 = vrsqrt.f32 %v10693_v35  ;;  %v10704_v19 = vpop.f32.mrf.mxu1  ;;  %vm930_vm9 = vweird.f32 %v10693_v35 }
 0x1b7   :  { %16206 = vst [vmem:[#allocation72_spill] sm:$0xff] %v10695_v41  ;;  %v530_v10 = vpop.xlane.xlu2 %529  ;;  %v16212_v41 = vld [vmem:[#allocation81_spill] sm:$0xff] }
 0x1b8   :  { %16207 = vst [vmem:[#allocation222_spill] sm:$0xff] %v10699_v59  ;;  %v918_v49 = vsub.f32 1.5, %v917_v6  ;;  %v16209_v59 = vld [vmem:[#allocation78_spill] sm:$0xff]  ;;  %v10716_v42 = vadd.f32 %v16212_v41, %v16211_v22  ;;  %v10722_v23 = vmul.f32 0.001953125, %v530_v10  ;;  %v6885_v6 = vld [vmem:[%s15514_s1 + $0x88] sm:$0xf] }
 0x1b9   :  { %16208 = vst [vmem:[#allocation223_spill] sm:$0xff] %v10704_v19  ;;  %v10712_v1 = vadd.f32 %v16209_v59, %v16201_v52  ;;  %v16213_v19 = vld [vmem:[#allocation84_spill] sm:$0xff]  ;;  %v6886_v55 = vor.u32 %v7786_v8, %v6885_v6 }
 0x1ba   :  { %v10720_v20 = vadd.f32 %v16213_v19, %v16211_v22  ;;  %v16214_v59 = vld [vmem:[#allocation68_spill] sm:$0xff]  ;;  %v919_v41 = vmul.f32 %v7984_v24, %v918_v49  ;;  %v7943_v19 = vld [vmem:[%s15514_s1 + $0x584] sm:$0xf]  ;;  %v750_v3 = vmul.f32 %v10722_v23, %v10722_v23 }
 0x1bb   :  { %16210 = vst [vmem:[#allocation78_spill] sm:$0xff] %v10712_v1  ;;  %v798_v50 = vsub.f32 %v16214_v59, %v10618_v12  ;;  %v7519_v10 = vld [vmem:[%s15514_s1 + $0x590] sm:$0xf0]  ;;  %v16217_v59 = vld [vmem:[#allocation77_spill] sm:$0xff]  ;;  %3752 = vmatpush.bf16.msra.mxu2 %v6886_v55 }
 0x1bc   :  { %v10697_v36 = vpop.f32.mrf.mxu3  ;;  %v801_v49 = vsub.f32 %v16217_v59, %v10618_v12  ;;  %v16218_v6 = vld [vmem:[#allocation88_spill] sm:$0xff]  ;;  %v923_v47 = vsel %vm922_vm7, %v7984_v24, %v919_v41  ;;  %v7522_v18 = vor.u32 %v7943_v19, %v7519_v10  ;;  %v10752_v43 = vpop.eup %7985  ;;  %v766_v53 = vsub.f32 %v734_v33, %v750_v3  ;;  %v7818_v33 = vld [vmem:[%s15514_s1 + $0x194] sm:$0xf0]  ;;  %v7939_v3 = vld [vmem:[%s15514_s1 + $0x564] sm:$0xf] }
 0x1bd   :  { %v10750_v8 = vadd.f32 %v16218_v6, %v16211_v22  ;;  %v10754_v7 = vmul.f32 %v923_v47, %v798_v50  ;;  %v10756_v14 = vmul.f32 %v923_v47, %v799_v58  ;;  %v10758_v12 = vmul.f32 %v923_v47, %v800_v63  ;;  %v10762_v15 = vpop.f32.mrf.mxu2  ;;  %v7013_v58 = vld [vmem:[%s15514_s1 + $0x188] sm:$0xf]  ;;  %v7782_v50 = vld [vmem:[%s15514_s1 + $0x74] sm:$0xf0] }
 0x1be   :  { %v10760_v59 = vmul.f32 %v923_v47, %v801_v49  ;;  %16223 = vst [vmem:[#allocation71_spill] sm:$0xff] %v10762_v15  ;;  %v925_v6 = vmul.f32 %v10752_v43, %v10693_v35  ;;  %v10768_v55 = vpop.f32.mrf.mxu0  ;;  %3654 = vmatpush.bf16.msra.mxu0 %v7522_v18  ;;  %v638_v63 = vmul.f32 %v10716_v42, %v10716_v42  ;;  %v10777_v45 = vpop.f32.mrf.mxu1  ;;  %v6869_v18 = vld [vmem:[%s15514_s1 + $0x68] sm:$0xf]  ;;  %v10789_v19 = vadd.f32 1e-05, %v766_v53  ;;  %v16227_v53 = vld [vmem:[#allocation90_spill] sm:$0xff] }
 0x1bf   :  { %16219 = vst [vmem:[#allocation22_spill] sm:$0xff] %v10754_v7  ;;  %v639_v47 = vmul.f32 %v10720_v20, %v10720_v20  ;;  %v636_v10 = vmul.f32 %v10712_v1, %v10712_v1  ;;  %v551_v49 = vadd.f32 %v10691_v46, %v10684_v30  ;;  %v708_v7 = vadd.f32 %v707_v51, %v633_v5  ;;  %v7959_v15 = vld [vmem:[%s15514_s1 + $0x604] sm:$0xf]  ;;  %v16229_v46 = vld [vmem:[#allocation80_spill] sm:$0xff]  ;;  %v6997_v5 = vld [vmem:[%s15514_s1 + $0x168] sm:$0xf] }
 0x1c0   :  { %16220 = vst [vmem:[#allocation81_spill] sm:$0xff] %v10756_v14  ;;  %v926_v41 = vmul.f32 %v10752_v43, %v925_v6  ;;  %v10805_v6 = vadd.f32 %v16227_v53, %v16211_v22  ;;  %v16228_v14 = vld [vmem:[#allocation23_spill] sm:$0xff]  ;;  %v10816_v30 = vadd.f32 %v16229_v46, %v16201_v52  ;;  %7987 = vrsqrt.f32 %v10789_v19  ;;  %v16230_v22 = vld [vmem:[#allocation24_spill] sm:$0xff]  ;;  %v16231_v53 = vld [vmem:[#allocation25_spill] sm:$0xff] }
 0x1c1   :  { %16221 = vst [vmem:[#allocation84_spill] sm:$0xff] %v10758_v12  ;;  %v640_v12 = vmul.f32 %v10750_v8, %v10750_v8  ;;  %3478 = vmatmul.bf16.gmra.mxu0 %v16228_v14  ;;  %v7014_v46 = vor.u32 %v7818_v33, %v7013_v58  ;;  %v716_v52 = vadd.f32 %v639_v47, %v638_v63  ;;  %vm931_vm8 = vweird.f32 %v10752_v43  ;;  %v10842_v63 = vpop.xlane.xlu0 %534 }
 0x1c2   :  { %16222 = vst [vmem:[#allocation68_spill] sm:$0xff] %v10760_v59  ;;  %v7503_v59 = vld [vmem:[%s15514_s1 + $0x570] sm:$0xf0]  ;;  %3527 = vmatmul.bf16.gmra.mxu1 %v16230_v22  ;;  %3576 = vmatmul.bf16.gmra.mxu2 %v16231_v53  ;;  %v6870_v51 = vor.u32 %v7782_v50, %v6869_v18  ;;  %v6853_v53 = vld [vmem:[%s15514_s1 + $0x48] sm:$0xf]  ;;  %v641_v33 = vmul.f32 %v10805_v6, %v10805_v6  ;;  %vm932_vm10 = vmor %vm930_vm9, %vm931_vm8  ;;  %vm940_vm12 = vweird.f32 %v10789_v19 }
 0x1c3   :  { %16225 = vst [vmem:[#allocation77_spill] sm:$0xff] %v10768_v55  ;;  %v7583_v55 = vld [vmem:[%s15514_s1 + $0x610] sm:$0xf0]  ;;  %3625 = vmatmul.bf16.gmra.mxu3 %v10036_v44  ;;  %v7935_v22 = vld [vmem:[%s15514_s1 + $0x544] sm:$0xf]  ;;  %v717_v18 = vadd.f32 %v716_v52, %v640_v12  ;;  %v805_v35 = vsub.f32 %v9825_v16, %v10646_v4 }
 0x1c4   :  { %v10766_v24 = vpop.f32.mrf.mxu3  ;;  %16226 = vst [vmem:[#allocation88_spill] sm:$0xff] %v10777_v45  ;;  %v711_v45 = vadd.f32 %v635_v62, %v634_v37  ;;  %v552_v37 = vadd.f32 %v551_v49, %v10712_v1  ;;  %v7814_v62 = vld [vmem:[%s15514_s1 + $0x174] sm:$0xf0]  ;;  %v7586_v58 = vor.u32 %v7959_v15, %v7583_v55  ;;  %3801 = vmatpush.bf16.msra.mxu3 %v7014_v46  ;;  %v16235_v46 = vld [vmem:[#allocation115_spill] sm:$0xff] }
 0x1c5   :  { %16224 = vst [vmem:[#allocation74_spill] sm:$0xff] %v10766_v24  ;;  %v927_v24 = vmul.f32 0.5, %v926_v41  ;;  %v7506_v41 = vor.u32 %v7939_v3, %v7503_v59  ;;  %v7778_v49 = vld [vmem:[%s15514_s1 + $0x54] sm:$0xf0]  ;;  %v7487_v59 = vld [vmem:[%s15514_s1 + $0x550] sm:$0xf0]  ;;  %v10844_v47 = vpop.f32.mrf.mxu2  ;;  %3753 = vmatpush.bf16.msra.mxu2 %v6870_v51  ;;  %v6998_v50 = vor.u32 %v7814_v62, %v6997_v5  ;;  %v803_v52 = vsub.f32 %v16235_v46, %v10646_v4 }
 0x1c6   :  { %v712_v44 = vadd.f32 %v711_v45, %v636_v10  ;;  %16232 = vst [vmem:[#allocation90_spill] sm:$0xff] %v10844_v47  ;;  %v7810_v15 = vld [vmem:[%s15514_s1 + $0x154] sm:$0xf0]  ;;  %v10858_v10 = vpop.f32.mrf.mxu0  ;;  %3707 = vmatpush.bf16.msra.mxu1 %v7586_v58  ;;  %v6854_v12 = vor.u32 %v7778_v49, %v6853_v53  ;;  %v7490_v3 = vor.u32 %v7935_v22, %v7487_v59  ;;  %v16234_v5 = vld [vmem:[#allocation114_spill] sm:$0xff]  ;;  %v7988_v53 = vpop.eup %7987  ;;  %v16237_v22 = vld [vmem:[#allocation27_spill] sm:$0xff] }
 0x1c7   :  { %v928_v1 = vsub.f32 1.5, %v927_v24  ;;  %v6981_v24 = vld [vmem:[%s15514_s1 + $0x148] sm:$0xf]  ;;  %16233 = vst [vmem:[#allocation80_spill] sm:$0xff] %v10858_v10  ;;  %3655 = vmatpush.bf16.msra.mxu0 %v7506_v41  ;;  %v802_v62 = vsub.f32 %v16234_v5, %v10646_v4  ;;  %v804_v51 = vsub.f32 %v9789_v28, %v10646_v4  ;;  %709 = vadd.xlane.f32.xlu1 %v708_v7  ;;  %v16240_v58 = vld [vmem:[#allocation92_spill] sm:$0xff]  ;;  %v16246_v7 = vld [vmem:[#allocation94_spill] sm:$0xff]  ;;  %vm941_vm11 = vweird.f32 %v7988_v53 }
 0x1c8   :  { %v16238_v41 = vld [vmem:[#allocation91_spill] sm:$0xff]  ;;  %v10878_v59 = vadd.f32 %v16240_v58, %v16237_v22  ;;  %v6982_v5 = vor.u32 %v7810_v15, %v6981_v24  ;;  %3802 = vmatpush.bf16.msra.mxu3 %v6998_v50  ;;  %v935_v47 = vmul.f32 %v7988_v53, %v10789_v19  ;;  %v718_v58 = vadd.f32 %v717_v18, %v641_v33  ;;  %vm942_vm13 = vmor %vm940_vm12, %vm941_vm11 }
 0x1c9   :  { %v929_v55 = vmul.f32 %v10752_v43, %v928_v1  ;;  %v10870_v1 = vpop.f32.mrf.mxu1  ;;  %v10874_v49 = vadd.f32 %v16238_v41, %v16237_v22  ;;  %v10891_v41 = vadd.f32 %v16246_v7, %v16237_v22  ;;  %3754 = vmatpush.bf16.msra.mxu2 %v6854_v12  ;;  %v637_v24 = vmul.f32 %v10816_v30, %v10816_v30  ;;  %v16250_v12 = vld [vmem:[#allocation105_spill] sm:$0xff] }
 0x1ca   :  { %16236 = vst [vmem:[#allocation114_spill] sm:$0xff] %v10870_v1  ;;  %v553_v50 = vadd.f32 %v552_v37, %v10816_v30  ;;  %v556_v18 = vadd.f32 %v10720_v20, %v10716_v42  ;;  %v16253_v37 = vld [vmem:[#allocation97_spill] sm:$0xff] }
 0x1cb   :  { %16239 = vst [vmem:[#allocation115_spill] sm:$0xff] %v10874_v49  ;;  %v933_v28 = vsel %vm932_vm10, %v10752_v43, %v929_v55  ;;  %3656 = vmatpush.bf16.msra.mxu0 %v7490_v3  ;;  %v936_v43 = vmul.f32 %v7988_v53, %v935_v47  ;;  %v561_v15 = vadd.f32 %v10878_v59, %v10874_v49 }
 0x1cc   :  { %v10856_v45 = vpop.f32.mrf.mxu3  ;;  %16241 = vst [vmem:[#allocation27_spill] sm:$0xff] %v10878_v59  ;;  %v10881_v46 = vmul.f32 %v933_v28, %v802_v62  ;;  %v10883_v16 = vmul.f32 %v933_v28, %v803_v52  ;;  %v10885_v4 = vmul.f32 %v933_v28, %v804_v51  ;;  %v10887_v1 = vmul.f32 %v933_v28, %v805_v35 }
 0x1cd   :  { %16247 = vst [vmem:[#allocation94_spill] sm:$0xff] %v10891_v41  ;;  %719 = vadd.xlane.f32.xlu0 %v718_v58  ;;  %v10898_v55 = vpop.f32.mrf.mxu2  ;;  %3803 = vmatpush.bf16.msra.mxu3 %v6982_v5  ;;  %v937_v62 = vmul.f32 0.5, %v936_v43  ;;  %v10903_v51 = vpop.permute.xlu0 %1685  ;;  %v713_v33 = vadd.f32 %v712_v44, %v637_v24  ;;  %v562_v47 = vadd.f32 %v561_v15, %v10891_v41  ;;  %v16255_v44 = vld [vmem:[#allocation106_spill] sm:$0xff]  ;;  %v16256_v43 = vld [vmem:[#allocation31_spill] sm:$0xff] }
 0x1ce   :  { %16242 = vst [vmem:[#allocation91_spill] sm:$0xff] %v10881_v46  ;;  %v3075_v3 = vadd.f32 %v16250_v12, %v10903_v51  ;;  %v10910_v35 = vpop.f32.mrf.mxu0  ;;  %v10916_v5 = vadd.f32 %v16253_v37, %v16237_v22  ;;  %v557_v24 = vadd.f32 %v556_v18, %v10750_v8  ;;  %v806_v15 = vsub.f32 %v9829_v0, %v10722_v23  ;;  %v16259_v0 = vld [vmem:[#allocation107_spill] sm:$0xff] }
 0x1cf   :  { %16243 = vst [vmem:[#allocation92_spill] sm:$0xff] %v10883_v16  ;;  %554 = vadd.xlane.f32.xlu1 %v553_v50  ;;  %v938_v7 = vsub.f32 1.5, %v937_v62  ;;  %v16257_v50 = vld [vmem:[#allocation32_spill] sm:$0xff]  ;;  %v807_v62 = vsub.f32 %v9848_v9, %v10722_v23  ;;  %v809_v18 = vsub.f32 %v9931_v31, %v10722_v23  ;;  %v11005_v46 = vmul.f32 0.001953125, %v10842_v63 }
 0x1d0   :  { %16244 = vst [vmem:[#allocation224_spill] sm:$0xff] %v10885_v4  ;;  %v3124_v58 = vadd.f32 %v16255_v44, %v3075_v3  ;;  %v563_v22 = vadd.f32 %v562_v47, %v10916_v5  ;;  %v558_v31 = vadd.f32 %v557_v24, %v10805_v6  ;;  %v16273_v24 = vld [vmem:[#allocation44_spill] sm:$0xff] }
 0x1d1   :  { %16245 = vst [vmem:[#allocation225_spill] sm:$0xff] %v10887_v1  ;;  %v10912_v28 = vpop.f32.mrf.mxu1  ;;  %3483 = vmatmul.bf16.gmra.mxu0 %v16256_v43  ;;  %v939_v12 = vmul.f32 %v7988_v53, %v938_v7  ;;  %v16258_v1 = vld [vmem:[#allocation33_spill] sm:$0xff] }
 0x1d2   :  { %16248 = vst [vmem:[#allocation226_spill] sm:$0xff] %v10898_v55  ;;  %714 = vadd.xlane.f32.xlu2 %v713_v33  ;;  %3532 = vmatmul.bf16.gmra.mxu1 %v16257_v50  ;;  %v808_v33 = vsub.f32 %v9905_v25, %v10722_v23  ;;  %v3173_v3 = vadd.f32 %v16259_v0, %v3124_v58  ;;  %v16265_v25 = vld [vmem:[#allocation109_spill] sm:$0xff] }
 0x1d3   :  { %16249 = vst [vmem:[#allocation227_spill] sm:$0xff] %v10903_v51  ;;  %3581 = vmatmul.bf16.gmra.mxu2 %v16258_v1  ;;  %3630 = vmatmul.bf16.gmra.mxu3 %v10108_v38  ;;  %v943_v19 = vsel %vm942_vm13, %v7988_v53, %v939_v12  ;;  %v7890_v38 = vld [vmem:[%s15514_s1 + $0x3d4] sm:$0xf0]  ;;  %v3418_v1 = vadd.f32 %v10609_v32, %v10903_v51 }
 0x1d4   :  { %v10901_v52 = vpop.f32.mrf.mxu3  ;;  %16251 = vst [vmem:[#allocation105_spill] sm:$0xff] %v10910_v35  ;;  %v10935_v37 = vmul.f32 %v943_v19, %v806_v15  ;;  %v10937_v7 = vmul.f32 %v943_v19, %v807_v62  ;;  %v10939_v47 = vmul.f32 %v943_v19, %v808_v33  ;;  %v10941_v9 = vmul.f32 %v943_v19, %v809_v18  ;;  %v16275_v19 = vld [vmem:[#allocation47_spill] sm:$0xff]  ;;  %v7886_v32 = vld [vmem:[%s15514_s1 + $0x3b4] sm:$0xf0] }
 0x1d5   :  { %16252 = vst [vmem:[#allocation228_spill] sm:$0xff] %v10912_v28  ;;  %564 = vadd.xlane.f32.xlu0 %v563_v22  ;;  %v10943_v44 = vpop.f32.mrf.mxu2  ;;  %v3222_v4 = vadd.f32 %v16265_v25, %v3173_v3  ;;  %v16274_v3 = vld [vmem:[#allocation45_spill] sm:$0xff]  ;;  %v10980_v25 = vpop.permute.xlu1 %1321 }
 0x1d6   :  { %16254 = vst [vmem:[#allocation97_spill] sm:$0xff] %v10916_v5  ;;  %v10949_v58 = vpop.f32.mrf.mxu0  ;;  %v7842_v51 = vld [vmem:[%s15514_s1 + $0x254] sm:$0xf0] }
 0x1d7   :  { %16260 = vst [vmem:[#allocation106_spill] sm:$0xff] %v10935_v37  ;;  %v3271_v15 = vadd.f32 %v10598_v34, %v3222_v4 }
 0x1d8   :  { %16261 = vst [vmem:[#allocation107_spill] sm:$0xff] %v10937_v7 }
 0x1d9   :  { %16262 = vst [vmem:[#allocation229_spill] sm:$0xff] %v10939_v47  ;;  %v10951_v53 = vpop.f32.mrf.mxu1  ;;  %v3320_v12 = vadd.f32 %v10600_v48, %v3271_v15  ;;  %v1669_v48 = vld [vmem:[%s15519_s5 + $0x38] sm:$0xff]  ;;  %v7931_v47 = vld [vmem:[%s15514_s1 + $0x524] sm:$0xf] }
 0x1da   :  { %16263 = vst [vmem:[#allocation230_spill] sm:$0xff] %v10941_v9  ;;  %559 = vadd.xlane.f32.xlu2 %v558_v31  ;;  %v7774_v9 = vld [vmem:[%s15514_s1 + $0x34] sm:$0xf0] }
 0x1db   :  { %16264 = vst [vmem:[#allocation231_spill] sm:$0xff] %v10943_v44  ;;  %v10956_v22 = vadd.f32 %v10607_v56, %v3320_v12  ;;  %v1665_v56 = vld [vmem:[%s15519_s5 + $0x18] sm:$0xff]  ;;  %v6837_v12 = vld [vmem:[%s15514_s1 + $0x28] sm:$0xf] }
 0x1dc   :  { %v10946_v23 = vpop.f32.mrf.mxu3  ;;  %16266 = vst [vmem:[#allocation109_spill] sm:$0xff] %v10949_v58  ;;  %v6838_v7 = vor.u32 %v7774_v9, %v6837_v12  ;;  %v1672_v12 = vld [vmem:[%s15519_s5 + $0x50] sm:$0xff] }
 0x1dd   :  { %16267 = vst [vmem:[#allocation232_spill] sm:$0xff] %v10951_v53  ;;  %v10958_v62 = vpop.f32.mrf.mxu2 }
 0x1de   :  { %16268 = vst [vmem:[#allocation233_spill] sm:$0xff] %v10956_v22  ;;  %v10962_v18 = vpop.f32.mrf.mxu0  ;;  %3755 = vmatpush.bf16.msra.mxu2 %v6838_v7 }
 0x1df   :  { %16269 = vst [vmem:[#allocation234_spill] sm:$0xff] %v10958_v62 }
 0x1e0   :  { %16271 = vst [vmem:[#allocation236_spill] sm:$0xff] %v10962_v18 }
 0x1e1   :  { %v10964_v0 = vpop.f32.mrf.mxu1  ;;  %3488 = vmatmul.bf16.gmra.mxu0 %v16273_v24  ;;  %16277 = vst [vmem:[#allocation239_spill] sm:$0xff] %v10980_v25  ;;  %v7471_v25 = vld [vmem:[%s15514_s1 + $0x530] sm:$0xf0] }
 0x1e2   :  { %16272 = vst [vmem:[#allocation237_spill] sm:$0xff] %v10964_v0  ;;  %3537 = vmatmul.bf16.gmra.mxu1 %v16274_v3  ;;  %v7474_v37 = vor.u32 %v7931_v47, %v7471_v25  ;;  %v11028_v25 = vmul.f32 %v11005_v46, %v11005_v46  ;;  %v7802_v0 = vld [vmem:[%s15514_s1 + $0x114] sm:$0xf0]  ;;  %v7301_v3 = vld [vmem:[%s15514_s1 + $0x3c8] sm:$0xf] }
 0x1e3   :  { %3586 = vmatmul.bf16.gmra.mxu2 %v16275_v19  ;;  %3635 = vmatmul.bf16.gmra.mxu3 %v10168_v17 }
 0x1e4   :  { %v10960_v33 = vpop.f32.mrf.mxu3  ;;  %3657 = vmatpush.bf16.msra.mxu0 %v7474_v37  ;;  %v1668_v37 = vld [vmem:[%s15519_s5 + $0x30] sm:$0xff] }
 0x1e5   :  { %16270 = vst [vmem:[#allocation235_spill] sm:$0xff] %v10960_v33  ;;  %v10970_v34 = vpop.f32.mrf.mxu2 }
 0x1e6   :  { %16276 = vst [vmem:[#allocation238_spill] sm:$0xff] %v10970_v34  ;;  %v10982_v31 = vpop.f32.mrf.mxu0 }
 0x1e7   :  { %16278 = vst [vmem:[#allocation240_spill] sm:$0xff] %v10982_v31  ;;  %v16286_v31 = vld [vmem:[#allocation64_spill] sm:$0xff] }
 0x1e8   :  { %1695 = vperm.xlu1 %7969, %v1665_v56   ;;  %v7806_v56 = vld [vmem:[%s15514_s1 + $0x134] sm:$0xf0] }
 0x1e9   :  { %v10984_v15 = vpop.f32.mrf.mxu1  ;;  %1715 = vperm.xlu0 %7968, %v1669_v48   ;;  %v6965_v48 = vld [vmem:[%s15514_s1 + $0x128] sm:$0xf] }
 0x1ea   :  { %16279 = vst [vmem:[#allocation241_spill] sm:$0xff] %v10984_v15  ;;  %v6966_v16 = vor.u32 %v7806_v56, %v6965_v48  ;;  %v1667_v15 = vld [vmem:[%s15519_s5 + $0x28] sm:$0xff]  ;;  %v16284_v56 = vld [vmem:[#allocation62_spill] sm:$0xff] }
 0x1ec   :  { %v10978_v4 = vpop.f32.mrf.mxu3  ;;  %3804 = vmatpush.bf16.msra.mxu3 %v6966_v16  ;;  %v11020_v16 = vpop.permute.xlu2 %1331 }
 0x1ed   :  { %v11007_v9 = vpop.f32.mrf.mxu2  ;;  %16281 = vst [vmem:[#allocation243_spill] sm:$0xff] %v11020_v16  ;;  %v6821_v16 = vld [vmem:[%s15514_s1 + $0x8] sm:$0xf] }
 0x1ee   :  { %16280 = vst [vmem:[#allocation242_spill] sm:$0xff] %v11007_v9  ;;  %v11022_v63 = vpop.f32.mrf.mxu0  ;;  %v16285_v9 = vld [vmem:[#allocation63_spill] sm:$0xff] }
 0x1ef   :  { %16282 = vst [vmem:[#allocation244_spill] sm:$0xff] %v11022_v63  ;;  %v695_v47 = vpop.xlane.xlu1 %694  ;;  %v6949_v63 = vld [vmem:[%s15514_s1 + $0x108] sm:$0xf] }
 0x1f0   :  { %v11030_v48 = vmul.f32 0.001953125, %v695_v47  ;;  %1710 = vperm.xlu1 %7969, %v1668_v37   ;;  %v6950_v18 = vor.u32 %v7802_v0, %v6949_v63  ;;  %v7445_v0 = vld [vmem:[%s15514_s1 + $0x4e8] sm:$0xf]  ;;  %v7926_v63 = vld [vmem:[%s15514_s1 + $0x4f4] sm:$0xf0] }
 0x1f1   :  { %v11024_v7 = vpop.f32.mrf.mxu1  ;;  %1730 = vperm.xlu0 %7968, %v1672_v12   ;;  %3493 = vmatmul.bf16.gmra.mxu0 %v16284_v56  ;;  %v7927_v12 = vld [vmem:[%s15514_s1 + $0x504] sm:$0xf] }
 0x1f2   :  { %16283 = vst [vmem:[#allocation245_spill] sm:$0xff] %v11024_v7  ;;  %1705 = vperm.xlu2 %7970, %v1667_v15   ;;  %3542 = vmatmul.bf16.gmra.mxu1 %v16285_v9  ;;  %v7770_v15 = vld [vmem:[%s15514_s1 + $0x14] sm:$0xf0]  ;;  %v7455_v7 = vld [vmem:[%s15514_s1 + $0x510] sm:$0xf0] }
 0x1f3   :  { %3591 = vmatmul.bf16.gmra.mxu2 %v16286_v31  ;;  %3640 = vmatmul.bf16.gmra.mxu3 %v10296_v57  ;;  %v6822_v47 = vor.u32 %v7770_v15, %v6821_v16  ;;  %v7458_v62 = vor.u32 %v7927_v12, %v7455_v7  ;;  %v1675_v16 = vld [vmem:[%s15519_s5 + $0x68] sm:$0xff]  ;;  %v1670_v15 = vld [vmem:[%s15519_s5 + $0x40] sm:$0xff]  ;;  %v7862_v12 = vld [vmem:[%s15514_s1 + $0x2f4] sm:$0xf0] }
 0x1f4   :  { %v11015_v34 = vpop.f32.mrf.mxu3  ;;  %3805 = vmatpush.bf16.msra.mxu3 %v6950_v18  ;;  %v7189_v7 = vld [vmem:[%s15514_s1 + $0x2e8] sm:$0xf]  ;;  %v7446_v18 = vor.u32 %v7926_v63, %v7445_v0  ;;  %v7894_v63 = vld [vmem:[%s15514_s1 + $0x3f4] sm:$0xf0]  ;;  %v16311_v31 = vld [vmem:[#allocation2_spill] sm:$0xff] }
 0x1f5   :  { %v11056_v53 = vpop.f32.mrf.mxu2  ;;  %3756 = vmatpush.bf16.msra.mxu2 %v6822_v47  ;;  %3658 = vmatpush.bf16.msra.mxu0 %v7458_v62  ;;  %v7573_v47 = vld [vmem:[%s15514_s1 + $0x5e8] sm:$0xf]  ;;  %v7190_v28 = vor.u32 %v7862_v12, %v7189_v7 }
 0x1f6   :  { %16287 = vst [vmem:[#allocation62_spill] sm:$0xff] %v11056_v53  ;;  %v11066_v58 = vpop.f32.mrf.mxu0  ;;  %v7317_v0 = vld [vmem:[%s15514_s1 + $0x3e8] sm:$0xf] }
 0x1f7   :  { %16289 = vst [vmem:[#allocation247_spill] sm:$0xff] %v11066_v58  ;;  %v540_v62 = vpop.xlane.xlu1 %539 }
 0x1f8   :  { %v11088_v53 = vmul.f32 0.001953125, %v540_v62  ;;  %v700_v58 = vpop.xlane.xlu2 %699  ;;  %v7318_v62 = vor.u32 %v7894_v63, %v7317_v0  ;;  %v705_v0 = vpop.xlane.xlu0 %704  ;;  %v16298_v63 = vld [vmem:[#allocation83_spill] sm:$0xff] }
 0x1f9   :  { %v11068_v44 = vpop.f32.mrf.mxu1  ;;  %1745 = vperm.xlu0 %7968, %v1675_v16   ;;  %3945 = vmatpush.bf16.msrb.mxu2 %v7446_v18 }
 0x1fa   :  { %16290 = vst [vmem:[#allocation248_spill] sm:$0xff] %v11068_v44  ;;  %1720 = vperm.xlu2 %7970, %v1670_v15   ;;  %v7958_v44 = vld [vmem:[%s15514_s1 + $0x5f4] sm:$0xf0]  ;;  %v11090_v15 = vmul.f32 0.001953125, %v700_v58  ;;  %3847 = vmatpush.bf16.msrb.mxu0 %v7190_v28  ;;  %v11100_v55 = vmul.f32 %v11088_v53, %v11088_v53  ;;  %v5028_v28 = vld [vmem:[%s15520_s8 + $0x8] sm:$0xff] }
 0x1fb   :  { %16291 = vst [vmem:[#allocation249_spill] sm:$0xff] %v11088_v53  ;;  %v7574_v16 = vor.u32 %v7958_v44, %v7573_v47  ;;  %v1673_v44 = vld [vmem:[%s15519_s5 + $0x58] sm:$0xff]  ;;  %3896 = vmatpush.bf16.msrb.mxu1 %v7318_v62  ;;  %v7429_v62 = vld [vmem:[%s15514_s1 + $0x4c8] sm:$0xf] }
 0x1fc   :  { %v11064_v37 = vpop.f32.mrf.mxu3  ;;  %16292 = vst [vmem:[#allocation250_spill] sm:$0xff] %v11090_v15 }
 0x1fd   :  { %16288 = vst [vmem:[#allocation246_spill] sm:$0xff] %v11064_v37  ;;  %3994 = vmatpush.bf16.msrb.mxu3 %v7574_v16  ;;  %v11102_v7 = vpop.f32.mrf.mxu2  ;;  %v16297_v16 = vld [vmem:[#allocation82_spill] sm:$0xff]  ;;  %v16329_v37 = vld [vmem:[#allocation20_spill] sm:$0xff] }
 0x1fe   :  { %16293 = vst [vmem:[#allocation251_spill] sm:$0xff] %v11100_v55  ;;  %v11114_v12 = vpop.f32.mrf.mxu0 }
 0x1ff   :  { %16294 = vst [vmem:[#allocation252_spill] sm:$0xff] %v11102_v7  ;;  %v16299_v7 = vld [vmem:[#allocation85_spill] sm:$0xff] }
 0x200   :  { %16295 = vst [vmem:[#allocation253_spill] sm:$0xff] %v11114_v12  ;;  %v11139_v12 = vmul.f32 0.001953125, %v705_v0 }
 0x201   :  { %v11116_v47 = vpop.f32.mrf.mxu1  ;;  %5050 = vperm.xlu0 %7968, %v5028_v28   ;;  %3498 = vmatmul.bf16.gmra.mxu0 %v16297_v16  ;;  %v7922_v28 = vld [vmem:[%s15514_s1 + $0x4d4] sm:$0xf0] }
 0x202   :  { %16296 = vst [vmem:[#allocation254_spill] sm:$0xff] %v11116_v47  ;;  %1735 = vperm.xlu2 %7970, %v1673_v44   ;;  %3547 = vmatmul.bf16.gmra.mxu1 %v16298_v63  ;;  %v5030_v44 = vld [vmem:[%s15520_s8 + $0x18] sm:$0xff]  ;;  %v7173_v47 = vld [vmem:[%s15514_s1 + $0x2c8] sm:$0xf]  ;;  %v7430_v57 = vor.u32 %v7922_v28, %v7429_v62  ;;  %v7302_v62 = vor.u32 %v7890_v38, %v7301_v3 }
 0x203   :  { %3596 = vmatmul.bf16.gmra.mxu2 %v16299_v7  ;;  %3645 = vmatmul.bf16.gmra.mxu3 %v10475_v13  ;;  %16301 = vst [vmem:[#allocation256_spill] sm:$0xff] %v11139_v12  ;;  %v1676_v13 = vld [vmem:[%s15519_s5 + $0x70] sm:$0xff]  ;;  %v7557_v7 = vld [vmem:[%s15514_s1 + $0x5c8] sm:$0xf]  ;;  %v7954_v63 = vld [vmem:[%s15514_s1 + $0x5d4] sm:$0xf0]  ;;  %v643_v38 = vmul.f32 %v10878_v59, %v10878_v59 }
 0x204   :  { %v11112_v18 = vpop.f32.mrf.mxu3  ;;  %v545_v35 = vpop.xlane.xlu2 %544  ;;  %v7558_v19 = vor.u32 %v7954_v63, %v7557_v7  ;;  %3946 = vmatpush.bf16.msrb.mxu2 %v7430_v57  ;;  %3897 = vmatpush.bf16.msrb.mxu1 %v7302_v62  ;;  %v5033_v7 = vld [vmem:[%s15520_s8 + $0x30] sm:$0xff]  ;;  %v642_v63 = vmul.f32 %v10874_v49, %v10874_v49  ;;  %v16310_v62 = vld [vmem:[#allocation101_spill] sm:$0xff]  ;;  %v16330_v59 = vld [vmem:[#allocation51_spill] sm:$0xff] }
 0x205   :  { %v11122_v58 = vmul.f32 0.001953125, %v545_v35  ;;  %v7858_v35 = vld [vmem:[%s15514_s1 + $0x2d4] sm:$0xf0]  ;;  %v11145_v22 = vpop.f32.mrf.mxu2 }
 0x206   :  { %16303 = vst [vmem:[#allocation258_spill] sm:$0xff] %v11145_v22  ;;  %v11160_v9 = vpop.f32.mrf.mxu0  ;;  %v7174_v17 = vor.u32 %v7858_v35, %v7173_v47  ;;  %3995 = vmatpush.bf16.msrb.mxu3 %v7558_v19  ;;  %v644_v35 = vmul.f32 %v10891_v41, %v10891_v41 }
 0x207   :  { %16300 = vst [vmem:[#allocation255_spill] sm:$0xff] %v11122_v58  ;;  %v11143_v10 = vmul.f32 %v11122_v58, %v11122_v58 }
 0x208   :  { %16304 = vst [vmem:[#allocation259_spill] sm:$0xff] %v11160_v9  ;;  %3848 = vmatpush.bf16.msrb.mxu0 %v7174_v17 }
 0x209   :  { %16302 = vst [vmem:[#allocation257_spill] sm:$0xff] %v11143_v10  ;;  %v11162_v22 = vpop.f32.mrf.mxu1  ;;  %5060 = vperm.xlu0 %7968, %v5030_v44   ;;  %v16309_v44 = vld [vmem:[#allocation99_spill] sm:$0xff] }
 0x20a   :  { %16305 = vst [vmem:[#allocation260_spill] sm:$0xff] %v11162_v22  ;;  %1750 = vperm.xlu2 %7970, %v1676_v13   ;;  %v5029_v13 = vld [vmem:[%s15520_s8 + $0x10] sm:$0xff]  ;;  %v7157_v22 = vld [vmem:[%s15514_s1 + $0x2a8] sm:$0xf] }
 0x20c   :  { %v11156_v0 = vpop.f32.mrf.mxu3 }
 0x20d   :  { %v11170_v28 = vpop.f32.mrf.mxu2 }
 0x20e   :  { %16306 = vst [vmem:[#allocation261_spill] sm:$0xff] %v11170_v28  ;;  %v3464_v17 = vpop.f32.mrf.mxu0 }
 0x20f   :  { %v11184_v3 = vpop.permute.xlu1 %1680 }
 0x210   :  { %16308 = vst [vmem:[#allocation263_spill] sm:$0xff] %v11184_v3  ;;  %v3416_v19 = vadd.f32 %v10596_v54, %v11184_v3  ;;  %v7918_v54 = vld [vmem:[%s15514_s1 + $0x4b4] sm:$0xf0] }
 0x211   :  { %v3513_v57 = vpop.f32.mrf.mxu1  ;;  %5075 = vperm.xlu0 %7968, %v5033_v7   ;;  %3659 = vmatmul.bf16.vlgmr.msra.gmra.mxu0 %v16309_v44  ;;  %v721_v7 = vadd.f32 %v643_v38, %v642_v63  ;;  %v7541_v63 = vld [vmem:[%s15514_s1 + $0x5a8] sm:$0xf]  ;;  %v7950_v38 = vld [vmem:[%s15514_s1 + $0x5b4] sm:$0xf0] }
 0x212   :  { %5055 = vperm.xlu2 %7970, %v5029_v13   ;;  %7619 = vmatmul.msk.bf16.vlgmr.msra.gmra.mxu1 %vm3038_vm1, %v16310_v62  ;;  %v3465_v28 = vadd.f32 %v3464_v17, %v3416_v19  ;;  %v7413_v13 = vld [vmem:[%s15514_s1 + $0x4a8] sm:$0xf]  ;;  %v7542_v53 = vor.u32 %v7950_v38, %v7541_v63  ;;  %v16332_v3 = vld [vmem:[#allocation69_spill] sm:$0xff] }
 0x213   :  { %3757 = vmatmul.bf16.vlgmr.msra.gmra.mxu2 %v16311_v31  ;;  %3806 = vmatmul.bf16.vlgmr.msra.gmra.mxu3 %v16177_v21  ;;  %v7414_v9 = vor.u32 %v7918_v54, %v7413_v13  ;;  %v7854_v31 = vld [vmem:[%s15514_s1 + $0x2b4] sm:$0xf0]  ;;  %v5036_v21 = vld [vmem:[%s15520_s8 + $0x48] sm:$0xff]  ;;  %v722_v54 = vadd.f32 %v721_v7, %v644_v35  ;;  %v16312_v7 = vsub.f32 %v11030_v48, %v11028_v25 }
 0x214   :  { %v11178_v47 = vpop.f32.mrf.mxu3  ;;  %v3514_v17 = vadd.f32 %v3513_v57, %v3465_v28  ;;  %v5032_v13 = vld [vmem:[%s15520_s8 + $0x28] sm:$0xff]  ;;  %v7158_v50 = vor.u32 %v7854_v31, %v7157_v22  ;;  %v645_v57 = vmul.f32 %v10916_v5, %v10916_v5  ;;  %3996 = vmatpush.bf16.msrb.mxu3 %v7542_v53 }
 0x215   :  { %16307 = vst [vmem:[#allocation262_spill] sm:$0xff] %v11178_v47  ;;  %v3562_v19 = vpop.f32.mrf.mxu2  ;;  %3947 = vmatpush.bf16.msrb.mxu2 %v7414_v9  ;;  %v7285_v35 = vld [vmem:[%s15514_s1 + $0x3a8] sm:$0xf] }
 0x216   :  { %v3563_v33 = vadd.f32 %v3562_v19, %v3514_v17  ;;  %v3466_v58 = vpop.f32.mrf.mxu0  ;;  %v723_v22 = vadd.f32 %v722_v54, %v645_v57  ;;  %3849 = vmatpush.bf16.msrb.mxu0 %v7158_v50  ;;  %v7286_v31 = vor.u32 %v7886_v32, %v7285_v35  ;;  %v5035_v50 = vld [vmem:[%s15520_s8 + $0x40] sm:$0xff]  ;;  %v16315_v19 = vld [vmem:[#allocation111_spill] sm:$0xff]  ;;  %v16316_v54 = vld [vmem:[#allocation113_spill] sm:$0xff]  ;;  %v550_v57 = vpop.xlane.xlu0 %549 }
 0x217   :  { %v3467_v47 = vadd.f32 %v3466_v58, %v3418_v1  ;;  %v11234_v1 = vadd.f32 1e-05, %v16312_v7  ;;  %v11236_v58 = vpop.permute.xlu2 %1690  ;;  %v5042_v32 = vld [vmem:[%s15520_s8 + $0x78] sm:$0xff] }
 0x218   :  { %16313 = vst [vmem:[#allocation264_spill] sm:$0xff] %v11236_v58  ;;  %3898 = vmatpush.bf16.msrb.mxu1 %v7286_v31  ;;  %v3421_v48 = vadd.f32 %v10631_v29, %v11236_v58 }
 0x219   :  { %v3515_v28 = vpop.f32.mrf.mxu1  ;;  %5090 = vperm.xlu0 %7968, %v5036_v21   ;;  %7989 = vrsqrt.f32 %v11234_v1  ;;  %vm950_vm15 = vweird.f32 %v11234_v1 }
 0x21a   :  { %5070 = vperm.xlu2 %7970, %v5032_v13   ;;  %v3516_v21 = vadd.f32 %v3515_v28, %v3467_v47  ;;  %724 = vadd.xlane.f32.xlu1 %v723_v22  ;;  %v16317_v28 = vld [vmem:[#allocation6_spill] sm:$0xff]  ;;  %v5038_v22 = vld [vmem:[%s15520_s8 + $0x58] sm:$0xff] }
 0x21c   :  { %v3611_v62 = vpop.f32.mrf.mxu3 }
 0x21d   :  { %v11229_v9 = vadd.f32 %v3611_v62, %v3563_v33  ;;  %v3564_v63 = vpop.f32.mrf.mxu2  ;;  %v5039_v33 = vld [vmem:[%s15520_s8 + $0x60] sm:$0xff] }
 0x21e   :  { %v3565_v53 = vadd.f32 %v3564_v63, %v3516_v21  ;;  %v3469_v47 = vpop.f32.mrf.mxu0 }
 0x21f   :  { %v3470_v17 = vadd.f32 %v3469_v47, %v3421_v48  ;;  %v7990_v35 = vpop.eup %7989  ;;  %v5189_v47 = vld [vmem:[%s15521_s9 + $0x10] sm:$0xff] }
 0x220   :  { %v945_v21 = vmul.f32 %v7990_v35, %v11234_v1  ;;  %vm951_vm14 = vweird.f32 %v7990_v35  ;;  %v812_v1 = vsub.f32 %v10024_v61, %v11005_v46 }
 0x221   :  { %v3518_v62 = vpop.f32.mrf.mxu1  ;;  %5105 = vperm.xlu0 %7968, %v5039_v33   ;;  %3664 = vmatmul.bf16.gmra.mxu0 %v16315_v19  ;;  %vm952_vm0 = vmor %vm950_vm15, %vm951_vm14 }
 0x222   :  { %5085 = vperm.xlu2 %7970, %v5035_v50   ;;  %v3519_v13 = vadd.f32 %v3518_v62, %v3470_v17  ;;  %7620 = vmatmul.msk.bf16.gmra.mxu1 %vm3038_vm1, %v16316_v54  ;;  %v5041_v62 = vld [vmem:[%s15520_s8 + $0x70] sm:$0xff] }
 0x223   :  { %3762 = vmatmul.bf16.gmra.mxu2 %v16317_v28  ;;  %3811 = vmatmul.bf16.gmra.mxu3 %v16185_v39 }
 0x224   :  { %v3613_v25 = vpop.f32.mrf.mxu3 }
 0x225   :  { %v11247_v38 = vadd.f32 %v3613_v25, %v3565_v53  ;;  %v3567_v29 = vpop.f32.mrf.mxu2  ;;  %v946_v53 = vmul.f32 %v7990_v35, %v945_v21  ;;  %v11267_v25 = vpop.permute.xlu0 %1700 }
 0x226   :  { %v3568_v31 = vadd.f32 %v3567_v29, %v3519_v13  ;;  %v11261_v63 = vpop.f32.mrf.mxu0  ;;  %16319 = vst [vmem:[#allocation267_spill] sm:$0xff] %v11267_v25  ;;  %v3426_v13 = vadd.f32 %v10697_v36, %v11267_v25 }
 0x227   :  { %16314 = vst [vmem:[#allocation265_spill] sm:$0xff] %v11247_v38  ;;  %v947_v29 = vmul.f32 0.5, %v946_v53  ;;  %v5192_v53 = vld [vmem:[%s15521_s9 + $0x28] sm:$0xff] }
 0x229   :  { %v11263_v33 = vpop.f32.mrf.mxu1  ;;  %5120 = vperm.xlu0 %7968, %v5042_v32   ;;  %v948_v39 = vsub.f32 1.5, %v947_v29 }
 0x22a   :  { %5100 = vperm.xlu2 %7970, %v5038_v22  }
 0x22c   :  { %v3616_v7 = vpop.f32.mrf.mxu3 }
 0x22d   :  { %v11265_v50 = vadd.f32 %v3616_v7, %v3568_v31  ;;  %v11269_v48 = vpop.f32.mrf.mxu2  ;;  %v1671_v7 = vld [vmem:[%s15519_s5 + $0x48] sm:$0xff] }
 0x22e   :  { %v3474_v32 = vpop.f32.mrf.mxu0 }
 0x22f   :  { %16318 = vst [vmem:[#allocation266_spill] sm:$0xff] %v11265_v50  ;;  %v3475_v31 = vadd.f32 %v3474_v32, %v3426_v13  ;;  %v949_v32 = vmul.f32 %v7990_v35, %v948_v39  ;;  %v7109_v50 = vld [vmem:[%s15514_s1 + $0x248] sm:$0xf] }
 0x231   :  { %v3523_v22 = vpop.f32.mrf.mxu1  ;;  %5215 = vperm.xlu0 %7968, %v5189_v47   ;;  %3669 = vmatmul.bf16.gmra.mxu0 %v9878_v27  ;;  %v5188_v47 = vld [vmem:[%s15521_s9 + $0x8] sm:$0xff]  ;;  %v7846_v27 = vld [vmem:[%s15514_s1 + $0x274] sm:$0xf0] }
 0x232   :  { %5115 = vperm.xlu2 %7970, %v5041_v62   ;;  %v3524_v21 = vadd.f32 %v3523_v22, %v3475_v31  ;;  %7621 = vmatmul.msk.bf16.gmra.mxu1 %vm3038_vm1, %v9899_v60  ;;  %v11295_v22 = vmul.f32 0.001953125, %v550_v57  ;;  %v1674_v57 = vld [vmem:[%s15519_s5 + $0x60] sm:$0xff] }
 0x233   :  { %3767 = vmatmul.bf16.gmra.mxu2 %v9044_v11  ;;  %3816 = vmatmul.bf16.gmra.mxu3 %v16198_v2  ;;  %v7914_v2 = vld [vmem:[%s15514_s1 + $0x494] sm:$0xf0] }
 0x234   :  { %v11277_v17 = vpop.f32.mrf.mxu3  ;;  %1725 = vperm.xlu1 %7969, %v1671_v7   ;;  %v7397_v7 = vld [vmem:[%s15514_s1 + $0x488] sm:$0xf]  ;;  %v754_v60 = vmul.f32 %v11295_v22, %v11295_v22  ;;  %v822_v55 = vsub.f32 %v16329_v37, %v11295_v22  ;;  %v823_v49 = vsub.f32 %v16330_v59, %v11295_v22  ;;  %v825_v44 = vsub.f32 %v16332_v3, %v11295_v22 }
 0x235   :  { %v3572_v36 = vpop.f32.mrf.mxu2  ;;  %v7398_v39 = vor.u32 %v7914_v2, %v7397_v7  ;;  %v811_v2 = vsub.f32 %v10011_v26, %v11005_v46  ;;  %v7493_v59 = vld [vmem:[%s15514_s1 + $0x548] sm:$0xf] }
 0x236   :  { %v3573_v62 = vadd.f32 %v3572_v36, %v3524_v21  ;;  %v11297_v31 = vpop.f32.mrf.mxu0  ;;  %v953_v36 = vsel %vm952_vm0, %v7990_v35, %v949_v32  ;;  %v5199_v35 = vld [vmem:[%s15521_s9 + $0x60] sm:$0xff] }
 0x237   :  { %3948 = vmatpush.bf16.msrb.mxu2 %v7398_v39  ;;  %v11335_v61 = vmul.f32 %v953_v36, %v811_v2  ;;  %v11337_v39 = vmul.f32 %v953_v36, %v812_v1  ;;  %v1677_v2 = vld [vmem:[%s15519_s5 + $0x78] sm:$0xff]  ;;  %v16327_v1 = vld [vmem:[#allocation12_spill] sm:$0xff] }
 0x239   :  { %v11299_v29 = vpop.f32.mrf.mxu1  ;;  %5230 = vperm.xlu0 %7968, %v5192_v53   ;;  %v16321_v53 = vld [vmem:[#allocation146_spill] sm:$0xff]  ;;  %16323 = vst [vmem:[#allocation269_spill] sm:$0xff] %v11335_v61 }
 0x23a   :  { %5210 = vperm.xlu2 %7970, %v5188_v47   ;;  %v710_v21 = vpop.xlane.xlu1 %709  ;;  %v813_v47 = vsub.f32 %v16321_v53, %v11005_v46  ;;  %16324 = vst [vmem:[#allocation270_spill] sm:$0xff] %v11337_v39  ;;  %v16328_v53 = vld [vmem:[#allocation21_spill] sm:$0xff] }
 0x23b   :  { %v738_v28 = vmul.f32 0.001953125, %v710_v21  ;;  %v16326_v21 = vld [vmem:[#allocation142_spill] sm:$0xff] }
 0x23c   :  { %v3621_v13 = vpop.f32.mrf.mxu3  ;;  %1740 = vperm.xlu1 %7969, %v1674_v57  }
 0x23d   :  { %v11307_v11 = vadd.f32 %v3621_v13, %v3573_v62  ;;  %v810_v62 = vsub.f32 %v10007_v40, %v11005_v46  ;;  %v770_v13 = vsub.f32 %v738_v28, %v754_v60  ;;  %v11323_v7 = vpop.f32.mrf.mxu2  ;;  %v5191_v40 = vld [vmem:[%s15521_s9 + $0x20] sm:$0xff]  ;;  %v11339_v46 = vmul.f32 %v953_v36, %v813_v47 }
 0x23e   :  { %v11343_v28 = vpop.f32.mrf.mxu0 }
 0x23f   :  { %16320 = vst [vmem:[#allocation268_spill] sm:$0xff] %v11307_v11  ;;  %v11333_v26 = vmul.f32 %v953_v36, %v810_v62  ;;  %v11341_v60 = vadd.f32 1e-05, %v770_v13  ;;  %v7141_v62 = vld [vmem:[%s15514_s1 + $0x288] sm:$0xf] }
 0x240   :  { %16325 = vst [vmem:[#allocation271_spill] sm:$0xff] %v11339_v46  ;;  %v7850_v36 = vld [vmem:[%s15514_s1 + $0x294] sm:$0xf0]  ;;  %v7269_v46 = vld [vmem:[%s15514_s1 + $0x388] sm:$0xf] }
 0x241   :  { %16322 = vst [vmem:[#allocation146_spill] sm:$0xff] %v11333_v26  ;;  %v11345_v57 = vpop.f32.mrf.mxu1  ;;  %5265 = vperm.xlu0 %7968, %v5199_v35   ;;  %7991 = vrsqrt.f32 %v11341_v60  ;;  %3674 = vmatmul.bf16.gmra.mxu0 %v16326_v21  ;;  %v7142_v13 = vor.u32 %v7850_v36, %v7141_v62  ;;  %v7525_v35 = vld [vmem:[%s15514_s1 + $0x588] sm:$0xf]  ;;  %v7882_v62 = vld [vmem:[%s15514_s1 + $0x394] sm:$0xf0]  ;;  %v5027_v21 = vld [vmem:[%s15520_s8] sm:$0xff]  ;;  %vm980_vm3 = vweird.f32 %v11341_v60 }
 0x242   :  { %5225 = vperm.xlu2 %7970, %v5191_v40   ;;  %7622 = vmatmul.msk.bf16.gmra.mxu1 %vm3038_vm1, %v16327_v1  ;;  %v555_v47 = vpop.xlane.xlu1 %554  ;;  %v7946_v40 = vld [vmem:[%s15514_s1 + $0x594] sm:$0xf0]  ;;  %v7270_v36 = vor.u32 %v7882_v62, %v7269_v46  ;;  %v720_v62 = vpop.xlane.xlu0 %719  ;;  %v7509_v11 = vld [vmem:[%s15514_s1 + $0x568] sm:$0xf] }
 0x243   :  { %3772 = vmatmul.bf16.gmra.mxu2 %v16328_v53  ;;  %3821 = vmatmul.bf16.gmra.mxu3 %v16228_v14  ;;  %v11371_v61 = vmul.f32 0.001953125, %v555_v47  ;;  %v7526_v26 = vor.u32 %v7946_v40, %v7525_v35  ;;  %v5202_v47 = vld [vmem:[%s15521_s9 + $0x78] sm:$0xff]  ;;  %v740_v37 = vmul.f32 0.001953125, %v720_v62 }
 0x244   :  { %v11331_v32 = vpop.f32.mrf.mxu3  ;;  %3850 = vmatpush.bf16.msrb.mxu0 %v7142_v13  ;;  %1755 = vperm.xlu1 %7969, %v1677_v2   ;;  %v5194_v35 = vld [vmem:[%s15521_s9 + $0x38] sm:$0xff] }
 0x245   :  { %v715_v39 = vpop.xlane.xlu2 %714  ;;  %v755_v1 = vmul.f32 %v11371_v61, %v11371_v61  ;;  %3997 = vmatpush.bf16.msrb.mxu3 %v7526_v26  ;;  %v11378_v54 = vpop.f32.mrf.mxu2  ;;  %3899 = vmatpush.bf16.msrb.mxu1 %v7270_v36 }
 0x246   :  { %v739_v53 = vmul.f32 0.001953125, %v715_v39  ;;  %v11390_v46 = vpop.f32.mrf.mxu0 }
 0x247   :  { %v11388_v2 = vpop.eup %7991 }
 0x248   :  { %v771_v39 = vsub.f32 %v739_v53, %v755_v1  ;;  %v975_v26 = vmul.f32 %v11388_v2, %v11341_v60  ;;  %v5201_v53 = vld [vmem:[%s15521_s9 + $0x70] sm:$0xff]  ;;  %vm981_vm2 = vweird.f32 %v11388_v2 }
 0x249   :  { %v11392_v13 = vpop.f32.mrf.mxu1  ;;  %5280 = vperm.xlu0 %7968, %v5202_v47   ;;  %v7381_v47 = vld [vmem:[%s15514_s1 + $0x468] sm:$0xf]  ;;  %vm982_vm4 = vmor %vm980_vm3, %vm981_vm2 }
 0x24a   :  { %5240 = vperm.xlu2 %7970, %v5194_v35   ;;  %v11396_v14 = vadd.f32 1e-05, %v771_v39  ;;  %v976_v36 = vmul.f32 %v11388_v2, %v975_v26  ;;  %v7910_v35 = vld [vmem:[%s15514_s1 + $0x474] sm:$0xf0]  ;;  %v7125_v39 = vld [vmem:[%s15514_s1 + $0x268] sm:$0xf] }
 0x24b   :  { %v7382_v58 = vor.u32 %v7910_v35, %v7381_v47  ;;  %v7126_v5 = vor.u32 %v7846_v27, %v7125_v39  ;;  %v7365_v35 = vld [vmem:[%s15514_s1 + $0x448] sm:$0xf]  ;;  %v7906_v39 = vld [vmem:[%s15514_s1 + $0x454] sm:$0xf0] }
 0x24c   :  { %v11386_v40 = vpop.f32.mrf.mxu3  ;;  %7993 = vrsqrt.f32 %v11396_v14  ;;  %v977_v26 = vmul.f32 0.5, %v976_v36  ;;  %5045 = vperm.xlu1 %7969, %v5027_v21   ;;  %v7942_v36 = vld [vmem:[%s15514_s1 + $0x574] sm:$0xf0]  ;;  %v7253_v21 = vld [vmem:[%s15514_s1 + $0x368] sm:$0xf]  ;;  %v7366_v60 = vor.u32 %v7906_v39, %v7365_v35  ;;  %vm990_vm6 = vweird.f32 %v11396_v14 }
 0x24d   :  { %v560_v1 = vpop.xlane.xlu2 %559  ;;  %v11425_v15 = vpop.f32.mrf.mxu2  ;;  %3949 = vmatpush.bf16.msrb.mxu2 %v7382_v58  ;;  %3851 = vmatpush.bf16.msrb.mxu0 %v7126_v5  ;;  %v7510_v12 = vor.u32 %v7942_v36, %v7509_v11  ;;  %v5031_v11 = vld [vmem:[%s15520_s8 + $0x20] sm:$0xff]  ;;  %v7938_v58 = vld [vmem:[%s15514_s1 + $0x554] sm:$0xf0] }
 0x24e   :  { %v11415_v25 = vmul.f32 0.001953125, %v560_v1  ;;  %v7878_v1 = vld [vmem:[%s15514_s1 + $0x374] sm:$0xf0]  ;;  %v978_v41 = vsub.f32 1.5, %v977_v26  ;;  %v16331_v26 = vld [vmem:[#allocation200_spill] sm:$0xff]  ;;  %v11451_v62 = vpop.f32.mrf.mxu0 }
 0x24f   :  { %v824_v19 = vsub.f32 %v16331_v26, %v11295_v22  ;;  %v7254_v5 = vor.u32 %v7878_v1, %v7253_v21  ;;  %3998 = vmatpush.bf16.msrb.mxu3 %v7510_v12  ;;  %v7237_v21 = vld [vmem:[%s15514_s1 + $0x348] sm:$0xf]  ;;  %v7874_v1 = vld [vmem:[%s15514_s1 + $0x354] sm:$0xf0]  ;;  %v11488_v22 = vpop.xlane.xlu0 %564 }
 0x250   :  { %v756_v47 = vmul.f32 %v11415_v25, %v11415_v25  ;;  %v979_v26 = vmul.f32 %v11388_v2, %v978_v41  ;;  %v16333_v41 = vld [vmem:[#allocation155_spill] sm:$0xff]  ;;  %v16334_v12 = vld [vmem:[#allocation157_spill] sm:$0xff] }
 0x251   :  { %v11453_v10 = vpop.f32.mrf.mxu1  ;;  %3679 = vmatmul.bf16.gmra.mxu0 %v16333_v41  ;;  %3900 = vmatpush.bf16.msrb.mxu1 %v7254_v5 }
 0x252   :  { %v772_v38 = vsub.f32 %v740_v37, %v756_v47  ;;  %5275 = vperm.xlu2 %7970, %v5201_v53   ;;  %v11472_v36 = vpop.eup %7993  ;;  %v7110_v53 = vor.u32 %v7842_v51, %v7109_v50  ;;  %v983_v37 = vsel %vm982_vm4, %v11388_v2, %v979_v26  ;;  %7623 = vmatmul.msk.bf16.gmra.mxu1 %vm3038_vm1, %v16334_v12  ;;  %v16335_v51 = vld [vmem:[#allocation30_spill] sm:$0xff] }
 0x253   :  { %v985_v3 = vmul.f32 %v11472_v36, %v11396_v14  ;;  %3777 = vmatmul.bf16.gmra.mxu2 %v16335_v51  ;;  %v7494_v50 = vor.u32 %v7938_v58, %v7493_v59  ;;  %v11495_v35 = vmul.f32 %v983_v37, %v822_v55  ;;  %v11497_v39 = vmul.f32 %v983_v37, %v823_v49  ;;  %v7349_v49 = vld [vmem:[%s15514_s1 + $0x428] sm:$0xf]  ;;  %v7902_v55 = vld [vmem:[%s15514_s1 + $0x434] sm:$0xf0] }
 0x254   :  { %v11439_v27 = vpop.f32.mrf.mxu3  ;;  %v11490_v47 = vadd.f32 1e-05, %v772_v38  ;;  %v11499_v41 = vmul.f32 %v983_v37, %v824_v19  ;;  %v11501_v2 = vmul.f32 %v983_v37, %v825_v44  ;;  %3826 = vmatmul.bf16.gmra.mxu3 %v16256_v43  ;;  %5065 = vperm.xlu1 %7969, %v5031_v11   ;;  %v7238_v51 = vor.u32 %v7874_v1, %v7237_v21  ;;  %v7093_v44 = vld [vmem:[%s15514_s1 + $0x228] sm:$0xf]  ;;  %v16340_v11 = vld [vmem:[#allocation74_spill] sm:$0xff] }
 0x255   :  { %16336 = vst [vmem:[#allocation20_spill] sm:$0xff] %v11495_v35  ;;  %v11504_v26 = vpop.permute.xlu2 %1705  ;;  %v986_v38 = vmul.f32 %v11472_v36, %v985_v3  ;;  %3950 = vmatpush.bf16.msrb.mxu2 %v7366_v60  ;;  %3852 = vmatpush.bf16.msrb.mxu0 %v7110_v53  ;;  %v7350_v60 = vor.u32 %v7902_v55, %v7349_v49  ;;  %v7838_v21 = vld [vmem:[%s15514_s1 + $0x234] sm:$0xf0]  ;;  %v7477_v1 = vld [vmem:[%s15514_s1 + $0x528] sm:$0xf]  ;;  %vm991_vm5 = vweird.f32 %v11472_v36  ;;  %v16342_v43 = vld [vmem:[#allocation26_spill] sm:$0xff] }
 0x256   :  { %16337 = vst [vmem:[#allocation51_spill] sm:$0xff] %v11497_v39  ;;  %7995 = vrsqrt.f32 %v11490_v47  ;;  %v11508_v59 = vpop.f32.mrf.mxu2  ;;  %v3428_v5 = vadd.f32 %v16340_v11, %v11504_v26  ;;  %3999 = vmatpush.bf16.msrb.mxu3 %v7494_v50  ;;  %v11529_v37 = vpop.f32.mrf.mxu0  ;;  %v7221_v53 = vld [vmem:[%s15514_s1 + $0x328] sm:$0xf]  ;;  %v7870_v50 = vld [vmem:[%s15514_s1 + $0x334] sm:$0xf0]  ;;  %3901 = vmatpush.bf16.msrb.mxu1 %v7238_v51  ;;  %v7094_v11 = vor.u32 %v7838_v21, %v7093_v44  ;;  %v16343_v51 = vld [vmem:[#allocation70_spill] sm:$0xff]  ;;  %vm1000_vm9 = vweird.f32 %v11490_v47 }
 0x257   :  { %16338 = vst [vmem:[#allocation200_spill] sm:$0xff] %v11499_v41  ;;  %v987_v19 = vmul.f32 0.5, %v986_v38  ;;  %v7934_v38 = vld [vmem:[%s15514_s1 + $0x534] sm:$0xf0]  ;;  %v7222_v39 = vor.u32 %v7870_v50, %v7221_v53  ;;  %v826_v12 = vsub.f32 %v16342_v43, %v11371_v61  ;;  %v827_v44 = vsub.f32 %v16343_v51, %v11371_v61  ;;  %vm992_vm7 = vmor %vm990_vm6, %vm991_vm5  ;;  %v16351_v51 = vld [vmem:[#allocation171_spill] sm:$0xff] }
 0x258   :  { %16339 = vst [vmem:[#allocation69_spill] sm:$0xff] %v11501_v2  ;;  %v3477_v55 = vadd.f32 %v11297_v31, %v3428_v5  ;;  %v5034_v2 = vld [vmem:[%s15520_s8 + $0x38] sm:$0xff]  ;;  %v7478_v41 = vor.u32 %v7934_v38, %v7477_v1  ;;  %v16344_v5 = vld [vmem:[#allocation78_spill] sm:$0xff]  ;;  %v829_v21 = vsub.f32 %v10816_v30, %v11371_v61 }
 0x259   :  { %v11531_v3 = vpop.f32.mrf.mxu1  ;;  %v988_v49 = vsub.f32 1.5, %v987_v19  ;;  %3951 = vmatpush.bf16.msrb.mxu2 %v7350_v60  ;;  %3853 = vmatpush.bf16.msrb.mxu0 %v7094_v11  ;;  %v828_v60 = vsub.f32 %v16344_v5, %v11371_v61 }
 0x25a   :  { %16341 = vst [vmem:[#allocation74_spill] sm:$0xff] %v11531_v3  ;;  %v3526_v31 = vadd.f32 %v11299_v29, %v3477_v55  ;;  %4000 = vmatpush.bf16.msrb.mxu3 %v7478_v41  ;;  %v11564_v1 = vpop.permute.xlu1 %1695  ;;  %3902 = vmatpush.bf16.msrb.mxu1 %v7222_v39  ;;  %v16352_v39 = vld [vmem:[#allocation42_spill] sm:$0xff] }
 0x25b   :  { %v989_v3 = vmul.f32 %v11472_v36, %v988_v49  ;;  %v11551_v19 = vpop.permute.xlu0 %1715  ;;  %16345 = vst [vmem:[#allocation26_spill] sm:$0xff] %v11564_v1 }
 0x25c   :  { %v11521_v58 = vpop.f32.mrf.mxu3  ;;  %v7996_v35 = vpop.eup %7995  ;;  %5080 = vperm.xlu1 %7969, %v5034_v2   ;;  %v16350_v2 = vld [vmem:[#allocation169_spill] sm:$0xff]  ;;  %v11591_v5 = vadd.f32 %v11323_v7, %v3526_v31  ;;  %v833_v7 = vsub.f32 %v10805_v6, %v11415_v25 }
 0x25d   :  { %v995_v43 = vmul.f32 %v7996_v35, %v11490_v47  ;;  %v993_v14 = vsel %vm992_vm7, %v11472_v36, %v989_v3  ;;  %v11578_v3 = vpop.permute.xlu2 %1720  ;;  %vm1001_vm8 = vweird.f32 %v7996_v35 }
 0x25e   :  { %v11566_v29 = vmul.f32 %v993_v14, %v826_v12  ;;  %v11568_v38 = vmul.f32 %v993_v14, %v827_v44  ;;  %v11570_v53 = vmul.f32 %v993_v14, %v828_v60  ;;  %v11572_v50 = vmul.f32 %v993_v14, %v829_v21  ;;  %v11574_v30 = vpop.f32.mrf.mxu2  ;;  %v3489_v41 = vpop.f32.mrf.mxu0  ;;  %v5037_v12 = vld [vmem:[%s15520_s8 + $0x50] sm:$0xff]  ;;  %vm1002_vm10 = vmor %vm1000_vm9, %vm1001_vm8 }
 0x25f   :  { %v996_v61 = vmul.f32 %v7996_v35, %v995_v43  ;;  %v830_v43 = vsub.f32 %v10716_v42, %v11415_v25  ;;  %v831_v14 = vsub.f32 %v10720_v20, %v11415_v25 }
 0x260   :  { %16346 = vst [vmem:[#allocation70_spill] sm:$0xff] %v11566_v29 }
 0x261   :  { %16347 = vst [vmem:[#allocation78_spill] sm:$0xff] %v11568_v38  ;;  %v3538_v55 = vpop.f32.mrf.mxu1  ;;  %v997_v36 = vmul.f32 0.5, %v996_v61  ;;  %3684 = vmatmul.bf16.gmra.mxu0 %v16350_v2  ;;  %v832_v61 = vsub.f32 %v10750_v8, %v11415_v25  ;;  %v16358_v8 = vld [vmem:[#allocation218_spill] sm:$0xff]  ;;  %v5040_v25 = vld [vmem:[%s15520_s8 + $0x68] sm:$0xff] }
 0x262   :  { %16348 = vst [vmem:[#allocation272_spill] sm:$0xff] %v11570_v53  ;;  %7624 = vmatmul.msk.bf16.gmra.mxu1 %vm3038_vm1, %v16351_v51  ;;  %v11604_v47 = vpop.permute.xlu1 %1710  ;;  %v3423_v38 = vadd.f32 %v16358_v8, %v11564_v1  ;;  %v3436_v8 = vadd.f32 %v10946_v23, %v11578_v3 }
 0x263   :  { %16349 = vst [vmem:[#allocation273_spill] sm:$0xff] %v11572_v50  ;;  %v998_v11 = vsub.f32 1.5, %v997_v36  ;;  %3782 = vmatmul.bf16.gmra.mxu2 %v16352_v39  ;;  %v11587_v44 = vpop.permute.xlu0 %1730 }
 0x264   :  { %v11576_v49 = vpop.f32.mrf.mxu3  ;;  %16353 = vst [vmem:[#allocation169_spill] sm:$0xff] %v11587_v44  ;;  %3831 = vmatmul.bf16.gmra.mxu3 %v16273_v24  ;;  %v3441_v21 = vadd.f32 %v10978_v4, %v11587_v44  ;;  %5095 = vperm.xlu1 %7969, %v5037_v12  }
 0x265   :  { %v999_v60 = vmul.f32 %v7996_v35, %v998_v11 }
 0x266   :  { %v3587_v31 = vpop.f32.mrf.mxu2  ;;  %v3491_v20 = vpop.f32.mrf.mxu0  ;;  %v3490_v6 = vadd.f32 %v3489_v41, %v3441_v21  ;;  %v7898_v41 = vld [vmem:[%s15514_s1 + $0x414] sm:$0xf0]  ;;  %v7077_v21 = vld [vmem:[%s15514_s1 + $0x208] sm:$0xf] }
 0x267   :  { %v1003_v36 = vsel %vm1002_vm10, %v7996_v35, %v999_v60  ;;  %v11619_v35 = vpop.permute.xlu2 %1735  ;;  %v3431_v60 = vadd.f32 %v10856_v45, %v11604_v47  ;;  %v3472_v45 = vadd.f32 %v11261_v63, %v3423_v38  ;;  %v7205_v63 = vld [vmem:[%s15514_s1 + $0x308] sm:$0xf]  ;;  %v7866_v38 = vld [vmem:[%s15514_s1 + $0x314] sm:$0xf0] }
 0x268   :  { %v11606_v4 = vmul.f32 %v1003_v36, %v830_v43  ;;  %v11608_v12 = vmul.f32 %v1003_v36, %v831_v14  ;;  %v11610_v42 = vmul.f32 %v1003_v36, %v832_v61  ;;  %v11612_v50 = vmul.f32 %v1003_v36, %v833_v7  ;;  %16359 = vst [vmem:[#allocation218_spill] sm:$0xff] %v11619_v35  ;;  %v7333_v43 = vld [vmem:[%s15514_s1 + $0x408] sm:$0xf]  ;;  %v7834_v61 = vld [vmem:[%s15514_s1 + $0x214] sm:$0xf0] }
 0x269   :  { %v3540_v53 = vpop.f32.mrf.mxu1  ;;  %v3433_v14 = vadd.f32 %v10901_v52, %v11551_v19  ;;  %v3539_v7 = vadd.f32 %v3538_v55, %v3490_v6  ;;  %v7461_v52 = vld [vmem:[%s15514_s1 + $0x508] sm:$0xf]  ;;  %v7930_v36 = vld [vmem:[%s15514_s1 + $0x514] sm:$0xf0]  ;;  %v3480_v55 = vadd.f32 %v11343_v28, %v3431_v60  ;;  %v3521_v44 = vadd.f32 %v11263_v33, %v3472_v45  ;;  %v16360_v60 = vld [vmem:[#allocation182_spill] sm:$0xff] }
 0x26a   :  { %16354 = vst [vmem:[#allocation274_spill] sm:$0xff] %v11606_v4  ;;  %v7078_v4 = vor.u32 %v7834_v61, %v7077_v21  ;;  %v7462_v39 = vor.u32 %v7930_v36, %v7461_v52  ;;  %v3485_v28 = vadd.f32 %v11451_v62, %v3436_v8  ;;  %v11674_v33 = vadd.f32 %v11331_v32, %v11591_v5  ;;  %v16364_v36 = vld [vmem:[#allocation194_spill] sm:$0xff] }
 0x26b   :  { %16355 = vst [vmem:[#allocation275_spill] sm:$0xff] %v11608_v12  ;;  %v3588_v6 = vadd.f32 %v3587_v31, %v3539_v7  ;;  %v7334_v12 = vor.u32 %v7898_v41, %v7333_v43  ;;  %v3482_v23 = vadd.f32 %v11390_v46, %v3433_v14  ;;  %v5187_v46 = vld [vmem:[%s15521_s9] sm:$0xff]  ;;  %v3529_v62 = vadd.f32 %v11345_v57, %v3480_v55 }
 0x26c   :  { %v3636_v11 = vpop.f32.mrf.mxu3  ;;  %16356 = vst [vmem:[#allocation276_spill] sm:$0xff] %v11610_v42  ;;  %5110 = vperm.xlu1 %7969, %v5040_v25   ;;  %3854 = vmatpush.bf16.msrb.mxu0 %v7078_v4  ;;  %v3570_v4 = vadd.f32 %v11269_v48, %v3521_v44  ;;  %v3534_v57 = vadd.f32 %v11453_v10, %v3485_v28  ;;  %v5190_v10 = vld [vmem:[%s15521_s9 + $0x18] sm:$0xff] }
 0x26d   :  { %16357 = vst [vmem:[#allocation277_spill] sm:$0xff] %v11612_v50  ;;  %v3443_v50 = vadd.f32 %v11015_v34, %v11619_v35  ;;  %v11660_v51 = vadd.f32 %v3636_v11, %v3588_v6  ;;  %3952 = vmatpush.bf16.msrb.mxu2 %v7334_v12  ;;  %v7206_v35 = vor.u32 %v7866_v38, %v7205_v63  ;;  %v16362_v11 = vld [vmem:[#allocation60_spill] sm:$0xff]  ;;  %v16365_v63 = vld [vmem:[#allocation195_spill] sm:$0xff] }
 0x26e   :  { %v3589_v42 = vpop.f32.mrf.mxu2  ;;  %v11656_v24 = vpop.f32.mrf.mxu0  ;;  %4001 = vmatpush.bf16.msrb.mxu3 %v7462_v39  ;;  %v11681_v39 = vadd.f32 %v11277_v17, %v3570_v4  ;;  %v3578_v12 = vadd.f32 %v11378_v54, %v3529_v62  ;;  %v3531_v48 = vadd.f32 %v11392_v13, %v3482_v23  ;;  %v3583_v13 = vadd.f32 %v11508_v59, %v3534_v57  ;;  %v16366_v38 = vld [vmem:[#allocation79_spill] sm:$0xff]  ;;  %v7063_v62 = vld [vmem:[%s15514_s1 + $0x1f8] sm:$0xf0] }
 0x26f   :  { %v3492_v29 = vadd.f32 %v3491_v20, %v3443_v50  ;;  %v16361_v50 = vld [vmem:[#allocation184_spill] sm:$0xff]  ;;  %3903 = vmatpush.bf16.msrb.mxu1 %v7206_v35  ;;  %v7828_v4 = vld [vmem:[%s15514_s1 + $0x1ec] sm:$0xf]  ;;  %v7191_v57 = vld [vmem:[%s15514_s1 + $0x2f8] sm:$0xf0] }
 0x270   :  { %v11695_v20 = vadd.f32 %v11386_v40, %v3578_v12  ;;  %v3580_v17 = vadd.f32 %v11425_v15, %v3531_v48  ;;  %v11706_v41 = vadd.f32 %v11521_v58, %v3583_v13  ;;  %v11708_v40 = vpop.permute.xlu2 %1750  ;;  %v5193_v58 = vld [vmem:[%s15521_s9 + $0x30] sm:$0xff]  ;;  %v7066_v12 = vor.u32 %v7828_v4, %v7063_v62  ;;  %v7966_v48 = vld [vmem:[%s15514_s1 + $0x634] sm:$0xf0]  ;;  %v6935_v13 = vld [vmem:[%s15514_s1 + $0xf8] sm:$0xf0] }
 0x271   :  { %v11658_v34 = vpop.f32.mrf.mxu1  ;;  %v3541_v31 = vadd.f32 %v3540_v53, %v3492_v29  ;;  %3689 = vmatmul.bf16.gmra.mxu0 %v16360_v60  ;;  %v11677_v29 = vpop.permute.xlu0 %1745  ;;  %16363 = vst [vmem:[#allocation184_spill] sm:$0xff] %v11708_v40  ;;  %v3451_v59 = vadd.f32 %v11156_v0, %v11708_v40  ;;  %v16367_v62 = vld [vmem:[#allocation4_spill] sm:$0xff] }
 0x272   :  { %7625 = vmatmul.msk.bf16.gmra.mxu1 %vm3038_vm1, %v16361_v50  ;;  %v11700_v14 = vadd.f32 %v11439_v27, %v3580_v17  ;;  %4141 = vmatpush.bf16.msra.mxu2 %v7066_v12 }
 0x273   :  { %3787 = vmatmul.bf16.gmra.mxu2 %v16362_v11  ;;  %v3590_v53 = vadd.f32 %v3589_v42, %v3541_v31  ;;  %v3448_v42 = vadd.f32 %v11112_v18, %v11677_v29  ;;  %v5200_v31 = vld [vmem:[%s15521_s9 + $0x68] sm:$0xff] }
 0x274   :  { %v3638_v25 = vpop.f32.mrf.mxu3  ;;  %3836 = vmatmul.bf16.gmra.mxu3 %v16284_v56  ;;  %5205 = vperm.xlu1 %7969, %v5187_v46   ;;  %v11732_v46 = vmul.f32 0.001953125, %v11488_v22  ;;  %v7860_v22 = vld [vmem:[%s15514_s1 + $0x2ec] sm:$0xf] }
 0x275   :  { %v11685_v44 = vadd.f32 %v3638_v25, %v3590_v53  ;;  %v7605_v53 = vld [vmem:[%s15514_s1 + $0x628] sm:$0xf] }
 0x276   :  { %v11687_v32 = vpop.f32.mrf.mxu2  ;;  %v3496_v35 = vpop.f32.mrf.mxu0  ;;  %v7606_v17 = vor.u32 %v7966_v48, %v7605_v53  ;;  %v5195_v53 = vld [vmem:[%s15521_s9 + $0x40] sm:$0xff] }
 0x277   :  { %v3497_v43 = vadd.f32 %v3496_v35, %v3448_v42  ;;  %v7194_v35 = vor.u32 %v7860_v22, %v7191_v57  ;;  %v16369_v22 = vld [vmem:[#allocation5_spill] sm:$0xff]  ;;  %v16370_v57 = vld [vmem:[#allocation96_spill] sm:$0xff] }
 0x278   :  { %4049 = vmatpush.bf16.msra.mxu0 %v7606_v17 }
 0x279   :  { %v3545_v54 = vpop.f32.mrf.mxu1  ;;  %4190 = vmatpush.bf16.msra.mxu3 %v7194_v35  ;;  %v16371_v35 = vld [vmem:[#allocation99_spill] sm:$0xff] }
 0x27a   :  { %v3546_v18 = vadd.f32 %v3545_v54, %v3497_v43  ;;  %v7796_v54 = vld [vmem:[%s15514_s1 + $0xec] sm:$0xf] }
 0x27b   :  { %v7824_v43 = vld [vmem:[%s15514_s1 + $0x1cc] sm:$0xf] }
 0x27c   :  { %v11690_v5 = vpop.f32.mrf.mxu3  ;;  %5220 = vperm.xlu1 %7969, %v5190_v10  }
 0x27e   :  { %v3594_v15 = vpop.f32.mrf.mxu2  ;;  %v3499_v45 = vpop.f32.mrf.mxu0 }
 0x27f   :  { %v3595_v21 = vadd.f32 %v3594_v15, %v3546_v18  ;;  %v3500_v52 = vadd.f32 %v3499_v45, %v3451_v59  ;;  %v6938_v15 = vor.u32 %v7796_v54, %v6935_v13  ;;  %v7175_v59 = vld [vmem:[%s15514_s1 + $0x2d8] sm:$0xf0]  ;;  %v757_v45 = vmul.f32 %v11732_v46, %v11732_v46  ;;  %v7820_v54 = vld [vmem:[%s15514_s1 + $0x1ac] sm:$0xf] }
 0x280   :  { %v7031_v13 = vld [vmem:[%s15514_s1 + $0x1b8] sm:$0xf0] }
 0x281   :  { %v3548_v27 = vpop.f32.mrf.mxu1  ;;  %3694 = vmatmul.bf16.gmra.mxu0 %v16364_v36  ;;  %4092 = vmatpush.bf16.msra.mxu1 %v6938_v15 }
 0x282   :  { %v3549_v8 = vadd.f32 %v3548_v27, %v3500_v52  ;;  %7626 = vmatmul.msk.bf16.gmra.mxu1 %vm3038_vm1, %v16365_v63 }
 0x283   :  { %3792 = vmatmul.bf16.gmra.mxu2 %v16366_v38 }
 0x284   :  { %v3643_v61 = vpop.f32.mrf.mxu3  ;;  %3841 = vmatmul.bf16.gmra.mxu3 %v16297_v16  ;;  %5235 = vperm.xlu1 %7969, %v5193_v58  }
 0x285   :  { %v11712_v7 = vadd.f32 %v3643_v61, %v3595_v21  ;;  %v7047_v21 = vld [vmem:[%s15514_s1 + $0x1d8] sm:$0xf0]  ;;  %v7856_v61 = vld [vmem:[%s15514_s1 + $0x2cc] sm:$0xf] }
 0x286   :  { %v3597_v0 = vpop.f32.mrf.mxu2  ;;  %v11722_v25 = vpop.f32.mrf.mxu0 }
 0x287   :  { %v3598_v55 = vadd.f32 %v3597_v0, %v3549_v8  ;;  %v7050_v8 = vor.u32 %v7824_v43, %v7047_v21  ;;  %v7792_v0 = vld [vmem:[%s15514_s1 + $0xcc] sm:$0xf] }
 0x288   :  { %v7852_v43 = vld [vmem:[%s15514_s1 + $0x2ac] sm:$0xf] }
 0x289   :  { %v11724_v23 = vpop.f32.mrf.mxu1  ;;  %4142 = vmatpush.bf16.msra.mxu2 %v7050_v8  ;;  %v16373_v8 = vld [vmem:[#allocation265_spill] sm:$0xff] }
 0x28c   :  { %v3646_v6 = vpop.f32.mrf.mxu3  ;;  %5270 = vperm.xlu1 %7969, %v5200_v31   ;;  %v7178_v31 = vor.u32 %v7856_v61, %v7175_v59  ;;  %v7034_v61 = vor.u32 %v7820_v54, %v7031_v13  ;;  %v7159_v59 = vld [vmem:[%s15514_s1 + $0x2b8] sm:$0xf0]  ;;  %v16375_v13 = vld [vmem:[#allocation227_spill] sm:$0xff] }
 0x28d   :  { %v11726_v28 = vadd.f32 %v3646_v6, %v3598_v55  ;;  %v725_v18 = vpop.xlane.xlu1 %724  ;;  %v6919_v55 = vld [vmem:[%s15514_s1 + $0xd8] sm:$0xf0] }
 0x28e   :  { %v11752_v42 = vpop.f32.mrf.mxu2  ;;  %v741_v27 = vmul.f32 0.001953125, %v725_v18  ;;  %v3660_v52 = vpop.f32.mrf.mxu0  ;;  %v6922_v12 = vor.u32 %v7792_v0, %v6919_v55  ;;  %4191 = vmatpush.bf16.msra.mxu3 %v7178_v31  ;;  %v16372_v18 = vld [vmem:[#allocation263_spill] sm:$0xff]  ;;  %4143 = vmatpush.bf16.msra.mxu2 %v7034_v61 }
 0x28f   :  { %v3661_v6 = vadd.f32 %v3660_v52, %v11229_v9  ;;  %v7162_v52 = vor.u32 %v7852_v43, %v7159_v59  ;;  %v7788_v55 = vld [vmem:[%s15514_s1 + $0xac] sm:$0xf] }
 0x290   :  { %v773_v4 = vsub.f32 %v741_v27, %v757_v45  ;;  %4093 = vmatpush.bf16.msra.mxu1 %v6922_v12 }
 0x291   :  { %v3709_v58 = vpop.f32.mrf.mxu1  ;;  %3855 = vmatmul.bf16.vlgmr.msrb.gmra.mxu0 %v16367_v62 }
 0x292   :  { %v11787_v48 = vadd.f32 %v3709_v58, %v3661_v6  ;;  %3904 = vmatmul.bf16.vlgmr.msrb.gmra.mxu1 %v16369_v22  ;;  %v853_v17 = vadd.f32 1e-05, %v773_v4  ;;  %v6903_v6 = vld [vmem:[%s15514_s1 + $0xb8] sm:$0xf0]  ;;  %4192 = vmatpush.bf16.msra.mxu3 %v7162_v52  ;;  %v16378_v52 = vld [vmem:[#allocation256_spill] sm:$0xff] }
 0x293   :  { %3953 = vmatmul.bf16.vlgmr.msrb.gmra.mxu2 %v16370_v57  ;;  %v6906_v31 = vor.u32 %v7788_v55, %v6903_v6 }
 0x294   :  { %v11763_v10 = vpop.f32.mrf.mxu3  ;;  %16368 = vst [vmem:[#allocation60_spill] sm:$0xff] %v11787_v48  ;;  %4002 = vmatmul.bf16.vlgmr.msrb.gmra.mxu3 %v16371_v35  ;;  %5245 = vperm.xlu1 %7969, %v5195_v53   ;;  %7997 = vrsqrt.f32 %v853_v17  ;;  %vm1010_vm12 = vweird.f32 %v853_v17 }
 0x295   :  { %4094 = vmatpush.bf16.msra.mxu1 %v6906_v31 }
 0x296   :  { %v3758_v9 = vpop.f32.mrf.mxu2  ;;  %v3662_v45 = vpop.f32.mrf.mxu0 }
 0x297   :  { %v3759_v15 = vadd.f32 %v3758_v9, %v16372_v18  ;;  %v3663_v0 = vadd.f32 %v3662_v45, %v16373_v8  ;;  %v16376_v8 = vld [vmem:[#allocation266_spill] sm:$0xff]  ;;  %v16377_v18 = vld [vmem:[#allocation8_spill] sm:$0xff] }
 0x299   :  { %v3711_v27 = vpop.f32.mrf.mxu1 }
 0x29a   :  { %v11814_v4 = vadd.f32 %v3711_v27, %v3663_v0  ;;  %v7998_v53 = vpop.eup %7997  ;;  %v16379_v27 = vld [vmem:[#allocation257_spill] sm:$0xff] }
 0x29b   :  { %v1005_v12 = vmul.f32 %v7998_v53, %v853_v17  ;;  %v16380_v0 = vsub.f32 %v16378_v52, %v16379_v27  ;;  %vm1011_vm11 = vweird.f32 %v7998_v53  ;;  %v16387_v27 = vld [vmem:[#allocation94_spill] sm:$0xff]  ;;  %v16388_v17 = vld [vmem:[#allocation97_spill] sm:$0xff] }
 0x29c   :  { %v3807_v21 = vpop.f32.mrf.mxu3  ;;  %16374 = vst [vmem:[#allocation195_spill] sm:$0xff] %v11814_v4  ;;  %vm1012_vm13 = vmor %vm1010_vm12, %vm1011_vm11  ;;  %v7143_v4 = vld [vmem:[%s15514_s1 + $0x298] sm:$0xf0] }
 0x29d   :  { %v11805_v58 = vadd.f32 %v3807_v21, %v3759_v15  ;;  %v1006_v54 = vmul.f32 %v7998_v53, %v1005_v12  ;;  %v11824_v55 = vadd.f32 1e-05, %v16380_v0  ;;  %v16382_v12 = vld [vmem:[#allocation9_spill] sm:$0xff]  ;;  %v836_v0 = vsub.f32 %v16387_v27, %v11732_v46 }
 0x29e   :  { %v3760_v9 = vpop.f32.mrf.mxu2  ;;  %v3665_v21 = vpop.f32.mrf.mxu0 }
 0x29f   :  { %v3761_v43 = vadd.f32 %v3760_v9, %v16375_v13  ;;  %v1007_v59 = vmul.f32 0.5, %v1006_v54  ;;  %v3666_v48 = vadd.f32 %v3665_v21, %v16376_v8  ;;  %v16383_v9 = vld [vmem:[#allocation108_spill] sm:$0xff]  ;;  %v16384_v54 = vld [vmem:[#allocation111_spill] sm:$0xff]  ;;  %7999 = vrsqrt.f32 %v11824_v55 }
 0x2a0   :  { %v7816_v8 = vld [vmem:[%s15514_s1 + $0x18c] sm:$0xf]  ;;  %vm970_vm15 = vweird.f32 %v11824_v55 }
 0x2a1   :  { %v3714_v61 = vpop.f32.mrf.mxu1  ;;  %3860 = vmatmul.bf16.gmra.mxu0 %v16377_v18  ;;  %v1008_v6 = vsub.f32 1.5, %v1007_v59  ;;  %v16386_v59 = vld [vmem:[#allocation27_spill] sm:$0xff] }
 0x2a2   :  { %v11826_v31 = vadd.f32 %v3714_v61, %v3666_v48  ;;  %3909 = vmatmul.bf16.gmra.mxu1 %v16382_v12  ;;  %v7015_v48 = vld [vmem:[%s15514_s1 + $0x198] sm:$0xf0]  ;;  %v7848_v61 = vld [vmem:[%s15514_s1 + $0x28c] sm:$0xf]  ;;  %v835_v52 = vsub.f32 %v16386_v59, %v11732_v46 }
 0x2a3   :  { %3958 = vmatmul.bf16.gmra.mxu2 %v16383_v9  ;;  %v1009_v21 = vmul.f32 %v7998_v53, %v1008_v6  ;;  %v837_v6 = vsub.f32 %v16388_v17, %v11732_v46  ;;  %v16389_v9 = vld [vmem:[#allocation264_spill] sm:$0xff]  ;;  %v7146_v35 = vor.u32 %v7848_v61, %v7143_v4  ;;  %v7784_v4 = vld [vmem:[%s15514_s1 + $0x8c] sm:$0xf] }
 0x2a4   :  { %v3809_v15 = vpop.f32.mrf.mxu3  ;;  %16381 = vst [vmem:[#allocation4_spill] sm:$0xff] %v11826_v31  ;;  %4007 = vmatmul.bf16.gmra.mxu3 %v16384_v54  ;;  %v7018_v31 = vor.u32 %v7816_v8, %v7015_v48 }
 0x2a5   :  { %v11817_v45 = vadd.f32 %v3809_v15, %v3761_v43  ;;  %v16385_v43 = vld [vmem:[#allocation115_spill] sm:$0xff]  ;;  %v1013_v54 = vsel %vm1012_vm13, %v7998_v53, %v1009_v21  ;;  %4193 = vmatpush.bf16.msra.mxu3 %v7146_v35  ;;  %v11874_v61 = vpop.eup %7999 }
 0x2a6   :  { %v834_v15 = vsub.f32 %v16385_v43, %v11732_v46  ;;  %v3763_v43 = vpop.f32.mrf.mxu2  ;;  %v11853_v59 = vpop.permute.xlu1 %1725  ;;  %v11857_v57 = vmul.f32 %v1013_v54, %v835_v52  ;;  %v11859_v46 = vmul.f32 %v1013_v54, %v836_v0  ;;  %v11861_v8 = vmul.f32 %v1013_v54, %v837_v6  ;;  %4144 = vmatpush.bf16.msra.mxu2 %v7018_v31 }
 0x2a7   :  { %v3764_v12 = vadd.f32 %v3763_v43, %v16389_v9  ;;  %v3667_v48 = vpop.f32.mrf.mxu0  ;;  %v16399_v43 = vld [vmem:[#allocation246_spill] sm:$0xff]  ;;  %vm971_vm14 = vweird.f32 %v11874_v61 }
 0x2a8   :  { %v11855_v27 = vmul.f32 %v1013_v54, %v834_v15  ;;  %16391 = vst [vmem:[#allocation266_spill] sm:$0xff] %v11857_v57  ;;  %v3668_v53 = vadd.f32 %v3667_v48, %v11681_v39  ;;  %v6887_v15 = vld [vmem:[%s15514_s1 + $0x98] sm:$0xf0]  ;;  %vm972_vm0 = vmor %vm970_vm15, %vm971_vm14 }
 0x2a9   :  { %16392 = vst [vmem:[#allocation8_spill] sm:$0xff] %v11859_v46  ;;  %v3716_v17 = vpop.f32.mrf.mxu1  ;;  %v6890_v54 = vor.u32 %v7784_v4, %v6887_v15  ;;  %v965_v4 = vmul.f32 %v11874_v61, %v11824_v55  ;;  %v16405_v46 = vld [vmem:[#allocation122_spill] sm:$0xff] }
 0x2aa   :  { %16390 = vst [vmem:[#allocation265_spill] sm:$0xff] %v11855_v27  ;;  %v11872_v21 = vadd.f32 %v3716_v17, %v3668_v53 }
 0x2ab   :  { %16393 = vst [vmem:[#allocation256_spill] sm:$0xff] %v11861_v8  ;;  %4095 = vmatpush.bf16.msra.mxu1 %v6890_v54  ;;  %v16400_v54 = vld [vmem:[#allocation268_spill] sm:$0xff] }
 0x2ac   :  { %v3812_v13 = vpop.f32.mrf.mxu3  ;;  %16394 = vst [vmem:[#allocation257_spill] sm:$0xff] %v11872_v21 }
 0x2ad   :  { %v11863_v22 = vadd.f32 %v3812_v13, %v3764_v12  ;;  %v16395_v13 = vld [vmem:[#allocation250_spill] sm:$0xff]  ;;  %v16396_v12 = vld [vmem:[#allocation251_spill] sm:$0xff] }
 0x2ae   :  { %v3765_v31 = vpop.f32.mrf.mxu2  ;;  %v16397_v52 = vsub.f32 %v16395_v13, %v16396_v12  ;;  %v11882_v6 = vpop.permute.xlu1 %1740  ;;  %v16401_v12 = vld [vmem:[#allocation16_spill] sm:$0xff] }
 0x2af   :  { %v3766_v35 = vadd.f32 %v3765_v31, %v11564_v1  ;;  %16398 = vst [vmem:[#allocation115_spill] sm:$0xff] %v11882_v6  ;;  %v3446_v48 = vadd.f32 %v16399_v43, %v11882_v6  ;;  %v3670_v17 = vpop.f32.mrf.mxu0  ;;  %v16404_v43 = vld [vmem:[#allocation121_spill] sm:$0xff] }
 0x2b0   :  { %v11879_v39 = vadd.f32 1e-05, %v16397_v52  ;;  %v3671_v8 = vadd.f32 %v3670_v17, %v16400_v54  ;;  %v16403_v52 = vld [vmem:[#allocation17_spill] sm:$0xff] }
 0x2b1   :  { %v3719_v53 = vpop.f32.mrf.mxu1  ;;  %v3495_v13 = vadd.f32 %v11656_v24, %v3446_v48  ;;  %3865 = vmatmul.bf16.gmra.mxu0 %v16401_v12  ;;  %v7812_v24 = vld [vmem:[%s15514_s1 + $0x16c] sm:$0xf] }
 0x2b2   :  { %8001 = vrsqrt.f32 %v11879_v39  ;;  %v11894_v31 = vadd.f32 %v3719_v53, %v3671_v8  ;;  %3914 = vmatmul.bf16.gmra.mxu1 %v16403_v52  ;;  %v7589_v8 = vld [vmem:[%s15514_s1 + $0x608] sm:$0xf]  ;;  %v7844_v53 = vld [vmem:[%s15514_s1 + $0x26c] sm:$0xf]  ;;  %vm960_vm3 = vweird.f32 %v11879_v39 }
 0x2b3   :  { %3963 = vmatmul.bf16.gmra.mxu2 %v16404_v43  ;;  %v3544_v57 = vadd.f32 %v11658_v34, %v3495_v13  ;;  %v7962_v34 = vld [vmem:[%s15514_s1 + $0x614] sm:$0xf0]  ;;  %v16406_v13 = vld [vmem:[#allocation267_spill] sm:$0xff] }
 0x2b4   :  { %v3814_v0 = vpop.f32.mrf.mxu3  ;;  %16402 = vst [vmem:[#allocation27_spill] sm:$0xff] %v11894_v31  ;;  %4012 = vmatmul.bf16.gmra.mxu3 %v16405_v46  ;;  %v16408_v46 = vld [vmem:[#allocation262_spill] sm:$0xff] }
 0x2b5   :  { %v11888_v15 = vadd.f32 %v3814_v0, %v3766_v35  ;;  %v966_v35 = vmul.f32 %v11874_v61, %v965_v4  ;;  %v6999_v0 = vld [vmem:[%s15514_s1 + $0x178] sm:$0xf0]  ;;  %v3593_v54 = vadd.f32 %v11687_v32, %v3544_v57  ;;  %v7780_v57 = vld [vmem:[%s15514_s1 + $0x6c] sm:$0xf] }
 0x2b6   :  { %v3768_v48 = vpop.f32.mrf.mxu2  ;;  %v7002_v17 = vor.u32 %v7812_v24, %v6999_v0  ;;  %v7127_v4 = vld [vmem:[%s15514_s1 + $0x278] sm:$0xf0]  ;;  %v11921_v21 = vpop.permute.xlu1 %1755  ;;  %v7590_v24 = vor.u32 %v7962_v34, %v7589_v8  ;;  %v16410_v34 = vld [vmem:[#allocation255_spill] sm:$0xff] }
 0x2b7   :  { %v3769_v27 = vadd.f32 %v3768_v48, %v16406_v13  ;;  %16407 = vst [vmem:[#allocation94_spill] sm:$0xff] %v11921_v21  ;;  %v7130_v0 = vor.u32 %v7844_v53, %v7127_v4  ;;  %v3453_v43 = vadd.f32 %v16408_v46, %v11921_v21  ;;  %v3672_v52 = vpop.f32.mrf.mxu0  ;;  %v11926_v9 = vadd.f32 %v11690_v5, %v3593_v54  ;;  %v6871_v46 = vld [vmem:[%s15514_s1 + $0x78] sm:$0xf0]  ;;  %v16413_v54 = vld [vmem:[#allocation187_spill] sm:$0xff] }
 0x2b8   :  { %4145 = vmatpush.bf16.msra.mxu2 %v7002_v17  ;;  %v11928_v16 = vpop.eup %8001  ;;  %v3673_v32 = vadd.f32 %v3672_v52, %v11674_v33  ;;  %4050 = vmatpush.bf16.msra.mxu0 %v7590_v24  ;;  %v967_v8 = vmul.f32 0.5, %v966_v35  ;;  %v6874_v48 = vor.u32 %v7780_v57, %v6871_v46  ;;  %v16411_v35 = vld [vmem:[#allocation18_spill] sm:$0xff]  ;;  %v820_v24 = vsub.f32 %v16413_v54, %v16410_v34  ;;  %v16424_v54 = vld [vmem:[#allocation235_spill] sm:$0xff] }
 0x2b9   :  { %v3721_v1 = vpop.f32.mrf.mxu1  ;;  %4194 = vmatpush.bf16.msra.mxu3 %v7130_v0  ;;  %v3502_v5 = vadd.f32 %v11722_v25, %v3453_v43  ;;  %v955_v33 = vmul.f32 %v11928_v16, %v11879_v39  ;;  %v818_v53 = vsub.f32 %v16411_v35, %v16410_v34  ;;  %v16412_v25 = vld [vmem:[#allocation54_spill] sm:$0xff]  ;;  %vm961_vm2 = vweird.f32 %v11928_v16 }
 0x2ba   :  { %v11940_v17 = vadd.f32 %v3721_v1, %v3673_v32  ;;  %4096 = vmatpush.bf16.msra.mxu1 %v6874_v48  ;;  %v819_v1 = vsub.f32 %v16412_v25, %v16410_v34  ;;  %v16414_v0 = vld [vmem:[#allocation190_spill] sm:$0xff]  ;;  %vm962_vm4 = vmor %vm960_vm3, %vm961_vm2 }
 0x2bb   :  { %v956_v46 = vmul.f32 %v11928_v16, %v955_v33 }
 0x2bc   :  { %v3817_v31 = vpop.f32.mrf.mxu3  ;;  %16409 = vst [vmem:[#allocation97_spill] sm:$0xff] %v11940_v17  ;;  %v16449_v17 = vld [vmem:[#allocation63_spill] sm:$0xff] }
 0x2bd   :  { %v11930_v38 = vadd.f32 %v3817_v31, %v3769_v27  ;;  %v968_v27 = vsub.f32 1.5, %v967_v8  ;;  %v3551_v31 = vadd.f32 %v11724_v23, %v3502_v5  ;;  %v821_v23 = vsub.f32 %v16414_v0, %v16410_v34 }
 0x2be   :  { %v3770_v43 = vpop.f32.mrf.mxu2 }
 0x2bf   :  { %v969_v52 = vmul.f32 %v11874_v61, %v968_v27  ;;  %v3600_v4 = vadd.f32 %v11752_v42, %v3551_v31  ;;  %v3771_v32 = vadd.f32 %v3770_v43, %v11504_v26  ;;  %v3675_v8 = vpop.f32.mrf.mxu0  ;;  %v16423_v43 = vld [vmem:[#allocation142_spill] sm:$0xff] }
 0x2c0   :  { %v3676_v34 = vadd.f32 %v3675_v8, %v11695_v20  ;;  %v6983_v20 = vld [vmem:[%s15514_s1 + $0x158] sm:$0xf0] }
 0x2c1   :  { %v973_v55 = vsel %vm972_vm0, %v11874_v61, %v969_v52  ;;  %v3724_v5 = vpop.f32.mrf.mxu1  ;;  %v11961_v48 = vadd.f32 %v11763_v10, %v3600_v4  ;;  %v16419_v61 = vld [vmem:[#allocation24_spill] sm:$0xff]  ;;  %v16421_v52 = vld [vmem:[#allocation25_spill] sm:$0xff]  ;;  %v7840_v4 = vld [vmem:[%s15514_s1 + $0x24c] sm:$0xf] }
 0x2c2   :  { %v11963_v42 = vmul.f32 %v973_v55, %v818_v53  ;;  %v11965_v27 = vmul.f32 %v973_v55, %v819_v1  ;;  %v11970_v35 = vmul.f32 %v973_v55, %v820_v24  ;;  %v11972_v25 = vmul.f32 %v973_v55, %v821_v23  ;;  %3870 = vmatmul.bf16.gmra.mxu0 %v16419_v61  ;;  %v16422_v10 = vld [vmem:[#allocation141_spill] sm:$0xff]  ;;  %v7808_v1 = vld [vmem:[%s15514_s1 + $0x14c] sm:$0xf] }
 0x2c3   :  { %v11975_v33 = vadd.f32 %v3724_v5, %v3676_v34  ;;  %3919 = vmatmul.bf16.gmra.mxu1 %v16421_v52  ;;  %3968 = vmatmul.bf16.gmra.mxu2 %v16422_v10  ;;  %v957_v53 = vmul.f32 0.5, %v956_v46  ;;  %v3438_v24 = vadd.f32 %v16424_v54, %v11853_v59  ;;  %v6986_v23 = vor.u32 %v7808_v1, %v6983_v20  ;;  %v7776_v1 = vld [vmem:[%s15514_s1 + $0x4c] sm:$0xf]  ;;  %v6855_v20 = vld [vmem:[%s15514_s1 + $0x58] sm:$0xf0] }
 0x2c4   :  { %v3819_v57 = vpop.f32.mrf.mxu3  ;;  %16415 = vst [vmem:[#allocation250_spill] sm:$0xff] %v11963_v42  ;;  %4017 = vmatmul.bf16.gmra.mxu3 %v16423_v43  ;;  %v16435_v42 = vld [vmem:[#allocation154_spill] sm:$0xff] }
 0x2c5   :  { %16416 = vst [vmem:[#allocation251_spill] sm:$0xff] %v11965_v27  ;;  %v11967_v31 = vadd.f32 %v3819_v57, %v3771_v32  ;;  %v7111_v32 = vld [vmem:[%s15514_s1 + $0x258] sm:$0xf0]  ;;  %v958_v8 = vsub.f32 1.5, %v957_v53  ;;  %4146 = vmatpush.bf16.msra.mxu2 %v6986_v23  ;;  %v3487_v54 = vadd.f32 %v11529_v37, %v3438_v24  ;;  %v16426_v23 = vld [vmem:[#allocation74_spill] sm:$0xff]  ;;  %v16432_v27 = vld [vmem:[#allocation32_spill] sm:$0xff] }
 0x2c6   :  { %16417 = vst [vmem:[#allocation246_spill] sm:$0xff] %v11970_v35  ;;  %v3773_v0 = vpop.f32.mrf.mxu2  ;;  %v7114_v46 = vor.u32 %v7840_v4, %v7111_v32  ;;  %v6858_v4 = vor.u32 %v7776_v1, %v6855_v20 }
 0x2c7   :  { %16418 = vst [vmem:[#allocation268_spill] sm:$0xff] %v11972_v25  ;;  %v3774_v57 = vadd.f32 %v3773_v0, %v11604_v47  ;;  %v3677_v5 = vpop.f32.mrf.mxu0  ;;  %v959_v0 = vmul.f32 %v11928_v16, %v958_v8  ;;  %v3536_v32 = vadd.f32 %v16426_v23, %v3487_v54  ;;  %v16429_v8 = vld [vmem:[#allocation177_spill] sm:$0xff] }
 0x2c8   :  { %16420 = vst [vmem:[#allocation16_spill] sm:$0xff] %v11975_v33  ;;  %v3678_v35 = vadd.f32 %v3677_v5, %v11700_v14  ;;  %4195 = vmatpush.bf16.msra.mxu3 %v7114_v46  ;;  %4097 = vmatpush.bf16.msra.mxu1 %v6858_v4  ;;  %v16428_v5 = vld [vmem:[#allocation19_spill] sm:$0xff]  ;;  %v16430_v54 = vld [vmem:[#allocation185_spill] sm:$0xff] }
 0x2c9   :  { %v3726_v34 = vpop.f32.mrf.mxu1  ;;  %v963_v46 = vsel %vm962_vm4, %v11928_v16, %v959_v0  ;;  %v3585_v16 = vadd.f32 %v11574_v30, %v3536_v32 }
 0x2ca   :  { %v12005_v53 = vadd.f32 %v3726_v34, %v3678_v35  ;;  %v16427_v35 = vld [vmem:[#allocation249_spill] sm:$0xff] }
 0x2cb   :  { %v814_v34 = vsub.f32 %v16428_v5, %v16427_v35  ;;  %v815_v1 = vsub.f32 %v16429_v8, %v16427_v35  ;;  %v816_v4 = vsub.f32 %v16430_v54, %v16427_v35  ;;  %v16434_v5 = vld [vmem:[#allocation33_spill] sm:$0xff]  ;;  %v3634_v32 = vadd.f32 %v11576_v49, %v3585_v16 }
 0x2cc   :  { %v3822_v55 = vpop.f32.mrf.mxu3  ;;  %16425 = vst [vmem:[#allocation267_spill] sm:$0xff] %v12005_v53 }
 0x2cd   :  { %v11995_v25 = vadd.f32 %v3822_v55, %v3774_v57 }
 0x2ce   :  { %v3775_v14 = vpop.f32.mrf.mxu2 }
 0x2cf   :  { %v3776_v57 = vadd.f32 %v3775_v14, %v11551_v19  ;;  %v3680_v37 = vpop.f32.mrf.mxu0  ;;  %v16431_v14 = vld [vmem:[#allocation55_spill] sm:$0xff] }
 0x2d0   :  { %v3681_v39 = vadd.f32 %v3680_v37, %v11706_v41  ;;  %v817_v23 = vsub.f32 %v16431_v14, %v16427_v35  ;;  %v16438_v41 = vld [vmem:[#allocation155_spill] sm:$0xff]  ;;  %v12035_v37 = vmul.f32 %v963_v46, %v816_v4  ;;  %v7095_v14 = vld [vmem:[%s15514_s1 + $0x238] sm:$0xf0] }
 0x2d1   :  { %v3729_v24 = vpop.f32.mrf.mxu1 }
 0x2d2   :  { %3875 = vmatmul.bf16.gmra.mxu0 %v16432_v27  ;;  %v12026_v0 = vadd.f32 %v3729_v24, %v3681_v39  ;;  %16439 = vst [vmem:[#allocation54_spill] sm:$0xff] %v12035_v37  ;;  %v12037_v8 = vmul.f32 %v963_v46, %v817_v23  ;;  %v7804_v24 = vld [vmem:[%s15514_s1 + $0x12c] sm:$0xf] }
 0x2d3   :  { %3924 = vmatmul.bf16.gmra.mxu1 %v16434_v5  ;;  %3973 = vmatmul.bf16.gmra.mxu2 %v16435_v42 }
 0x2d4   :  { %v3824_v55 = vpop.f32.mrf.mxu3  ;;  %16433 = vst [vmem:[#allocation262_spill] sm:$0xff] %v12026_v0  ;;  %4022 = vmatmul.bf16.gmra.mxu3 %v16438_v41  ;;  %v6823_v0 = vld [vmem:[%s15514_s1 + $0x18] sm:$0xf0] }
 0x2d5   :  { %v12017_v20 = vadd.f32 %v3824_v55, %v3776_v57  ;;  %v12030_v57 = vmul.f32 %v963_v46, %v814_v34  ;;  %v12032_v55 = vmul.f32 %v963_v46, %v815_v1  ;;  %16440 = vst [vmem:[#allocation187_spill] sm:$0xff] %v12037_v8  ;;  %v6967_v34 = vld [vmem:[%s15514_s1 + $0x138] sm:$0xf0]  ;;  %v7836_v1 = vld [vmem:[%s15514_s1 + $0x22c] sm:$0xf] }
 0x2d6   :  { %v3778_v35 = vpop.f32.mrf.mxu2  ;;  %v6970_v4 = vor.u32 %v7804_v24, %v6967_v34  ;;  %v7098_v16 = vor.u32 %v7836_v1, %v7095_v14  ;;  %v6839_v8 = vld [vmem:[%s15514_s1 + $0x38] sm:$0xf0] }
 0x2d7   :  { %16436 = vst [vmem:[#allocation255_spill] sm:$0xff] %v12030_v57  ;;  %v3779_v54 = vadd.f32 %v3778_v35, %v11578_v3  ;;  %v3682_v46 = vpop.f32.mrf.mxu0  ;;  %v7772_v35 = vld [vmem:[%s15514_s1 + $0x2c] sm:$0xf]  ;;  %v16442_v14 = vld [vmem:[#allocation45_spill] sm:$0xff] }
 0x2d8   :  { %16437 = vst [vmem:[#allocation18_spill] sm:$0xff] %v12032_v55  ;;  %v3683_v23 = vadd.f32 %v3682_v46, %v3634_v32  ;;  %4147 = vmatpush.bf16.msra.mxu2 %v6970_v4  ;;  %v6842_v37 = vor.u32 %v7772_v35, %v6839_v8  ;;  %4196 = vmatpush.bf16.msra.mxu3 %v7098_v16  ;;  %v16444_v4 = vld [vmem:[#allocation47_spill] sm:$0xff]  ;;  %v16445_v8 = vld [vmem:[#allocation168_spill] sm:$0xff] }
 0x2d9   :  { %v3731_v39 = vpop.f32.mrf.mxu1  ;;  %v7800_v35 = vld [vmem:[%s15514_s1 + $0x10c] sm:$0xf] }
 0x2da   :  { %v12061_v55 = vadd.f32 %v3731_v39, %v3683_v23  ;;  %4098 = vmatpush.bf16.msra.mxu1 %v6842_v37  ;;  %v16446_v39 = vld [vmem:[#allocation169_spill] sm:$0xff] }
 0x2dc   :  { %v3827_v30 = vpop.f32.mrf.mxu3  ;;  %16441 = vst [vmem:[#allocation190_spill] sm:$0xff] %v12061_v55  ;;  %v7768_v55 = vld [vmem:[%s15514_s1 + $0xc] sm:$0xf] }
 0x2dd   :  { %v12053_v49 = vadd.f32 %v3827_v30, %v3779_v54  ;;  %v6826_v53 = vor.u32 %v7768_v55, %v6823_v0  ;;  %v16452_v0 = vld [vmem:[#allocation181_spill] sm:$0xff] }
 0x2de   :  { %v3780_v24 = vpop.f32.mrf.mxu2  ;;  %v7319_v55 = vld [vmem:[%s15514_s1 + $0x3f8] sm:$0xf0] }
 0x2df   :  { %v3781_v54 = vadd.f32 %v3780_v24, %v11853_v59  ;;  %v3685_v32 = vpop.f32.mrf.mxu0  ;;  %v7832_v24 = vld [vmem:[%s15514_s1 + $0x20c] sm:$0xf]  ;;  %4099 = vmatpush.bf16.msra.mxu1 %v6826_v53 }
 0x2e0   :  { %v3686_v46 = vadd.f32 %v3685_v32, %v11660_v51  ;;  %v6951_v51 = vld [vmem:[%s15514_s1 + $0x118] sm:$0xf0]  ;;  %v7956_v53 = vld [vmem:[%s15514_s1 + $0x5ec] sm:$0xf] }
 0x2e1   :  { %v3734_v34 = vpop.f32.mrf.mxu1  ;;  %v6954_v32 = vor.u32 %v7800_v35, %v6951_v51 }
 0x2e2   :  { %3880 = vmatmul.bf16.gmra.mxu0 %v16442_v14  ;;  %v12068_v57 = vadd.f32 %v3734_v34, %v3686_v46  ;;  %v7079_v34 = vld [vmem:[%s15514_s1 + $0x218] sm:$0xf0] }
 0x2e3   :  { %3929 = vmatmul.bf16.gmra.mxu1 %v16444_v4  ;;  %3978 = vmatmul.bf16.gmra.mxu2 %v16445_v8 }
 0x2e4   :  { %v3829_v30 = vpop.f32.mrf.mxu3  ;;  %16443 = vst [vmem:[#allocation24_spill] sm:$0xff] %v12068_v57  ;;  %4027 = vmatmul.bf16.gmra.mxu3 %v16350_v2  ;;  %v7082_v57 = vor.u32 %v7832_v24, %v7079_v34  ;;  %4148 = vmatpush.bf16.msra.mxu2 %v6954_v32  ;;  %v16451_v32 = vld [vmem:[#allocation64_spill] sm:$0xff] }
 0x2e5   :  { %v12064_v1 = vadd.f32 %v3829_v30, %v3781_v54 }
 0x2e6   :  { %v3783_v37 = vpop.f32.mrf.mxu2  ;;  %4197 = vmatpush.bf16.msra.mxu3 %v7082_v57 }
 0x2e7   :  { %v3784_v23 = vadd.f32 %v3783_v37, %v16446_v39  ;;  %v3687_v54 = vpop.f32.mrf.mxu0 }
 0x2e8   :  { %v3688_v37 = vadd.f32 %v3687_v54, %v11685_v44 }
 0x2e9   :  { %v3736_v30 = vpop.f32.mrf.mxu1 }
 0x2ea   :  { %v12095_v35 = vadd.f32 %v3736_v30, %v3688_v37  ;;  %v7964_v30 = vld [vmem:[%s15514_s1 + $0x62c] sm:$0xf]  ;;  %v7607_v37 = vld [vmem:[%s15514_s1 + $0x638] sm:$0xf0] }
 0x2ec   :  { %v3832_v16 = vpop.f32.mrf.mxu3  ;;  %16447 = vst [vmem:[#allocation25_spill] sm:$0xff] %v12095_v35 }
 0x2ed   :  { %v12086_v46 = vadd.f32 %v3832_v16, %v3784_v23  ;;  %v16448_v23 = vld [vmem:[#allocation218_spill] sm:$0xff] }
 0x2ee   :  { %v3785_v51 = vpop.f32.mrf.mxu2 }
 0x2ef   :  { %v3786_v16 = vadd.f32 %v3785_v51, %v16448_v23  ;;  %v3690_v44 = vpop.f32.mrf.mxu0 }
 0x2f0   :  { %v3691_v34 = vadd.f32 %v3690_v44, %v11926_v9  ;;  %v7892_v9 = vld [vmem:[%s15514_s1 + $0x3ec] sm:$0xf]  ;;  %v7610_v44 = vor.u32 %v7964_v30, %v7607_v37 }
 0x2f1   :  { %v3739_v24 = vpop.f32.mrf.mxu1 }
 0x2f2   :  { %3885 = vmatmul.bf16.gmra.mxu0 %v16449_v17  ;;  %v12102_v39 = vadd.f32 %v3739_v24, %v3691_v34  ;;  %4392 = vmatpush.bf16.msrb.mxu3 %v7610_v44 }
 0x2f3   :  { %3934 = vmatmul.bf16.gmra.mxu1 %v16451_v32  ;;  %3983 = vmatmul.bf16.gmra.mxu2 %v16452_v0 }
 0x2f4   :  { %v3834_v33 = vpop.f32.mrf.mxu3  ;;  %16450 = vst [vmem:[#allocation141_spill] sm:$0xff] %v12102_v39  ;;  %4032 = vmatmul.bf16.gmra.mxu3 %v16360_v60  ;;  %v7924_v60 = vld [vmem:[%s15514_s1 + $0x4ec] sm:$0xf] }
 0x2f5   :  { %v12098_v54 = vadd.f32 %v3834_v33, %v3786_v16  ;;  %v7575_v33 = vld [vmem:[%s15514_s1 + $0x5f8] sm:$0xf0]  ;;  %v7322_v16 = vor.u32 %v7892_v9, %v7319_v55 }
 0x2f6   :  { %v7578_v57 = vor.u32 %v7956_v53, %v7575_v33  ;;  %v3788_v51 = vpop.f32.mrf.mxu2  ;;  %v7447_v9 = vld [vmem:[%s15514_s1 + $0x4f8] sm:$0xf0] }
 0x2f7   :  { %v3789_v24 = vadd.f32 %v3788_v51, %v11882_v6  ;;  %v3692_v53 = vpop.f32.mrf.mxu0  ;;  %4239 = vmatpush.bf16.msrb.mxu0 %v7322_v16  ;;  %v7450_v55 = vor.u32 %v7924_v60, %v7447_v9  ;;  %v16456_v6 = vld [vmem:[#allocation85_spill] sm:$0xff]  ;;  %v16457_v60 = vld [vmem:[#allocation192_spill] sm:$0xff] }
 0x2f8   :  { %4337 = vmatpush.bf16.msrb.mxu2 %v7578_v57  ;;  %v3693_v35 = vadd.f32 %v3692_v53, %v11712_v7 }
 0x2f9   :  { %v3741_v33 = vpop.f32.mrf.mxu1  ;;  %4288 = vmatpush.bf16.msrb.mxu1 %v7450_v55  ;;  %v7303_v55 = vld [vmem:[%s15514_s1 + $0x3d8] sm:$0xf0] }
 0x2fa   :  { %v12135_v30 = vadd.f32 %v3741_v33, %v3693_v35  ;;  %v7952_v35 = vld [vmem:[%s15514_s1 + $0x5cc] sm:$0xf]  ;;  %v7559_v33 = vld [vmem:[%s15514_s1 + $0x5d8] sm:$0xf0] }
 0x2fb   :  { %v7562_v9 = vor.u32 %v7952_v35, %v7559_v33  ;;  %v7920_v35 = vld [vmem:[%s15514_s1 + $0x4cc] sm:$0xf]  ;;  %v7431_v33 = vld [vmem:[%s15514_s1 + $0x4d8] sm:$0xf0] }
 0x2fc   :  { %v3837_v34 = vpop.f32.mrf.mxu3  ;;  %16453 = vst [vmem:[#allocation142_spill] sm:$0xff] %v12135_v30 }
 0x2fd   :  { %v12126_v39 = vadd.f32 %v3837_v34, %v3789_v24  ;;  %v16454_v34 = vld [vmem:[#allocation83_spill] sm:$0xff]  ;;  %4338 = vmatpush.bf16.msrb.mxu2 %v7562_v9 }
 0x2fe   :  { %v3790_v57 = vpop.f32.mrf.mxu2 }
 0x2ff   :  { %v3791_v37 = vadd.f32 %v3790_v57, %v11677_v29  ;;  %v3695_v16 = vpop.f32.mrf.mxu0 }
 0x300   :  { %v3696_v7 = vadd.f32 %v3695_v16, %v11726_v28  ;;  %v7888_v28 = vld [vmem:[%s15514_s1 + $0x3cc] sm:$0xf] }
 0x301   :  { %v3744_v44 = vpop.f32.mrf.mxu1 }
 0x302   :  { %3890 = vmatmul.bf16.gmra.mxu0 %v16454_v34  ;;  %v12142_v53 = vadd.f32 %v3744_v44, %v3696_v7 }
 0x303   :  { %3939 = vmatmul.bf16.gmra.mxu1 %v16456_v6  ;;  %3988 = vmatmul.bf16.gmra.mxu2 %v16457_v60  ;;  %v16460_v60 = vld [vmem:[#allocation2_spill] sm:$0xff] }
 0x304   :  { %v3839_v51 = vpop.f32.mrf.mxu3  ;;  %16455 = vst [vmem:[#allocation235_spill] sm:$0xff] %v12142_v53  ;;  %4037 = vmatmul.bf16.gmra.mxu3 %v16364_v36 }
 0x305   :  { %v12138_v24 = vadd.f32 %v3839_v51, %v3791_v37  ;;  %v7306_v37 = vor.u32 %v7888_v28, %v7303_v55  ;;  %v7434_v28 = vor.u32 %v7920_v35, %v7431_v33  ;;  %v16461_v35 = vld [vmem:[#allocation3_spill] sm:$0xff] }
 0x306   :  { %v3793_v57 = vpop.f32.mrf.mxu2 }
 0x307   :  { %v3794_v51 = vadd.f32 %v3793_v57, %v11708_v40  ;;  %v3697_v44 = vpop.f32.mrf.mxu0  ;;  %4240 = vmatpush.bf16.msrb.mxu0 %v7306_v37  ;;  %4289 = vmatpush.bf16.msrb.mxu1 %v7434_v28 }
 0x308   :  { %v3698_v30 = vadd.f32 %v3697_v44, %v11961_v48  ;;  %v16459_v44 = vld [vmem:[#allocation101_spill] sm:$0xff] }
 0x309   :  { %v3746_v7 = vpop.f32.mrf.mxu1 }
 0x30a   :  { %v12169_v55 = vadd.f32 %v3746_v7, %v3698_v30  ;;  %v7948_v30 = vld [vmem:[%s15514_s1 + $0x5ac] sm:$0xf]  ;;  %v7543_v7 = vld [vmem:[%s15514_s1 + $0x5b8] sm:$0xf0] }
 0x30b   :  { %v7546_v33 = vor.u32 %v7948_v30, %v7543_v7  ;;  %v7415_v30 = vld [vmem:[%s15514_s1 + $0x4b8] sm:$0xf0] }
 0x30c   :  { %v3842_v16 = vpop.f32.mrf.mxu3  ;;  %16458 = vst [vmem:[#allocation74_spill] sm:$0xff] %v12169_v55  ;;  %v16463_v55 = vld [vmem:[#allocation6_spill] sm:$0xff] }
 0x30d   :  { %v12160_v53 = vadd.f32 %v3842_v16, %v3794_v51  ;;  %4339 = vmatpush.bf16.msrb.mxu2 %v7546_v33 }
 0x30e   :  { %v3795_v9 = vpop.f32.mrf.mxu2 }
 0x30f   :  { %v3796_v57 = vadd.f32 %v3795_v9, %v11921_v21  ;;  %v3856_v51 = vpop.f32.mrf.mxu0  ;;  %v16464_v21 = vld [vmem:[#allocation7_spill] sm:$0xff] }
 0x310   :  { %v3857_v48 = vadd.f32 %v3856_v51, %v11805_v58  ;;  %v7884_v58 = vld [vmem:[%s15514_s1 + $0x3ac] sm:$0xf] }
 0x311   :  { %v3905_v16 = vpop.f32.mrf.mxu1 }
 0x312   :  { %7627 = vmatmul.msk.bf16.vlgmr.msra.gmra.mxu0 %vm3038_vm1, %v16459_v44  ;;  %v3906_v36 = vadd.f32 %v3905_v16, %v3857_v48 }
 0x313   :  { %4100 = vmatmul.bf16.vlgmr.msra.gmra.mxu1 %v16460_v60  ;;  %4149 = vmatmul.bf16.vlgmr.msra.gmra.mxu2 %v16461_v35  ;;  %v7287_v60 = vld [vmem:[%s15514_s1 + $0x3b8] sm:$0xf0]  ;;  %v7916_v35 = vld [vmem:[%s15514_s1 + $0x4ac] sm:$0xf] }
 0x314   :  { %v3844_v37 = vpop.f32.mrf.mxu3  ;;  %4198 = vmatmul.bf16.vlgmr.msra.gmra.mxu3 %v16367_v62  ;;  %v7290_v9 = vor.u32 %v7884_v58, %v7287_v60  ;;  %v7418_v7 = vor.u32 %v7916_v35, %v7415_v30 }
 0x315   :  { %v12172_v40 = vadd.f32 %v3844_v37, %v3796_v57 }
 0x316   :  { %v3954_v28 = vpop.f32.mrf.mxu2  ;;  %4241 = vmatpush.bf16.msrb.mxu0 %v7290_v9  ;;  %4290 = vmatpush.bf16.msrb.mxu1 %v7418_v7 }
 0x317   :  { %v3955_v62 = vadd.f32 %v3954_v28, %v3906_v36  ;;  %v3858_v37 = vpop.f32.mrf.mxu0 }
 0x318   :  { %v3859_v48 = vadd.f32 %v3858_v37, %v11817_v45 }
 0x319   :  { %v3907_v51 = vpop.f32.mrf.mxu1 }
 0x31a   :  { %v3908_v58 = vadd.f32 %v3907_v51, %v3859_v48  ;;  %v7944_v51 = vld [vmem:[%s15514_s1 + $0x58c] sm:$0xf]  ;;  %v7527_v48 = vld [vmem:[%s15514_s1 + $0x598] sm:$0xf0] }
 0x31b   :  { %v7530_v35 = vor.u32 %v7944_v51, %v7527_v48 }
 0x31c   :  { %v4003_v57 = vpop.f32.mrf.mxu3 }
 0x31d   :  { %v12192_v16 = vadd.f32 %v4003_v57, %v3955_v62  ;;  %v16462_v57 = vld [vmem:[#allocation113_spill] sm:$0xff]  ;;  %4340 = vmatpush.bf16.msrb.mxu2 %v7530_v35 }
 0x31e   :  { %v3956_v36 = vpop.f32.mrf.mxu2 }
 0x31f   :  { %v3957_v33 = vadd.f32 %v3956_v36, %v3908_v58  ;;  %v3861_v28 = vpop.f32.mrf.mxu0 }
 0x320   :  { %v3862_v45 = vadd.f32 %v3861_v28, %v11863_v22  ;;  %v7880_v22 = vld [vmem:[%s15514_s1 + $0x38c] sm:$0xf] }
 0x321   :  { %v3910_v9 = vpop.f32.mrf.mxu1  ;;  %v7912_v28 = vld [vmem:[%s15514_s1 + $0x48c] sm:$0xf] }
 0x322   :  { %7628 = vmatmul.msk.bf16.gmra.mxu0 %vm3038_vm1, %v16462_v57  ;;  %v3911_v37 = vadd.f32 %v3910_v9, %v3862_v45  ;;  %v7399_v9 = vld [vmem:[%s15514_s1 + $0x498] sm:$0xf0] }
 0x323   :  { %4105 = vmatmul.bf16.gmra.mxu1 %v16463_v55  ;;  %4154 = vmatmul.bf16.gmra.mxu2 %v16464_v21  ;;  %v7271_v55 = vld [vmem:[%s15514_s1 + $0x398] sm:$0xf0]  ;;  %v7402_v45 = vor.u32 %v7912_v28, %v7399_v9 }
 0x324   :  { %v4005_v60 = vpop.f32.mrf.mxu3  ;;  %4203 = vmatmul.bf16.gmra.mxu3 %v16377_v18  ;;  %v7274_v30 = vor.u32 %v7880_v22, %v7271_v55  ;;  %v7255_v9 = vld [vmem:[%s15514_s1 + $0x378] sm:$0xf0] }
 0x325   :  { %v12201_v62 = vadd.f32 %v4005_v60, %v3957_v33  ;;  %4291 = vmatpush.bf16.msrb.mxu1 %v7402_v45  ;;  %v7591_v45 = vld [vmem:[%s15514_s1 + $0x618] sm:$0xf0] }
 0x326   :  { %v3959_v21 = vpop.f32.mrf.mxu2  ;;  %4242 = vmatpush.bf16.msrb.mxu0 %v7274_v30  ;;  %v16465_v30 = vld [vmem:[#allocation126_spill] sm:$0xff] }
 0x327   :  { %v3960_v18 = vadd.f32 %v3959_v21, %v3911_v37  ;;  %v3863_v58 = vpop.f32.mrf.mxu0 }
 0x328   :  { %v3864_v60 = vadd.f32 %v3863_v58, %v11888_v15  ;;  %v16467_v58 = vld [vmem:[#allocation15_spill] sm:$0xff] }
 0x329   :  { %v3912_v36 = vpop.f32.mrf.mxu1 }
 0x32a   :  { %v3913_v51 = vadd.f32 %v3912_v36, %v3864_v60  ;;  %v7940_v36 = vld [vmem:[%s15514_s1 + $0x56c] sm:$0xf]  ;;  %v7511_v60 = vld [vmem:[%s15514_s1 + $0x578] sm:$0xf0] }
 0x32b   :  { %v7514_v28 = vor.u32 %v7940_v36, %v7511_v60  ;;  %v7908_v36 = vld [vmem:[%s15514_s1 + $0x46c] sm:$0xf]  ;;  %v7383_v60 = vld [vmem:[%s15514_s1 + $0x478] sm:$0xf0] }
 0x32c   :  { %v4008_v7 = vpop.f32.mrf.mxu3 }
 0x32d   :  { %v12221_v33 = vadd.f32 %v4008_v7, %v3960_v18  ;;  %v16466_v7 = vld [vmem:[#allocation14_spill] sm:$0xff]  ;;  %4341 = vmatpush.bf16.msrb.mxu2 %v7514_v28 }
 0x32e   :  { %v3961_v37 = vpop.f32.mrf.mxu2 }
 0x32f   :  { %v3962_v48 = vadd.f32 %v3961_v37, %v3913_v51  ;;  %v3866_v35 = vpop.f32.mrf.mxu0 }
 0x330   :  { %v3867_v15 = vadd.f32 %v3866_v35, %v11930_v38  ;;  %v7876_v38 = vld [vmem:[%s15514_s1 + $0x36c] sm:$0xf] }
 0x331   :  { %v3915_v55 = vpop.f32.mrf.mxu1  ;;  %v7258_v37 = vor.u32 %v7876_v38, %v7255_v9  ;;  %v7386_v38 = vor.u32 %v7908_v36, %v7383_v60  ;;  %v7239_v60 = vld [vmem:[%s15514_s1 + $0x358] sm:$0xf0] }
 0x332   :  { %7629 = vmatmul.msk.bf16.gmra.mxu0 %vm3038_vm1, %v16465_v30  ;;  %v3916_v18 = vadd.f32 %v3915_v55, %v3867_v15 }
 0x333   :  { %4110 = vmatmul.bf16.gmra.mxu1 %v16466_v7  ;;  %4159 = vmatmul.bf16.gmra.mxu2 %v16467_v58 }
 0x334   :  { %v4010_v22 = vpop.f32.mrf.mxu3  ;;  %4208 = vmatmul.bf16.gmra.mxu3 %v16401_v12  ;;  %v7960_v12 = vld [vmem:[%s15514_s1 + $0x60c] sm:$0xf]  ;;  %4243 = vmatpush.bf16.msrb.mxu0 %v7258_v37 }
 0x335   :  { %v12230_v21 = vadd.f32 %v4010_v22, %v3962_v48  ;;  %v7594_v48 = vor.u32 %v7960_v12, %v7591_v45  ;;  %4292 = vmatpush.bf16.msrb.mxu1 %v7386_v38 }
 0x336   :  { %v3964_v51 = vpop.f32.mrf.mxu2 }
 0x337   :  { %v3965_v22 = vadd.f32 %v3964_v51, %v3916_v18  ;;  %v3868_v55 = vpop.f32.mrf.mxu0  ;;  %4393 = vmatpush.bf16.msrb.mxu3 %v7594_v48  ;;  %v16468_v48 = vld [vmem:[#allocation12_spill] sm:$0xff] }
 0x338   :  { %v3869_v58 = vadd.f32 %v3868_v55, %v11967_v31  ;;  %v16470_v55 = vld [vmem:[#allocation23_spill] sm:$0xff] }
 0x339   :  { %v3917_v15 = vpop.f32.mrf.mxu1 }
 0x33a   :  { %v3918_v18 = vadd.f32 %v3917_v15, %v3869_v58  ;;  %v7936_v15 = vld [vmem:[%s15514_s1 + $0x54c] sm:$0xf]  ;;  %v7495_v58 = vld [vmem:[%s15514_s1 + $0x558] sm:$0xf0] }
 0x33b   :  { %v7498_v36 = vor.u32 %v7936_v15, %v7495_v58 }
 0x33c   :  { %v4013_v35 = vpop.f32.mrf.mxu3 }
 0x33d   :  { %v12256_v7 = vadd.f32 %v4013_v35, %v3965_v22  ;;  %v16469_v35 = vld [vmem:[#allocation21_spill] sm:$0xff]  ;;  %4342 = vmatpush.bf16.msrb.mxu2 %v7498_v36 }
 0x33e   :  { %v3966_v28 = vpop.f32.mrf.mxu2 }
 0x33f   :  { %v3967_v9 = vadd.f32 %v3966_v28, %v3918_v18  ;;  %v3871_v45 = vpop.f32.mrf.mxu0 }
 0x340   :  { %v3872_v31 = vadd.f32 %v3871_v45, %v11995_v25  ;;  %v7872_v25 = vld [vmem:[%s15514_s1 + $0x34c] sm:$0xf] }
 0x341   :  { %v3920_v51 = vpop.f32.mrf.mxu1  ;;  %v7242_v18 = vor.u32 %v7872_v25, %v7239_v60 }
 0x342   :  { %7630 = vmatmul.msk.bf16.gmra.mxu0 %vm3038_vm1, %v16468_v48  ;;  %v3921_v22 = vadd.f32 %v3920_v51, %v3872_v31  ;;  %v7904_v31 = vld [vmem:[%s15514_s1 + $0x44c] sm:$0xf] }
 0x343   :  { %4115 = vmatmul.bf16.gmra.mxu1 %v16469_v35  ;;  %4164 = vmatmul.bf16.gmra.mxu2 %v16470_v55  ;;  %v7367_v35 = vld [vmem:[%s15514_s1 + $0x458] sm:$0xf0] }
 0x344   :  { %v4015_v12 = vpop.f32.mrf.mxu3  ;;  %4213 = vmatmul.bf16.gmra.mxu3 %v16419_v61  ;;  %4244 = vmatpush.bf16.msrb.mxu0 %v7242_v18  ;;  %v7370_v55 = vor.u32 %v7904_v31, %v7367_v35  ;;  %v16471_v18 = vld [vmem:[#allocation157_spill] sm:$0xff] }
 0x345   :  { %v12265_v37 = vadd.f32 %v4015_v12, %v3967_v9  ;;  %v7223_v35 = vld [vmem:[%s15514_s1 + $0x338] sm:$0xf0] }
 0x346   :  { %v3969_v38 = vpop.f32.mrf.mxu2  ;;  %4293 = vmatpush.bf16.msrb.mxu1 %v7370_v55 }
 0x347   :  { %v3970_v61 = vadd.f32 %v3969_v38, %v3921_v22  ;;  %v3873_v9 = vpop.f32.mrf.mxu0 }
 0x348   :  { %v3874_v51 = vadd.f32 %v3873_v9, %v12017_v20  ;;  %v16473_v9 = vld [vmem:[#allocation31_spill] sm:$0xff] }
 0x349   :  { %v3922_v12 = vpop.f32.mrf.mxu1 }
 0x34a   :  { %v3923_v15 = vadd.f32 %v3922_v12, %v3874_v51  ;;  %v7932_v12 = vld [vmem:[%s15514_s1 + $0x52c] sm:$0xf]  ;;  %v7479_v51 = vld [vmem:[%s15514_s1 + $0x538] sm:$0xf0] }
 0x34b   :  { %v7482_v31 = vor.u32 %v7932_v12, %v7479_v51 }
 0x34c   :  { %v4018_v28 = vpop.f32.mrf.mxu3 }
 0x34d   :  { %v12285_v45 = vadd.f32 %v4018_v28, %v3970_v61  ;;  %v16472_v28 = vld [vmem:[#allocation30_spill] sm:$0xff]  ;;  %4343 = vmatpush.bf16.msrb.mxu2 %v7482_v31 }
 0x34e   :  { %v3971_v22 = vpop.f32.mrf.mxu2 }
 0x34f   :  { %v3972_v58 = vadd.f32 %v3971_v22, %v3923_v15  ;;  %v3876_v36 = vpop.f32.mrf.mxu0 }
 0x350   :  { %v3877_v20 = vadd.f32 %v3876_v36, %v12053_v49  ;;  %v7868_v49 = vld [vmem:[%s15514_s1 + $0x32c] sm:$0xf] }
 0x351   :  { %v3925_v60 = vpop.f32.mrf.mxu1  ;;  %v7226_v15 = vor.u32 %v7868_v49, %v7223_v35 }
 0x352   :  { %7631 = vmatmul.msk.bf16.gmra.mxu0 %vm3038_vm1, %v16471_v18  ;;  %v3926_v61 = vadd.f32 %v3925_v60, %v3877_v20  ;;  %v7900_v20 = vld [vmem:[%s15514_s1 + $0x42c] sm:$0xf] }
 0x353   :  { %4120 = vmatmul.bf16.gmra.mxu1 %v16472_v28  ;;  %4169 = vmatmul.bf16.gmra.mxu2 %v16473_v9  ;;  %v7351_v28 = vld [vmem:[%s15514_s1 + $0x438] sm:$0xf0] }
 0x354   :  { %v4020_v25 = vpop.f32.mrf.mxu3  ;;  %4218 = vmatmul.bf16.gmra.mxu3 %v16432_v27  ;;  %4245 = vmatpush.bf16.msrb.mxu0 %v7226_v15  ;;  %v7354_v9 = vor.u32 %v7900_v20, %v7351_v28  ;;  %v16474_v15 = vld [vmem:[#allocation171_spill] sm:$0xff]  ;;  %v7207_v28 = vld [vmem:[%s15514_s1 + $0x318] sm:$0xf0] }
 0x355   :  { %v12294_v38 = vadd.f32 %v4020_v25, %v3972_v58 }
 0x356   :  { %v3974_v55 = vpop.f32.mrf.mxu2  ;;  %4294 = vmatpush.bf16.msrb.mxu1 %v7354_v9 }
 0x357   :  { %v3975_v27 = vadd.f32 %v3974_v55, %v3926_v61  ;;  %v3878_v58 = vpop.f32.mrf.mxu0 }
 0x358   :  { %v3879_v60 = vadd.f32 %v3878_v58, %v12064_v1  ;;  %v16476_v58 = vld [vmem:[#allocation44_spill] sm:$0xff] }
 0x359   :  { %v3927_v25 = vpop.f32.mrf.mxu1 }
 0x35a   :  { %v3928_v12 = vadd.f32 %v3927_v25, %v3879_v60  ;;  %v7928_v25 = vld [vmem:[%s15514_s1 + $0x50c] sm:$0xf]  ;;  %v7463_v60 = vld [vmem:[%s15514_s1 + $0x518] sm:$0xf0] }
 0x35b   :  { %v7466_v20 = vor.u32 %v7928_v25, %v7463_v60 }
 0x35c   :  { %v4023_v22 = vpop.f32.mrf.mxu3 }
 0x35d   :  { %v12314_v36 = vadd.f32 %v4023_v22, %v3975_v27  ;;  %v16475_v22 = vld [vmem:[#allocation42_spill] sm:$0xff]  ;;  %4344 = vmatpush.bf16.msrb.mxu2 %v7466_v20 }
 0x35e   :  { %v3976_v61 = vpop.f32.mrf.mxu2 }
 0x35f   :  { %v3977_v51 = vadd.f32 %v3976_v61, %v3928_v12  ;;  %v3881_v31 = vpop.f32.mrf.mxu0 }
 0x360   :  { %v3882_v1 = vadd.f32 %v3881_v31, %v12086_v46  ;;  %v7864_v46 = vld [vmem:[%s15514_s1 + $0x30c] sm:$0xf] }
 0x361   :  { %v3930_v35 = vpop.f32.mrf.mxu1  ;;  %v7210_v12 = vor.u32 %v7864_v46, %v7207_v28 }
 0x362   :  { %7632 = vmatmul.msk.bf16.gmra.mxu0 %vm3038_vm1, %v16474_v15  ;;  %v3931_v27 = vadd.f32 %v3930_v35, %v3882_v1  ;;  %v7896_v1 = vld [vmem:[%s15514_s1 + $0x40c] sm:$0xf] }
 0x363   :  { %4125 = vmatmul.bf16.gmra.mxu1 %v16475_v22  ;;  %4174 = vmatmul.bf16.gmra.mxu2 %v16476_v58  ;;  %v7335_v22 = vld [vmem:[%s15514_s1 + $0x418] sm:$0xf0] }
 0x364   :  { %v4025_v49 = vpop.f32.mrf.mxu3  ;;  %4223 = vmatmul.bf16.gmra.mxu3 %v16442_v14  ;;  %4246 = vmatpush.bf16.msrb.mxu0 %v7210_v12  ;;  %v7338_v58 = vor.u32 %v7896_v1, %v7335_v22 }
 0x365   :  { %v12323_v55 = vadd.f32 %v4025_v49, %v3977_v51 }
 0x366   :  { %v3979_v9 = vpop.f32.mrf.mxu2  ;;  %4295 = vmatpush.bf16.msrb.mxu1 %v7338_v58 }
 0x367   :  { %v3980_v14 = vadd.f32 %v3979_v9, %v3931_v27  ;;  %v3883_v51 = vpop.f32.mrf.mxu0 }
 0x368   :  { %v3884_v35 = vadd.f32 %v3883_v51, %v12098_v54 }
 0x369   :  { %v3932_v49 = vpop.f32.mrf.mxu1 }
 0x36a   :  { %v3933_v25 = vadd.f32 %v3932_v49, %v3884_v35 }
 0x36c   :  { %v4028_v61 = vpop.f32.mrf.mxu3 }
 0x36d   :  { %v12343_v31 = vadd.f32 %v4028_v61, %v3980_v14 }
 0x36e   :  { %v3981_v27 = vpop.f32.mrf.mxu2 }
 0x36f   :  { %v3982_v60 = vadd.f32 %v3981_v27, %v3933_v25  ;;  %v3886_v20 = vpop.f32.mrf.mxu0 }
 0x370   :  { %v3887_v54 = vadd.f32 %v3886_v20, %v12126_v39  ;;  %v16477_v20 = vld [vmem:[#allocation79_spill] sm:$0xff] }
 0x371   :  { %v3935_v28 = vpop.f32.mrf.mxu1 }
 0x372   :  { %7633 = vmatmul.msk.bf16.gmra.mxu0 %vm3038_vm1, %v16361_v50  ;;  %v3936_v12 = vadd.f32 %v3935_v28, %v3887_v54  ;;  %v16478_v28 = vld [vmem:[#allocation82_spill] sm:$0xff] }
 0x373   :  { %4130 = vmatmul.bf16.gmra.mxu1 %v16362_v11  ;;  %4179 = vmatmul.bf16.gmra.mxu2 %v16284_v56 }
 0x374   :  { %v4030_v46 = vpop.f32.mrf.mxu3  ;;  %4228 = vmatmul.bf16.gmra.mxu3 %v16449_v17 }
 0x375   :  { %v12352_v9 = vadd.f32 %v4030_v46, %v3982_v60 }
 0x376   :  { %v3984_v14 = vpop.f32.mrf.mxu2 }
 0x377   :  { %v3985_v61 = vadd.f32 %v3984_v14, %v3936_v12  ;;  %v3888_v49 = vpop.f32.mrf.mxu0 }
 0x378   :  { %v3889_v22 = vadd.f32 %v3888_v49, %v12138_v24 }
 0x379   :  { %v3937_v35 = vpop.f32.mrf.mxu1 }
 0x37a   :  { %v3938_v39 = vadd.f32 %v3937_v35, %v3889_v22 }
 0x37c   :  { %v4033_v51 = vpop.f32.mrf.mxu3 }
 0x37d   :  { %v12360_v1 = vadd.f32 %v4033_v51, %v3985_v61 }
 0x37e   :  { %v3986_v58 = vpop.f32.mrf.mxu2 }
 0x37f   :  { %v3987_v25 = vadd.f32 %v3986_v58, %v3938_v39  ;;  %v3891_v60 = vpop.f32.mrf.mxu0 }
 0x380   :  { %v3892_v56 = vadd.f32 %v3891_v60, %v12160_v53 }
 0x381   :  { %v3940_v46 = vpop.f32.mrf.mxu1 }
 0x382   :  { %7634 = vmatmul.msk.bf16.gmra.mxu0 %vm3038_vm1, %v16365_v63  ;;  %v3941_v17 = vadd.f32 %v3940_v46, %v3892_v56  ;;  %v16480_v46 = vld [vmem:[#allocation96_spill] sm:$0xff]  ;;  %v16481_v56 = vld [vmem:[#allocation99_spill] sm:$0xff] }
 0x383   :  { %4135 = vmatmul.bf16.gmra.mxu1 %v16477_v20  ;;  %4184 = vmatmul.bf16.gmra.mxu2 %v16478_v28 }
 0x384   :  { %v4035_v27 = vpop.f32.mrf.mxu3  ;;  %4233 = vmatmul.bf16.gmra.mxu3 %v16454_v34  ;;  %v16479_v34 = vld [vmem:[#allocation5_spill] sm:$0xff] }
 0x385   :  { %v12363_v11 = vadd.f32 %v4035_v27, %v3987_v25 }
 0x386   :  { %v3989_v24 = vpop.f32.mrf.mxu2 }
 0x387   :  { %v3990_v54 = vadd.f32 %v3989_v24, %v3941_v17  ;;  %v3893_v14 = vpop.f32.mrf.mxu0 }
 0x388   :  { %v3894_v49 = vadd.f32 %v3893_v14, %v12172_v40  ;;  %v16482_v40 = vld [vmem:[#allocation263_spill] sm:$0xff] }
 0x389   :  { %v3942_v61 = vpop.f32.mrf.mxu1 }
 0x38a   :  { %v3943_v53 = vadd.f32 %v3942_v61, %v3894_v49  ;;  %v16483_v61 = vld [vmem:[#allocation227_spill] sm:$0xff] }
 0x38c   :  { %v4038_v12 = vpop.f32.mrf.mxu3 }
 0x38d   :  { %v12371_v51 = vadd.f32 %v4038_v12, %v3990_v54 }
 0x38e   :  { %v3991_v35 = vpop.f32.mrf.mxu2 }
 0x38f   :  { %v3992_v22 = vadd.f32 %v3991_v35, %v3943_v53  ;;  %v4052_v58 = vpop.f32.mrf.mxu0 }
 0x390   :  { %v12377_v60 = vadd.f32 %v4052_v58, %v12192_v16 }
 0x391   :  { %v4101_v25 = vpop.f32.mrf.mxu1 }
 0x392   :  { %4247 = vmatmul.bf16.vlgmr.msrb.gmra.mxu0 %v16479_v34  ;;  %v4102_v17 = vadd.f32 %v4101_v25, %v16482_v40  ;;  %v16485_v34 = vld [vmem:[#allocation9_spill] sm:$0xff] }
 0x393   :  { %4296 = vmatmul.bf16.vlgmr.msrb.gmra.mxu1 %v16480_v46  ;;  %4345 = vmatmul.bf16.vlgmr.msrb.gmra.mxu2 %v16481_v56  ;;  %v16486_v46 = vld [vmem:[#allocation108_spill] sm:$0xff]  ;;  %v16487_v56 = vld [vmem:[#allocation111_spill] sm:$0xff] }
 0x394   :  { %v4040_v39 = vpop.f32.mrf.mxu3  ;;  %7635 = vmatmul.msk.bf16.vlgmr.msrb.gmra.mxu3 %vm3038_vm1, %v16459_v44 }
 0x395   :  { %v12374_v27 = vadd.f32 %v4040_v39, %v3992_v22 }
 0x396   :  { %v4150_v20 = vpop.f32.mrf.mxu2 }
 0x397   :  { %v4151_v28 = vadd.f32 %v4150_v20, %v4102_v17  ;;  %v4054_v54 = vpop.f32.mrf.mxu0 }
 0x398   :  { %v12388_v16 = vadd.f32 %v4054_v54, %v12201_v62  ;;  %v16488_v62 = vld [vmem:[#allocation264_spill] sm:$0xff] }
 0x399   :  { %v4103_v12 = vpop.f32.mrf.mxu1 }
 0x39a   :  { %v4104_v49 = vadd.f32 %v4103_v12, %v16483_v61 }
 0x39c   :  { %v4199_v24 = vpop.f32.mrf.mxu3 }
 0x39d   :  { %v12385_v14 = vadd.f32 %v4199_v24, %v4151_v28 }
 0x39e   :  { %v4152_v53 = vpop.f32.mrf.mxu2 }
 0x39f   :  { %v4153_v35 = vadd.f32 %v4152_v53, %v4104_v49  ;;  %v4057_v39 = vpop.f32.mrf.mxu0  ;;  %v16490_v49 = vld [vmem:[#allocation26_spill] sm:$0xff] }
 0x3a0   :  { %v12394_v25 = vadd.f32 %v4057_v39, %v12221_v33 }
 0x3a1   :  { %v4106_v58 = vpop.f32.mrf.mxu1 }
 0x3a2   :  { %16484 = vst [vmem:[#allocation249_spill] sm:$0xff] %v12394_v25  ;;  %4252 = vmatmul.bf16.gmra.mxu0 %v16485_v34  ;;  %v4107_v17 = vadd.f32 %v4106_v58, %v16488_v62 }
 0x3a3   :  { %4301 = vmatmul.bf16.gmra.mxu1 %v16486_v46  ;;  %4350 = vmatmul.bf16.gmra.mxu2 %v16487_v56  ;;  %v16491_v56 = vld [vmem:[#allocation17_spill] sm:$0xff] }
 0x3a4   :  { %v4201_v22 = vpop.f32.mrf.mxu3  ;;  %7636 = vmatmul.msk.bf16.gmra.mxu3 %vm3038_vm1, %v16462_v57 }
 0x3a5   :  { %v12391_v44 = vadd.f32 %v4201_v22, %v4153_v35 }
 0x3a6   :  { %v4155_v20 = vpop.f32.mrf.mxu2 }
 0x3a7   :  { %v4156_v28 = vadd.f32 %v4155_v20, %v4107_v17  ;;  %v4059_v54 = vpop.f32.mrf.mxu0  ;;  %v16492_v17 = vld [vmem:[#allocation121_spill] sm:$0xff]  ;;  %v16493_v20 = vld [vmem:[#allocation122_spill] sm:$0xff] }
 0x3a8   :  { %v12405_v33 = vadd.f32 %v4059_v54, %v12230_v21 }
 0x3a9   :  { %v4108_v12 = vpop.f32.mrf.mxu1 }
 0x3aa   :  { %16489 = vst [vmem:[#allocation19_spill] sm:$0xff] %v12405_v33  ;;  %v4109_v53 = vadd.f32 %v4108_v12, %v16490_v49 }
 0x3ac   :  { %v4204_v24 = vpop.f32.mrf.mxu3 }
 0x3ad   :  { %v12402_v61 = vadd.f32 %v4204_v24, %v4156_v28 }
 0x3ae   :  { %v4157_v35 = vpop.f32.mrf.mxu2 }
 0x3af   :  { %v4158_v22 = vadd.f32 %v4157_v35, %v4109_v53  ;;  %v4062_v34 = vpop.f32.mrf.mxu0 }
 0x3b0   :  { %v12411_v58 = vadd.f32 %v4062_v34, %v12256_v7 }
 0x3b1   :  { %v4111_v46 = vpop.f32.mrf.mxu1 }
 0x3b2   :  { %4257 = vmatmul.bf16.gmra.mxu0 %v16491_v56  ;;  %v4112_v21 = vadd.f32 %v4111_v46, %v16406_v13 }
 0x3b3   :  { %4306 = vmatmul.bf16.gmra.mxu1 %v16492_v17  ;;  %4355 = vmatmul.bf16.gmra.mxu2 %v16493_v20 }
 0x3b4   :  { %v4206_v39 = vpop.f32.mrf.mxu3  ;;  %7637 = vmatmul.msk.bf16.gmra.mxu3 %vm3038_vm1, %v16465_v30 }
 0x3b5   :  { %v12408_v57 = vadd.f32 %v4206_v39, %v4158_v22 }
 0x3b6   :  { %v4160_v28 = vpop.f32.mrf.mxu2 }
 0x3b7   :  { %v4161_v24 = vadd.f32 %v4160_v28, %v4112_v21  ;;  %v4064_v12 = vpop.f32.mrf.mxu0 }
 0x3b8   :  { %v12422_v7 = vadd.f32 %v4064_v12, %v12265_v37 }
 0x3b9   :  { %v4113_v53 = vpop.f32.mrf.mxu1 }
 0x3ba   :  { %16494 = vst [vmem:[#allocation177_spill] sm:$0xff] %v12422_v7  ;;  %v4114_v22 = vadd.f32 %v4113_v53, %v11504_v26 }
 0x3bc   :  { %v4209_v54 = vpop.f32.mrf.mxu3 }
 0x3bd   :  { %v12419_v35 = vadd.f32 %v4209_v54, %v4161_v24 }
 0x3be   :  { %v4162_v39 = vpop.f32.mrf.mxu2 }
 0x3bf   :  { %v4163_v34 = vadd.f32 %v4162_v39, %v4114_v22  ;;  %v4067_v17 = vpop.f32.mrf.mxu0 }
 0x3c0   :  { %v12428_v46 = vadd.f32 %v4067_v17, %v12285_v45 }
 0x3c1   :  { %v4116_v20 = vpop.f32.mrf.mxu1 }
 0x3c2   :  { %16495 = vst [vmem:[#allocation185_spill] sm:$0xff] %v12428_v46  ;;  %4262 = vmatmul.bf16.gmra.mxu0 %v16421_v52  ;;  %v4117_v37 = vadd.f32 %v4116_v20, %v11604_v47 }
 0x3c3   :  { %4311 = vmatmul.bf16.gmra.mxu1 %v16422_v10  ;;  %4360 = vmatmul.bf16.gmra.mxu2 %v16423_v43 }
 0x3c4   :  { %v4211_v56 = vpop.f32.mrf.mxu3  ;;  %7638 = vmatmul.msk.bf16.gmra.mxu3 %vm3038_vm1, %v16468_v48 }
 0x3c5   :  { %v12425_v30 = vadd.f32 %v4211_v56, %v4163_v34 }
 0x3c6   :  { %v4165_v21 = vpop.f32.mrf.mxu2 }
 0x3c7   :  { %v4166_v28 = vadd.f32 %v4165_v21, %v4117_v37  ;;  %v4069_v54 = vpop.f32.mrf.mxu0 }
 0x3c8   :  { %v12439_v45 = vadd.f32 %v4069_v54, %v12294_v38 }
 0x3c9   :  { %v4118_v12 = vpop.f32.mrf.mxu1 }
 0x3ca   :  { %16496 = vst [vmem:[#allocation55_spill] sm:$0xff] %v12439_v45  ;;  %v4119_v52 = vadd.f32 %v4118_v12, %v11551_v19 }
 0x3cc   :  { %v4214_v24 = vpop.f32.mrf.mxu3 }
 0x3cd   :  { %v12436_v53 = vadd.f32 %v4214_v24, %v4166_v28 }
 0x3ce   :  { %v4167_v10 = vpop.f32.mrf.mxu2 }
 0x3cf   :  { %v4168_v22 = vadd.f32 %v4167_v10, %v4119_v52  ;;  %v4072_v39 = vpop.f32.mrf.mxu0 }
 0x3d0   :  { %v12445_v56 = vadd.f32 %v4072_v39, %v12314_v36 }
 0x3d1   :  { %v4121_v34 = vpop.f32.mrf.mxu1 }
 0x3d2   :  { %16497 = vst [vmem:[#allocation32_spill] sm:$0xff] %v12445_v56  ;;  %4267 = vmatmul.bf16.gmra.mxu0 %v16434_v5  ;;  %v4122_v38 = vadd.f32 %v4121_v34, %v11578_v3 }
 0x3d3   :  { %4316 = vmatmul.bf16.gmra.mxu1 %v16435_v42  ;;  %4365 = vmatmul.bf16.gmra.mxu2 %v16438_v41 }
 0x3d4   :  { %v4216_v43 = vpop.f32.mrf.mxu3  ;;  %7639 = vmatmul.msk.bf16.gmra.mxu3 %vm3038_vm1, %v16471_v18 }
 0x3d5   :  { %v12442_v48 = vadd.f32 %v4216_v43, %v4168_v22 }
 0x3d6   :  { %v4170_v17 = vpop.f32.mrf.mxu2 }
 0x3d7   :  { %v4171_v20 = vadd.f32 %v4170_v17, %v4122_v38  ;;  %v4074_v21 = vpop.f32.mrf.mxu0 }
 0x3d8   :  { %v12456_v36 = vadd.f32 %v4074_v21, %v12323_v55  ;;  %v16500_v55 = vld [vmem:[#allocation169_spill] sm:$0xff] }
 0x3d9   :  { %v4123_v28 = vpop.f32.mrf.mxu1 }
 0x3da   :  { %16498 = vst [vmem:[#allocation33_spill] sm:$0xff] %v12456_v36  ;;  %v4124_v5 = vadd.f32 %v4123_v28, %v11853_v59 }
 0x3dc   :  { %v4219_v37 = vpop.f32.mrf.mxu3 }
 0x3dd   :  { %v12453_v24 = vadd.f32 %v4219_v37, %v4171_v20 }
 0x3de   :  { %v4172_v42 = vpop.f32.mrf.mxu2 }
 0x3df   :  { %v4173_v54 = vadd.f32 %v4172_v42, %v4124_v5  ;;  %v4077_v12 = vpop.f32.mrf.mxu0  ;;  %v16503_v42 = vld [vmem:[#allocation182_spill] sm:$0xff] }
 0x3e0   :  { %v12462_v10 = vadd.f32 %v4077_v12, %v12343_v31 }
 0x3e1   :  { %v4126_v52 = vpop.f32.mrf.mxu1 }
 0x3e2   :  { %16499 = vst [vmem:[#allocation154_spill] sm:$0xff] %v12462_v10  ;;  %4272 = vmatmul.bf16.gmra.mxu0 %v16444_v4  ;;  %v4127_v22 = vadd.f32 %v4126_v52, %v16500_v55 }
 0x3e3   :  { %4321 = vmatmul.bf16.gmra.mxu1 %v16445_v8  ;;  %4370 = vmatmul.bf16.gmra.mxu2 %v16350_v2 }
 0x3e4   :  { %v4221_v41 = vpop.f32.mrf.mxu3  ;;  %7640 = vmatmul.msk.bf16.gmra.mxu3 %vm3038_vm1, %v16474_v15 }
 0x3e5   :  { %v12459_v18 = vadd.f32 %v4221_v41, %v4173_v54 }
 0x3e6   :  { %v4175_v43 = vpop.f32.mrf.mxu2 }
 0x3e7   :  { %v4176_v39 = vadd.f32 %v4175_v43, %v4127_v22  ;;  %v4079_v38 = vpop.f32.mrf.mxu0 }
 0x3e8   :  { %v12473_v31 = vadd.f32 %v4079_v38, %v12352_v9  ;;  %v16504_v9 = vld [vmem:[#allocation115_spill] sm:$0xff]  ;;  %v16507_v38 = vld [vmem:[#allocation100_spill] sm:$0xff] }
 0x3e9   :  { %v4128_v17 = vpop.f32.mrf.mxu1 }
 0x3ea   :  { %16501 = vst [vmem:[#allocation155_spill] sm:$0xff] %v12473_v31  ;;  %v4129_v4 = vadd.f32 %v4128_v17, %v16448_v23 }
 0x3ec   :  { %v4224_v34 = vpop.f32.mrf.mxu3 }
 0x3ed   :  { %v12470_v20 = vadd.f32 %v4224_v34, %v4176_v39 }
 0x3ee   :  { %v4177_v8 = vpop.f32.mrf.mxu2 }
 0x3ef   :  { %v4178_v37 = vadd.f32 %v4177_v8, %v4129_v4  ;;  %v4082_v21 = vpop.f32.mrf.mxu0 }
 0x3f0   :  { %v12479_v5 = vadd.f32 %v4082_v21, %v12360_v1 }
 0x3f1   :  { %v4131_v28 = vpop.f32.mrf.mxu1 }
 0x3f2   :  { %16502 = vst [vmem:[#allocation45_spill] sm:$0xff] %v12479_v5  ;;  %4277 = vmatmul.bf16.gmra.mxu0 %v16451_v32  ;;  %v4132_v54 = vadd.f32 %v4131_v28, %v16504_v9  ;;  %v16506_v32 = vld [vmem:[#allocation98_spill] sm:$0xff] }
 0x3f3   :  { %4326 = vmatmul.bf16.gmra.mxu1 %v16452_v0  ;;  %4375 = vmatmul.bf16.gmra.mxu2 %v16503_v42  ;;  %v3073_v0 = vadd.f32 %v16506_v32, %v16482_v40  ;;  %v16509_v42 = vld [vmem:[#allocation102_spill] sm:$0xff] }
 0x3f4   :  { %v4226_v2 = vpop.f32.mrf.mxu3  ;;  %7641 = vmatmul.msk.bf16.gmra.mxu3 %vm3038_vm1, %v16361_v50  ;;  %v16511_v40 = vld [vmem:[#allocation194_spill] sm:$0xff] }
 0x3f5   :  { %v12476_v15 = vadd.f32 %v4226_v2, %v4178_v37  ;;  %v3122_v17 = vadd.f32 %v16507_v38, %v3073_v0 }
 0x3f6   :  { %v4180_v41 = vpop.f32.mrf.mxu2 }
 0x3f7   :  { %v4181_v12 = vadd.f32 %v4180_v41, %v4132_v54  ;;  %v4084_v22 = vpop.f32.mrf.mxu0  ;;  %v16510_v54 = vld [vmem:[#allocation192_spill] sm:$0xff] }
 0x3f8   :  { %v12490_v1 = vadd.f32 %v4084_v22, %v12363_v11  ;;  %v3171_v11 = vadd.f32 %v16509_v42, %v3122_v17  ;;  %v16512_v41 = vld [vmem:[#allocation184_spill] sm:$0xff]  ;;  %v16515_v17 = vld [vmem:[#allocation110_spill] sm:$0xff] }
 0x3f9   :  { %v4133_v43 = vpop.f32.mrf.mxu1 }
 0x3fa   :  { %16505 = vst [vmem:[#allocation47_spill] sm:$0xff] %v12490_v1  ;;  %v4134_v34 = vadd.f32 %v4133_v43, %v11677_v29 }
 0x3fc   :  { %v4229_v52 = vpop.f32.mrf.mxu3 }
 0x3fd   :  { %v12487_v39 = vadd.f32 %v4229_v52, %v4181_v12  ;;  %v16513_v52 = vld [vmem:[#allocation104_spill] sm:$0xff] }
 0x3fe   :  { %v4182_v50 = vpop.f32.mrf.mxu2  ;;  %v3220_v22 = vadd.f32 %v16513_v52, %v3171_v11  ;;  %v16519_v11 = vld [vmem:[#allocation208_spill] sm:$0xff] }
 0x3ff   :  { %v4183_v4 = vadd.f32 %v4182_v50, %v4134_v34  ;;  %v4087_v37 = vpop.f32.mrf.mxu0  ;;  %v3078_v50 = vadd.f32 %v16515_v17, %v16488_v62  ;;  %v16522_v62 = vld [vmem:[#allocation209_spill] sm:$0xff] }
 0x400   :  { %v12499_v28 = vadd.f32 %v4087_v37, %v12371_v51 }
 0x401   :  { %v4136_v2 = vpop.f32.mrf.mxu1 }
 0x402   :  { %16508 = vst [vmem:[#allocation168_spill] sm:$0xff] %v12499_v28  ;;  %4282 = vmatmul.bf16.gmra.mxu0 %v16456_v6  ;;  %v4137_v12 = vadd.f32 %v4136_v2, %v16512_v41  ;;  %v16518_v2 = vld [vmem:[#allocation112_spill] sm:$0xff] }
 0x403   :  { %4331 = vmatmul.bf16.gmra.mxu1 %v16510_v54  ;;  %4380 = vmatmul.bf16.gmra.mxu2 %v16511_v40  ;;  %v3127_v42 = vadd.f32 %v16518_v2, %v3078_v50  ;;  %v16525_v50 = vld [vmem:[#allocation60_spill] sm:$0xff] }
 0x404   :  { %v4231_v8 = vpop.f32.mrf.mxu3  ;;  %7642 = vmatmul.msk.bf16.gmra.mxu3 %vm3038_vm1, %v16365_v63  ;;  %v16517_v63 = vld [vmem:[#allocation94_spill] sm:$0xff] }
 0x405   :  { %v12496_v21 = vadd.f32 %v4231_v8, %v4183_v4  ;;  %v16516_v4 = vld [vmem:[#allocation207_spill] sm:$0xff] }
 0x406   :  { %v4185_v43 = vpop.f32.mrf.mxu2  ;;  %v3269_v8 = vadd.f32 %v16516_v4, %v3220_v22  ;;  %v16524_v22 = vld [vmem:[#allocation118_spill] sm:$0xff]  ;;  %v4532_v4 = vmul.f32 %v16525_v50, %v16525_v50 }
 0x407   :  { %v4186_v32 = vadd.f32 %v4185_v43, %v4137_v12  ;;  %v4089_v51 = vpop.f32.mrf.mxu0 }
 0x408   :  { %v12512_v6 = vadd.f32 %v4089_v51, %v12374_v27  ;;  %v3318_v54 = vadd.f32 %v16519_v11, %v3269_v8  ;;  %v16521_v51 = vld [vmem:[#allocation116_spill] sm:$0xff] }
 0x409   :  { %v4138_v34 = vpop.f32.mrf.mxu1 }
 0x40a   :  { %16514 = vst [vmem:[#allocation218_spill] sm:$0xff] %v12512_v6  ;;  %v4139_v37 = vadd.f32 %v4138_v34, %v16517_v63  ;;  %v3176_v6 = vadd.f32 %v16521_v51, %v3127_v42  ;;  %v12525_v17 = vadd.f32 %v16522_v62, %v3318_v54  ;;  %v3080_v34 = vadd.f32 %v16524_v22, %v16490_v49  ;;  %v16529_v22 = vld [vmem:[#allocation124_spill] sm:$0xff] }
 0x40b   :  { %v4533_v54 = vmul.f32 %v12377_v60, %v12377_v60 }
 0x40c   :  { %v4234_v0 = vpop.f32.mrf.mxu3  ;;  %16523 = vst [vmem:[#allocation64_spill] sm:$0xff] %v12525_v17  ;;  %v4435_v42 = vadd.f32 %v16525_v50, %v12525_v17  ;;  %v16531_v50 = vld [vmem:[#allocation120_spill] sm:$0xff] }
 0x40d   :  { %v12509_v38 = vadd.f32 %v4234_v0, %v4186_v32 }
 0x40e   :  { %v4187_v40 = vpop.f32.mrf.mxu2 }
 0x40f   :  { %v4188_v12 = vadd.f32 %v4187_v40, %v4139_v37  ;;  %v4248_v43 = vpop.f32.mrf.mxu0  ;;  %v16526_v37 = vld [vmem:[#allocation117_spill] sm:$0xff]  ;;  %v4531_v40 = vmul.f32 %v12525_v17, %v12525_v17 }
 0x410   :  { %v4249_v27 = vadd.f32 %v4248_v43, %v12385_v14  ;;  %v3225_v2 = vadd.f32 %v16526_v37, %v3176_v6  ;;  %v16530_v37 = vld [vmem:[#allocation211_spill] sm:$0xff] }
 0x411   :  { %v4297_v32 = vpop.f32.mrf.mxu1 }
 0x412   :  { %v4298_v8 = vadd.f32 %v4297_v32, %v4249_v27  ;;  %v4436_v32 = vadd.f32 %v4435_v42, %v12377_v60  ;;  %v4595_v27 = vadd.f32 %v4532_v4, %v4531_v40  ;;  %v16533_v4 = vld [vmem:[#allocation125_spill] sm:$0xff] }
 0x414   :  { %v4236_v52 = vpop.f32.mrf.mxu3 }
 0x415   :  { %v12520_v0 = vadd.f32 %v4236_v52, %v4188_v12  ;;  %v16527_v12 = vld [vmem:[#allocation119_spill] sm:$0xff] }
 0x416   :  { %v4346_v11 = vpop.f32.mrf.mxu2  ;;  %v3129_v14 = vadd.f32 %v16527_v12, %v3080_v34  ;;  %v3083_v34 = vadd.f32 %v16529_v22, %v16406_v13  ;;  %v3274_v12 = vadd.f32 %v16530_v37, %v3225_v2  ;;  %v16535_v2 = vld [vmem:[#allocation123_spill] sm:$0xff] }
 0x417   :  { %16520 = vst [vmem:[#allocation63_spill] sm:$0xff] %v12520_v0  ;;  %v4347_v52 = vadd.f32 %v4346_v11, %v4298_v8  ;;  %v4250_v43 = vpop.f32.mrf.mxu0  ;;  %v4596_v11 = vadd.f32 %v4595_v27, %v4533_v54  ;;  %v4537_v54 = vmul.f32 %v12388_v16, %v12388_v16 }
 0x418   :  { %v4251_v6 = vadd.f32 %v4250_v43, %v12391_v44  ;;  %v3178_v17 = vadd.f32 %v16531_v50, %v3129_v14  ;;  %v3132_v40 = vadd.f32 %v16533_v4, %v3083_v34  ;;  %v16534_v43 = vld [vmem:[#allocation212_spill] sm:$0xff] }
 0x419   :  { %v4299_v51 = vpop.f32.mrf.mxu1  ;;  %v3323_v13 = vadd.f32 %v16534_v43, %v3274_v12  ;;  %v16542_v43 = vld [vmem:[#allocation215_spill] sm:$0xff] }
 0x41a   :  { %v4300_v44 = vadd.f32 %v4299_v51, %v4251_v6  ;;  %v3227_v37 = vadd.f32 %v16535_v2, %v3178_v17  ;;  %v16538_v17 = vld [vmem:[#allocation131_spill] sm:$0xff] }
 0x41c   :  { %v4395_v49 = vpop.f32.mrf.mxu3 }
 0x41d   :  { %v12539_v62 = vadd.f32 %v4395_v49, %v4347_v52  ;;  %v16532_v52 = vld [vmem:[#allocation195_spill] sm:$0xff] }
 0x41e   :  { %v4536_v49 = vmul.f32 %v16532_v52, %v16532_v52  ;;  %v4348_v22 = vpop.f32.mrf.mxu2 }
 0x41f   :  { %16528 = vst [vmem:[#allocation181_spill] sm:$0xff] %v12539_v62  ;;  %v4437_v0 = vadd.f32 %v4436_v32, %v12539_v62  ;;  %v4534_v8 = vmul.f32 %v12539_v62, %v12539_v62  ;;  %v4349_v50 = vadd.f32 %v4348_v22, %v4300_v44  ;;  %v16536_v32 = vld [vmem:[#allocation233_spill] sm:$0xff]  ;;  %v4253_v27 = vpop.f32.mrf.mxu0  ;;  %v3276_v22 = vadd.f32 %v16542_v43, %v3227_v37  ;;  %v16546_v43 = vld [vmem:[#allocation216_spill] sm:$0xff] }
 0x420   :  { %v4535_v62 = vmul.f32 %v16536_v32, %v16536_v32  ;;  %v4254_v6 = vadd.f32 %v4253_v27, %v12402_v61  ;;  %v4440_v12 = vadd.f32 %v16532_v52, %v16536_v32 }
 0x421   :  { %4438 = vadd.xlane.f32.xlu0 %v4437_v0  ;;  %v4597_v42 = vadd.f32 %v4596_v11, %v4534_v8  ;;  %v4302_v51 = vpop.f32.mrf.mxu1  ;;  %v3181_v8 = vadd.f32 %v16538_v17, %v3132_v40  ;;  %v16539_v11 = vld [vmem:[#allocation133_spill] sm:$0xff]  ;;  %v16544_v17 = vld [vmem:[#allocation132_spill] sm:$0xff] }
 0x422   :  { %v4600_v34 = vadd.f32 %v4536_v49, %v4535_v62  ;;  %v3085_v44 = vadd.f32 %v16539_v11, %v11504_v26  ;;  %v4441_v61 = vadd.f32 %v4440_v12, %v12388_v16  ;;  %v16543_v62 = vld [vmem:[#allocation4_spill] sm:$0xff]  ;;  %v16545_v11 = vld [vmem:[#allocation134_spill] sm:$0xff] }
 0x423   :  { %4598 = vadd.xlane.f32.xlu2 %v4597_v42  ;;  %v16540_v42 = vld [vmem:[#allocation214_spill] sm:$0xff]  ;;  %v4540_v49 = vmul.f32 %v16543_v62, %v16543_v62  ;;  %v3230_v26 = vadd.f32 %v16544_v17, %v3181_v8 }
 0x424   :  { %v4397_v14 = vpop.f32.mrf.mxu3  ;;  %v12568_v4 = vadd.f32 %v16540_v42, %v3323_v13  ;;  %v3134_v13 = vadd.f32 %v16545_v11, %v3085_v44  ;;  %v16547_v17 = vld [vmem:[#allocation10_spill] sm:$0xff] }
 0x425   :  { %v12559_v0 = vadd.f32 %v4397_v14, %v4349_v50  ;;  %v4601_v50 = vadd.f32 %v4600_v34, %v4537_v54  ;;  %v4303_v14 = vadd.f32 %v4302_v51, %v4254_v6  ;;  %v4541_v54 = vmul.f32 %v12394_v25, %v12394_v25 }
 0x426   :  { %16541 = vst [vmem:[#allocation85_spill] sm:$0xff] %v12568_v4  ;;  %v4351_v42 = vpop.f32.mrf.mxu2  ;;  %v4539_v37 = vmul.f32 %v12568_v4, %v12568_v4  ;;  %v3325_v51 = vadd.f32 %v16546_v43, %v3276_v22  ;;  %v4445_v8 = vadd.f32 %v16543_v62, %v12568_v4  ;;  %v3183_v11 = vadd.f32 %v16547_v17, %v3134_v13 }
 0x427   :  { %16537 = vst [vmem:[#allocation83_spill] sm:$0xff] %v12559_v0  ;;  %v4538_v2 = vmul.f32 %v12559_v0, %v12559_v0  ;;  %v4442_v40 = vadd.f32 %v4441_v61, %v12559_v0  ;;  %v4352_v34 = vadd.f32 %v4351_v42, %v4303_v14  ;;  %v4255_v6 = vpop.f32.mrf.mxu0  ;;  %v16548_v0 = vld [vmem:[#allocation140_spill] sm:$0xff]  ;;  %v16549_v42 = vld [vmem:[#allocation219_spill] sm:$0xff] }
 0x428   :  { %v4256_v44 = vadd.f32 %v4255_v6, %v12408_v57  ;;  %v4605_v61 = vadd.f32 %v4540_v49, %v4539_v37  ;;  %v3088_v14 = vadd.f32 %v16548_v0, %v11604_v47  ;;  %v4446_v22 = vadd.f32 %v4445_v8, %v12394_v25  ;;  %v16552_v57 = vld [vmem:[#allocation257_spill] sm:$0xff]  ;;  %v16553_v0 = vld [vmem:[#allocation139_spill] sm:$0xff] }
 0x429   :  { %v4602_v27 = vadd.f32 %v4601_v50, %v4538_v2  ;;  %v4304_v2 = vpop.f32.mrf.mxu1  ;;  %v4544_v49 = vmul.f32 %v16552_v57, %v16552_v57  ;;  %v16554_v6 = vld [vmem:[#allocation11_spill] sm:$0xff] }
 0x42a   :  { %v4606_v62 = vadd.f32 %v4605_v61, %v4541_v54  ;;  %v4305_v13 = vadd.f32 %v4304_v2, %v4256_v44  ;;  %v3137_v17 = vadd.f32 %v16554_v6, %v3088_v14 }
 0x42b   :  { %4603 = vadd.xlane.f32.xlu1 %v4602_v27  ;;  %4443 = vadd.xlane.f32.xlu2 %v4442_v40  ;;  %v3279_v27 = vadd.f32 %v16549_v42, %v3230_v26  ;;  %v12593_v40 = vpop.permute.xlu0 %5050  ;;  %v3232_v26 = vadd.f32 %v16553_v0, %v3183_v11  ;;  %v16555_v42 = vld [vmem:[#allocation220_spill] sm:$0xff]  ;;  %v16562_v0 = vld [vmem:[#allocation27_spill] sm:$0xff] }
 0x42c   :  { %v4400_v12 = vpop.f32.mrf.mxu3  ;;  %16550 = vst [vmem:[#allocation101_spill] sm:$0xff] %v12593_v40  ;;  %v4548_v6 = vmul.f32 %v16562_v0, %v16562_v0 }
 0x42d   :  { %v12586_v50 = vadd.f32 %v4400_v12, %v4352_v34  ;;  %v16551_v34 = vld [vmem:[#allocation217_spill] sm:$0xff]  ;;  %v3328_v8 = vadd.f32 %v16555_v42, %v3279_v27 }
 0x42e   :  { %v12599_v12 = vadd.f32 %v16551_v34, %v3325_v51  ;;  %v4353_v25 = vpop.f32.mrf.mxu2  ;;  %v4545_v51 = vmul.f32 %v12405_v33, %v12405_v33  ;;  %v16559_v34 = vld [vmem:[#allocation72_spill] sm:$0xff] }
 0x42f   :  { %v4542_v43 = vmul.f32 %v12586_v50, %v12586_v50  ;;  %v4447_v37 = vadd.f32 %v4446_v22, %v12586_v50  ;;  %v4354_v40 = vadd.f32 %v4353_v25, %v4305_v13  ;;  %v4258_v2 = vpop.f32.mrf.mxu0  ;;  %v16557_v25 = vld [vmem:[#allocation149_spill] sm:$0xff]  ;;  %v16558_v22 = vld [vmem:[#allocation147_spill] sm:$0xff]  ;;  %v12620_v13 = vadd.f32 %v16559_v34, %v3328_v8 }
 0x430   :  { %v4543_v54 = vmul.f32 %v12599_v12, %v12599_v12  ;;  %v4259_v61 = vadd.f32 %v4258_v2, %v12419_v35  ;;  %v4450_v14 = vadd.f32 %v16552_v57, %v12599_v12  ;;  %v3090_v27 = vadd.f32 %v16557_v25, %v11551_v19  ;;  %v16564_v2 = vld [vmem:[#allocation148_spill] sm:$0xff] }
 0x431   :  { %v4607_v47 = vadd.f32 %v4606_v62, %v4542_v43  ;;  %v4307_v44 = vpop.f32.mrf.mxu1  ;;  %v3186_v43 = vadd.f32 %v16558_v22, %v3137_v17  ;;  %v4547_v22 = vmul.f32 %v12620_v13, %v12620_v13 }
 0x432   :  { %v4610_v11 = vadd.f32 %v4544_v49, %v4543_v54  ;;  %v4451_v35 = vadd.f32 %v4450_v14, %v12405_v33  ;;  %v4308_v42 = vadd.f32 %v4307_v44, %v4259_v61  ;;  %v16563_v54 = vld [vmem:[#allocation150_spill] sm:$0xff]  ;;  %v16565_v44 = vld [vmem:[#allocation223_spill] sm:$0xff] }
 0x433   :  { %4448 = vadd.xlane.f32.xlu1 %v4447_v37  ;;  %4608 = vadd.xlane.f32.xlu0 %v4607_v47  ;;  %v16560_v37 = vld [vmem:[#allocation222_spill] sm:$0xff]  ;;  %v12626_v49 = vpop.permute.xlu0 %5060  ;;  %v3139_v8 = vadd.f32 %v16563_v54, %v3090_v27  ;;  %v3235_v25 = vadd.f32 %v16564_v2, %v3186_v43  ;;  %v12640_v27 = vpop.permute.xlu2 %5055  ;;  %v4455_v43 = vadd.f32 %v16562_v0, %v12620_v13  ;;  %v16567_v2 = vld [vmem:[#allocation151_spill] sm:$0xff] }
 0x434   :  { %v4402_v4 = vpop.f32.mrf.mxu3  ;;  %v3281_v47 = vadd.f32 %v16560_v37, %v3232_v26  ;;  %16561 = vst [vmem:[#allocation3_spill] sm:$0xff] %v12626_v49  ;;  %v4615_v54 = vadd.f32 %v4548_v6, %v4547_v22  ;;  %v16570_v33 = vld [vmem:[#allocation71_spill] sm:$0xff] }
 0x435   :  { %v12611_v62 = vadd.f32 %v4402_v4, %v4354_v40  ;;  %v4611_v40 = vadd.f32 %v4610_v11, %v4545_v51  ;;  %v12635_v51 = vpop.permute.xlu1 %5045  ;;  %v4549_v11 = vmul.f32 %v12411_v58, %v12411_v58  ;;  %v3188_v49 = vadd.f32 %v16567_v2, %v3139_v8  ;;  %v16575_v2 = vld [vmem:[#allocation88_spill] sm:$0xff] }
 0x436   :  { %v4356_v26 = vpop.f32.mrf.mxu2  ;;  %v3330_v61 = vadd.f32 %v16565_v44, %v3281_v47 }
 0x437   :  { %16556 = vst [vmem:[#allocation2_spill] sm:$0xff] %v12611_v62  ;;  %v4546_v4 = vmul.f32 %v12611_v62, %v12611_v62  ;;  %v4452_v17 = vadd.f32 %v4451_v35, %v12611_v62  ;;  %v4357_v14 = vadd.f32 %v4356_v26, %v4308_v42  ;;  %v4260_v37 = vpop.f32.mrf.mxu0  ;;  %v16568_v42 = vld [vmem:[#allocation153_spill] sm:$0xff]  ;;  %v4616_v44 = vadd.f32 %v4615_v54, %v4549_v11 }
 0x438   :  { %v4261_v35 = vadd.f32 %v4260_v37, %v12425_v30  ;;  %v4456_v62 = vadd.f32 %v4455_v43, %v12411_v58  ;;  %v12655_v0 = vadd.f32 %v16570_v33, %v3330_v61  ;;  %v16574_v37 = vld [vmem:[#allocation156_spill] sm:$0xff]  ;;  %v4553_v61 = vmul.f32 %v12422_v7, %v12422_v7 }
 0x439   :  { %v4612_v19 = vadd.f32 %v4611_v40, %v4546_v4  ;;  %v4309_v4 = vpop.f32.mrf.mxu1 }
 0x43a   :  { %16571 = vst [vmem:[#allocation6_spill] sm:$0xff] %v12655_v0  ;;  %v4310_v6 = vadd.f32 %v4309_v4, %v4261_v35  ;;  %v4551_v33 = vmul.f32 %v12655_v0, %v12655_v0 }
 0x43b   :  { %4613 = vadd.xlane.f32.xlu2 %v4612_v19  ;;  %4453 = vadd.xlane.f32.xlu0 %v4452_v17  ;;  %v3093_v19 = vadd.f32 %v16568_v42, %v11578_v3  ;;  %v16569_v17 = vld [vmem:[#allocation77_spill] sm:$0xff]  ;;  %v12663_v11 = vpop.permute.xlu0 %5075 }
 0x43c   :  { %v4405_v34 = vpop.f32.mrf.mxu3  ;;  %v3284_v26 = vadd.f32 %v16569_v17, %v3235_v25  ;;  %16576 = vst [vmem:[#allocation7_spill] sm:$0xff] %v12663_v11 }
 0x43d   :  { %v12644_v40 = vadd.f32 %v4405_v34, %v4357_v14  ;;  %v16572_v14 = vld [vmem:[#allocation97_spill] sm:$0xff]  ;;  %v16573_v34 = vld [vmem:[#allocation152_spill] sm:$0xff]  ;;  %v3142_v25 = vadd.f32 %v16574_v37, %v3093_v19 }
 0x43e   :  { %v4552_v30 = vmul.f32 %v16572_v14, %v16572_v14  ;;  %v3237_v3 = vadd.f32 %v16573_v34, %v3188_v49  ;;  %v3333_v42 = vadd.f32 %v16575_v2, %v3284_v26  ;;  %v4358_v17 = vpop.f32.mrf.mxu2  ;;  %v12669_v49 = vpop.permute.xlu1 %5065  ;;  %v4460_v26 = vadd.f32 %v16572_v14, %v12655_v0  ;;  %v16581_v34 = vld [vmem:[#allocation90_spill] sm:$0xff]  ;;  %v16768_v0 = vld [vmem:[#allocation271_spill] sm:$0xff] }
 0x43f   :  { %16566 = vst [vmem:[#allocation113_spill] sm:$0xff] %v12644_v40  ;;  %v4550_v47 = vmul.f32 %v12644_v40, %v12644_v40  ;;  %v4457_v8 = vadd.f32 %v4456_v62, %v12644_v40  ;;  %v4359_v43 = vadd.f32 %v4358_v17, %v4310_v6  ;;  %v4263_v62 = vpop.f32.mrf.mxu0  ;;  %v12681_v2 = vpop.permute.xlu2 %5070  ;;  %v16584_v17 = vld [vmem:[#allocation162_spill] sm:$0xff] }
 0x440   :  { %16577 = vst [vmem:[#allocation126_spill] sm:$0xff] %v12669_v49  ;;  %v4264_v19 = vadd.f32 %v4263_v62, %v12436_v53  ;;  %v12679_v37 = vadd.f32 %v16581_v34, %v3333_v42  ;;  %v3095_v11 = vadd.f32 %v16584_v17, %v11853_v59  ;;  %v16585_v62 = vld [vmem:[#allocation16_spill] sm:$0xff]  ;;  %v16586_v42 = vld [vmem:[#allocation161_spill] sm:$0xff]  ;;  %v16587_v59 = vld [vmem:[#allocation114_spill] sm:$0xff] }
 0x441   :  { %v4617_v22 = vadd.f32 %v4616_v44, %v4550_v47  ;;  %v4312_v4 = vpop.f32.mrf.mxu1  ;;  %v4620_v47 = vadd.f32 %v4552_v30, %v4551_v33  ;;  %v16579_v44 = vld [vmem:[#allocation80_spill] sm:$0xff]  ;;  %16583 = vst [vmem:[#allocation12_spill] sm:$0xff] %v12681_v2  ;;  %v4556_v30 = vmul.f32 %v16585_v62, %v16585_v62 }
 0x442   :  { %v3286_v6 = vadd.f32 %v16579_v44, %v3237_v3  ;;  %16582 = vst [vmem:[#allocation15_spill] sm:$0xff] %v12679_v37  ;;  %v4313_v3 = vadd.f32 %v4312_v4, %v4264_v19  ;;  %v4555_v34 = vmul.f32 %v12679_v37, %v12679_v37 }
 0x443   :  { %4618 = vadd.xlane.f32.xlu1 %v4617_v22  ;;  %4458 = vadd.xlane.f32.xlu2 %v4457_v8  ;;  %v16580_v22 = vld [vmem:[#allocation159_spill] sm:$0xff] }
 0x444   :  { %v4407_v54 = vpop.f32.mrf.mxu3  ;;  %v3191_v8 = vadd.f32 %v16580_v22, %v3142_v25  ;;  %v3335_v17 = vadd.f32 %v16587_v59, %v3286_v6  ;;  %v16590_v6 = vld [vmem:[#allocation167_spill] sm:$0xff]  ;;  %v16592_v59 = vld [vmem:[#allocation105_spill] sm:$0xff] }
 0x445   :  { %v12671_v35 = vadd.f32 %v4407_v54, %v4359_v43  ;;  %v4461_v43 = vadd.f32 %v4460_v26, %v12422_v7  ;;  %v4621_v54 = vadd.f32 %v4620_v47, %v4553_v61  ;;  %v16588_v26 = vld [vmem:[#allocation163_spill] sm:$0xff]  ;;  %v4557_v61 = vmul.f32 %v12428_v46, %v12428_v46 }
 0x446   :  { %v3240_v44 = vadd.f32 %v16586_v42, %v3191_v8  ;;  %v4361_v22 = vpop.f32.mrf.mxu2  ;;  %v3144_v2 = vadd.f32 %v16588_v26, %v3095_v11  ;;  %v4465_v8 = vadd.f32 %v16585_v62, %v12679_v37  ;;  %v3098_v11 = vadd.f32 %v16590_v6, %v16500_v55  ;;  %v12705_v42 = vpop.permute.xlu0 %5090  ;;  %v16598_v55 = vld [vmem:[#allocation267_spill] sm:$0xff]  ;;  %v16599_v6 = vld [vmem:[#allocation170_spill] sm:$0xff] }
 0x447   :  { %16578 = vst [vmem:[#allocation14_spill] sm:$0xff] %v12671_v35  ;;  %v4554_v53 = vmul.f32 %v12671_v35, %v12671_v35  ;;  %v4462_v25 = vadd.f32 %v4461_v43, %v12671_v35  ;;  %v4362_v47 = vadd.f32 %v4361_v22, %v4313_v3  ;;  %v4265_v4 = vpop.f32.mrf.mxu0  ;;  %v16593_v22 = vld [vmem:[#allocation226_spill] sm:$0xff]  ;;  %v12712_v35 = vpop.permute.xlu1 %5080 }
 0x448   :  { %16591 = vst [vmem:[#allocation23_spill] sm:$0xff] %v12705_v42  ;;  %v3289_v3 = vadd.f32 %v16592_v59, %v3240_v44  ;;  %v3147_v59 = vadd.f32 %v16599_v6, %v3098_v11  ;;  %v16603_v6 = vld [vmem:[#allocation172_spill] sm:$0xff] }
 0x449   :  { %v4622_v33 = vadd.f32 %v4621_v54, %v4554_v53  ;;  %v4314_v19 = vpop.f32.mrf.mxu1  ;;  %v4266_v53 = vadd.f32 %v4265_v4, %v12442_v48  ;;  %v4625_v54 = vadd.f32 %v4556_v30, %v4555_v34  ;;  %16596 = vst [vmem:[#allocation30_spill] sm:$0xff] %v12712_v35  ;;  %v4466_v48 = vadd.f32 %v4465_v8, %v12428_v46  ;;  %v12717_v30 = vpop.permute.xlu2 %5085 }
 0x44a   :  { %16597 = vst [vmem:[#allocation31_spill] sm:$0xff] %v12717_v30  ;;  %v4560_v34 = vmul.f32 %v16598_v55, %v16598_v55 }
 0x44b   :  { %4463 = vadd.xlane.f32.xlu1 %v4462_v25  ;;  %4623 = vadd.xlane.f32.xlu0 %v4622_v33  ;;  %v12709_v25 = vadd.f32 %v16593_v22, %v3335_v17  ;;  %v16595_v33 = vld [vmem:[#allocation165_spill] sm:$0xff]  ;;  %v4315_v4 = vadd.f32 %v4314_v19, %v4266_v53  ;;  %v4561_v19 = vmul.f32 %v12439_v45, %v12439_v45 }
 0x44c   :  { %v4410_v49 = vpop.f32.mrf.mxu3  ;;  %v3193_v26 = vadd.f32 %v16595_v33, %v3144_v2  ;;  %v16600_v2 = vld [vmem:[#allocation228_spill] sm:$0xff] }
 0x44d   :  { %v12700_v43 = vadd.f32 %v4410_v49, %v4362_v47  ;;  %16594 = vst [vmem:[#allocation157_spill] sm:$0xff] %v12709_v25  ;;  %v4626_v47 = vadd.f32 %v4625_v54, %v4557_v61  ;;  %v3338_v22 = vadd.f32 %v16600_v2, %v3289_v3  ;;  %v4559_v42 = vmul.f32 %v12709_v25, %v12709_v25  ;;  %v16601_v61 = vld [vmem:[#allocation166_spill] sm:$0xff] }
 0x44e   :  { %v4363_v33 = vpop.f32.mrf.mxu2  ;;  %v3242_v54 = vadd.f32 %v16601_v61, %v3193_v26  ;;  %v3196_v2 = vadd.f32 %v16603_v6, %v3147_v59  ;;  %v16604_v26 = vld [vmem:[#allocation175_spill] sm:$0xff] }
 0x44f   :  { %16589 = vst [vmem:[#allocation21_spill] sm:$0xff] %v12700_v43  ;;  %v4558_v49 = vmul.f32 %v12700_v43, %v12700_v43  ;;  %v4467_v17 = vadd.f32 %v4466_v48, %v12700_v43  ;;  %v4364_v8 = vadd.f32 %v4363_v33, %v4315_v4  ;;  %v4268_v53 = vpop.f32.mrf.mxu0  ;;  %v4630_v3 = vadd.f32 %v4560_v34, %v4559_v42  ;;  %v16607_v33 = vld [vmem:[#allocation109_spill] sm:$0xff]  ;;  %v12744_v42 = vpop.permute.xlu0 %5105  ;;  %v16609_v34 = vld [vmem:[#allocation262_spill] sm:$0xff] }
 0x450   :  { %v4269_v11 = vadd.f32 %v4268_v53, %v12453_v24  ;;  %v4470_v48 = vadd.f32 %v16598_v55, %v12709_v25  ;;  %v3100_v4 = vadd.f32 %v16604_v26, %v16448_v23  ;;  %v3291_v61 = vadd.f32 %v16607_v33, %v3242_v54  ;;  %16608 = vst [vmem:[#allocation44_spill] sm:$0xff] %v12744_v42  ;;  %v12748_v59 = vpop.permute.xlu1 %5095  ;;  %v16611_v26 = vld [vmem:[#allocation174_spill] sm:$0xff]  ;;  %v16612_v54 = vld [vmem:[#allocation176_spill] sm:$0xff] }
 0x451   :  { %v4627_v44 = vadd.f32 %v4626_v47, %v4558_v49  ;;  %v4317_v49 = vpop.f32.mrf.mxu1  ;;  %v4564_v53 = vmul.f32 %v16609_v34, %v16609_v34  ;;  %16610 = vst [vmem:[#allocation79_spill] sm:$0xff] %v12748_v59 }
 0x452   :  { %v4471_v24 = vadd.f32 %v4470_v48, %v12439_v45  ;;  %v4318_v6 = vadd.f32 %v4317_v49, %v4269_v11  ;;  %v3149_v33 = vadd.f32 %v16612_v54, %v3100_v4  ;;  %v4565_v48 = vmul.f32 %v12445_v56, %v12445_v56  ;;  %v16614_v49 = vld [vmem:[#allocation232_spill] sm:$0xff]  ;;  %v16616_v54 = vld [vmem:[#allocation178_spill] sm:$0xff] }
 0x453   :  { %4628 = vadd.xlane.f32.xlu2 %v4627_v44  ;;  %4468 = vadd.xlane.f32.xlu0 %v4467_v17  ;;  %v16605_v44 = vld [vmem:[#allocation231_spill] sm:$0xff]  ;;  %v3340_v11 = vadd.f32 %v16614_v49, %v3291_v61 }
 0x454   :  { %v4412_v35 = vpop.f32.mrf.mxu3  ;;  %v12738_v17 = vadd.f32 %v16605_v44, %v3338_v22  ;;  %v3245_v44 = vadd.f32 %v16611_v26, %v3196_v2  ;;  %v3198_v59 = vadd.f32 %v16616_v54, %v3149_v33 }
 0x455   :  { %v12729_v47 = vadd.f32 %v4412_v35, %v4364_v8  ;;  %v4631_v8 = vadd.f32 %v4630_v3, %v4561_v19  ;;  %v12755_v3 = vpop.permute.xlu2 %5100 }
 0x456   :  { %16606 = vst [vmem:[#allocation42_spill] sm:$0xff] %v12738_v17  ;;  %v4366_v30 = vpop.f32.mrf.mxu2  ;;  %v4563_v19 = vmul.f32 %v12738_v17, %v12738_v17  ;;  %v4475_v2 = vadd.f32 %v16609_v34, %v12738_v17  ;;  %v16718_v17 = vld [vmem:[#allocation36_spill] sm:$0xff] }
 0x457   :  { %16602 = vst [vmem:[#allocation171_spill] sm:$0xff] %v12729_v47  ;;  %v4562_v35 = vmul.f32 %v12729_v47, %v12729_v47  ;;  %v4472_v22 = vadd.f32 %v4471_v24, %v12729_v47  ;;  %v4367_v42 = vadd.f32 %v4366_v30, %v4318_v6  ;;  %v16618_v6 = vld [vmem:[#allocation236_spill] sm:$0xff]  ;;  %v16619_v47 = vld [vmem:[#allocation234_spill] sm:$0xff] }
 0x458   :  { %16613 = vst [vmem:[#allocation82_spill] sm:$0xff] %v12755_v3  ;;  %v4635_v26 = vadd.f32 %v4564_v53, %v4563_v19  ;;  %v16617_v3 = vld [vmem:[#allocation180_spill] sm:$0xff]  ;;  %v12773_v34 = vadd.f32 %v16619_v47, %v3340_v11  ;;  %v16622_v19 = vld [vmem:[#allocation179_spill] sm:$0xff]  ;;  %v4569_v47 = vmul.f32 %v12456_v36, %v12456_v36 }
 0x459   :  { %v4632_v23 = vadd.f32 %v4631_v8, %v4562_v35  ;;  %v4270_v35 = vpop.f32.mrf.mxu0  ;;  %v4319_v8 = vpop.f32.mrf.mxu1  ;;  %v3103_v30 = vadd.f32 %v16617_v3, %v16504_v9  ;;  %v3247_v9 = vadd.f32 %v16622_v19, %v3198_v59 }
 0x45a   :  { %v4271_v24 = vadd.f32 %v4270_v35, %v12459_v18  ;;  %v4636_v49 = vadd.f32 %v4635_v26, %v4565_v48  ;;  %16620 = vst [vmem:[#allocation96_spill] sm:$0xff] %v12773_v34  ;;  %v12779_v3 = vpop.permute.xlu0 %5120  ;;  %v12783_v48 = vpop.permute.xlu1 %5110 }
 0x45b   :  { %4633 = vadd.xlane.f32.xlu1 %v4632_v23  ;;  %4473 = vadd.xlane.f32.xlu2 %v4472_v22  ;;  %v3294_v23 = vadd.f32 %v16618_v6, %v3245_v44  ;;  %v4476_v22 = vadd.f32 %v4475_v2, %v12445_v56  ;;  %16623 = vst [vmem:[#allocation99_spill] sm:$0xff] %v12779_v3  ;;  %v16624_v44 = vld [vmem:[#allocation183_spill] sm:$0xff]  ;;  %v16625_v2 = vld [vmem:[#allocation237_spill] sm:$0xff] }
 0x45c   :  { %v4415_v45 = vpop.f32.mrf.mxu3  ;;  %v3152_v35 = vadd.f32 %v16624_v44, %v3103_v30  ;;  %16626 = vst [vmem:[#allocation263_spill] sm:$0xff] %v12783_v48  ;;  %v16675_v48 = vld [vmem:[#allocation235_spill] sm:$0xff]  ;;  %v16717_v56 = vld [vmem:[#allocation57_spill] sm:$0xff] }
 0x45d   :  { %v12762_v4 = vadd.f32 %v4415_v45, %v4367_v42  ;;  %v16621_v45 = vld [vmem:[#allocation190_spill] sm:$0xff]  ;;  %v4320_v42 = vadd.f32 %v4319_v8, %v4271_v24  ;;  %v3343_v54 = vadd.f32 %v16625_v2, %v3294_v23  ;;  %v4567_v8 = vmul.f32 %v12773_v34, %v12773_v34 }
 0x45e   :  { %v4568_v18 = vmul.f32 %v16621_v45, %v16621_v45  ;;  %v4368_v6 = vpop.f32.mrf.mxu2 }
 0x45f   :  { %16615 = vst [vmem:[#allocation5_spill] sm:$0xff] %v12762_v4  ;;  %v4566_v61 = vmul.f32 %v12762_v4, %v12762_v4  ;;  %v4477_v53 = vadd.f32 %v4476_v22, %v12762_v4  ;;  %v4369_v11 = vadd.f32 %v4368_v6, %v4320_v42  ;;  %v16629_v42 = vld [vmem:[#allocation37_spill] sm:$0xff] }
 0x460   :  { %v4640_v23 = vadd.f32 %v4568_v18, %v4567_v8  ;;  %v3105_v44 = vadd.f32 %v16629_v42, %v11677_v29  ;;  %v16633_v6 = vld [vmem:[#allocation53_spill] sm:$0xff] }
 0x461   :  { %v4637_v33 = vadd.f32 %v4636_v49, %v4566_v61  ;;  %v4273_v59 = vpop.f32.mrf.mxu0  ;;  %v4322_v24 = vpop.f32.mrf.mxu1  ;;  %v4480_v61 = vadd.f32 %v16621_v45, %v12773_v34  ;;  %v16628_v49 = vld [vmem:[#allocation240_spill] sm:$0xff]  ;;  %v3201_v3 = vadd.f32 %v16633_v6, %v3152_v35  ;;  %v16637_v6 = vld [vmem:[#allocation186_spill] sm:$0xff] }
 0x462   :  { %v4274_v30 = vadd.f32 %v4273_v59, %v12470_v20  ;;  %v3296_v19 = vadd.f32 %v16628_v49, %v3247_v9  ;;  %v4641_v20 = vadd.f32 %v4640_v23, %v4569_v47  ;;  %v16635_v49 = vld [vmem:[#allocation188_spill] sm:$0xff]  ;;  %v4573_v47 = vmul.f32 %v12462_v10, %v12462_v10 }
 0x463   :  { %4478 = vadd.xlane.f32.xlu1 %v4477_v53  ;;  %4638 = vadd.xlane.f32.xlu0 %v4637_v33  ;;  %v12797_v53 = vpop.permute.xlu2 %5115  ;;  %v16631_v33 = vld [vmem:[#allocation238_spill] sm:$0xff]  ;;  %v4481_v18 = vadd.f32 %v4480_v61, %v12456_v36  ;;  %v3154_v42 = vadd.f32 %v16635_v49, %v3105_v44  ;;  %v3250_v45 = vadd.f32 %v16637_v6, %v3201_v3  ;;  %v16639_v3 = vld [vmem:[#allocation191_spill] sm:$0xff]  ;;  %v16640_v49 = vld [vmem:[#allocation48_spill] sm:$0xff] }
 0x464   :  { %v4417_v26 = vpop.f32.mrf.mxu3  ;;  %16630 = vst [vmem:[#allocation9_spill] sm:$0xff] %v12797_v53  ;;  %v12800_v2 = vadd.f32 %v16631_v33, %v3343_v54  ;;  %v4323_v9 = vadd.f32 %v4322_v24, %v4274_v30  ;;  %v16636_v53 = vld [vmem:[#allocation241_spill] sm:$0xff]  ;;  %v16643_v6 = vld [vmem:[#allocation244_spill] sm:$0xff]  ;;  %v16674_v36 = vld [vmem:[#allocation259_spill] sm:$0xff] }
 0x465   :  { %v12789_v22 = vadd.f32 %v4417_v26, %v4369_v11  ;;  %v16634_v26 = vld [vmem:[#allocation24_spill] sm:$0xff]  ;;  %v3345_v54 = vadd.f32 %v16636_v53, %v3296_v19 }
 0x466   :  { %16632 = vst [vmem:[#allocation108_spill] sm:$0xff] %v12800_v2  ;;  %v4572_v8 = vmul.f32 %v16634_v26, %v16634_v26  ;;  %v4371_v33 = vpop.f32.mrf.mxu2  ;;  %v4571_v35 = vmul.f32 %v12800_v2, %v12800_v2  ;;  %v4485_v19 = vadd.f32 %v16634_v26, %v12800_v2 }
 0x467   :  { %16627 = vst [vmem:[#allocation227_spill] sm:$0xff] %v12789_v22  ;;  %v4570_v11 = vmul.f32 %v12789_v22, %v12789_v22  ;;  %v4482_v29 = vadd.f32 %v4481_v18, %v12789_v22  ;;  %v4372_v23 = vadd.f32 %v4371_v33, %v4323_v9  ;;  %v3203_v18 = vadd.f32 %v16639_v3, %v3154_v42  ;;  %v12826_v33 = vpop.permute.xlu1 %5205  ;;  %v16645_v3 = vld [vmem:[#allocation193_spill] sm:$0xff] }
 0x468   :  { %v3108_v9 = vadd.f32 %v16640_v49, %v16512_v41  ;;  %v3299_v22 = vadd.f32 %v16643_v6, %v3250_v45  ;;  %v16646_v49 = vld [vmem:[#allocation49_spill] sm:$0xff] }
 0x469   :  { %v4642_v59 = vadd.f32 %v4641_v20, %v4570_v11  ;;  %v4275_v24 = vpop.f32.mrf.mxu0  ;;  %v4324_v30 = vpop.f32.mrf.mxu1  ;;  %v4645_v20 = vadd.f32 %v4572_v8, %v4571_v35  ;;  %v16644_v8 = vld [vmem:[#allocation25_spill] sm:$0xff] }
 0x46a   :  { %v12816_v11 = vpop.permute.xlu0 %5215  ;;  %v4276_v53 = vadd.f32 %v4275_v24, %v12476_v15  ;;  %v4576_v42 = vmul.f32 %v16644_v8, %v16644_v8 }
 0x46b   :  { %4643 = vadd.xlane.f32.xlu2 %v4642_v59  ;;  %4483 = vadd.xlane.f32.xlu0 %v4482_v29  ;;  %v16641_v59 = vld [vmem:[#allocation242_spill] sm:$0xff]  ;;  %v12835_v15 = vpop.permute.xlu2 %5210 }
 0x46c   :  { %v4420_v61 = vpop.f32.mrf.mxu3  ;;  %v12829_v29 = vadd.f32 %v16641_v59, %v3345_v54  ;;  %v4325_v35 = vadd.f32 %v4324_v30, %v4276_v53  ;;  %v3252_v54 = vadd.f32 %v16645_v3, %v3203_v18  ;;  %v3157_v59 = vadd.f32 %v16646_v49, %v3108_v9 }
 0x46d   :  { %v12820_v44 = vadd.f32 %v4420_v61, %v4372_v23  ;;  %v4646_v23 = vadd.f32 %v4645_v20, %v4573_v47  ;;  %v4486_v61 = vadd.f32 %v4485_v19, %v12462_v10  ;;  %v16647_v47 = vld [vmem:[#allocation245_spill] sm:$0xff]  ;;  %v4577_v19 = vmul.f32 %v12473_v31, %v12473_v31 }
 0x46e   :  { %16642 = vst [vmem:[#allocation264_spill] sm:$0xff] %v12829_v29  ;;  %v4373_v45 = vpop.f32.mrf.mxu2  ;;  %v4575_v6 = vmul.f32 %v12829_v29, %v12829_v29  ;;  %v3348_v20 = vadd.f32 %v16647_v47, %v3299_v22  ;;  %v4490_v53 = vadd.f32 %v16644_v8, %v12829_v29  ;;  %v16650_v22 = vld [vmem:[#allocation201_spill] sm:$0xff]  ;;  %v16651_v47 = vld [vmem:[#allocation203_spill] sm:$0xff] }
 0x46f   :  { %16638 = vst [vmem:[#allocation111_spill] sm:$0xff] %v12820_v44  ;;  %v4574_v26 = vmul.f32 %v12820_v44, %v12820_v44  ;;  %v4487_v24 = vadd.f32 %v4486_v61, %v12820_v44  ;;  %v4374_v10 = vadd.f32 %v4373_v45, %v4325_v35  ;;  %v16649_v61 = vld [vmem:[#allocation247_spill] sm:$0xff]  ;;  %v3206_v49 = vadd.f32 %v16650_v22, %v3157_v59 }
 0x470   :  { %v3301_v3 = vadd.f32 %v16649_v61, %v3252_v54  ;;  %v3110_v35 = vadd.f32 %v16651_v47, %v16517_v63  ;;  %v4491_v44 = vadd.f32 %v4490_v53, %v12473_v31  ;;  %v16659_v53 = vld [vmem:[#allocation248_spill] sm:$0xff] }
 0x471   :  { %v4647_v41 = vadd.f32 %v4646_v23, %v4574_v26  ;;  %v4278_v26 = vpop.f32.mrf.mxu0  ;;  %v4327_v30 = vpop.f32.mrf.mxu1  ;;  %v4650_v23 = vadd.f32 %v4576_v42, %v4575_v6  ;;  %v16655_v42 = vld [vmem:[#allocation141_spill] sm:$0xff] }
 0x472   :  { %v4279_v9 = vadd.f32 %v4278_v26, %v12487_v39  ;;  %v12856_v45 = vpop.permute.xlu0 %5230  ;;  %v12864_v39 = vpop.permute.xlu1 %5220  ;;  %v4580_v54 = vmul.f32 %v16655_v42, %v16655_v42  ;;  %v16656_v26 = vld [vmem:[#allocation202_spill] sm:$0xff] }
 0x473   :  { %4648 = vadd.xlane.f32.xlu1 %v4647_v41  ;;  %4488 = vadd.xlane.f32.xlu2 %v4487_v24  ;;  %16652 = vst [vmem:[#allocation17_spill] sm:$0xff] %v12856_v45  ;;  %v16653_v41 = vld [vmem:[#allocation62_spill] sm:$0xff]  ;;  %v3255_v61 = vadd.f32 %v16656_v26, %v3206_v49  ;;  %v12870_v22 = vpop.permute.xlu2 %5225 }
 0x474   :  { %v4422_v2 = vpop.f32.mrf.mxu3  ;;  %v12859_v24 = vadd.f32 %v16653_v41, %v3348_v20  ;;  %v4328_v59 = vadd.f32 %v4327_v30, %v4279_v9  ;;  %16657 = vst [vmem:[#allocation122_spill] sm:$0xff] %v12870_v22  ;;  %v16658_v20 = vld [vmem:[#allocation204_spill] sm:$0xff]  ;;  %v3350_v41 = vadd.f32 %v16659_v53, %v3301_v3  ;;  %v16755_v22 = vld [vmem:[#allocation230_spill] sm:$0xff] }
 0x475   :  { %v12849_v18 = vadd.f32 %v4422_v2, %v4374_v10  ;;  %v4651_v2 = vadd.f32 %v4650_v23, %v4577_v19  ;;  %v3159_v47 = vadd.f32 %v16658_v20, %v3110_v35  ;;  %v4581_v23 = vmul.f32 %v12479_v5, %v12479_v5  ;;  %v16663_v20 = vld [vmem:[#allocation253_spill] sm:$0xff] }
 0x476   :  { %16654 = vst [vmem:[#allocation121_spill] sm:$0xff] %v12859_v24  ;;  %v4376_v31 = vpop.f32.mrf.mxu2  ;;  %v4579_v19 = vmul.f32 %v12859_v24, %v12859_v24  ;;  %v4495_v49 = vadd.f32 %v16655_v42, %v12859_v24  ;;  %v3304_v53 = vadd.f32 %v16663_v20, %v3255_v61  ;;  %v16668_v61 = vld [vmem:[#allocation254_spill] sm:$0xff] }
 0x477   :  { %16648 = vst [vmem:[#allocation26_spill] sm:$0xff] %v12849_v18  ;;  %v4578_v10 = vmul.f32 %v12849_v18, %v12849_v18  ;;  %v4492_v6 = vadd.f32 %v4491_v44, %v12849_v18  ;;  %v4377_v8 = vadd.f32 %v4376_v31, %v4328_v59  ;;  %v16664_v18 = vld [vmem:[#allocation205_spill] sm:$0xff] }
 0x478   :  { %v3208_v31 = vadd.f32 %v16664_v18, %v3159_v47  ;;  %v4496_v59 = vadd.f32 %v4495_v49, %v12479_v5  ;;  %v16669_v49 = vld [vmem:[#allocation206_spill] sm:$0xff] }
 0x479   :  { %v4652_v63 = vadd.f32 %v4651_v2, %v4578_v10  ;;  %v4280_v44 = vpop.f32.mrf.mxu0  ;;  %v4329_v9 = vpop.f32.mrf.mxu1  ;;  %v4655_v10 = vadd.f32 %v4580_v54, %v4579_v19  ;;  %v16661_v2 = vld [vmem:[#allocation252_spill] sm:$0xff]  ;;  %v16666_v54 = vld [vmem:[#allocation142_spill] sm:$0xff] }
 0x47a   :  { %v4281_v3 = vadd.f32 %v4280_v44, %v12496_v21  ;;  %v12884_v26 = vadd.f32 %v16661_v2, %v3350_v41  ;;  %v12891_v29 = vpop.permute.xlu0 %5265  ;;  %v3353_v44 = vadd.f32 %v16668_v61, %v3304_v53  ;;  %v3257_v2 = vadd.f32 %v16669_v49, %v3208_v31  ;;  %v16672_v61 = vld [vmem:[#allocation258_spill] sm:$0xff] }
 0x47b   :  { %4493 = vadd.xlane.f32.xlu1 %v4492_v6  ;;  %4653 = vadd.xlane.f32.xlu0 %v4652_v63  ;;  %v4656_v63 = vadd.f32 %v4655_v10, %v4581_v23  ;;  %16665 = vst [vmem:[#allocation115_spill] sm:$0xff] %v12891_v29  ;;  %v4585_v23 = vmul.f32 %v12490_v1, %v12490_v1 }
 0x47c   :  { %v4425_v30 = vpop.f32.mrf.mxu3  ;;  %16662 = vst [vmem:[#allocation182_spill] sm:$0xff] %v12884_v26  ;;  %v4330_v19 = vadd.f32 %v4329_v9, %v4281_v3  ;;  %v4583_v47 = vmul.f32 %v12884_v26, %v12884_v26  ;;  %v12904_v9 = vpop.permute.xlu2 %5240  ;;  %v12912_v31 = vadd.f32 %v16672_v61, %v3353_v44 }
 0x47d   :  { %v12880_v35 = vadd.f32 %v4425_v30, %v4377_v8  ;;  %v4584_v8 = vmul.f32 %v16666_v54, %v16666_v54  ;;  %v12896_v30 = vpop.permute.xlu1 %5235  ;;  %16670 = vst [vmem:[#allocation100_spill] sm:$0xff] %v12904_v9  ;;  %v1194_v9 = vmul.f32 %v16718_v17, %v16717_v56 }
 0x47e   :  { %16667 = vst [vmem:[#allocation98_spill] sm:$0xff] %v12896_v30  ;;  %v4378_v18 = vpop.f32.mrf.mxu2  ;;  %v4505_v61 = vadd.f32 %v16675_v48, %v12912_v31  ;;  %v16719_v30 = vld [vmem:[#allocation58_spill] sm:$0xff] }
 0x47f   :  { %16660 = vst [vmem:[#allocation169_spill] sm:$0xff] %v12880_v35  ;;  %v4582_v6 = vmul.f32 %v12880_v35, %v12880_v35  ;;  %v4497_v41 = vadd.f32 %v4496_v59, %v12880_v35  ;;  %v4379_v10 = vadd.f32 %v4378_v18, %v4330_v19  ;;  %v4500_v59 = vadd.f32 %v16666_v54, %v12884_v26  ;;  %v16700_v35 = vld [vmem:[#allocation29_spill] sm:$0xff] }
 0x480   :  { %16673 = vst [vmem:[#allocation192_spill] sm:$0xff] %v12912_v31  ;;  %v3306_v19 = vadd.f32 %v16674_v36, %v3257_v2  ;;  %v4588_v54 = vmul.f32 %v16675_v48, %v16675_v48  ;;  %v16677_v36 = vld [vmem:[#allocation260_spill] sm:$0xff] }
 0x481   :  { %v4657_v21 = vadd.f32 %v4656_v63, %v4582_v6  ;;  %v4283_v3 = vpop.f32.mrf.mxu0  ;;  %v4660_v63 = vadd.f32 %v4584_v8, %v4583_v47  ;;  %v4332_v49 = vpop.f32.mrf.mxu1  ;;  %v4587_v8 = vmul.f32 %v12912_v31, %v12912_v31 }
 0x482   :  { %v4284_v6 = vadd.f32 %v4283_v3, %v12509_v38  ;;  %v12923_v47 = vpop.permute.xlu0 %5280  ;;  %v3355_v2 = vadd.f32 %v16677_v36, %v3306_v19  ;;  %v4589_v3 = vmul.f32 %v12499_v28, %v12499_v28  ;;  %v16682_v19 = vld [vmem:[#allocation261_spill] sm:$0xff] }
 0x483   :  { %4658 = vadd.xlane.f32.xlu2 %v4657_v21  ;;  %4498 = vadd.xlane.f32.xlu0 %v4497_v41  ;;  %v4501_v21 = vadd.f32 %v4500_v59, %v12490_v1  ;;  %v4661_v18 = vadd.f32 %v4660_v63, %v4585_v23  ;;  %16676 = vst [vmem:[#allocation194_spill] sm:$0xff] %v12923_v47 }
 0x484   :  { %v4427_v20 = vpop.f32.mrf.mxu3  ;;  %v12935_v47 = vpop.permute.xlu2 %5275  ;;  %v12938_v36 = vadd.f32 %v16682_v19, %v3355_v2  ;;  %v16687_v2 = vld [vmem:[#allocation218_spill] sm:$0xff] }
 0x485   :  { %v12908_v53 = vadd.f32 %v4427_v20, %v4379_v10  ;;  %v4333_v10 = vadd.f32 %v4332_v49, %v4284_v6  ;;  %v12928_v63 = vpop.permute.xlu1 %5270  ;;  %v4665_v49 = vadd.f32 %v4588_v54, %v4587_v8  ;;  %16681 = vst [vmem:[#allocation110_spill] sm:$0xff] %v12935_v47  ;;  %v4593_v19 = vmul.f32 %v16687_v2, %v16687_v2 }
 0x486   :  { %v4381_v44 = vpop.f32.mrf.mxu2  ;;  %16678 = vst [vmem:[#allocation184_spill] sm:$0xff] %v12928_v63  ;;  %v16684_v63 = vld [vmem:[#allocation74_spill] sm:$0xff] }
 0x487   :  { %16671 = vst [vmem:[#allocation102_spill] sm:$0xff] %v12908_v53  ;;  %v4586_v41 = vmul.f32 %v12908_v53, %v12908_v53  ;;  %v4502_v38 = vadd.f32 %v4501_v21, %v12908_v53  ;;  %v4382_v59 = vadd.f32 %v4381_v44, %v4333_v10  ;;  %v4506_v10 = vadd.f32 %v4505_v61, %v12499_v28  ;;  %v16694_v53 = vld [vmem:[#allocation34_spill] sm:$0xff] }
 0x488   :  { %16683 = vst [vmem:[#allocation207_spill] sm:$0xff] %v12938_v36  ;;  %v4592_v48 = vmul.f32 %v16684_v63, %v16684_v63 }
 0x489   :  { %v4662_v20 = vadd.f32 %v4661_v18, %v4586_v41  ;;  %v4285_v6 = vpop.f32.mrf.mxu0  ;;  %v16680_v41 = vld [vmem:[#allocation63_spill] sm:$0xff]  ;;  %v4334_v44 = vpop.f32.mrf.mxu1 }
 0x48a   :  { %v4286_v18 = vadd.f32 %v4285_v6, %v16680_v41  ;;  %v16686_v6 = vld [vmem:[#allocation28_spill] sm:$0xff] }
 0x48b   :  { %4663 = vadd.xlane.f32.xlu1 %v4662_v20  ;;  %4503 = vadd.xlane.f32.xlu2 %v4502_v38  ;;  %v4666_v38 = vadd.f32 %v4665_v49, %v4589_v3  ;;  %v4591_v3 = vmul.f32 %v12938_v36, %v12938_v36  ;;  %v16688_v49 = vld [vmem:[#allocation128_spill] sm:$0xff] }
 0x48c   :  { %v4430_v23 = vpop.f32.mrf.mxu3  ;;  %v4335_v54 = vadd.f32 %v4334_v44, %v4286_v18  ;;  %v1175_v28 = vmul.f32 %v16686_v6, %v16688_v49  ;;  %v16689_v18 = vld [vmem:[#allocation129_spill] sm:$0xff]  ;;  %v4510_v44 = vadd.f32 %v16684_v63, %v12938_v36  ;;  %v16693_v49 = vld [vmem:[#allocation135_spill] sm:$0xff] }
 0x48d   :  { %v12932_v21 = vadd.f32 %v4430_v23, %v4382_v59  ;;  %v16685_v23 = vld [vmem:[#allocation127_spill] sm:$0xff]  ;;  %v1178_v1 = vmul.f32 %v16694_v53, %v16693_v49  ;;  %v12971_v29 = vpop.permute.xlu1 %5245  ;;  %v16699_v36 = vld [vmem:[#allocation13_spill] sm:$0xff] }
 0x48e   :  { %v1174_v41 = vmul.f32 %v16686_v6, %v16685_v23  ;;  %v4383_v47 = vpop.f32.mrf.mxu2  ;;  %16696 = vst [vmem:[#allocation112_spill] sm:$0xff] %v12971_v29  ;;  %v1182_v5 = vmul.f32 %v16700_v35, %v16699_v36 }
 0x48f   :  { %16679 = vst [vmem:[#allocation104_spill] sm:$0xff] %v12932_v21  ;;  %v4590_v20 = vmul.f32 %v12932_v21, %v12932_v21  ;;  %v4507_v8 = vadd.f32 %v4506_v10, %v12932_v21  ;;  %v4384_v61 = vadd.f32 %v4383_v47, %v4335_v54  ;;  %v1176_v10 = vmul.f32 %v16686_v6, %v16689_v18  ;;  %v16691_v54 = vld [vmem:[#allocation130_spill] sm:$0xff]  ;;  %v16695_v18 = vld [vmem:[#allocation136_spill] sm:$0xff] }
 0x490   :  { %v4670_v47 = vadd.f32 %v4592_v48, %v4591_v3  ;;  %v1179_v26 = vmul.f32 %v16694_v53, %v16695_v18  ;;  %v4511_v48 = vadd.f32 %v4510_v44, %v16687_v2 }
 0x491   :  { %v4667_v59 = vadd.f32 %v4666_v38, %v4590_v20 }
 0x492   :  { %v4671_v3 = vadd.f32 %v4670_v47, %v4593_v19 }
 0x493   :  { %4508 = vadd.xlane.f32.xlu1 %v4507_v8  ;;  %4668 = vadd.xlane.f32.xlu0 %v4667_v59  ;;  %v1177_v8 = vmul.f32 %v16686_v6, %v16691_v54  ;;  %v16692_v59 = vld [vmem:[#allocation75_spill] sm:$0xff] }
 0x494   :  { %v4432_v20 = vpop.f32.mrf.mxu3  ;;  %v4439_v38 = vpop.xlane.xlu0 %4438  ;;  %v12965_v31 = vadd.f32 %v16692_v59, %v1174_v41  ;;  %v12979_v41 = vadd.f32 %v16692_v59, %v1175_v28  ;;  %v12991_v19 = vadd.f32 %v16692_v59, %v1176_v10 }
 0x495   :  { %v12958_v23 = vadd.f32 %v4432_v20, %v4384_v61  ;;  %v12960_v21 = vmul.f32 0.001953125, %v4439_v38  ;;  %v16697_v61 = vld [vmem:[#allocation137_spill] sm:$0xff]  ;;  %v16698_v38 = vld [vmem:[#allocation138_spill] sm:$0xff]  ;;  %v12994_v28 = vadd.f32 %v16692_v59, %v1177_v8 }
 0x496   :  { %v4599_v63 = vpop.xlane.xlu2 %4598  ;;  %v1180_v20 = vmul.f32 %v16694_v53, %v16697_v61  ;;  %v1181_v54 = vmul.f32 %v16694_v53, %v16698_v38  ;;  %v16701_v61 = vld [vmem:[#allocation143_spill] sm:$0xff]  ;;  %v16702_v53 = vld [vmem:[#allocation144_spill] sm:$0xff]  ;;  %v16704_v8 = vld [vmem:[#allocation145_spill] sm:$0xff] }
 0x497   :  { %16690 = vst [vmem:[#allocation94_spill] sm:$0xff] %v12958_v23  ;;  %v4594_v6 = vmul.f32 %v12958_v23, %v12958_v23  ;;  %v4675_v49 = vmul.f32 0.001953125, %v4599_v63  ;;  %v4691_v18 = vmul.f32 %v12960_v21, %v12960_v21  ;;  %v1183_v44 = vmul.f32 %v16700_v35, %v16701_v61  ;;  %v16703_v38 = vld [vmem:[#allocation76_spill] sm:$0xff] }
 0x498   :  { %v4512_v42 = vadd.f32 %v4511_v48, %v12958_v23  ;;  %v1184_v63 = vmul.f32 %v16700_v35, %v16702_v53  ;;  %v12999_v29 = vadd.f32 %v16703_v38, %v1178_v1  ;;  %v13002_v36 = vadd.f32 %v16703_v38, %v1179_v26  ;;  %v16705_v48 = vld [vmem:[#allocation38_spill] sm:$0xff]  ;;  %v16707_v1 = vld [vmem:[#allocation93_spill] sm:$0xff] }
 0x499   :  { %v4672_v2 = vadd.f32 %v4671_v3, %v4594_v6  ;;  %v4707_v47 = vsub.f32 %v4675_v49, %v4691_v18  ;;  %v13005_v6 = vadd.f32 %v16703_v38, %v1180_v20  ;;  %v13008_v10 = vadd.f32 %v16703_v38, %v1181_v54  ;;  %v16706_v3 = vld [vmem:[#allocation40_spill] sm:$0xff]  ;;  %v16708_v20 = vld [vmem:[#allocation39_spill] sm:$0xff]  ;;  %v16713_v23 = vld [vmem:[#allocation197_spill] sm:$0xff] }
 0x49a   :  { %v1185_v59 = vmul.f32 %v16700_v35, %v16704_v8  ;;  %v1186_v49 = vmul.f32 %v16706_v3, %v16705_v48  ;;  %v13017_v61 = vadd.f32 %v16707_v1, %v1182_v5  ;;  %v13020_v26 = vadd.f32 %v16707_v1, %v1183_v44  ;;  %v16710_v35 = vld [vmem:[#allocation189_spill] sm:$0xff]  ;;  %v16712_v8 = vld [vmem:[#allocation35_spill] sm:$0xff] }
 0x49b   :  { %4673 = vadd.xlane.f32.xlu2 %v4672_v2  ;;  %4513 = vadd.xlane.f32.xlu0 %v4512_v42  ;;  %v13014_v18 = vadd.f32 1e-05, %v4707_v47  ;;  %v1187_v42 = vmul.f32 %v16706_v3, %v16708_v20  ;;  %v16709_v2 = vld [vmem:[#allocation46_spill] sm:$0xff]  ;;  %v13027_v53 = vadd.f32 %v16707_v1, %v1184_v63  ;;  %v1189_v38 = vmul.f32 %v16706_v3, %v16710_v35  ;;  %v16711_v47 = vld [vmem:[#allocation196_spill] sm:$0xff]  ;;  %v16716_v35 = vld [vmem:[#allocation87_spill] sm:$0xff] }
 0x49c   :  { %v1188_v54 = vmul.f32 %v16706_v3, %v16709_v2  ;;  %v1190_v48 = vmul.f32 %v16712_v8, %v16711_v47  ;;  %v1191_v24 = vmul.f32 %v16712_v8, %v16713_v23  ;;  %v16714_v20 = vld [vmem:[#allocation198_spill] sm:$0xff]  ;;  %v16715_v2 = vld [vmem:[#allocation199_spill] sm:$0xff]  ;;  %v13043_v3 = vadd.f32 %v16707_v1, %v1185_v59 }
 0x49d   :  { %8003 = vrsqrt.f32 %v13014_v18  ;;  %v1192_v34 = vmul.f32 %v16712_v8, %v16714_v20  ;;  %v1193_v63 = vmul.f32 %v16712_v8, %v16715_v2  ;;  %v13046_v47 = vadd.f32 %v16716_v35, %v1186_v49  ;;  %v16720_v8 = vld [vmem:[#allocation59_spill] sm:$0xff]  ;;  %v16722_v2 = vld [vmem:[#allocation89_spill] sm:$0xff] }
 0x49e   :  { %v4444_v5 = vpop.xlane.xlu2 %4443  ;;  %v4604_v44 = vpop.xlane.xlu1 %4603  ;;  %v1195_v23 = vmul.f32 %v16718_v17, %v16719_v30  ;;  %v13053_v55 = vadd.f32 %v16716_v35, %v1187_v42  ;;  %v13056_v20 = vadd.f32 %v16716_v35, %v1188_v54  ;;  %v16721_v59 = vld [vmem:[#allocation67_spill] sm:$0xff]  ;;  %v13063_v49 = vadd.f32 %v16716_v35, %v1189_v38 }
 0x49f   :  { %v13040_v4 = vmul.f32 0.001953125, %v4444_v5  ;;  %v1196_v5 = vmul.f32 %v16718_v17, %v16720_v8  ;;  %v1197_v1 = vmul.f32 %v16718_v17, %v16721_v59  ;;  %v13066_v56 = vadd.f32 %v16722_v2, %v1190_v48  ;;  %v16727_v17 = vld [vmem:[#allocation22_spill] sm:$0xff]  ;;  %v16729_v48 = vld [vmem:[#allocation103_spill] sm:$0xff] }
 0x4a0   :  { %v4676_v42 = vmul.f32 0.001953125, %v4604_v44  ;;  %v13071_v25 = vadd.f32 %v16722_v2, %v1191_v24  ;;  %v13074_v54 = vadd.f32 %v16722_v2, %v1192_v34  ;;  %v13077_v8 = vadd.f32 %v16722_v2, %v1193_v63  ;;  %v16728_v59 = vld [vmem:[#allocation50_spill] sm:$0xff]  ;;  %v16732_v44 = vld [vmem:[#allocation81_spill] sm:$0xff]  ;;  %v16735_v2 = vld [vmem:[#allocation84_spill] sm:$0xff] }
 0x4a1   :  { %16723 = vst [vmem:[#allocation208_spill] sm:$0xff] %v13066_v56  ;;  %v4692_v30 = vmul.f32 %v13040_v4, %v13040_v4  ;;  %v1198_v38 = vmul.f32 %v16728_v59, %v16727_v17  ;;  %v13084_v43 = vadd.f32 %v16729_v48, %v1194_v9  ;;  %v13087_v46 = vadd.f32 %v16729_v48, %v1195_v23 }
 0x4a2   :  { %16724 = vst [vmem:[#allocation116_spill] sm:$0xff] %v13071_v25  ;;  %v1199_v24 = vmul.f32 %v16728_v59, %v16732_v44  ;;  %v13092_v34 = vadd.f32 %v16729_v48, %v1196_v5  ;;  %v13095_v63 = vadd.f32 %v16729_v48, %v1197_v1  ;;  %v1200_v17 = vmul.f32 %v16728_v59, %v16735_v2  ;;  %v16738_v25 = vld [vmem:[#allocation41_spill] sm:$0xff]  ;;  %v16739_v44 = vld [vmem:[#allocation92_spill] sm:$0xff]  ;;  %v16740_v48 = vld [vmem:[#allocation95_spill] sm:$0xff] }
 0x4a3   :  { %16725 = vst [vmem:[#allocation209_spill] sm:$0xff] %v13074_v54  ;;  %v13081_v35 = vpop.eup %8003  ;;  %v4708_v62 = vsub.f32 %v4676_v42, %v4692_v30  ;;  %v16737_v54 = vld [vmem:[#allocation91_spill] sm:$0xff]  ;;  %v1203_v30 = vmul.f32 %v16738_v25, %v16739_v44  ;;  %v13110_v56 = vadd.f32 %v16740_v48, %v1198_v38  ;;  %v16742_v2 = vld [vmem:[#allocation224_spill] sm:$0xff]  ;;  %vm4809_vm5 = vweird.f32 %v13014_v18 }
 0x4a4   :  { %16726 = vst [vmem:[#allocation118_spill] sm:$0xff] %v13077_v8  ;;  %v4804_v9 = vmul.f32 %v13081_v35, %v13014_v18  ;;  %v16736_v8 = vld [vmem:[#allocation68_spill] sm:$0xff]  ;;  %v1202_v37 = vmul.f32 %v16738_v25, %v16737_v54  ;;  %v16744_v54 = vld [vmem:[#allocation225_spill] sm:$0xff]  ;;  %v16746_v44 = vld [vmem:[#allocation43_spill] sm:$0xff]  ;;  %vm4810_vm1 = vweird.f32 %v13081_v35 }
 0x4a5   :  { %16730 = vst [vmem:[#allocation117_spill] sm:$0xff] %v13084_v43  ;;  %v1201_v23 = vmul.f32 %v16728_v59, %v16736_v8  ;;  %v13107_v5 = vadd.f32 1e-05, %v4708_v62  ;;  %v13118_v8 = vadd.f32 %v16740_v48, %v1199_v24  ;;  %v1205_v59 = vmul.f32 %v16738_v25, %v16744_v54  ;;  %v16745_v62 = vld [vmem:[#allocation106_spill] sm:$0xff]  ;;  %v16747_v38 = vld [vmem:[#allocation107_spill] sm:$0xff]  ;;  %v5198_v24 = vld [vmem:[%s15521_s9 + $0x58] sm:$0xff] }
 0x4a6   :  { %16731 = vst [vmem:[#allocation119_spill] sm:$0xff] %v13087_v46  ;;  %v4609_v42 = vpop.xlane.xlu0 %4608  ;;  %v4449_v1 = vpop.xlane.xlu1 %4448  ;;  %v1206_v43 = vmul.f32 %v16746_v44, %v16745_v62  ;;  %v16750_v54 = vld [vmem:[#allocation158_spill] sm:$0xff]  ;;  %v1209_v7 = vmul.f32 %v16746_v44, %v16755_v22  ;;  %vm4811_vm6 = vmor %vm4809_vm5, %vm4810_vm1 }
 0x4a7   :  { %16733 = vst [vmem:[#allocation124_spill] sm:$0xff] %v13092_v34  ;;  %v4805_v34 = vmul.f32 %v13081_v35, %v4804_v9  ;;  %v13115_v46 = vmul.f32 0.001953125, %v4449_v1  ;;  %8005 = vrsqrt.f32 %v13107_v5  ;;  %v13133_v1 = vadd.f32 %v16740_v48, %v1200_v17 }
 0x4a8   :  { %16734 = vst [vmem:[#allocation211_spill] sm:$0xff] %v13095_v63  ;;  %v1204_v63 = vmul.f32 %v16738_v25, %v16742_v2  ;;  %v4677_v2 = vmul.f32 0.001953125, %v4609_v42  ;;  %v13136_v25 = vadd.f32 %v16740_v48, %v1201_v23  ;;  %v13139_v62 = vadd.f32 %v16750_v54, %v1202_v37  ;;  %v16754_v42 = vld [vmem:[#allocation229_spill] sm:$0xff]  ;;  %v5197_v37 = vld [vmem:[%s15521_s9 + $0x50] sm:$0xff]  ;;  %v16757_v23 = vld [vmem:[#allocation146_spill] sm:$0xff] }
 0x4a9   :  { %16741 = vst [vmem:[#allocation120_spill] sm:$0xff] %v13110_v56  ;;  %v1207_v56 = vmul.f32 %v16746_v44, %v16747_v38  ;;  %v4806_v45 = vmul.f32 0.5, %v4805_v34  ;;  %v4693_v9 = vmul.f32 %v13115_v46, %v13115_v46  ;;  %v13142_v38 = vadd.f32 %v16750_v54, %v1203_v30  ;;  %v16758_v30 = vld [vmem:[#allocation61_spill] sm:$0xff] }
 0x4aa   :  { %16743 = vst [vmem:[#allocation195_spill] sm:$0xff] %v13118_v8  ;;  %v13145_v34 = vadd.f32 %v16750_v54, %v1204_v63  ;;  %v1208_v8 = vmul.f32 %v16746_v44, %v16754_v42  ;;  %v1210_v48 = vmul.f32 %v16758_v30, %v16757_v23  ;;  %v16759_v63 = vld [vmem:[#allocation269_spill] sm:$0xff]  ;;  %v16766_v23 = vld [vmem:[#allocation51_spill] sm:$0xff]  ;;  %vm4819_vm8 = vweird.f32 %v13107_v5 }
 0x4ab   :  { %16748 = vst [vmem:[#allocation125_spill] sm:$0xff] %v13133_v1  ;;  %v4709_v17 = vsub.f32 %v4677_v2, %v4693_v9  ;;  %v13152_v1 = vadd.f32 %v16750_v54, %v1205_v59  ;;  %v4807_v44 = vsub.f32 1.5, %v4806_v45  ;;  %v16765_v54 = vld [vmem:[#allocation73_spill] sm:$0xff] }
 0x4ac   :  { %16749 = vst [vmem:[#allocation212_spill] sm:$0xff] %v13136_v25  ;;  %5260 = vperm.xlu1 %7969, %v5198_v24   ;;  %v16764_v24 = vld [vmem:[#allocation20_spill] sm:$0xff]  ;;  %v1223_v25 = vmul.f32 %v16765_v54, %v16766_v23 }
 0x4ad   :  { %16751 = vst [vmem:[#allocation123_spill] sm:$0xff] %v13139_v62  ;;  %v16761_v62 = vld [vmem:[#allocation164_spill] sm:$0xff]  ;;  %v13169_v2 = vadd.f32 1e-05, %v4709_v17  ;;  %v8006_v9 = vpop.eup %8005 }
 0x4ae   :  { %16752 = vst [vmem:[#allocation233_spill] sm:$0xff] %v13142_v38  ;;  %v16760_v38 = vld [vmem:[#allocation270_spill] sm:$0xff]  ;;  %v13164_v22 = vadd.f32 %v16761_v62, %v1206_v43  ;;  %v13167_v59 = vadd.f32 %v16761_v62, %v1207_v56  ;;  %v1213_v43 = vmul.f32 %v16758_v30, %v16768_v0  ;;  %v13180_v56 = vadd.f32 %v16761_v62, %v1208_v8  ;;  %v16772_v0 = vld [vmem:[#allocation160_spill] sm:$0xff] }
 0x4af   :  { %16753 = vst [vmem:[#allocation131_spill] sm:$0xff] %v13145_v34  ;;  %v1211_v34 = vmul.f32 %v16758_v30, %v16759_v63  ;;  %v1212_v42 = vmul.f32 %v16758_v30, %v16760_v38  ;;  %v16767_v63 = vld [vmem:[#allocation200_spill] sm:$0xff]  ;;  %v4454_v38 = vpop.xlane.xlu0 %4453  ;;  %v13183_v45 = vadd.f32 %v16761_v62, %v1209_v7  ;;  %v4814_v17 = vmul.f32 %v8006_v9, %v13107_v5 }
 0x4b0   :  { %16756 = vst [vmem:[#allocation133_spill] sm:$0xff] %v13152_v1  ;;  %v1222_v1 = vmul.f32 %v16765_v54, %v16764_v24  ;;  %v1224_v14 = vmul.f32 %v16765_v54, %v16767_v63  ;;  %8007 = vrsqrt.f32 %v13169_v2  ;;  %5255 = vperm.xlu0 %7968, %v5197_v37   ;;  %v16771_v24 = vld [vmem:[#allocation69_spill] sm:$0xff]  ;;  %v5196_v63 = vld [vmem:[%s15521_s9 + $0x48] sm:$0xff]  ;;  %v13193_v30 = vadd.f32 %v16772_v0, %v1210_v48 }
 0x4b1   :  { %16762 = vst [vmem:[#allocation214_spill] sm:$0xff] %v13164_v22  ;;  %v1225_v23 = vmul.f32 %v16765_v54, %v16771_v24  ;;  %v13196_v8 = vadd.f32 %v16772_v0, %v1211_v34  ;;  %v13199_v7 = vadd.f32 %v16772_v0, %v1212_v42  ;;  %v4808_v62 = vmul.f32 %v13081_v35, %v4807_v44  ;;  %v16776_v24 = vld [vmem:[#allocation213_spill] sm:$0xff] }
 0x4b2   :  { %16763 = vst [vmem:[#allocation215_spill] sm:$0xff] %v13167_v59  ;;  %v4614_v59 = vpop.xlane.xlu2 %4613  ;;  %v4815_v37 = vmul.f32 %v8006_v9, %v4814_v17  ;;  %v13203_v54 = vmul.f32 0.001953125, %v4454_v38  ;;  %v13212_v48 = vadd.f32 %v16776_v24, %v1224_v14  ;;  %v13215_v34 = vadd.f32 %v16772_v0, %v1213_v43  ;;  %v16782_v17 = vld [vmem:[#allocation70_spill] sm:$0xff]  ;;  %v16785_v43 = vld [vmem:[#allocation272_spill] sm:$0xff]  ;;  %v16791_v22 = vld [vmem:[#allocation101_spill] sm:$0xff] }
 0x4b3   :  { %16769 = vst [vmem:[#allocation132_spill] sm:$0xff] %v13180_v56  ;;  %v13209_v56 = vadd.f32 %v16776_v24, %v1223_v25  ;;  %v4678_v44 = vmul.f32 0.001953125, %v4614_v59  ;;  %5250 = vperm.xlu2 %7970, %v5196_v63   ;;  %v16783_v25 = vld [vmem:[#allocation65_spill] sm:$0xff]  ;;  %v16784_v14 = vld [vmem:[#allocation78_spill] sm:$0xff]  ;;  %v4812_v63 = vsel %vm4811_vm6, %v13081_v35, %v4808_v62  ;;  %vm4820_vm7 = vweird.f32 %v8006_v9 }
 0x4b4   :  { %16770 = vst [vmem:[#allocation134_spill] sm:$0xff] %v13183_v45  ;;  %v13206_v45 = vadd.f32 %v16776_v24, %v1222_v1  ;;  %v4816_v42 = vmul.f32 0.5, %v4815_v37  ;;  %v4694_v38 = vmul.f32 %v13203_v54, %v13203_v54  ;;  %v13221_v1 = vadd.f32 %v16776_v24, %v1225_v23  ;;  %v16786_v37 = vld [vmem:[#allocation64_spill] sm:$0xff]  ;;  %vm4821_vm9 = vmor %vm4819_vm8, %vm4820_vm7 }
 0x4b5   :  { %16773 = vst [vmem:[#allocation216_spill] sm:$0xff] %v13193_v30  ;;  %v13233_v18 = vmul.f32 %v16783_v25, %v16785_v43  ;;  %v4723_v24 = vsub.f32 %v16786_v37, %v12960_v21  ;;  %v16788_v43 = vld [vmem:[#allocation181_spill] sm:$0xff]  ;;  %vm4829_vm11 = vweird.f32 %v13169_v2 }
 0x4b6   :  { %16774 = vst [vmem:[#allocation10_spill] sm:$0xff] %v13196_v8  ;;  %v13229_v8 = vmul.f32 %v16783_v25, %v16784_v14  ;;  %v8008_v59 = vpop.eup %8007  ;;  %v4817_v23 = vsub.f32 1.5, %v4816_v42  ;;  %v4710_v0 = vsub.f32 %v4678_v44, %v4694_v38  ;;  %v4726_v30 = vsub.f32 %v16788_v43, %v12960_v21  ;;  %v16790_v43 = vld [vmem:[#allocation85_spill] sm:$0xff] }
 0x4b7   :  { %16775 = vst [vmem:[#allocation140_spill] sm:$0xff] %v13199_v7  ;;  %v13225_v7 = vmul.f32 %v16783_v25, %v16782_v17  ;;  %v16787_v17 = vld [vmem:[#allocation60_spill] sm:$0xff]  ;;  %v4824_v35 = vmul.f32 %v8008_v59, %v13169_v2  ;;  %v4963_v42 = vmul.f32 %v4812_v63, %v4723_v24  ;;  %v4727_v44 = vsub.f32 %v16536_v32, %v13040_v4  ;;  %v16792_v2 = vld [vmem:[#allocation273_spill] sm:$0xff] }
 0x4b8   :  { %16777 = vst [vmem:[#allocation219_spill] sm:$0xff] %v13206_v45  ;;  %v4724_v14 = vsub.f32 %v16787_v17, %v12960_v21  ;;  %v13248_v62 = vadd.f32 1e-05, %v4710_v0  ;;  %v4728_v38 = vsub.f32 %v16532_v52, %v13040_v4  ;;  %v4731_v32 = vsub.f32 %v16790_v43, %v13115_v46 }
 0x4b9   :  { %16778 = vst [vmem:[#allocation217_spill] sm:$0xff] %v13209_v56  ;;  %v4825_v5 = vmul.f32 %v8008_v59, %v4824_v35  ;;  %vm4830_vm10 = vweird.f32 %v8008_v59 }
 0x4ba   :  { %16779 = vst [vmem:[#allocation257_spill] sm:$0xff] %v13212_v48  ;;  %8009 = vrsqrt.f32 %v13248_v62  ;;  %v4964_v48 = vmul.f32 %v4812_v63, %v4724_v14  ;;  %vm4831_vm12 = vmor %vm4829_vm11, %vm4830_vm10  ;;  %vm4839_vm14 = vweird.f32 %v13248_v62 }
 0x4bb   :  { %16780 = vst [vmem:[#allocation139_spill] sm:$0xff] %v13215_v34  ;;  %v4725_v34 = vsub.f32 %v12377_v60, %v12960_v21  ;;  %v4729_v60 = vsub.f32 %v12388_v16, %v13040_v4  ;;  %v16789_v21 = vld [vmem:[#allocation83_spill] sm:$0xff]  ;;  %v4826_v45 = vmul.f32 0.5, %v4825_v5  ;;  %v5123_v16 = vmul.f32 %v12635_v51, %v4963_v42  ;;  %v16793_v5 = vld [vmem:[#allocation4_spill] sm:$0xff] }
 0x4bc   :  { %16781 = vst [vmem:[#allocation11_spill] sm:$0xff] %v13221_v1  ;;  %v4818_v1 = vmul.f32 %v8006_v9, %v4817_v23  ;;  %v4730_v23 = vsub.f32 %v16789_v21, %v13040_v4 }
 0x4bd   :  { %v4965_v56 = vmul.f32 %v4812_v63, %v4725_v34 }
 0x4be   :  { %v4822_v37 = vsel %vm4821_vm9, %v8006_v9, %v4818_v1  ;;  %v4966_v1 = vmul.f32 %v4812_v63, %v4726_v30 }
 0x4bf   :  { %v4967_v0 = vmul.f32 %v4822_v37, %v4727_v44  ;;  %v4968_v17 = vmul.f32 %v4822_v37, %v4728_v38  ;;  %v4969_v24 = vmul.f32 %v4822_v37, %v4729_v60  ;;  %v4970_v52 = vmul.f32 %v4822_v37, %v4730_v23 }
 0x4c0   :  { %v4827_v44 = vsub.f32 1.5, %v4826_v45  ;;  %v13270_v42 = vpop.eup %8009  ;;  %v5124_v60 = vmul.f32 %v12635_v51, %v4964_v48  ;;  %v5125_v21 = vmul.f32 %v12635_v51, %v4965_v56  ;;  %v1229_v48 = vmul.f32 %v16783_v25, %v16792_v2 }
 0x4c1   :  { %v5127_v40 = vmul.f32 %v16791_v22, %v4967_v0  ;;  %v5128_v4 = vmul.f32 %v16791_v22, %v4968_v17  ;;  %v5129_v9 = vmul.f32 %v16791_v22, %v4969_v24  ;;  %v5130_v35 = vmul.f32 %v16791_v22, %v4970_v52  ;;  %v16794_v0 = vld [vmem:[#allocation249_spill] sm:$0xff]  ;;  %v16795_v24 = vld [vmem:[#allocation239_spill] sm:$0xff] }
 0x4c2   :  { %v4828_v63 = vmul.f32 %v8008_v59, %v4827_v44  ;;  %v5283_v22 = vadd.f32 %v12826_v33, %v5123_v16  ;;  %v4834_v37 = vmul.f32 %v13270_v42, %v13248_v62  ;;  %v13299_v43 = vadd.f32 %v16795_v24, %v13225_v7 }
 0x4c3   :  { %v5287_v38 = vadd.f32 %v12835_v15, %v5127_v40  ;;  %v5288_v14 = vadd.f32 %v12835_v15, %v5128_v4  ;;  %v5289_v34 = vadd.f32 %v12835_v15, %v5129_v9  ;;  %v5290_v30 = vadd.f32 %v12835_v15, %v5130_v35  ;;  %v16797_v35 = vld [vmem:[#allocation66_spill] sm:$0xff] }
 0x4c4   :  { %v4832_v15 = vsel %vm4831_vm12, %v8008_v59, %v4828_v63  ;;  %v5284_v25 = vadd.f32 %v12826_v33, %v5124_v60  ;;  %v5285_v59 = vadd.f32 %v12826_v33, %v5125_v21  ;;  %v5347_v52 = vadd.f32 %v5283_v22, %v12965_v31  ;;  %v16798_v22 = vld [vmem:[#allocation275_spill] sm:$0xff] }
 0x4c5   :  { %v13277_v45 = vadd.f32 %v5287_v38, %v12999_v29  ;;  %v13280_v40 = vadd.f32 %v5288_v14, %v13002_v36  ;;  %v13283_v23 = vadd.f32 %v5289_v34, %v13005_v6  ;;  %v13288_v56 = vadd.f32 %v5290_v30, %v13008_v10 }
 0x4c6   :  { %v5126_v29 = vmul.f32 %v12635_v51, %v4966_v1  ;;  %v4732_v36 = vsub.f32 %v16793_v5, %v13115_v46  ;;  %v4733_v6 = vsub.f32 %v16794_v0, %v13115_v46  ;;  %v4971_v17 = vmul.f32 %v4832_v15, %v4731_v32  ;;  %v16796_v1 = vld [vmem:[#allocation274_spill] sm:$0xff]  ;;  %v4619_v0 = vpop.xlane.xlu1 %4618 }
 0x4c7   :  { %v13303_v10 = vadd.f32 %v16795_v24, %v13229_v8  ;;  %v4734_v51 = vsub.f32 %v12586_v50, %v13115_v46  ;;  %v13312_v32 = vadd.f32 %v16795_v24, %v13233_v18  ;;  %v4835_v8 = vmul.f32 %v13270_v42, %v4834_v37 }
 0x4c8   :  { %v4972_v16 = vmul.f32 %v4832_v15, %v4732_v36  ;;  %v4973_v4 = vmul.f32 %v4832_v15, %v4733_v6  ;;  %v5131_v9 = vmul.f32 %v12640_v27, %v4971_v17  ;;  %v1230_v44 = vmul.f32 %v16797_v35, %v16796_v1  ;;  %v16799_v6 = vld [vmem:[#allocation276_spill] sm:$0xff]  ;;  %v4624_v1 = vpop.xlane.xlu0 %4623 }
 0x4c9   :  { %v4974_v7 = vmul.f32 %v4832_v15, %v4734_v51  ;;  %v5286_v46 = vadd.f32 %v12826_v33, %v5126_v29  ;;  %v5348_v38 = vadd.f32 %v5284_v25, %v12979_v41  ;;  %v4836_v34 = vmul.f32 0.5, %v4835_v8 }
 0x4ca   :  { %v5132_v50 = vmul.f32 %v12640_v27, %v4972_v16  ;;  %v5133_v31 = vmul.f32 %v12640_v27, %v4973_v4  ;;  %v5291_v18 = vadd.f32 %v12816_v11, %v5131_v9  ;;  %v5349_v60 = vadd.f32 %v5285_v59, %v12991_v19  ;;  %v16802_v59 = vld [vmem:[#allocation19_spill] sm:$0xff] }
 0x4cb   :  { %v5134_v14 = vmul.f32 %v12640_v27, %v4974_v7  ;;  %v7643_v21 = vmul.f32 -1.442695, %v5347_v52  ;;  %v1231_v33 = vmul.f32 %v16797_v35, %v16798_v22  ;;  %v4837_v41 = vsub.f32 1.5, %v4836_v34  ;;  %v4459_v27 = vpop.xlane.xlu2 %4458  ;;  %v16803_v7 = vld [vmem:[#allocation2_spill] sm:$0xff] }
 0x4cc   :  { %v5292_v30 = vadd.f32 %v12816_v11, %v5132_v50  ;;  %v5293_v63 = vadd.f32 %v12816_v11, %v5133_v31  ;;  %v13331_v15 = vadd.f32 %v5291_v18, %v13017_v61  ;;  %v13334_v37 = vadd.f32 %v16795_v24, %v1229_v48  ;;  %v16801_v24 = vld [vmem:[#allocation221_spill] sm:$0xff] }
 0x4cd   :  { %v5294_v2 = vadd.f32 %v12816_v11, %v5134_v14  ;;  %vm4840_vm13 = vweird.f32 %v13270_v42  ;;  %v5350_v5 = vadd.f32 %v5286_v46, %v12994_v28  ;;  %v7644_v36 = vmul.f32 -1.442695, %v5348_v38  ;;  %v16804_v46 = vld [vmem:[#allocation265_spill] sm:$0xff]  ;;  %v16806_v38 = vld [vmem:[#allocation3_spill] sm:$0xff] }
 0x4ce   :  { %v13337_v19 = vadd.f32 %v5292_v30, %v13020_v26  ;;  %v13340_v29 = vadd.f32 %v5293_v63, %v13027_v53  ;;  %v4838_v61 = vmul.f32 %v13270_v42, %v4837_v41  ;;  %v1232_v48 = vmul.f32 %v16797_v35, %v16799_v6  ;;  %v16800_v53 = vld [vmem:[#allocation277_spill] sm:$0xff]  ;;  %vm4841_vm15 = vmor %vm4839_vm14, %vm4840_vm13  ;;  %v16808_v6 = vld [vmem:[#allocation8_spill] sm:$0xff] }
 0x4cf   :  { %v13345_v11 = vadd.f32 %v5294_v2, %v13043_v3  ;;  %8011 = vpow2.f32 %v7643_v21  ;;  %v7645_v26 = vmul.f32 -1.442695, %v5349_v60  ;;  %v1233_v17 = vmul.f32 %v16797_v35, %v16800_v53 }
 0x4d0   :  { %v13354_v25 = vadd.f32 %v16801_v24, %v1230_v44  ;;  %v13357_v28 = vadd.f32 %v16801_v24, %v1231_v33  ;;  %v4735_v3 = vsub.f32 %v12599_v12, %v13203_v54  ;;  %v4736_v51 = vsub.f32 %v16552_v57, %v13203_v54 }
 0x4d1   :  { %v4737_v52 = vsub.f32 %v16802_v59, %v13203_v54  ;;  %v4842_v62 = vsel %vm4841_vm15, %v13270_v42, %v4838_v61  ;;  %v13366_v16 = vmul.f32 0.001953125, %v4459_v27  ;;  %8013 = vpow2.f32 %v7644_v36  ;;  %v16805_v42 = vld [vmem:[#allocation86_spill] sm:$0xff]  ;;  %v16809_v59 = vld [vmem:[#allocation256_spill] sm:$0xff] }
 0x4d2   :  { %v7646_v4 = vmul.f32 -1.442695, %v5350_v5  ;;  %v4738_v9 = vsub.f32 %v16803_v7, %v13203_v54  ;;  %v4975_v8 = vmul.f32 %v4842_v62, %v4735_v3  ;;  %v13371_v12 = vadd.f32 %v16801_v24, %v1232_v48  ;;  %v16807_v54 = vld [vmem:[#allocation266_spill] sm:$0xff] }
 0x4d3   :  { %8015 = vpow2.f32 %v7645_v26  ;;  %v4976_v35 = vmul.f32 %v4842_v62, %v4736_v51  ;;  %v4977_v57 = vmul.f32 %v4842_v62, %v4737_v52  ;;  %v13374_v44 = vadd.f32 %v16801_v24, %v1233_v17  ;;  %v4629_v18 = vpop.xlane.xlu2 %4628  ;;  %v4464_v17 = vpop.xlane.xlu1 %4463 }
 0x4d4   :  { %v1234_v50 = vmul.f32 %v16805_v42, %v16804_v46  ;;  %v4978_v31 = vmul.f32 %v4842_v62, %v4738_v9  ;;  %v5135_v14 = vmul.f32 %v16806_v38, %v4975_v8  ;;  %v1235_v60 = vmul.f32 %v16805_v42, %v16807_v54  ;;  %v16810_v62 = vld [vmem:[#allocation243_spill] sm:$0xff] }
 0x4d5   :  { %v8012_v34 = vpop.eup %8011  ;;  %v5136_v21 = vmul.f32 %v16806_v38, %v4976_v35  ;;  %v5137_v30 = vmul.f32 %v16806_v38, %v4977_v57  ;;  %v4695_v63 = vmul.f32 %v13366_v16, %v13366_v16  ;;  %8017 = vpow2.f32 %v7646_v4 }
 0x4d6   :  { %v7647_v22 = vmul.f32 -1.442695, %v13277_v45  ;;  %v5138_v33 = vmul.f32 %v16806_v38, %v4978_v31  ;;  %v5295_v2 = vadd.f32 %v12864_v39, %v5135_v14  ;;  %v7648_v41 = vmul.f32 -1.442695, %v13280_v40  ;;  %v16814_v31 = vld [vmem:[#allocation56_spill] sm:$0xff]  ;;  %v16815_v14 = vld [vmem:[#allocation251_spill] sm:$0xff] }
 0x4d7   :  { %v5296_v27 = vadd.f32 %v12864_v39, %v5136_v21  ;;  %v5297_v5 = vadd.f32 %v12864_v39, %v5137_v30  ;;  %v4679_v36 = vmul.f32 0.001953125, %v4619_v0  ;;  %v8014_v61 = vpop.eup %8013  ;;  %v1236_v48 = vmul.f32 %v16805_v42, %v16808_v6  ;;  %v16816_v21 = vld [vmem:[#allocation246_spill] sm:$0xff] }
 0x4d8   :  { %v13393_v26 = vadd.f32 1.0, %v8012_v34  ;;  %v5298_v53 = vadd.f32 %v12864_v39, %v5138_v33  ;;  %v13397_v45 = vadd.f32 %v5295_v2, %v13046_v47  ;;  %v7649_v40 = vmul.f32 -1.442695, %v13283_v23 }
 0x4d9   :  { %v8016_v24 = vpop.eup %8015  ;;  %v13401_v3 = vadd.f32 %v5296_v27, %v13053_v55  ;;  %v13404_v0 = vadd.f32 %v5297_v5, %v13056_v20  ;;  %v4711_v51 = vsub.f32 %v4679_v36, %v4695_v63  ;;  %v1237_v52 = vmul.f32 %v16805_v42, %v16809_v59 }
 0x4da   :  { %8019 = vpow2.f32 %v7647_v22  ;;  %v7650_v39 = vmul.f32 -1.442695, %v13288_v56  ;;  %v13410_v47 = vadd.f32 %v5298_v53, %v13063_v49  ;;  %v13413_v4 = vadd.f32 %v16810_v62, %v1234_v50  ;;  %v4469_v49 = vpop.xlane.xlu0 %4468  ;;  %v16813_v50 = vld [vmem:[#allocation250_spill] sm:$0xff] }
 0x4db   :  { %v13415_v23 = vadd.f32 1.0, %v8014_v61  ;;  %8021 = vpow2.f32 %v7648_v41  ;;  %v13417_v55 = vmul.f32 0.001953125, %v4464_v17  ;;  %v8018_v20 = vpop.eup %8017  ;;  %v13420_v7 = vadd.f32 %v16810_v62, %v1235_v60  ;;  %v4474_v42 = vpop.xlane.xlu2 %4473 }
 0x4dc   :  { %v13423_v9 = vadd.f32 %v16810_v62, %v1236_v48  ;;  %v13425_v8 = vadd.f32 1.0, %v8016_v24  ;;  %8023 = vrcp.f32 %v13393_v26  ;;  %v13428_v56 = vadd.f32 1e-05, %v4711_v51  ;;  %v16819_v24 = vld [vmem:[#allocation173_spill] sm:$0xff] }
 0x4dd   :  { %16811 = vst [vmem:[#allocation220_spill] sm:$0xff] %v13420_v7  ;;  %8025 = vpow2.f32 %v7649_v40  ;;  %v4680_v35 = vmul.f32 0.001953125, %v4624_v1  ;;  %v4696_v57 = vmul.f32 %v13417_v55, %v13417_v55  ;;  %v7651_v46 = vmul.f32 -1.442695, %v13331_v15 }
 0x4de   :  { %16812 = vst [vmem:[#allocation149_spill] sm:$0xff] %v13423_v9  ;;  %8027 = vpow2.f32 %v7650_v39  ;;  %v1218_v38 = vmul.f32 %v16814_v31, %v16813_v50  ;;  %v1219_v34 = vmul.f32 %v16814_v31, %v16815_v14  ;;  %v13438_v60 = vmul.f32 0.001953125, %v4469_v49  ;;  %v16827_v50 = vld [vmem:[#allocation52_spill] sm:$0xff] }
 0x4df   :  { %8029 = vrcp.f32 %v13415_v23  ;;  %v4712_v54 = vsub.f32 %v4680_v35, %v4696_v57  ;;  %v1220_v1 = vmul.f32 %v16814_v31, %v16816_v21  ;;  %v13442_v63 = vadd.f32 1.0, %v8018_v20 }
 0x4e0   :  { %v8020_v30 = vpop.eup %8019  ;;  %8031 = vrcp.f32 %v13425_v8  ;;  %v7652_v15 = vmul.f32 -1.442695, %v13337_v19  ;;  %v4681_v22 = vmul.f32 0.001953125, %v4629_v18  ;;  %v4697_v41 = vmul.f32 %v13438_v60, %v13438_v60  ;;  %v4634_v19 = vpop.xlane.xlu1 %4633  ;;  %v16818_v18 = vld [vmem:[#allocation268_spill] sm:$0xff] }
 0x4e1   :  { %v8022_v33 = vpop.eup %8021  ;;  %8033 = vrsqrt.f32 %v13428_v56  ;;  %v13447_v2 = vadd.f32 1e-05, %v4712_v54  ;;  %v13451_v27 = vmul.f32 0.001953125, %v4474_v42  ;;  %v13456_v36 = vadd.f32 %v16810_v62, %v1237_v52  ;;  %v16826_v42 = vld [vmem:[#allocation255_spill] sm:$0xff]  ;;  %v16829_v54 = vld [vmem:[#allocation18_spill] sm:$0xff] }
 0x4e2   :  { %v13453_v5 = vpop.eup %8023  ;;  %8035 = vpow2.f32 %v7651_v46  ;;  %v7653_v61 = vmul.f32 -1.442695, %v13340_v29  ;;  %v1221_v6 = vmul.f32 %v16814_v31, %v16818_v18  ;;  %v13461_v53 = vadd.f32 1.0, %v8020_v30 }
 0x4e3   :  { %16817 = vst [vmem:[#allocation147_spill] sm:$0xff] %v13456_v36  ;;  %v8026_v48 = vpop.eup %8025  ;;  %8037 = vrsqrt.f32 %v13447_v2  ;;  %v4713_v17 = vsub.f32 %v4681_v22, %v4697_v41  ;;  %v13465_v40 = vadd.f32 %v16819_v24, %v1218_v38  ;;  %v13467_v59 = vadd.f32 1.0, %v8022_v33  ;;  %v16831_v33 = vld [vmem:[#allocation187_spill] sm:$0xff]  ;;  %v16843_v36 = vld [vmem:[#allocation177_spill] sm:$0xff] }
 0x4e4   :  { %v8028_v51 = vpop.eup %8027  ;;  %8039 = vpow2.f32 %v7652_v15  ;;  %v13470_v52 = vadd.f32 %v16819_v24, %v1219_v34  ;;  %v13473_v29 = vadd.f32 %v16819_v24, %v1220_v1  ;;  %v4698_v20 = vmul.f32 %v13451_v27, %v13451_v27  ;;  %v16830_v15 = vld [vmem:[#allocation54_spill] sm:$0xff] }
 0x4e5   :  { %16820 = vst [vmem:[#allocation72_spill] sm:$0xff] %v13465_v40  ;;  %v13475_v39 = vpop.eup %8029  ;;  %8041 = vrcp.f32 %v13442_v63  ;;  %v13478_v62 = vadd.f32 1e-05, %v4713_v17  ;;  %v4682_v49 = vmul.f32 0.001953125, %v4634_v19  ;;  %v13484_v57 = vadd.f32 1.0, %v8026_v48 }
 0x4e6   :  { %16821 = vst [vmem:[#allocation222_spill] sm:$0xff] %v13467_v59  ;;  %v13482_v35 = vpop.eup %8031  ;;  %8043 = vpow2.f32 %v7653_v61  ;;  %v13487_v46 = vadd.f32 %v16819_v24, %v1221_v6  ;;  %v13491_v31 = vmul.f32 %v16827_v50, %v16826_v42  ;;  %v13493_v14 = vadd.f32 1.0, %v8028_v51 }
 0x4e7   :  { %16822 = vst [vmem:[#allocation150_spill] sm:$0xff] %v13470_v52  ;;  %v8034_v38 = vpop.eup %8033  ;;  %8045 = vrcp.f32 %v13461_v53  ;;  %v4714_v34 = vsub.f32 %v4682_v49, %v4698_v20  ;;  %v13498_v21 = vmul.f32 %v16827_v50, %v16829_v54  ;;  %v13504_v22 = vmul.f32 %v16827_v50, %v16830_v15  ;;  %v16835_v54 = vld [vmem:[#allocation113_spill] sm:$0xff] }
 0x4e8   :  { %16823 = vst [vmem:[#allocation148_spill] sm:$0xff] %v13473_v29  ;;  %v8036_v1 = vpop.eup %8035  ;;  %8047 = vrcp.f32 %v13467_v59  ;;  %v4844_v30 = vmul.f32 %v8034_v38, %v13428_v56  ;;  %v13508_v41 = vmul.f32 %v16827_v50, %v16831_v33  ;;  %v13512_v19 = vmul.f32 %v13453_v5, %v13393_v26 }
 0x4e9   :  { %16824 = vst [vmem:[#allocation223_spill] sm:$0xff] %v13484_v57  ;;  %v8038_v61 = vpop.eup %8037  ;;  %v7654_v18 = vmul.f32 -1.442695, %v13345_v11  ;;  %8049 = vrsqrt.f32 %v13478_v62  ;;  %v13516_v6 = vadd.f32 1e-05, %v4714_v34  ;;  %v4739_v17 = vsub.f32 %v12620_v13, %v13366_v16  ;;  %v16834_v11 = vld [vmem:[#allocation27_spill] sm:$0xff] }
 0x4ea   :  { %16825 = vst [vmem:[#allocation151_spill] sm:$0xff] %v13487_v46  ;;  %v8040_v48 = vpop.eup %8039  ;;  %8051 = vrcp.f32 %v13484_v57  ;;  %v4845_v24 = vmul.f32 %v8034_v38, %v4844_v30  ;;  %v4854_v51 = vmul.f32 %v8038_v61, %v13447_v2  ;;  %v13525_v49 = vadd.f32 1.0, %v8036_v1 }
 0x4eb   :  { %16828 = vst [vmem:[#allocation153_spill] sm:$0xff] %v13493_v14  ;;  %v13522_v20 = vpop.eup %8041  ;;  %8053 = vrcp.f32 %v13493_v14  ;;  %v4740_v42 = vsub.f32 %v16834_v11, %v13366_v16  ;;  %v4741_v50 = vsub.f32 %v12411_v58, %v13366_v16  ;;  %v4742_v15 = vsub.f32 %v16835_v54, %v13366_v16 }
 0x4ec   :  { %16832 = vst [vmem:[#allocation77_spill] sm:$0xff] %v13508_v41  ;;  %v8044_v34 = vpop.eup %8043  ;;  %v4846_v13 = vmul.f32 0.5, %v4845_v24  ;;  %v4855_v30 = vmul.f32 %v8038_v61, %v4854_v51  ;;  %8055 = vrsqrt.f32 %v13516_v6  ;;  %v13539_v1 = vmul.f32 %v13475_v39, %v13415_v23 }
 0x4ed   :  { %16833 = vst [vmem:[#allocation71_spill] sm:$0xff] %v13525_v49  ;;  %v13534_v33 = vpop.eup %8045  ;;  %8057 = vpow2.f32 %v7654_v18  ;;  %v13541_v11 = vadd.f32 1.0, %v8040_v48  ;;  %v7655_v29 = vmul.f32 -1.442695, %v13397_v45  ;;  %vm4850_vm0 = vweird.f32 %v8034_v38 }
 0x4ee   :  { %v13543_v58 = vpop.eup %8047  ;;  %v4847_v16 = vsub.f32 1.5, %v4846_v13  ;;  %v4856_v24 = vmul.f32 0.5, %v4855_v30  ;;  %v13550_v54 = vmul.f32 %v13482_v35, %v13425_v8  ;;  %v13554_v46 = vmul.f32 %v13522_v20, %v13442_v63 }
 0x4ef   :  { %16836 = vst [vmem:[#allocation152_spill] sm:$0xff] %v13541_v11  ;;  %v13546_v51 = vpop.eup %8049  ;;  %8059 = vrcp.f32 %v13525_v49  ;;  %v7656_v18 = vmul.f32 -1.442695, %v13401_v3  ;;  %vm4849_vm2 = vweird.f32 %v13428_v56  ;;  %vm4860_vm3 = vweird.f32 %v8038_v61 }
 0x4f0   :  { %16837 = vst [vmem:[#allocation156_spill] sm:$0xff] %v13543_v58  ;;  %v13558_v48 = vpop.eup %8051  ;;  %v4848_v45 = vmul.f32 %v8034_v38, %v4847_v16  ;;  %v4857_v13 = vsub.f32 1.5, %v4856_v24  ;;  %v13563_v52 = vadd.f32 1.0, %v8044_v34  ;;  %8061 = vrcp.f32 %v13541_v11  ;;  %vm4851_vm4 = vmor %vm4849_vm2, %vm4850_vm0  ;;  %v16841_v11 = vld [vmem:[#allocation6_spill] sm:$0xff] }
 0x4f1   :  { %16838 = vst [vmem:[#allocation88_spill] sm:$0xff] %v13558_v48  ;;  %v13561_v30 = vpop.eup %8053  ;;  %v7657_v40 = vmul.f32 -1.442695, %v13404_v0  ;;  %v4864_v3 = vmul.f32 %v13546_v51, %v13478_v62  ;;  %8063 = vpow2.f32 %v7655_v29  ;;  %vm4859_vm1 = vweird.f32 %v13447_v2  ;;  %v16842_v0 = vld [vmem:[#allocation97_spill] sm:$0xff]  ;;  %v16844_v29 = vld [vmem:[#allocation14_spill] sm:$0xff] }
 0x4f2   :  { %16839 = vst [vmem:[#allocation80_spill] sm:$0xff] %v13561_v30  ;;  %v13570_v49 = vpop.eup %8055  ;;  %v4852_v16 = vsel %vm4851_vm4, %v8034_v38, %v4848_v45  ;;  %v4858_v56 = vmul.f32 %v8038_v61, %v4857_v13  ;;  %8065 = vpow2.f32 %v7656_v18  ;;  %v4743_v30 = vsub.f32 %v16841_v11, %v13417_v55  ;;  %vm4861_vm5 = vmor %vm4859_vm1, %vm4860_vm3 }
 0x4f3   :  { %16840 = vst [vmem:[#allocation159_spill] sm:$0xff] %v13563_v52  ;;  %v8058_v24 = vpop.eup %8057  ;;  %v4979_v34 = vmul.f32 %v4852_v16, %v4739_v17  ;;  %v4980_v41 = vmul.f32 %v4852_v16, %v4740_v42  ;;  %v4744_v14 = vsub.f32 %v16842_v0, %v13417_v55  ;;  %v4745_v9 = vsub.f32 %v16843_v36, %v13417_v55  ;;  %v16846_v17 = vld [vmem:[#allocation126_spill] sm:$0xff] }
 0x4f4   :  { %v4746_v38 = vsub.f32 %v16844_v29, %v13417_v55  ;;  %v4862_v45 = vsel %vm4861_vm5, %v8038_v61, %v4858_v56  ;;  %v4981_v18 = vmul.f32 %v4852_v16, %v4741_v50  ;;  %v4865_v13 = vmul.f32 %v13546_v51, %v4864_v3  ;;  %v16848_v56 = vld [vmem:[#allocation12_spill] sm:$0xff] }
 0x4f5   :  { %v13582_v2 = vpop.eup %8059  ;;  %v5139_v42 = vmul.f32 %v16846_v17, %v4979_v34  ;;  %v4874_v11 = vmul.f32 %v13570_v49, %v13516_v6  ;;  %v4983_v48 = vmul.f32 %v4862_v45, %v4743_v30  ;;  %v4984_v57 = vmul.f32 %v4862_v45, %v4744_v14 }
 0x4f6   :  { %16845 = vst [vmem:[#allocation90_spill] sm:$0xff] %v13582_v2  ;;  %v4985_v0 = vmul.f32 %v4862_v45, %v4745_v9  ;;  %v4986_v7 = vmul.f32 %v4862_v45, %v4746_v38  ;;  %v13588_v58 = vpop.eup %8061  ;;  %8067 = vpow2.f32 %v7657_v40  ;;  %v7658_v55 = vmul.f32 -1.442695, %v13410_v47  ;;  %v16849_v38 = vld [vmem:[#allocation122_spill] sm:$0xff] }
 0x4f7   :  { %16847 = vst [vmem:[#allocation162_spill] sm:$0xff] %v13588_v58  ;;  %v4982_v36 = vmul.f32 %v4852_v16, %v4742_v15  ;;  %v5140_v61 = vmul.f32 %v16846_v17, %v4980_v41  ;;  %v8064_v50 = vpop.eup %8063  ;;  %v5143_v34 = vmul.f32 %v16848_v56, %v4983_v48  ;;  %v5144_v3 = vmul.f32 %v16848_v56, %v4984_v57  ;;  %v16850_v15 = vld [vmem:[#allocation17_spill] sm:$0xff] }
 0x4f8   :  { %v5145_v29 = vmul.f32 %v16848_v56, %v4985_v0  ;;  %v5146_v30 = vmul.f32 %v16848_v56, %v4986_v7  ;;  %v8066_v14 = vpop.eup %8065  ;;  %v5141_v9 = vmul.f32 %v16846_v17, %v4981_v18  ;;  %v5299_v45 = vadd.f32 %v16849_v38, %v5139_v42  ;;  %v16852_v0 = vld [vmem:[#allocation117_spill] sm:$0xff]  ;;  %v16854_v56 = vld [vmem:[#allocation124_spill] sm:$0xff] }
 0x4f9   :  { %v4866_v40 = vmul.f32 0.5, %v4865_v13  ;;  %v4875_v47 = vmul.f32 %v13570_v49, %v4874_v11  ;;  %v5303_v16 = vadd.f32 %v16850_v15, %v5143_v34  ;;  %v5304_v41 = vadd.f32 %v16850_v15, %v5144_v3  ;;  %v16853_v13 = vld [vmem:[#allocation119_spill] sm:$0xff] }
 0x4fa   :  { %v5305_v48 = vadd.f32 %v16850_v15, %v5145_v29  ;;  %v5306_v57 = vadd.f32 %v16850_v15, %v5146_v30  ;;  %v13603_v58 = vadd.f32 1.0, %v8058_v24  ;;  %8069 = vpow2.f32 %v7658_v55  ;;  %v16855_v29 = vld [vmem:[#allocation211_spill] sm:$0xff] }
 0x4fb   :  { %v5142_v7 = vmul.f32 %v16846_v17, %v4982_v36  ;;  %v5300_v18 = vadd.f32 %v16849_v38, %v5140_v61  ;;  %v13608_v42 = vadd.f32 %v5303_v16, %v16852_v0  ;;  %v13611_v11 = vadd.f32 %v5304_v41, %v16853_v13  ;;  %v16856_v61 = vld [vmem:[#allocation208_spill] sm:$0xff]  ;;  %v16857_v15 = vld [vmem:[#allocation15_spill] sm:$0xff] }
 0x4fc   :  { %16851 = vst [vmem:[#allocation161_spill] sm:$0xff] %v13603_v58  ;;  %v13614_v34 = vadd.f32 %v5305_v48, %v16854_v56  ;;  %vm4870_vm6 = vweird.f32 %v13546_v51  ;;  %v8068_v3 = vpop.eup %8067  ;;  %v5301_v24 = vadd.f32 %v16849_v38, %v5141_v9  ;;  %v13619_v55 = vadd.f32 %v5306_v57, %v16855_v29  ;;  %v16858_v48 = vld [vmem:[#allocation116_spill] sm:$0xff]  ;;  %v16861_v56 = vld [vmem:[#allocation21_spill] sm:$0xff] }
 0x4fd   :  { %v4867_v17 = vsub.f32 1.5, %v4866_v40  ;;  %v4876_v36 = vmul.f32 0.5, %v4875_v47  ;;  %v5363_v30 = vadd.f32 %v5299_v45, %v16856_v61  ;;  %v4747_v16 = vsub.f32 %v16857_v15, %v13438_v60  ;;  %v16859_v57 = vld [vmem:[#allocation16_spill] sm:$0xff]  ;;  %v16860_v47 = vld [vmem:[#allocation185_spill] sm:$0xff] }
 0x4fe   :  { %vm4869_vm7 = vweird.f32 %v13478_v62  ;;  %vm4880_vm8 = vweird.f32 %v13570_v49  ;;  %v5302_v41 = vadd.f32 %v16849_v38, %v5142_v7  ;;  %v5364_v0 = vadd.f32 %v5300_v18, %v16858_v48  ;;  %v16862_v62 = vld [vmem:[#allocation157_spill] sm:$0xff] }
 0x4ff   :  { %v4868_v9 = vmul.f32 %v13546_v51, %v4867_v17  ;;  %v4877_v13 = vsub.f32 1.5, %v4876_v36  ;;  %v4748_v40 = vsub.f32 %v16859_v57, %v13438_v60  ;;  %v4749_v45 = vsub.f32 %v16860_v47, %v13438_v60  ;;  %vm4871_vm9 = vmor %vm4869_vm7, %vm4870_vm6  ;;  %v16863_v18 = vld [vmem:[#allocation209_spill] sm:$0xff] }
 0x500   :  { %v4750_v29 = vsub.f32 %v16861_v56, %v13438_v60  ;;  %v4751_v38 = vsub.f32 %v16862_v62, %v13451_v27  ;;  %v8070_v7 = vpop.eup %8069  ;;  %v5365_v61 = vadd.f32 %v5301_v24, %v16863_v18  ;;  %vm4879_vm10 = vweird.f32 %v13516_v6  ;;  %v16864_v60 = vld [vmem:[#allocation118_spill] sm:$0xff]  ;;  %v16877_v18 = vld [vmem:[#allocation267_spill] sm:$0xff] }
 0x501   :  { %v4872_v17 = vsel %vm4871_vm9, %v13546_v51, %v4868_v9  ;;  %v4878_v36 = vmul.f32 %v13570_v49, %v4877_v13  ;;  %v7659_v15 = vmul.f32 -1.442695, %v5363_v30  ;;  %vm4881_vm11 = vmor %vm4879_vm10, %vm4880_vm8  ;;  %v5366_v56 = vadd.f32 %v5302_v41, %v16864_v60  ;;  %v16866_v6 = vld [vmem:[#allocation210_spill] sm:$0xff] }
 0x502   :  { %v4987_v48 = vmul.f32 %v4872_v17, %v4747_v16  ;;  %v4988_v57 = vmul.f32 %v4872_v17, %v4748_v40  ;;  %v4989_v47 = vmul.f32 %v4872_v17, %v4749_v45  ;;  %v7660_v2 = vmul.f32 -1.442695, %v5364_v0 }
 0x503   :  { %v4990_v62 = vmul.f32 %v4872_v17, %v4750_v29  ;;  %v13647_v59 = vsel %vm4881_vm11, %v13570_v49, %v4878_v36  ;;  %8071 = vrcp.f32 %v13563_v52  ;;  %v13650_v51 = vadd.f32 1.0, %v8064_v50  ;;  %v16878_v17 = vld [vmem:[#allocation55_spill] sm:$0xff] }
 0x504   :  { %v13654_v24 = vadd.f32 %v16866_v6, %v13491_v31  ;;  %v13658_v30 = vadd.f32 %v16866_v6, %v13498_v21  ;;  %8073 = vrcp.f32 %v13603_v58  ;;  %v13661_v16 = vadd.f32 1.0, %v8066_v14 }
 0x505   :  { %16865 = vst [vmem:[#allocation114_spill] sm:$0xff] %v13650_v51  ;;  %v13664_v41 = vmul.f32 %v13647_v59, %v4751_v38  ;;  %v16870_v49 = vsub.f32 1.0, %v13512_v19  ;;  %v5492_v0 = vsub.f32 1.0, %v13539_v1  ;;  %8075 = vpow2.f32 %v7659_v15  ;;  %v16874_v19 = vld [vmem:[#allocation7_spill] sm:$0xff]  ;;  %v4639_v38 = vpop.xlane.xlu0 %4638 }
 0x506   :  { %16867 = vst [vmem:[#allocation163_spill] sm:$0xff] %v13654_v24  ;;  %v7661_v31 = vmul.f32 -1.442695, %v5365_v61  ;;  %v13672_v9 = vadd.f32 %v16866_v6, %v13504_v22  ;;  %v5507_v21 = vsub.f32 1.0, %v13550_v54  ;;  %8077 = vpow2.f32 %v7660_v2 }
 0x507   :  { %16868 = vst [vmem:[#allocation167_spill] sm:$0xff] %v13658_v30  ;;  %v5478_v50 = vmul.f32 %v13453_v5, %v16870_v49  ;;  %v7662_v13 = vmul.f32 -1.442695, %v5366_v56  ;;  %v13676_v40 = vadd.f32 1.0, %v8068_v3  ;;  %v13678_v45 = vadd.f32 1.0, %v8070_v7  ;;  %v16880_v49 = vld [vmem:[#allocation98_spill] sm:$0xff] }
 0x508   :  { %16869 = vst [vmem:[#allocation105_spill] sm:$0xff] %v13661_v16  ;;  %8079 = vrcp.f32 %v13650_v51  ;;  %vm5480_vm12 = vweird.f32 %v13393_v26  ;;  %v5147_v1 = vmul.f32 %v16874_v19, %v4987_v48  ;;  %v5148_v22 = vmul.f32 %v16874_v19, %v4988_v57  ;;  %v16879_v57 = vld [vmem:[#allocation171_spill] sm:$0xff] }
 0x509   :  { %16871 = vst [vmem:[#allocation226_spill] sm:$0xff] %v13672_v9  ;;  %8081 = vrcp.f32 %v13661_v16  ;;  %v13686_v54 = vadd.f32 %v13453_v5, %v5478_v50  ;;  %v13688_v29 = vpop.eup %8071  ;;  %v5149_v2 = vmul.f32 %v16874_v19, %v4989_v47  ;;  %v5150_v3 = vmul.f32 %v16874_v19, %v4990_v62 }
 0x50a   :  { %16872 = vst [vmem:[#allocation165_spill] sm:$0xff] %v13676_v40  ;;  %8083 = vpow2.f32 %v7661_v31  ;;  %vm5481_vm13 = vweird.f32 %v13453_v5  ;;  %v13693_v7 = vpop.eup %8073  ;;  %v4752_v61 = vsub.f32 %v16877_v18, %v13451_v27  ;;  %v4753_v36 = vsub.f32 %v16878_v17, %v13451_v27 }
 0x50b   :  { %16873 = vst [vmem:[#allocation170_spill] sm:$0xff] %v13678_v45  ;;  %8085 = vpow2.f32 %v7662_v13  ;;  %v5486_v15 = vand.u32 2147483648, %v13393_v26  ;;  %v8076_v48 = vpop.eup %8075  ;;  %v4754_v47 = vsub.f32 %v16879_v57, %v13451_v27  ;;  %v5484_v60 = vand.u32 2147483647, %v13393_v26  ;;  %vm13714_vm14 = vmor %vm5480_vm12, %vm5481_vm13 }
 0x50c   :  { %16875 = vst [vmem:[#allocation228_spill] sm:$0xff] %v13688_v29  ;;  %8087 = vrcp.f32 %v13676_v40  ;;  %v5493_v56 = vmul.f32 %v13475_v39, %v5492_v0  ;;  %v8078_v62 = vpop.eup %8077  ;;  %v5307_v50 = vadd.f32 %v16880_v49, %v5147_v1  ;;  %v5308_v31 = vadd.f32 %v16880_v49, %v5148_v22  ;;  %v16891_v29 = vld [vmem:[#allocation212_spill] sm:$0xff] }
 0x50d   :  { %16876 = vst [vmem:[#allocation166_spill] sm:$0xff] %v13693_v7  ;;  %8089 = vrcp.f32 %v13678_v45  ;;  %v13708_v13 = vmul.f32 0.001953125, %v4639_v38  ;;  %v7663_v0 = vmul.f32 -1.442695, %v13608_v42  ;;  %v5309_v18 = vadd.f32 %v16880_v49, %v5149_v2  ;;  %v16890_v7 = vld [vmem:[#allocation125_spill] sm:$0xff] }
 0x50e   :  { %v13718_v27 = vpop.eup %8079  ;;  %v5310_v1 = vadd.f32 %v16880_v49, %v5150_v3  ;;  %v5483_v22 = vsel %vm13714_vm14, %v13453_v5, %v13686_v54  ;;  %v13729_v26 = vadd.f32 1.0, %v8076_v48  ;;  %v5487_v17 = vor.u32 1.1754944e-38, %v5486_v15  ;;  %v16887_v48 = vld [vmem:[#allocation120_spill] sm:$0xff] }
 0x50f   :  { %16883 = vst [vmem:[#allocation172_spill] sm:$0xff] %v13718_v27  ;;  %v13727_v38 = vpop.eup %8081  ;;  %vm5495_vm15 = vweird.f32 %v13415_v23  ;;  %v5508_v57 = vmul.f32 %v13482_v35, %v5507_v21  ;;  %v13733_v42 = vadd.f32 1.0, %v8078_v62  ;;  %vm13735_vm0 = vcmp.eq.f32.partialorder %v5484_v60, 8.507059e+37  ;;  %v16888_v21 = vld [vmem:[#allocation195_spill] sm:$0xff] }
 0x510   :  { %16884 = vst [vmem:[#allocation175_spill] sm:$0xff] %v13727_v38  ;;  %v8084_v14 = vpop.eup %8083  ;;  %v13740_v3 = vadd.f32 %v13475_v39, %v5493_v56  ;;  %vm5496_vm2 = vweird.f32 %v13475_v39  ;;  %v5499_v5 = vand.u32 2147483647, %v13415_v23  ;;  %v7664_v15 = vmul.f32 -1.442695, %v13611_v11 }
 0x511   :  { %v8086_v54 = vpop.eup %8085  ;;  %v13746_v49 = vadd.f32 %v5307_v50, %v16887_v48  ;;  %v13749_v62 = vadd.f32 %v5308_v31, %v16888_v21  ;;  %v5501_v60 = vand.u32 2147483648, %v13415_v23  ;;  %8091 = vpow2.f32 %v7663_v0  ;;  %vm13792_vm4 = vmor %vm5495_vm15, %vm5496_vm2 }
 0x512   :  { %v13752_v19 = vpop.eup %8087  ;;  %v7665_v56 = vmul.f32 -1.442695, %v13614_v34  ;;  %v13756_v58 = vadd.f32 %v5309_v18, %v16890_v7  ;;  %v13759_v52 = vadd.f32 %v5310_v1, %v16891_v29  ;;  %v13763_v50 = vadd.f32 1.0, %v8084_v14  ;;  %v16893_v14 = vld [vmem:[#allocation30_spill] sm:$0xff]  ;;  %v13777_v18 = vpop.xlane.xlu1 %4478 }
 0x513   :  { %16889 = vst [vmem:[#allocation231_spill] sm:$0xff] %v13752_v19  ;;  %v13761_v11 = vpop.eup %8089  ;;  %8093 = vrcp.f32 %v13729_v26  ;;  %v4992_v31 = vmul.f32 %v13647_v59, %v4752_v61  ;;  %v5509_v48 = vadd.f32 %v13482_v35, %v5508_v57  ;;  %v13768_v21 = vadd.f32 1.0, %v8086_v54  ;;  %v16894_v54 = vld [vmem:[#allocation100_spill] sm:$0xff] }
 0x514   :  { %16892 = vst [vmem:[#allocation109_spill] sm:$0xff] %v13761_v11  ;;  %8095 = vrcp.f32 %v13733_v42  ;;  %v4993_v34 = vmul.f32 %v13647_v59, %v4753_v36  ;;  %vm5511_vm3 = vweird.f32 %v13482_v35  ;;  %v4994_v29 = vmul.f32 %v13647_v59, %v4754_v47 }
 0x515   :  { %8097 = vpow2.f32 %v7664_v15  ;;  %v5151_v7 = vmul.f32 %v16893_v14, %v13664_v41  ;;  %v5152_v0 = vmul.f32 %v16893_v14, %v4992_v31  ;;  %v7666_v61 = vmul.f32 -1.442695, %v13619_v55  ;;  %v4484_v55 = vpop.xlane.xlu0 %4483 }
 0x516   :  { %8099 = vpow2.f32 %v7665_v56  ;;  %v5153_v1 = vmul.f32 %v16893_v14, %v4993_v34  ;;  %v5516_v57 = vand.u32 2147483648, %v13425_v8  ;;  %v5154_v36 = vmul.f32 %v16893_v14, %v4994_v29  ;;  %v16897_v29 = vld [vmem:[#allocation123_spill] sm:$0xff] }
 0x517   :  { %8101 = vrcp.f32 %v13763_v50  ;;  %v5311_v59 = vadd.f32 %v16894_v54, %v5151_v7  ;;  %v5312_v47 = vadd.f32 %v16894_v54, %v5152_v0  ;;  %v8092_v41 = vpop.eup %8091  ;;  %vm5510_vm1 = vweird.f32 %v13425_v8  ;;  %v16898_v7 = vld [vmem:[#allocation233_spill] sm:$0xff] }
 0x518   :  { %8103 = vrcp.f32 %v13768_v21  ;;  %v5313_v15 = vadd.f32 %v16894_v54, %v5153_v1  ;;  %v5514_v56 = vand.u32 2147483647, %v13425_v8  ;;  %v5314_v34 = vadd.f32 %v16894_v54, %v5154_v36  ;;  %vm13813_vm5 = vmor %vm5510_vm1, %vm5511_vm3  ;;  %v13817_v8 = vpop.xlane.xlu2 %4643  ;;  %v16901_v36 = vld [vmem:[#allocation131_spill] sm:$0xff] }
 0x519   :  { %v13798_v31 = vpop.eup %8093  ;;  %v13802_v14 = vadd.f32 %v5311_v59, %v16897_v29  ;;  %v13805_v0 = vadd.f32 %v5312_v47, %v16898_v7  ;;  %v13809_v23 = vsel %vm13735_vm0, %v5487_v17, %v5483_v22  ;;  %8105 = vpow2.f32 %v7666_v61  ;;  %v16902_v47 = vld [vmem:[#allocation133_spill] sm:$0xff] }
 0x51a   :  { %v13819_v9 = vpop.eup %8095  ;;  %v13822_v54 = vadd.f32 %v5313_v15, %v16901_v36  ;;  %v5498_v22 = vsel %vm13792_vm4, %v13475_v39, %v13740_v3  ;;  %v5513_v17 = vsel %vm13813_vm5, %v13482_v35, %v5509_v48  ;;  %v5790_v59 = vand.u32 2147483648, %v13729_v26 }
 0x51b   :  { %v8098_v2 = vpop.eup %8097  ;;  %v13833_v29 = vadd.f32 %v5314_v34, %v16902_v47  ;;  %v5502_v7 = vor.u32 1.1754944e-38, %v5501_v60  ;;  %v5517_v61 = vor.u32 1.1754944e-38, %v5516_v57  ;;  %v5780_v15 = vmul.f32 %v13798_v31, %v13729_v26  ;;  %v4649_v34 = vpop.xlane.xlu1 %4648 }
 0x51c   :  { %v8100_v30 = vpop.eup %8099  ;;  %v5805_v36 = vand.u32 2147483648, %v13733_v42  ;;  %vm5500_vm6 = vcmp.eq.f32.partialorder %v5499_v5, 8.507059e+37  ;;  %vm5515_vm7 = vcmp.eq.f32.partialorder %v5514_v56, 8.507059e+37  ;;  %v5795_v35 = vmul.f32 %v13819_v9, %v13733_v42 }
 0x51d   :  { %v13838_v39 = vpop.eup %8101  ;;  %v13842_v3 = vsel %vm5500_vm6, %v5502_v7, %v5498_v22  ;;  %v13844_v48 = vsel %vm5515_vm7, %v5517_v61, %v5513_v17  ;;  %v16903_v60 = vsub.f32 1.0, %v13554_v46  ;;  %v5820_v56 = vand.u32 2147483648, %v13763_v50 }
 0x51e   :  { %v13849_v1 = vpop.eup %8103  ;;  %v5835_v47 = vand.u32 2147483648, %v13768_v21  ;;  %v13854_v24 = vadd.f32 1.0, %v8092_v41  ;;  %v13856_v22 = vor.u32 1.1754944e-38, %v5790_v59  ;;  %v13860_v7 = vadd.f32 1.0, %v8098_v2  ;;  %v4654_v59 = vpop.xlane.xlu0 %4653 }
 0x51f   :  { %v5523_v57 = vmul.f32 %v13522_v20, %v16903_v60  ;;  %v8106_v61 = vpop.eup %8105  ;;  %v5781_v60 = vsub.f32 1.0, %v5780_v15  ;;  %v13862_v11 = vor.u32 1.1754944e-38, %v5805_v36  ;;  %v5810_v5 = vmul.f32 %v13838_v39, %v13763_v50 }
 0x520   :  { %16904 = vst [vmem:[#allocation174_spill] sm:$0xff] %v13860_v7  ;;  %v13866_v45 = vadd.f32 1.0, %v8100_v30  ;;  %v5796_v6 = vsub.f32 1.0, %v5795_v35  ;;  %v5825_v41 = vmul.f32 %v13849_v1, %v13768_v21  ;;  %v7667_v17 = vmul.f32 -1.442695, %v13746_v49  ;;  %v4489_v49 = vpop.xlane.xlu2 %4488 }
 0x521   :  { %v13872_v46 = vor.u32 1.1754944e-38, %v5820_v56  ;;  %v13874_v2 = vor.u32 1.1754944e-38, %v5835_v47  ;;  %8107 = vrcp.f32 %v13854_v24  ;;  %v7668_v15 = vmul.f32 -1.442695, %v13749_v62 }
 0x522   :  { %16905 = vst [vmem:[#allocation176_spill] sm:$0xff] %v13866_v45  ;;  %v13878_v36 = vadd.f32 1.0, %v8106_v61  ;;  %8109 = vrcp.f32 %v13860_v7  ;;  %v7669_v30 = vmul.f32 -1.442695, %v13756_v58  ;;  %vm5525_vm8 = vweird.f32 %v13442_v63 }
 0x523   :  { %v13884_v35 = vmul.f32 0.001953125, %v13777_v18  ;;  %v5782_v56 = vmul.f32 %v13798_v31, %v5781_v60  ;;  %vm5785_vm9 = vweird.f32 %v13798_v31  ;;  %v5811_v47 = vsub.f32 1.0, %v5810_v5  ;;  %v4494_v18 = vpop.xlane.xlu1 %4493 }
 0x524   :  { %16906 = vst [vmem:[#allocation232_spill] sm:$0xff] %v13878_v36  ;;  %8111 = vrcp.f32 %v13866_v45  ;;  %vm5784_vm10 = vweird.f32 %v13729_v26  ;;  %v5797_v62 = vmul.f32 %v13819_v9, %v5796_v6  ;;  %v5826_v61 = vsub.f32 1.0, %v5825_v41 }
 0x525   :  { %8113 = vpow2.f32 %v7667_v17  ;;  %v4699_v58 = vmul.f32 %v13884_v35, %v13884_v35  ;;  %vm5800_vm11 = vweird.f32 %v13819_v9  ;;  %v7670_v60 = vmul.f32 -1.442695, %v13759_v52  ;;  %vm13969_vm4 = vmor %vm5784_vm10, %vm5785_vm9 }
 0x526   :  { %8115 = vpow2.f32 %v7668_v15  ;;  %v13895_v19 = vmul.f32 0.001953125, %v4484_v55  ;;  %v13897_v5 = vmul.f32 0.001953125, %v4489_v49  ;;  %vm5815_vm12 = vweird.f32 %v13838_v39 }
 0x527   :  { %8117 = vpow2.f32 %v7669_v30  ;;  %v13901_v6 = vadd.f32 %v13522_v20, %v5523_v57  ;;  %v4715_v17 = vsub.f32 %v13708_v13, %v4699_v58  ;;  %v13904_v41 = vmul.f32 0.001953125, %v4494_v18  ;;  %v13906_v40 = vpop.eup %8107 }
 0x528   :  { %16907 = vst [vmem:[#allocation178_spill] sm:$0xff] %v13897_v5  ;;  %vm5799_vm13 = vweird.f32 %v13733_v42  ;;  %v13910_v52 = vmul.f32 0.001953125, %v13817_v8  ;;  %v13914_v55 = vmul.f32 %v13895_v19, %v13895_v19  ;;  %v13918_v15 = vmul.f32 %v13897_v5, %v13897_v5  ;;  %v13922_v13 = vpop.eup %8109 }
 0x529   :  { %16908 = vst [vmem:[#allocation180_spill] sm:$0xff] %v13904_v41  ;;  %v13920_v57 = vmul.f32 0.001953125, %v4649_v34  ;;  %vm5814_vm14 = vweird.f32 %v13763_v50  ;;  %v7671_v30 = vmul.f32 -1.442695, %v13802_v14  ;;  %vm5526_vm15 = vweird.f32 %v13522_v20  ;;  %v4499_v14 = vpop.xlane.xlu0 %4498  ;;  %vm13992_vm1 = vmor %vm5799_vm13, %vm5800_vm11 }
 0x52a   :  { %16909 = vst [vmem:[#allocation236_spill] sm:$0xff] %v13922_v13  ;;  %v13927_v8 = vmul.f32 0.001953125, %v4654_v59  ;;  %v13931_v49 = vmul.f32 %v13904_v41, %v13904_v41  ;;  %v13933_v58 = vpop.eup %8111  ;;  %vm5829_vm0 = vweird.f32 %v13768_v21  ;;  %8119 = vpow2.f32 %v7670_v60  ;;  %vm13955_vm3 = vmor %vm5525_vm8, %vm5526_vm15  ;;  %v16985_v13 = vld [vmem:[#allocation9_spill] sm:$0xff] }
 0x52b   :  { %16910 = vst [vmem:[#allocation234_spill] sm:$0xff] %v13933_v58  ;;  %v13936_v34 = vadd.f32 1e-05, %v4715_v17  ;;  %v8114_v5 = vpop.eup %8113  ;;  %v5812_v59 = vmul.f32 %v13838_v39, %v5811_v47  ;;  %v7672_v38 = vmul.f32 -1.442695, %v13805_v0  ;;  %v5783_v41 = vadd.f32 %v13798_v31, %v5782_v56  ;;  %vm14006_vm7 = vmor %vm5814_vm14, %vm5815_vm12 }
 0x52c   :  { %v8116_v27 = vpop.eup %8115  ;;  %v5827_v60 = vmul.f32 %v13849_v1, %v5826_v61  ;;  %vm5830_vm2 = vweird.f32 %v13849_v1  ;;  %8121 = vrcp.f32 %v13878_v36  ;;  %v7673_v17 = vmul.f32 -1.442695, %v13822_v54  ;;  %v4659_v54 = vpop.xlane.xlu2 %4658 }
 0x52d   :  { %v8118_v56 = vpop.eup %8117  ;;  %8123 = vpow2.f32 %v7671_v30  ;;  %v5528_v47 = vsel %vm13955_vm3, %v13522_v20, %v13901_v6  ;;  %v5529_v61 = vand.u32 2147483647, %v13442_v63  ;;  %v5531_v16 = vand.u32 2147483648, %v13442_v63  ;;  %vm14019_vm8 = vmor %vm5829_vm0, %vm5830_vm2 }
 0x52e   :  { %v13973_v30 = vadd.f32 1.0, %v8114_v5  ;;  %v5798_v51 = vadd.f32 %v13819_v9, %v5797_v62  ;;  %8125 = vrsqrt.f32 %v13936_v34  ;;  %v13977_v20 = vmul.f32 0.001953125, %v4499_v14  ;;  %v6341_v14 = vld [vmem:[%s15522_s10 + $0x10] sm:$0xff] }
 0x52f   :  { %v13979_v6 = vadd.f32 1.0, %v8116_v27  ;;  %8127 = vpow2.f32 %v7672_v38  ;;  %v5787_v63 = vsel %vm13969_vm4, %v13798_v31, %v5783_v41  ;;  %v5813_v0 = vadd.f32 %v13838_v39, %v5812_v59 }
 0x530   :  { %16915 = vst [vmem:[#allocation179_spill] sm:$0xff] %v13973_v30  ;;  %v8120_v36 = vpop.eup %8119  ;;  %8129 = vpow2.f32 %v7673_v17  ;;  %v5828_v5 = vadd.f32 %v13849_v1, %v5827_v60  ;;  %v4687_v58 = vmul.f32 0.001953125, %v4659_v54  ;;  %v4703_v62 = vmul.f32 %v13977_v20, %v13977_v20 }
 0x531   :  { %16916 = vst [vmem:[#allocation183_spill] sm:$0xff] %v13979_v6  ;;  %v13996_v38 = vadd.f32 1.0, %v8118_v56  ;;  %vm5530_vm5 = vcmp.eq.f32.partialorder %v5529_v61, 8.507059e+37  ;;  %v5532_v31 = vor.u32 1.1754944e-38, %v5531_v16  ;;  %v16920_v41 = vand.u32 2147483647, %v13729_v26 }
 0x532   :  { %v14000_v18 = vpop.eup %8121  ;;  %8131 = vrcp.f32 %v13973_v30  ;;  %v7674_v59 = vmul.f32 -1.442695, %v13833_v29  ;;  %v5802_v16 = vsel %vm13992_vm1, %v13819_v9, %v5798_v51  ;;  %v4719_v26 = vsub.f32 %v4687_v58, %v4703_v62  ;;  %v16953_v30 = vld [vmem:[#allocation214_spill] sm:$0xff] }
 0x533   :  { %16919 = vst [vmem:[#allocation237_spill] sm:$0xff] %v13996_v38  ;;  %vm5789_vm6 = vcmp.eq.f32.partialorder %v16920_v41, 8.507059e+37  ;;  %v8124_v60 = vpop.eup %8123  ;;  %v14023_v56 = vadd.f32 1.0, %v8120_v36  ;;  %8133 = vrcp.f32 %v13979_v6  ;;  %v14026_v61 = vsel %vm5530_vm5, %v5532_v31, %v5528_v47 }
 0x534   :  { %16921 = vst [vmem:[#allocation240_spill] sm:$0xff] %v14000_v18  ;;  %v5792_v29 = vsel %vm5789_vm6, %v13856_v22, %v5787_v63  ;;  %v8126_v54 = vpop.eup %8125  ;;  %v16927_v51 = vand.u32 2147483647, %v13733_v42  ;;  %v5817_v9 = vsel %vm14006_vm7, %v13838_v39, %v5813_v0  ;;  %v5832_v58 = vsel %vm14019_vm8, %v13849_v1, %v5828_v5  ;;  %v6339_v42 = vld [vmem:[%s15522_s10] sm:$0xff]  ;;  %v6340_v39 = vld [vmem:[%s15522_s10 + $0x8] sm:$0xff]  ;;  %v4504_v63 = vpop.xlane.xlu2 %4503 }
 0x535   :  { %16926 = vst [vmem:[#allocation37_spill] sm:$0xff] %v14023_v56  ;;  %v14037_v36 = vadd.f32 1e-05, %v4719_v26  ;;  %v8128_v62 = vpop.eup %8127  ;;  %8135 = vrcp.f32 %v13996_v38  ;;  %v16928_v22 = vand.u32 2147483647, %v13763_v50  ;;  %v4884_v1 = vmul.f32 %v8126_v54, %v13936_v34  ;;  %v4664_v0 = vpop.xlane.xlu1 %4663 }
 0x536   :  { %vm5804_vm9 = vcmp.eq.f32.partialorder %v16927_v51, 8.507059e+37  ;;  %v8130_v5 = vpop.eup %8129  ;;  %v14050_v27 = vadd.f32 1.0, %v8124_v60  ;;  %v14055_v50 = vmul.f32 0.001953125, %v4504_v63  ;;  %v14068_v60 = vadd.f32 1.0, %v8128_v62 }
 0x537   :  { %v5807_v47 = vsel %vm5804_vm9, %v13862_v11, %v5802_v16  ;;  %vm5819_vm10 = vcmp.eq.f32.partialorder %v16928_v22, 8.507059e+37  ;;  %v16930_v11 = vand.u32 2147483647, %v13768_v21  ;;  %8137 = vrsqrt.f32 %v14037_v36  ;;  %v6342_v16 = vld [vmem:[%s15522_s10 + $0x18] sm:$0xff] }
 0x538   :  { %16929 = vst [vmem:[#allocation238_spill] sm:$0xff] %v14050_v27  ;;  %8139 = vrcp.f32 %v14023_v56  ;;  %v5822_v31 = vsel %vm5819_vm10, %v13872_v46, %v5817_v9  ;;  %v4885_v21 = vmul.f32 %v8126_v54, %v4884_v1  ;;  %v14066_v26 = vpop.eup %8131  ;;  %v14070_v17 = vmul.f32 %v6339_v42, %v5792_v29 }
 0x539   :  { %vm5834_vm11 = vcmp.eq.f32.partialorder %v16930_v11, 8.507059e+37  ;;  %16931 = vst [vmem:[#allocation53_spill] sm:$0xff] %v14066_v26  ;;  %8141 = vpow2.f32 %v7674_v59  ;;  %v14072_v51 = vmul.f32 %v6340_v39, %v5807_v47  ;;  %v14074_v46 = vpop.eup %8133  ;;  %v4688_v22 = vmul.f32 0.001953125, %v4664_v0  ;;  %v16939_v11 = vld [vmem:[#allocation42_spill] sm:$0xff] }
 0x53a   :  { %v5837_v41 = vsel %vm5834_vm11, %v13874_v2, %v5832_v58  ;;  %16932 = vst [vmem:[#allocation188_spill] sm:$0xff] %v14068_v60  ;;  %v14076_v2 = vadd.f32 1.0, %v8130_v5  ;;  %v4886_v9 = vmul.f32 0.5, %v4885_v21  ;;  %v4704_v58 = vmul.f32 %v14055_v50, %v14055_v50 }
 0x53b   :  { %16933 = vst [vmem:[#allocation241_spill] sm:$0xff] %v14074_v46  ;;  %8143 = vrcp.f32 %v14050_v27  ;;  %v14081_v1 = vmul.f32 %v6341_v14, %v5822_v31  ;;  %v14083_v59 = vmul.f32 %v6342_v16, %v5837_v41  ;;  %v16935_v29 = vsub.f32 %v13910_v52, %v13914_v55  ;;  %v14090_v47 = vpop.eup %8135  ;;  %v16940_v52 = vld [vmem:[#allocation262_spill] sm:$0xff]  ;;  %v16941_v41 = vld [vmem:[#allocation32_spill] sm:$0xff] }
 0x53c   :  { %16934 = vst [vmem:[#allocation186_spill] sm:$0xff] %v14076_v2  ;;  %v4887_v42 = vsub.f32 1.5, %v4886_v9  ;;  %vm4890_vm12 = vweird.f32 %v8126_v54  ;;  %v16937_v39 = vsub.f32 %v13920_v57, %v13918_v15  ;;  %v4720_v0 = vsub.f32 %v4688_v22, %v4704_v58  ;;  %v16943_v58 = vld [vmem:[#allocation5_spill] sm:$0xff] }
 0x53d   :  { %v14088_v62 = vadd.f32 1e-05, %v16935_v29  ;;  %16936 = vst [vmem:[#allocation191_spill] sm:$0xff] %v14090_v47  ;;  %v8138_v5 = vpop.eup %8137  ;;  %8145 = vrcp.f32 %v14068_v60  ;;  %v4755_v31 = vsub.f32 %v16939_v11, %v13884_v35  ;;  %v4756_v55 = vsub.f32 %v16940_v52, %v13884_v35  ;;  %v4509_v21 = vpop.xlane.xlu1 %4508 }
 0x53e   :  { %v14095_v63 = vadd.f32 1e-05, %v16937_v39  ;;  %v4757_v14 = vsub.f32 %v16941_v41, %v13884_v35  ;;  %v14104_v16 = vpop.eup %8139  ;;  %8147 = vrcp.f32 %v14076_v2  ;;  %v4888_v15 = vmul.f32 %v8126_v54, %v4887_v42  ;;  %v16944_v39 = vld [vmem:[#allocation96_spill] sm:$0xff]  ;;  %v4669_v47 = vpop.xlane.xlu0 %4668  ;;  %v16954_v2 = vld [vmem:[#allocation215_spill] sm:$0xff] }
 0x53f   :  { %16942 = vst [vmem:[#allocation242_spill] sm:$0xff] %v14104_v16  ;;  %vm4889_vm13 = vweird.f32 %v13936_v34  ;;  %v4924_v57 = vmul.f32 %v8138_v5, %v14037_v36  ;;  %v8142_v9 = vpop.eup %8141  ;;  %v4758_v22 = vsub.f32 %v16943_v58, %v13884_v35  ;;  %8149 = vrsqrt.f32 %v14088_v62 }
 0x540   :  { %16938 = vst [vmem:[#allocation48_spill] sm:$0xff] %v14095_v63  ;;  %vm4891_vm14 = vmor %vm4889_vm13, %vm4890_vm12  ;;  %v14113_v29 = vadd.f32 1e-05, %v4720_v0  ;;  %8151 = vrsqrt.f32 %v14095_v63  ;;  %v14118_v42 = vmul.f32 0.001953125, %v4509_v21  ;;  %v14122_v38 = vadd.f32 1.0, %v8142_v9  ;;  %v16947_v0 = vld [vmem:[#allocation121_spill] sm:$0xff] }
 0x541   :  { %v4892_v52 = vsel %vm4891_vm14, %v8126_v54, %v4888_v15  ;;  %v4925_v34 = vmul.f32 %v8138_v5, %v4924_v57  ;;  %v14120_v41 = vpop.eup %8143  ;;  %v4771_v46 = vsub.f32 %v16947_v0, %v13977_v20  ;;  %v16949_v15 = vld [vmem:[#allocation31_spill] sm:$0xff]  ;;  %vm4930_vm15 = vweird.f32 %v8138_v5  ;;  %v16951_v0 = vld [vmem:[#allocation112_spill] sm:$0xff] }
 0x542   :  { %16945 = vst [vmem:[#allocation244_spill] sm:$0xff] %v14120_v41  ;;  %v4995_v16 = vmul.f32 %v4892_v52, %v4755_v31  ;;  %v4996_v56 = vmul.f32 %v4892_v52, %v4756_v55  ;;  %v4997_v35 = vmul.f32 %v4892_v52, %v4757_v14  ;;  %v4998_v58 = vmul.f32 %v4892_v52, %v4758_v22 }
 0x543   :  { %16946 = vst [vmem:[#allocation193_spill] sm:$0xff] %v14122_v38  ;;  %v4926_v6 = vmul.f32 0.5, %v4925_v34  ;;  %8153 = vrsqrt.f32 %v14113_v29  ;;  %v14127_v54 = vpop.eup %8145  ;;  %v4689_v22 = vmul.f32 0.001953125, %v4669_v47  ;;  %v4705_v52 = vmul.f32 %v14118_v42, %v14118_v42 }
 0x544   :  { %16948 = vst [vmem:[#allocation49_spill] sm:$0xff] %v14127_v54  ;;  %v5155_v57 = vmul.f32 %v16949_v15, %v4995_v16  ;;  %v5156_v21 = vmul.f32 %v16949_v15, %v4996_v56  ;;  %v5157_v31 = vmul.f32 %v16949_v15, %v4997_v35  ;;  %v5158_v55 = vmul.f32 %v16949_v15, %v4998_v58  ;;  %v14133_v14 = vpop.eup %8147  ;;  %v16952_v58 = vld [vmem:[#allocation141_spill] sm:$0xff] }
 0x545   :  { %16950 = vst [vmem:[#allocation245_spill] sm:$0xff] %v14133_v14  ;;  %v4927_v9 = vsub.f32 1.5, %v4926_v6  ;;  %v14137_v34 = vpop.eup %8149  ;;  %v4772_v6 = vsub.f32 %v16952_v58, %v13977_v20  ;;  %vm4929_vm0 = vweird.f32 %v14037_v36  ;;  %v4721_v47 = vsub.f32 %v4689_v22, %v4705_v52  ;;  %v16958_v58 = vld [vmem:[#allocation169_spill] sm:$0xff] }
 0x546   :  { %v5315_v11 = vadd.f32 %v16951_v0, %v5155_v57  ;;  %v5316_v16 = vadd.f32 %v16951_v0, %v5156_v21  ;;  %v5317_v56 = vadd.f32 %v16951_v0, %v5157_v31  ;;  %v5318_v35 = vadd.f32 %v16951_v0, %v5158_v55  ;;  %v14143_v26 = vpop.eup %8151  ;;  %v16955_v57 = vld [vmem:[#allocation132_spill] sm:$0xff]  ;;  %v16956_v21 = vld [vmem:[#allocation45_spill] sm:$0xff]  ;;  %vm4931_vm2 = vmor %vm4929_vm0, %vm4930_vm15 }
 0x547   :  { %v4928_v15 = vmul.f32 %v8138_v5, %v4927_v9  ;;  %v4773_v31 = vsub.f32 %v16956_v21, %v13977_v20  ;;  %v16957_v0 = vld [vmem:[#allocation134_spill] sm:$0xff]  ;;  %v4774_v9 = vsub.f32 %v16958_v58, %v13977_v20  ;;  %v14157_v36 = vadd.f32 1e-05, %v4721_v47 }
 0x548   :  { %v5379_v14 = vadd.f32 %v5315_v11, %v16953_v30  ;;  %v5380_v54 = vadd.f32 %v5316_v16, %v16954_v2  ;;  %v5381_v60 = vadd.f32 %v5317_v56, %v16955_v57  ;;  %v5382_v41 = vadd.f32 %v5318_v35, %v16957_v0  ;;  %v16959_v56 = vld [vmem:[#allocation44_spill] sm:$0xff]  ;;  %v16961_v47 = vld [vmem:[#allocation182_spill] sm:$0xff] }
 0x549   :  { %v8154_v55 = vpop.eup %8153  ;;  %v4932_v27 = vsel %vm4931_vm2, %v8138_v5, %v4928_v15  ;;  %v4894_v22 = vmul.f32 %v14137_v34, %v14088_v62  ;;  %v4775_v21 = vsub.f32 %v16961_v47, %v14055_v50  ;;  %v4514_v47 = vpop.xlane.xlu0 %4513  ;;  %vm4939_vm4 = vweird.f32 %v14113_v29 }
 0x54a   :  { %8155 = vtanh.f32 %v5379_v14  ;;  %v5011_v30 = vmul.f32 %v4932_v27, %v4771_v46  ;;  %v5012_v11 = vmul.f32 %v4932_v27, %v4772_v6  ;;  %v5013_v2 = vmul.f32 %v4932_v27, %v4773_v31  ;;  %v16960_v14 = vld [vmem:[#allocation115_spill] sm:$0xff] }
 0x54b   :  { %8157 = vtanh.f32 %v5380_v54  ;;  %v5014_v52 = vmul.f32 %v4932_v27, %v4774_v9  ;;  %v4934_v16 = vmul.f32 %v8154_v55, %v14113_v29  ;;  %v4904_v46 = vmul.f32 %v14143_v26, %v14095_v63  ;;  %v16963_v9 = vld [vmem:[#allocation219_spill] sm:$0xff] }
 0x54c   :  { %8159 = vtanh.f32 %v5381_v60  ;;  %v5171_v35 = vmul.f32 %v16959_v56, %v5011_v30  ;;  %v5172_v57 = vmul.f32 %v16959_v56, %v5012_v11  ;;  %v5173_v20 = vmul.f32 %v16959_v56, %v5013_v2  ;;  %v16964_v11 = vld [vmem:[#allocation47_spill] sm:$0xff] }
 0x54d   :  { %8161 = vtanh.f32 %v5382_v41  ;;  %v5174_v5 = vmul.f32 %v16959_v56, %v5014_v52  ;;  %v4935_v54 = vmul.f32 %v8154_v55, %v4934_v16  ;;  %v16962_v41 = vld [vmem:[#allocation142_spill] sm:$0xff]  ;;  %v4777_v2 = vsub.f32 %v16964_v11, %v14055_v50 }
 0x54e   :  { %v5331_v6 = vadd.f32 %v16960_v14, %v5171_v35  ;;  %v5332_v27 = vadd.f32 %v16960_v14, %v5172_v57  ;;  %v5333_v15 = vadd.f32 %v16960_v14, %v5173_v20  ;;  %8163 = vrsqrt.f32 %v14157_v36  ;;  %v16965_v52 = vld [vmem:[#allocation102_spill] sm:$0xff]  ;;  %v16966_v20 = vld [vmem:[#allocation217_spill] sm:$0xff] }
 0x54f   :  { %v5334_v60 = vadd.f32 %v16960_v14, %v5174_v5  ;;  %v4776_v31 = vsub.f32 %v16962_v41, %v14055_v50  ;;  %v4936_v0 = vmul.f32 0.5, %v4935_v54  ;;  %v4778_v16 = vsub.f32 %v16965_v52, %v14055_v50  ;;  %v16968_v52 = vld [vmem:[#allocation11_spill] sm:$0xff] }
 0x550   :  { %v8156_v58 = vpop.eup %8155  ;;  %v5395_v30 = vadd.f32 %v5331_v6, %v16963_v9  ;;  %v4895_v56 = vmul.f32 %v14137_v34, %v4894_v22  ;;  %v5396_v5 = vadd.f32 %v5332_v27, %v16966_v20  ;;  %vm4940_vm3 = vweird.f32 %v8154_v55  ;;  %v16967_v6 = vld [vmem:[#allocation257_spill] sm:$0xff] }
 0x551   :  { %v8158_v35 = vpop.eup %8157  ;;  %v6371_v57 = vmul.f32 %v8156_v58, %v13809_v23  ;;  %v4937_v14 = vsub.f32 1.5, %v4936_v0  ;;  %v5397_v9 = vadd.f32 %v5333_v15, %v16967_v6  ;;  %v5398_v23 = vadd.f32 %v5334_v60, %v16968_v52  ;;  %vm4941_vm1 = vmor %vm4939_vm4, %vm4940_vm3 }
 0x552   :  { %v8160_v54 = vpop.eup %8159  ;;  %v6372_v41 = vmul.f32 %v8158_v35, %v13842_v3  ;;  %v7675_v63 = vmul.f32 -1.442695, %v5395_v30  ;;  %v14196_v3 = vmul.f32 0.001953125, %v4514_v47  ;;  %v4674_v35 = vpop.xlane.xlu2 %4673  ;;  %vm4949_vm7 = vweird.f32 %v14157_v36 }
 0x553   :  { %v8162_v11 = vpop.eup %8161  ;;  %v6373_v50 = vmul.f32 %v8160_v54, %v13844_v48  ;;  %v6387_v22 = vadd.f32 %v6371_v57, %v14070_v17  ;;  %v4938_v58 = vmul.f32 %v8154_v55, %v4937_v14  ;;  %v7676_v48 = vmul.f32 -1.442695, %v5396_v5  ;;  %v16969_v57 = vld [vmem:[#allocation263_spill] sm:$0xff]  ;;  %v16971_v54 = vld [vmem:[#allocation33_spill] sm:$0xff] }
 0x554   :  { %v14191_v27 = vpop.eup %8163  ;;  %v6374_v0 = vmul.f32 %v8162_v11, %v14026_v61  ;;  %v6388_v20 = vadd.f32 %v6372_v41, %v14072_v51  ;;  %8165 = vpow2.f32 %v7675_v63  ;;  %v7677_v51 = vmul.f32 -1.442695, %v5397_v9  ;;  %v16972_v9 = vld [vmem:[#allocation184_spill] sm:$0xff] }
 0x555   :  { %v6389_v29 = vadd.f32 %v6373_v50, %v14081_v1  ;;  %6435 = vst [vmem:[%s15523_s12] sm:$0xff] %v6387_v22  ;;  %v4942_v17 = vsel %vm4941_vm1, %v8154_v55, %v4938_v58  ;;  %v4944_v15 = vmul.f32 %v14191_v27, %v14157_v36  ;;  %8167 = vrcp.f32 %v14122_v38 }
 0x556   :  { %v6390_v61 = vadd.f32 %v6374_v0, %v14083_v59  ;;  %6436 = vst [vmem:[%s15523_s12 + $0x8] sm:$0xff] %v6388_v20  ;;  %v5015_v63 = vmul.f32 %v4942_v17, %v4775_v21  ;;  %v5016_v60 = vmul.f32 %v4942_v17, %v4776_v31  ;;  %v7678_v1 = vmul.f32 -1.442695, %v5398_v23 }
 0x557   :  { %6437 = vst [vmem:[%s15523_s12 + $0x10] sm:$0xff] %v6389_v29  ;;  %v5017_v55 = vmul.f32 %v4942_v17, %v4777_v2  ;;  %v4945_v30 = vmul.f32 %v14191_v27, %v4944_v15  ;;  %v5018_v59 = vmul.f32 %v4942_v17, %v4778_v16  ;;  %v4706_v31 = vmul.f32 %v14196_v3, %v14196_v3  ;;  %v16970_v2 = vld [vmem:[#allocation190_spill] sm:$0xff] }
 0x558   :  { %6438 = vst [vmem:[%s15523_s12 + $0x18] sm:$0xff] %v6390_v61  ;;  %v5175_v5 = vmul.f32 %v16969_v57, %v5015_v63  ;;  %v5176_v21 = vmul.f32 %v16969_v57, %v5016_v60  ;;  %v4905_v14 = vmul.f32 %v14143_v26, %v4904_v46  ;;  %8169 = vpow2.f32 %v7676_v48  ;;  %v16975_v63 = vld [vmem:[#allocation227_spill] sm:$0xff] }
 0x559   :  { %8171 = vpow2.f32 %v7677_v51  ;;  %v4690_v11 = vmul.f32 0.001953125, %v4674_v35  ;;  %v14226_v50 = vmul.f32 0.5, %v4895_v56  ;;  %v5177_v23 = vmul.f32 %v16969_v57, %v5017_v55 }
 0x55a   :  { %v8166_v6 = vpop.eup %8165  ;;  %v5335_v16 = vadd.f32 %v16972_v9, %v5175_v5  ;;  %8173 = vpow2.f32 %v7678_v1  ;;  %v4946_v46 = vmul.f32 0.5, %v4945_v30  ;;  %v5178_v58 = vmul.f32 %v16969_v57, %v5018_v59  ;;  %v16976_v1 = vld [vmem:[#allocation192_spill] sm:$0xff] }
 0x55b   :  { %v14228_v52 = vadd.f32 1.0, %v8166_v6  ;;  %8175 = vtanh.f32 %v6387_v22  ;;  %v5336_v0 = vadd.f32 %v16972_v9, %v5176_v21  ;;  %v4722_v48 = vsub.f32 %v4690_v11, %v4706_v31  ;;  %v14233_v17 = vpop.eup %8167 }
 0x55c   :  { %16973 = vst [vmem:[#allocation247_spill] sm:$0xff] %v14233_v17  ;;  %v14235_v15 = vmul.f32 0.5, %v4905_v14  ;;  %v16974_v56 = vsub.f32 %v13927_v8, %v13931_v49  ;;  %v5399_v22 = vadd.f32 %v5335_v16, %v13299_v43  ;;  %v4779_v55 = vsub.f32 %v16976_v1, %v14118_v42  ;;  %v16977_v8 = vld [vmem:[#allocation235_spill] sm:$0xff]  ;;  %v16978_v16 = vld [vmem:[#allocation168_spill] sm:$0xff] }
 0x55d   :  { %8177 = vrcp.f32 %v14228_v52  ;;  %v5337_v59 = vadd.f32 %v16972_v9, %v5177_v23  ;;  %v4780_v49 = vsub.f32 %v16977_v8, %v14118_v42  ;;  %v4947_v57 = vsub.f32 1.5, %v4946_v46 }
 0x55e   :  { %v14240_v51 = vadd.f32 1e-05, %v16974_v56  ;;  %8179 = vtanh.f32 %v6388_v20  ;;  %v8170_v35 = vpop.eup %8169  ;;  %v5338_v20 = vadd.f32 %v16972_v9, %v5178_v58  ;;  %v5400_v43 = vadd.f32 %v5336_v0, %v13303_v10 }
 0x55f   :  { %8181 = vtanh.f32 %v6389_v29  ;;  %v8172_v5 = vpop.eup %8171  ;;  %v14252_v21 = vadd.f32 1.0, %v8170_v35  ;;  %v14256_v31 = vadd.f32 1e-05, %v4722_v48  ;;  %v6108_v29 = vand.u32 2147483647, %v14228_v52 }
 0x560   :  { %v8174_v14 = vpop.eup %8173  ;;  %8183 = vtanh.f32 %v6390_v61  ;;  %v14258_v6 = vadd.f32 1.0, %v8172_v5  ;;  %v4781_v11 = vsub.f32 %v16978_v16, %v14118_v42  ;;  %v6110_v56 = vand.u32 2147483648, %v14228_v52 }
 0x561   :  { %v14263_v23 = vpop.eup %8175  ;;  %v14265_v46 = vadd.f32 1.0, %v8174_v14  ;;  %8185 = vrcp.f32 %v14252_v21  ;;  %v7679_v10 = vmul.f32 -1.442695, %v5399_v22  ;;  %v5401_v61 = vadd.f32 %v5337_v59, %v13312_v32 }
 0x562   :  { %8187 = vrcp.f32 %v14258_v6  ;;  %v4948_v58 = vmul.f32 %v14191_v27, %v4947_v57  ;;  %vm4950_vm5 = vweird.f32 %v14191_v27  ;;  %v5402_v1 = vadd.f32 %v5338_v20, %v13334_v37 }
 0x563   :  { %v8178_v9 = vpop.eup %8177  ;;  %v7680_v35 = vmul.f32 -1.442695, %v5400_v43  ;;  %8189 = vrsqrt.f32 %v14256_v31  ;;  %vm6104_vm6 = vweird.f32 %v14228_v52  ;;  %v6123_v22 = vand.u32 2147483647, %v14252_v21  ;;  %vm4951_vm9 = vmor %vm4949_vm7, %vm4950_vm5 }
 0x564   :  { %v14273_v0 = vpop.eup %8179  ;;  %v6100_v48 = vmul.f32 %v8178_v9, %v14228_v52  ;;  %8191 = vrcp.f32 %v14265_v46  ;;  %vm14284_vm8 = vcmp.eq.f32.partialorder %v6108_v29, 8.507059e+37  ;;  %v6111_v57 = vor.u32 1.1754944e-38, %v6110_v56 }
 0x565   :  { %v14278_v8 = vpop.eup %8181  ;;  %8193 = vpow2.f32 %v7679_v10  ;;  %v6125_v5 = vand.u32 2147483648, %v14252_v21  ;;  %v6138_v20 = vand.u32 2147483647, %v14258_v6  ;;  %v7681_v43 = vmul.f32 -1.442695, %v5401_v61 }
 0x566   :  { %v6101_v32 = vsub.f32 1.0, %v6100_v48  ;;  %v14290_v37 = vpop.eup %8183  ;;  %v14295_v14 = vsel %vm4951_vm9, %v14191_v27, %v4948_v58  ;;  %vm6105_vm10 = vweird.f32 %v8178_v9  ;;  %8195 = vpow2.f32 %v7680_v35 }
 0x567   :  { %v8186_v36 = vpop.eup %8185  ;;  %v7682_v16 = vmul.f32 -1.442695, %v5402_v1  ;;  %vm6119_vm11 = vweird.f32 %v14252_v21  ;;  %vm14299_vm12 = vcmp.eq.f32.partialorder %v6123_v22, 8.507059e+37  ;;  %vm6134_vm13 = vweird.f32 %v14258_v6  ;;  %vm6106_vm14 = vmor %vm6104_vm6, %vm6105_vm10 }
 0x568   :  { %v6102_v29 = vmul.f32 %v8178_v9, %v6101_v32  ;;  %v8188_v56 = vpop.eup %8187  ;;  %v6115_v10 = vmul.f32 %v8186_v36, %v14252_v21  ;;  %v6140_v32 = vand.u32 2147483648, %v14258_v6  ;;  %v5019_v1 = vmul.f32 %v14295_v14, %v4779_v55 }
 0x569   :  { %v14304_v61 = vpop.eup %8189  ;;  %v6130_v58 = vmul.f32 %v8188_v56, %v14258_v6  ;;  %v6126_v22 = vor.u32 1.1754944e-38, %v6125_v5  ;;  %vm14311_vm15 = vcmp.eq.f32.partialorder %v6138_v20, 8.507059e+37  ;;  %v5020_v47 = vmul.f32 %v14295_v14, %v4780_v49 }
 0x56a   :  { %v6103_v27 = vadd.f32 %v8178_v9, %v6102_v29  ;;  %v8192_v35 = vpop.eup %8191  ;;  %v6116_v60 = vsub.f32 1.0, %v6115_v10  ;;  %vm6120_vm0 = vweird.f32 %v8186_v36  ;;  %vm6135_vm2 = vweird.f32 %v8188_v56 }
 0x56b   :  { %v8194_v30 = vpop.eup %8193  ;;  %v6131_v17 = vsub.f32 1.0, %v6130_v58  ;;  %v6145_v38 = vmul.f32 %v8192_v35, %v14265_v46  ;;  %v5021_v52 = vmul.f32 %v14295_v14, %v4781_v11  ;;  %v5179_v49 = vmul.f32 %v16985_v13, %v5019_v1  ;;  %vm6121_vm4 = vmor %vm6119_vm11, %vm6120_vm0 }
 0x56c   :  { %v6107_v29 = vsel %vm6106_vm14, %v8178_v9, %v6103_v27  ;;  %v6117_v18 = vmul.f32 %v8186_v36, %v6116_v60  ;;  %v8196_v5 = vpop.eup %8195  ;;  %vm6149_vm3 = vweird.f32 %v14265_v46  ;;  %v6155_v9 = vand.u32 2147483648, %v14265_v46  ;;  %vm6136_vm5 = vmor %vm6134_vm13, %vm6135_vm2 }
 0x56d   :  { %v6112_v55 = vsel %vm14284_vm8, %v6111_v57, %v6107_v29  ;;  %v6132_v20 = vmul.f32 %v8188_v56, %v6131_v17  ;;  %v6146_v10 = vsub.f32 1.0, %v6145_v38  ;;  %v5180_v27 = vmul.f32 %v16985_v13, %v5020_v47  ;;  %v16986_v57 = vld [vmem:[#allocation110_spill] sm:$0xff] }
 0x56e   :  { %v6419_v45 = vmul.f32 %v14263_v23, %v6112_v55  ;;  %v6118_v7 = vadd.f32 %v8186_v36, %v6117_v18  ;;  %vm6150_vm1 = vweird.f32 %v8192_v35  ;;  %v6153_v38 = vand.u32 2147483647, %v14265_v46 }
 0x56f   :  { %v6133_v60 = vadd.f32 %v8188_v56, %v6132_v20  ;;  %v6147_v11 = vmul.f32 %v8192_v35, %v6146_v10  ;;  %v6141_v17 = vor.u32 1.1754944e-38, %v6140_v32  ;;  %8197 = vpow2.f32 %v7681_v43  ;;  %vm6151_vm6 = vmor %vm6149_vm3, %vm6150_vm1 }
 0x570   :  { %6451 = vst [vmem:[%s15524_s11] sm:$0xff] %v6419_v45  ;;  %v6122_v18 = vsel %vm6121_vm4, %v8186_v36, %v6118_v7  ;;  %v5181_v47 = vmul.f32 %v16985_v13, %v5021_v52  ;;  %v5339_v58 = vadd.f32 %v16986_v57, %v5179_v49  ;;  %v6156_v45 = vor.u32 1.1754944e-38, %v6155_v9 }
 0x571   :  { %v6127_v21 = vsel %vm14299_vm12, %v6126_v22, %v6122_v18  ;;  %v6137_v23 = vsel %vm6136_vm5, %v8188_v56, %v6133_v60  ;;  %v6148_v59 = vadd.f32 %v8192_v35, %v6147_v11  ;;  %v5340_v6 = vadd.f32 %v16986_v57, %v5180_v27  ;;  %v16987_v56 = vld [vmem:[#allocation104_spill] sm:$0xff] }
 0x572   :  { %v6142_v1 = vsel %vm14311_vm15, %v6141_v17, %v6137_v23  ;;  %v6420_v7 = vmul.f32 %v14273_v0, %v6127_v21  ;;  %vm6154_vm7 = vcmp.eq.f32.partialorder %v6153_v38, 8.507059e+37  ;;  %v4782_v48 = vsub.f32 %v16987_v56, %v14118_v42 }
 0x573   :  { %v6152_v43 = vsel %vm6151_vm6, %v8192_v35, %v6148_v59  ;;  %v6421_v36 = vmul.f32 %v14278_v8, %v6142_v1  ;;  %8199 = vpow2.f32 %v7682_v16  ;;  %v14351_v41 = vadd.f32 1.0, %v8194_v30 }
 0x574   :  { %v6157_v32 = vsel %vm6154_vm7, %v6156_v45, %v6152_v43  ;;  %6452 = vst [vmem:[%s15524_s11 + $0x8] sm:$0xff] %v6420_v7  ;;  %v4954_v46 = vmul.f32 %v14304_v61, %v14256_v31  ;;  %v5022_v8 = vmul.f32 %v14295_v14, %v4782_v48  ;;  %v5341_v42 = vadd.f32 %v16986_v57, %v5181_v47  ;;  %v16988_v14 = vld [vmem:[#allocation207_spill] sm:$0xff] }
 0x575   :  { %v6422_v0 = vmul.f32 %v14290_v37, %v6157_v32  ;;  %6453 = vst [vmem:[%s15524_s11 + $0x10] sm:$0xff] %v6421_v36  ;;  %v5403_v35 = vadd.f32 %v5339_v58, %v13354_v25  ;;  %v8198_v22 = vpop.eup %8197  ;;  %v4907_v16 = vsub.f32 1.5, %v14235_v15  ;;  %8201 = vrsqrt.f32 %v14240_v51  ;;  %v16989_v25 = vld [vmem:[#allocation74_spill] sm:$0xff] }
 0x576   :  { %v5404_v30 = vadd.f32 %v5340_v6, %v13357_v28  ;;  %v4955_v29 = vmul.f32 %v14304_v61, %v4954_v46  ;;  %v14369_v37 = vadd.f32 1.0, %v8196_v5  ;;  %v4783_v55 = vsub.f32 %v16988_v14, %v14196_v3  ;;  %v5251_v6 = vpop.permute.xlu2 %5250 }
 0x577   :  { %6454 = vst [vmem:[%s15524_s11 + $0x18] sm:$0xff] %v6422_v0  ;;  %v4784_v52 = vsub.f32 %v16989_v25, %v14196_v3  ;;  %v16990_v20 = vsub.f32 1.5, %v14226_v50  ;;  %8203 = vrcp.f32 %v14351_v41  ;;  %vm4899_vm8 = vweird.f32 %v14088_v62 }
 0x578   :  { %v4956_v28 = vmul.f32 0.5, %v4955_v29  ;;  %vm4900_vm9 = vweird.f32 %v14137_v34  ;;  %v14381_v49 = vadd.f32 1.0, %v8198_v22  ;;  %v5182_v5 = vmul.f32 %v16985_v13, %v5022_v8  ;;  %v16998_v8 = vld [vmem:[#allocation99_spill] sm:$0xff] }
 0x579   :  { %v4898_v10 = vmul.f32 %v14137_v34, %v16990_v20  ;;  %v5405_v9 = vadd.f32 %v5341_v42, %v13371_v12  ;;  %v7683_v27 = vmul.f32 -1.442695, %v5403_v35  ;;  %vm4901_vm10 = vmor %vm4899_vm8, %vm4900_vm9  ;;  %v8200_v60 = vpop.eup %8199  ;;  %v7684_v11 = vmul.f32 -1.442695, %v5404_v30 }
 0x57a   :  { %v4957_v50 = vsub.f32 1.5, %v4956_v28  ;;  %vm4960_vm11 = vweird.f32 %v14304_v61  ;;  %v16991_v62 = vsub.f32 %v16944_v39, %v13895_v19  ;;  %v16992_v17 = vsub.f32 %v16970_v2, %v13895_v19 }
 0x57b   :  { %v4902_v38 = vsel %vm4901_vm10, %v14137_v34, %v4898_v10  ;;  %v16993_v12 = vsub.f32 %v16971_v54, %v13895_v19  ;;  %v16994_v21 = vsub.f32 %v16975_v63, %v13895_v19  ;;  %v14399_v59 = vpop.eup %8201  ;;  %8205 = vrcp.f32 %v14369_v37  ;;  %v16995_v34 = vld [vmem:[#allocation218_spill] sm:$0xff] }
 0x57c   :  { %v4999_v18 = vmul.f32 %v4902_v38, %v16991_v62  ;;  %v5000_v47 = vmul.f32 %v4902_v38, %v16992_v17  ;;  %v4785_v39 = vsub.f32 %v16995_v34, %v14196_v3  ;;  %v4958_v58 = vmul.f32 %v14304_v61, %v4957_v50  ;;  %v16996_v19 = vld [vmem:[#allocation94_spill] sm:$0xff] }
 0x57d   :  { %v5001_v13 = vmul.f32 %v4902_v38, %v16993_v12  ;;  %v5002_v23 = vmul.f32 %v4902_v38, %v16994_v21  ;;  %vm4959_vm12 = vweird.f32 %v14256_v31  ;;  %v14406_v2 = vadd.f32 1.0, %v8200_v60  ;;  %v14414_v1 = vpop.eup %8203  ;;  %v17004_v34 = vld [vmem:[#allocation222_spill] sm:$0xff] }
 0x57e   :  { %8207 = vrcp.f32 %v14381_v49  ;;  %v5342_v54 = vadd.f32 %v16986_v57, %v5182_v5  ;;  %v4786_v63 = vsub.f32 %v16996_v19, %v14196_v3  ;;  %vm4961_vm13 = vmor %vm4959_vm12, %vm4960_vm11  ;;  %v7685_v45 = vmul.f32 -1.442695, %v5405_v9  ;;  %v16997_v57 = vld [vmem:[#allocation23_spill] sm:$0xff] }
 0x57f   :  { %8209 = vpow2.f32 %v7683_v27  ;;  %v4962_v7 = vsel %vm4961_vm13, %v14304_v61, %v4958_v58  ;;  %v5536_v31 = vmul.f32 %v13534_v33, %v13461_v53  ;;  %v5159_v56 = vmul.f32 %v16997_v57, %v4999_v18  ;;  %v17000_v27 = vld [vmem:[#allocation216_spill] sm:$0xff] }
 0x580   :  { %8211 = vpow2.f32 %v7684_v11  ;;  %v5023_v43 = vmul.f32 %v4962_v7, %v4783_v55  ;;  %v5024_v36 = vmul.f32 %v4962_v7, %v4784_v52  ;;  %v5025_v48 = vmul.f32 %v4962_v7, %v4785_v39  ;;  %v16999_v52 = vld [vmem:[#allocation194_spill] sm:$0xff]  ;;  %v17002_v18 = vld [vmem:[#allocation140_spill] sm:$0xff] }
 0x581   :  { %v5160_v3 = vmul.f32 %v16997_v57, %v5000_v47  ;;  %v5161_v32 = vmul.f32 %v16997_v57, %v5001_v13  ;;  %v5162_v46 = vmul.f32 %v16997_v57, %v5002_v23  ;;  %v5026_v0 = vmul.f32 %v4962_v7, %v4786_v63  ;;  %v14425_v22 = vpop.eup %8205  ;;  %v17003_v47 = vld [vmem:[#allocation139_spill] sm:$0xff]  ;;  %v17005_v39 = vld [vmem:[#allocation156_spill] sm:$0xff] }
 0x582   :  { %v5183_v42 = vmul.f32 %v16998_v8, %v5023_v43  ;;  %v5184_v61 = vmul.f32 %v16998_v8, %v5024_v36  ;;  %v5319_v35 = vadd.f32 %v5251_v6, %v5159_v56  ;;  %8213 = vrcp.f32 %v14406_v2  ;;  %v17006_v36 = vld [vmem:[#allocation220_spill] sm:$0xff]  ;;  %v17007_v56 = vld [vmem:[#allocation223_spill] sm:$0xff] }
 0x583   :  { %v5406_v30 = vadd.f32 %v5342_v54, %v13374_v44  ;;  %v5320_v29 = vadd.f32 %v5251_v6, %v5160_v3  ;;  %v5537_v14 = vsub.f32 1.0, %v5536_v31  ;;  %v5185_v25 = vmul.f32 %v16998_v8, %v5025_v48  ;;  %v17001_v44 = vld [vmem:[#allocation10_spill] sm:$0xff]  ;;  %v17008_v48 = vld [vmem:[#allocation88_spill] sm:$0xff] }
 0x584   :  { %v14429_v55 = vpop.eup %8207  ;;  %v5343_v20 = vadd.f32 %v16999_v52, %v5183_v42  ;;  %v5321_v10 = vadd.f32 %v5251_v6, %v5161_v32  ;;  %v5322_v28 = vadd.f32 %v5251_v6, %v5162_v46  ;;  %v14435_v9 = vmul.f32 %v14399_v59, %v14240_v51 }
 0x585   :  { %v8210_v5 = vpop.eup %8209  ;;  %8215 = vpow2.f32 %v7685_v45  ;;  %v14438_v60 = vadd.f32 %v5319_v35, %v17000_v27  ;;  %v14441_v11 = vadd.f32 %v5320_v29, %v17001_v44  ;;  %v5186_v38 = vmul.f32 %v16998_v8, %v5026_v0 }
 0x586   :  { %v8212_v50 = vpop.eup %8211  ;;  %v5344_v62 = vadd.f32 %v16999_v52, %v5184_v61  ;;  %v14446_v17 = vadd.f32 %v5321_v10, %v17002_v18  ;;  %v14449_v12 = vadd.f32 %v5322_v28, %v17003_v47  ;;  %v14454_v13 = vmul.f32 %v14143_v26, %v4907_v16  ;;  %v17009_v61 = vld [vmem:[#allocation149_spill] sm:$0xff] }
 0x587   :  { %v5407_v21 = vadd.f32 %v5343_v20, %v13413_v4  ;;  %v5538_v23 = vmul.f32 %v13534_v33, %v5537_v14  ;;  %v5551_v58 = vmul.f32 %v17005_v39, %v17004_v34  ;;  %v14462_v54 = vmul.f32 %v14414_v1, %v14351_v41  ;;  %v17015_v28 = vld [vmem:[#allocation153_spill] sm:$0xff] }
 0x588   :  { %v14466_v19 = vmul.f32 %v14425_v22, %v14369_v37  ;;  %v7686_v63 = vmul.f32 -1.442695, %v5406_v30  ;;  %v5345_v15 = vadd.f32 %v16999_v52, %v5185_v25  ;;  %v14469_v16 = vpop.eup %8213  ;;  %v14473_v4 = vmul.f32 %v14429_v55, %v14381_v49  ;;  %v17012_v25 = vld [vmem:[#allocation147_spill] sm:$0xff] }
 0x589   :  { %v14475_v45 = vadd.f32 1.0, %v8210_v5  ;;  %v5544_v7 = vand.u32 2147483647, %v13461_v53  ;;  %v5552_v6 = vsub.f32 1.0, %v5551_v58  ;;  %v14478_v31 = vadd.f32 1.0, %v8212_v50 }
 0x58a   :  { %v5346_v43 = vadd.f32 %v16999_v52, %v5186_v38  ;;  %v5408_v57 = vadd.f32 %v5344_v62, %v17006_v36  ;;  %v5566_v3 = vmul.f32 %v17008_v48, %v17007_v56  ;;  %v7687_v46 = vmul.f32 -1.442695, %v5407_v21 }
 0x58b   :  { %v8216_v32 = vpop.eup %8215  ;;  %v5539_v0 = vadd.f32 %v13534_v33, %v5538_v23  ;;  %vm5541_vm14 = vweird.f32 %v13534_v33  ;;  %v5546_v8 = vand.u32 2147483648, %v13461_v53  ;;  %v14489_v42 = vmul.f32 %v14469_v16, %v14406_v2 }
 0x58c   :  { %8217 = vpow2.f32 %v7686_v63  ;;  %v5409_v35 = vadd.f32 %v5345_v15, %v17009_v61  ;;  %vm5540_vm15 = vweird.f32 %v13461_v53  ;;  %vm14494_vm0 = vcmp.eq.f32.partialorder %v5544_v7, 8.507059e+37  ;;  %v17016_v53 = vld [vmem:[#allocation80_spill] sm:$0xff] }
 0x58d   :  { %8219 = vrcp.f32 %v14475_v45  ;;  %v5553_v29 = vmul.f32 %v17005_v39, %v5552_v6  ;;  %v5567_v14 = vsub.f32 1.0, %v5566_v3  ;;  %v5410_v52 = vadd.f32 %v5346_v43, %v17012_v25  ;;  %vm14501_vm2 = vmor %vm5540_vm15, %vm5541_vm14 }
 0x58e   :  { %8221 = vrcp.f32 %v14478_v31  ;;  %v7688_v20 = vmul.f32 -1.442695, %v5408_v57  ;;  %v5581_v5 = vmul.f32 %v17016_v53, %v17015_v28  ;;  %v14507_v27 = vadd.f32 1.0, %v8216_v32  ;;  %v17033_v32 = vld [vmem:[#allocation232_spill] sm:$0xff] }
 0x58f   :  { %8223 = vpow2.f32 %v7687_v46  ;;  %v5543_v44 = vsel %vm14501_vm2, %v13534_v33, %v5539_v0  ;;  %v5547_v50 = vor.u32 1.1754944e-38, %v5546_v8  ;;  %v7689_v38 = vmul.f32 -1.442695, %v5409_v35 }
 0x590   :  { %vm5556_vm3 = vweird.f32 %v17005_v39  ;;  %v5559_v62 = vand.u32 2147483647, %v17004_v34  ;;  %v5582_v18 = vsub.f32 1.0, %v5581_v5  ;;  %v5554_v47 = vadd.f32 %v17005_v39, %v5553_v29  ;;  %v17021_v29 = vld [vmem:[#allocation174_spill] sm:$0xff] }
 0x591   :  { %v5561_v21 = vand.u32 2147483648, %v17004_v34  ;;  %v5568_v23 = vmul.f32 %v17008_v48, %v5567_v14  ;;  %v5840_v58 = vmul.f32 %v13906_v40, %v13854_v24  ;;  %8225 = vpow2.f32 %v7688_v20  ;;  %v17022_v14 = vld [vmem:[#allocation236_spill] sm:$0xff] }
 0x592   :  { %v14519_v63 = vpop.eup %8217  ;;  %v7690_v33 = vmul.f32 -1.442695, %v5410_v52  ;;  %v14523_v15 = vsel %vm14494_vm0, %v5547_v50, %v5543_v44  ;;  %vm5555_vm4 = vweird.f32 %v17004_v34  ;;  %v5574_v6 = vand.u32 2147483647, %v17007_v56  ;;  %v17034_v34 = vld [vmem:[#allocation240_spill] sm:$0xff] }
 0x593   :  { %v14526_v7 = vpop.eup %8219  ;;  %v5576_v43 = vand.u32 2147483648, %v17007_v56  ;;  %v5583_v36 = vmul.f32 %v17016_v53, %v5582_v18  ;;  %v5841_v57 = vsub.f32 1.0, %v5840_v58  ;;  %8227 = vpow2.f32 %v7689_v38  ;;  %vm14535_vm1 = vmor %vm5555_vm4, %vm5556_vm3 }
 0x594   :  { %v14531_v3 = vpop.eup %8221  ;;  %vm14539_vm5 = vcmp.eq.f32.partialorder %v5559_v62, 8.507059e+37  ;;  %vm5570_vm6 = vweird.f32 %v17007_v56  ;;  %vm5571_vm7 = vweird.f32 %v17008_v48  ;;  %v5558_v0 = vsel %vm14535_vm1, %v17005_v39, %v5554_v47 }
 0x595   :  { %v8224_v46 = vpop.eup %8223  ;;  %v5562_v8 = vor.u32 1.1754944e-38, %v5561_v21  ;;  %v5569_v61 = vadd.f32 %v17008_v48, %v5568_v23  ;;  %v5842_v35 = vmul.f32 %v13906_v40, %v5841_v57  ;;  %8229 = vpow2.f32 %v7690_v33  ;;  %vm14570_vm11 = vmor %vm5570_vm6, %vm5571_vm7  ;;  %v17027_v21 = vld [vmem:[#allocation176_spill] sm:$0xff]  ;;  %v17028_v23 = vld [vmem:[#allocation234_spill] sm:$0xff] }
 0x596   :  { %vm5585_vm8 = vweird.f32 %v17015_v28  ;;  %v5589_v30 = vand.u32 2147483647, %v17015_v28  ;;  %v5855_v25 = vmul.f32 %v17022_v14, %v17021_v29  ;;  %vm14554_vm9 = vcmp.eq.f32.partialorder %v5574_v6, 8.507059e+37 }
 0x597   :  { %v5577_v20 = vor.u32 1.1754944e-38, %v5576_v43  ;;  %v5584_v39 = vadd.f32 %v17016_v53, %v5583_v36  ;;  %vm5586_vm10 = vweird.f32 %v17016_v53  ;;  %v8226_v10 = vpop.eup %8225  ;;  %v14560_v5 = vadd.f32 1.0, %v8224_v46 }
 0x598   :  { %v14564_v44 = vsel %vm14539_vm5, %v5562_v8, %v5558_v0  ;;  %v5591_v38 = vand.u32 2147483648, %v17015_v28  ;;  %v5856_v62 = vsub.f32 1.0, %v5855_v25  ;;  %v5573_v18 = vsel %vm14570_vm11, %v17008_v48, %v5569_v61  ;;  %vm14586_vm13 = vmor %vm5585_vm8, %vm5586_vm10 }
 0x599   :  { %v5843_v47 = vadd.f32 %v13906_v40, %v5842_v35  ;;  %vm5845_vm12 = vweird.f32 %v13906_v40  ;;  %v5870_v58 = vmul.f32 %v17028_v23, %v17027_v21  ;;  %v14582_v33 = vpop.eup %8227  ;;  %vm14590_vm14 = vcmp.eq.f32.partialorder %v5589_v30, 8.507059e+37 }
 0x59a   :  { %vm5844_vm15 = vweird.f32 %v13854_v24  ;;  %v5848_v48 = vand.u32 2147483647, %v13854_v24  ;;  %v5850_v43 = vand.u32 2147483648, %v13854_v24  ;;  %v14597_v36 = vadd.f32 1.0, %v8226_v10 }
 0x59b   :  { %v5588_v28 = vsel %vm14586_vm13, %v17016_v53, %v5584_v39  ;;  %v5871_v57 = vsub.f32 1.0, %v5870_v58  ;;  %v5885_v46 = vmul.f32 %v17034_v34, %v17033_v32  ;;  %v14604_v0 = vpop.eup %8229  ;;  %v14608_v8 = vsel %vm14554_vm9, %v5577_v20, %v5573_v18  ;;  %vm14612_vm0 = vmor %vm5844_vm15, %vm5845_vm12 }
 0x59c   :  { %v5592_v61 = vor.u32 1.1754944e-38, %v5591_v38  ;;  %v5857_v35 = vmul.f32 %v17022_v14, %v5856_v62  ;;  %vm5859_vm2 = vweird.f32 %v17021_v29  ;;  %v5847_v53 = vsel %vm14612_vm0, %v13906_v40, %v5843_v47 }
 0x59d   :  { %v5863_v30 = vand.u32 2147483647, %v17021_v29  ;;  %v5865_v25 = vand.u32 2147483648, %v17021_v29  ;;  %v5886_v52 = vsub.f32 1.0, %v5885_v46  ;;  %vm5849_vm3 = vcmp.eq.f32.partialorder %v5848_v48, 8.507059e+37 }
 0x59e   :  { %v14625_v20 = vsel %vm14590_vm14, %v5592_v61, %v5588_v28  ;;  %v5851_v39 = vor.u32 1.1754944e-38, %v5850_v43  ;;  %v5872_v10 = vmul.f32 %v17028_v23, %v5871_v57  ;;  %vm5860_vm4 = vweird.f32 %v17022_v14 }
 0x59f   :  { %vm5874_vm1 = vweird.f32 %v17027_v21  ;;  %v5878_v50 = vand.u32 2147483647, %v17027_v21  ;;  %v5887_v40 = vmul.f32 %v17034_v34, %v5886_v52  ;;  %v5858_v62 = vadd.f32 %v17022_v14, %v5857_v35  ;;  %vm14651_vm9 = vmor %vm5859_vm2, %vm5860_vm4 }
 0x5a0   :  { %v14632_v38 = vsel %vm5849_vm3, %v5851_v39, %v5847_v53  ;;  %vm5875_vm5 = vweird.f32 %v17028_v23  ;;  %v6161_v18 = vsub.f32 1.0, %v14462_v54  ;;  %vm14637_vm6 = vcmp.eq.f32.partialorder %v5863_v30, 8.507059e+37  ;;  %v17060_v30 = vld [vmem:[#allocation114_spill] sm:$0xff] }
 0x5a1   :  { %v5866_v58 = vor.u32 1.1754944e-38, %v5865_v25  ;;  %v5880_v56 = vand.u32 2147483648, %v17027_v21  ;;  %vm5889_vm7 = vweird.f32 %v17033_v32  ;;  %v5873_v6 = vadd.f32 %v17028_v23, %v5872_v10  ;;  %vm14672_vm11 = vmor %vm5874_vm1, %vm5875_vm5 }
 0x5a2   :  { %vm5890_vm8 = vweird.f32 %v17034_v34  ;;  %8231 = vtanh.f32 %v14438_v60  ;;  %v6162_v48 = vmul.f32 %v14414_v1, %v6161_v18  ;;  %vm14655_vm10 = vcmp.eq.f32.partialorder %v5878_v50, 8.507059e+37 }
 0x5a3   :  { %v5888_v28 = vadd.f32 %v17034_v34, %v5887_v40  ;;  %v5893_v57 = vand.u32 2147483647, %v17033_v32  ;;  %8233 = vtanh.f32 %v14441_v11  ;;  %v5862_v60 = vsel %vm14651_vm9, %v17022_v14, %v5858_v62  ;;  %vm14687_vm13 = vmor %vm5889_vm7, %vm5890_vm8  ;;  %v6343_v62 = vld [vmem:[%s15522_s10 + $0x20] sm:$0xff] }
 0x5a4   :  { %v5895_v29 = vand.u32 2147483648, %v17033_v32  ;;  %8235 = vtanh.f32 %v14446_v17  ;;  %v6176_v46 = vsub.f32 1.0, %v14466_v19  ;;  %v6163_v11 = vadd.f32 %v14414_v1, %v6162_v48 }
 0x5a5   :  { %8237 = vtanh.f32 %v14449_v12  ;;  %vm6165_vm12 = vweird.f32 %v14414_v1  ;;  %v6191_v14 = vsub.f32 1.0, %v14473_v4  ;;  %v5877_v17 = vsel %vm14672_vm11, %v17028_v23, %v5873_v6 }
 0x5a6   :  { %v5881_v19 = vor.u32 1.1754944e-38, %v5880_v56  ;;  %v6168_v12 = vand.u32 2147483647, %v14351_v41  ;;  %v6170_v24 = vand.u32 2147483648, %v14351_v41  ;;  %v5867_v4 = vsel %vm14637_vm6, %v5866_v58, %v5862_v60  ;;  %v6345_v58 = vld [vmem:[%s15522_s10 + $0x30] sm:$0xff]  ;;  %v6346_v56 = vld [vmem:[%s15522_s10 + $0x38] sm:$0xff] }
 0x5a7   :  { %v5892_v23 = vsel %vm14687_vm13, %v17034_v34, %v5888_v28  ;;  %vm14698_vm14 = vcmp.eq.f32.partialorder %v5893_v57, 8.507059e+37  ;;  %vm6164_vm15 = vweird.f32 %v14351_v41  ;;  %v5896_v53 = vor.u32 1.1754944e-38, %v5895_v29 }
 0x5a8   :  { %v8232_v32 = vpop.eup %8231  ;;  %vm14703_vm0 = vmor %vm6164_vm15, %vm6165_vm12  ;;  %v6177_v25 = vmul.f32 %v14425_v22, %v6176_v46  ;;  %v6192_v52 = vmul.f32 %v14429_v55, %v6191_v14  ;;  %v6206_v39 = vsub.f32 1.0, %v14489_v42  ;;  %v5882_v34 = vsel %vm14655_vm10, %v5881_v19, %v5877_v17  ;;  %v6344_v42 = vld [vmem:[%s15522_s10 + $0x28] sm:$0xff] }
 0x5a9   :  { %v8234_v10 = vpop.eup %8233  ;;  %v6167_v41 = vsel %vm14703_vm0, %v14414_v1, %v6163_v11  ;;  %vm6179_vm2 = vweird.f32 %v14369_v37  ;;  %v6183_v50 = vand.u32 2147483647, %v14369_v37  ;;  %v5897_v18 = vsel %vm14698_vm14, %v5896_v53, %v5892_v23 }
 0x5aa   :  { %v8236_v40 = vpop.eup %8235  ;;  %vm6169_vm3 = vcmp.eq.f32.partialorder %v6168_v12, 8.507059e+37  ;;  %v6171_v47 = vor.u32 1.1754944e-38, %v6170_v24  ;;  %vm6180_vm4 = vweird.f32 %v14425_v22  ;;  %v6185_v6 = vand.u32 2147483648, %v14369_v37 }
 0x5ab   :  { %v8238_v1 = vpop.eup %8237  ;;  %vm6194_vm1 = vweird.f32 %v14381_v49  ;;  %vm6195_vm5 = vweird.f32 %v14429_v55  ;;  %v6207_v48 = vmul.f32 %v14469_v16, %v6206_v39  ;;  %v6178_v43 = vadd.f32 %v14425_v22, %v6177_v25  ;;  %vm14754_vm8 = vmor %vm6179_vm2, %vm6180_vm4  ;;  %v17061_v25 = vld [vmem:[#allocation172_spill] sm:$0xff] }
 0x5ac   :  { %v6172_v54 = vsel %vm6169_vm3, %v6171_v47, %v6167_v41  ;;  %v6193_v28 = vadd.f32 %v14429_v55, %v6192_v52  ;;  %v6198_v57 = vand.u32 2147483647, %v14381_v49  ;;  %vm14739_vm6 = vcmp.eq.f32.partialorder %v6183_v50, 8.507059e+37  ;;  %vm14765_vm10 = vmor %vm6194_vm1, %vm6195_vm5  ;;  %v17063_v41 = vld [vmem:[#allocation175_spill] sm:$0xff]  ;;  %v17065_v47 = vld [vmem:[#allocation264_spill] sm:$0xff] }
 0x5ad   :  { %v6359_v29 = vmul.f32 %v6343_v62, %v14632_v38  ;;  %v6360_v46 = vmul.f32 %v6344_v42, %v5867_v4  ;;  %v6375_v61 = vmul.f32 %v8232_v32, %v14523_v15  ;;  %v6376_v11 = vmul.f32 %v8234_v10, %v14564_v44 }
 0x5ae   :  { %v6361_v14 = vmul.f32 %v6345_v58, %v5882_v34  ;;  %v6362_v17 = vmul.f32 %v6346_v56, %v5897_v18  ;;  %v6377_v19 = vmul.f32 %v8236_v40, %v14608_v8  ;;  %v6378_v21 = vmul.f32 %v8238_v1, %v14625_v20  ;;  %v17062_v34 = vld [vmem:[#allocation105_spill] sm:$0xff]  ;;  %v17064_v18 = vld [vmem:[#allocation180_spill] sm:$0xff] }
 0x5af   :  { %v6208_v12 = vadd.f32 %v14469_v16, %v6207_v48  ;;  %vm6210_vm7 = vweird.f32 %v14469_v16  ;;  %v6391_v24 = vadd.f32 %v6375_v61, %v6359_v29  ;;  %v6392_v23 = vadd.f32 %v6376_v11, %v6360_v46  ;;  %v17066_v56 = vld [vmem:[#allocation25_spill] sm:$0xff]  ;;  %v17067_v29 = vld [vmem:[#allocation155_spill] sm:$0xff] }
 0x5b0   :  { %v6200_v44 = vand.u32 2147483648, %v14381_v49  ;;  %v6215_v8 = vand.u32 2147483648, %v14406_v2  ;;  %v6393_v38 = vadd.f32 %v6377_v19, %v6361_v14  ;;  %v6394_v20 = vadd.f32 %v6378_v21, %v6362_v17  ;;  %v17068_v61 = vld [vmem:[#allocation165_spill] sm:$0xff]  ;;  %v17069_v11 = vld [vmem:[#allocation231_spill] sm:$0xff] }
 0x5b1   :  { %vm4910_vm9 = vweird.f32 %v14143_v26  ;;  %vm6209_vm11 = vweird.f32 %v14406_v2  ;;  %v6213_v37 = vand.u32 2147483647, %v14406_v2  ;;  %8239 = vtanh.f32 %v6391_v24  ;;  %6439 = vst [vmem:[%s15523_s12 + $0x20] sm:$0xff] %v6391_v24 }
 0x5b2   :  { %v4915_v35 = vmul.f32 %v14399_v59, %v14435_v9  ;;  %v6182_v49 = vsel %vm14754_vm8, %v14425_v22, %v6178_v43  ;;  %v6186_v32 = vor.u32 1.1754944e-38, %v6185_v6  ;;  %v6197_v53 = vsel %vm14765_vm10, %v14429_v55, %v6193_v28  ;;  %vm14784_vm12 = vmor %vm6209_vm11, %vm6210_vm7  ;;  %6440 = vst [vmem:[%s15523_s12 + $0x28] sm:$0xff] %v6392_v23  ;;  %v17059_v9 = vld [vmem:[#allocation48_spill] sm:$0xff] }
 0x5b3   :  { %8241 = vtanh.f32 %v6392_v23  ;;  %vm4909_vm13 = vweird.f32 %v17059_v9  ;;  %v6212_v22 = vsel %vm14784_vm12, %v14469_v16, %v6208_v12  ;;  %6441 = vst [vmem:[%s15523_s12 + $0x30] sm:$0xff] %v6393_v38  ;;  %v5656_v52 = vmul.f32 %v17061_v25, %v17060_v30  ;;  %v17070_v12 = vld [vmem:[#allocation26_spill] sm:$0xff]  ;;  %v17074_v9 = vld [vmem:[#allocation109_spill] sm:$0xff] }
 0x5b4   :  { %8243 = vtanh.f32 %v6393_v38  ;;  %v4916_v55 = vmul.f32 0.5, %v4915_v35  ;;  %v6201_v39 = vor.u32 1.1754944e-38, %v6200_v44  ;;  %v6216_v10 = vor.u32 1.1754944e-38, %v6215_v8  ;;  %6442 = vst [vmem:[%s15523_s12 + $0x38] sm:$0xff] %v6394_v20  ;;  %vm4911_vm4 = vmor %vm4909_vm13, %vm4910_vm9 }
 0x5b5   :  { %8245 = vtanh.f32 %v6394_v20  ;;  %v5671_v50 = vmul.f32 %v17063_v41, %v17062_v34  ;;  %vm6199_vm14 = vcmp.eq.f32.partialorder %v6198_v57, 8.507059e+37  ;;  %vm6214_vm15 = vcmp.eq.f32.partialorder %v6213_v37, 8.507059e+37 }
 0x5b6   :  { %v4917_v16 = vsub.f32 1.5, %v4916_v55  ;;  %vm4920_vm0 = vweird.f32 %v14399_v59  ;;  %v6187_v40 = vsel %vm14739_vm6, %v6186_v32, %v6182_v49  ;;  %v6202_v62 = vsel %vm6199_vm14, %v6201_v39, %v6197_v53  ;;  %v17072_v32 = vld [vmem:[#allocation210_spill] sm:$0xff] }
 0x5b7   :  { %v6217_v42 = vsel %vm6214_vm15, %v6216_v10, %v6212_v22  ;;  %v4767_v1 = vsub.f32 %v17065_v47, %v17064_v18  ;;  %v8240_v58 = vpop.eup %8239  ;;  %v4768_v6 = vsub.f32 %v17066_v56, %v17064_v18  ;;  %vm4919_vm2 = vweird.f32 %v14240_v51 }
 0x5b8   :  { %v4918_v48 = vmul.f32 %v14399_v59, %v4917_v16  ;;  %v5657_v43 = vsub.f32 1.0, %v5656_v52  ;;  %v6423_v57 = vmul.f32 %v8240_v58, %v6172_v54  ;;  %v4769_v60 = vsub.f32 %v17067_v29, %v17064_v18  ;;  %vm4921_vm3 = vmor %vm4919_vm2, %vm4920_vm0 }
 0x5b9   :  { %v8242_v28 = vpop.eup %8241  ;;  %v5672_v46 = vsub.f32 1.0, %v5671_v50  ;;  %v5686_v14 = vmul.f32 %v17069_v11, %v17068_v61  ;;  %v14819_v19 = vadd.f32 1.0, %v14582_v33  ;;  %v4770_v24 = vsub.f32 %v17070_v12, %v17064_v18 }
 0x5ba   :  { %v8244_v17 = vpop.eup %8243  ;;  %v6424_v21 = vmul.f32 %v8242_v28, %v6187_v40  ;;  %v4922_v51 = vsel %vm4921_vm3, %v14399_v59, %v4918_v48  ;;  %6455 = vst [vmem:[%s15524_s11 + $0x20] sm:$0xff] %v6423_v57  ;;  %8247 = vrcp.f32 %v14507_v27  ;;  %v5658_v20 = vmul.f32 %v17061_v25, %v5657_v43  ;;  %v17075_v40 = vld [vmem:[#allocation238_spill] sm:$0xff]  ;;  %v17085_v43 = vld [vmem:[#allocation188_spill] sm:$0xff]  ;;  %v17086_v28 = vld [vmem:[#allocation49_spill] sm:$0xff] }
 0x5bb   :  { %v8246_v23 = vpop.eup %8245  ;;  %v6425_v54 = vmul.f32 %v8244_v17, %v6202_v62  ;;  %v5007_v15 = vmul.f32 %v4922_v51, %v4767_v1  ;;  %v5008_v44 = vmul.f32 %v4922_v51, %v4768_v6  ;;  %v5009_v8 = vmul.f32 %v4922_v51, %v4769_v60  ;;  %v17076_v62 = vld [vmem:[#allocation244_spill] sm:$0xff]  ;;  %v17087_v60 = vld [vmem:[#allocation82_spill] sm:$0xff] }
 0x5bc   :  { %v6426_v38 = vmul.f32 %v8246_v23, %v6217_v42  ;;  %6456 = vst [vmem:[%s15524_s11 + $0x28] sm:$0xff] %v6424_v21  ;;  %v5010_v33 = vmul.f32 %v4922_v51, %v4770_v24  ;;  %v14837_v59 = vadd.f32 1.0, %v14604_v0  ;;  %8249 = vrcp.f32 %v14560_v5  ;;  %v17071_v0 = vld [vmem:[#allocation77_spill] sm:$0xff] }
 0x5bd   :  { %6457 = vst [vmem:[%s15524_s11 + $0x30] sm:$0xff] %v6425_v54  ;;  %v5673_v4 = vmul.f32 %v17063_v41, %v5672_v46  ;;  %v5687_v37 = vsub.f32 1.0, %v5686_v14  ;;  %v14846_v35 = vsel %vm4911_vm4, %v14143_v26, %v14454_v13  ;;  %v14849_v49 = vadd.f32 1.0, %v14519_v63  ;;  %v17073_v13 = vld [vmem:[#allocation170_spill] sm:$0xff] }
 0x5be   :  { %8251 = vrcp.f32 %v14597_v36  ;;  %6458 = vst [vmem:[%s15524_s11 + $0x38] sm:$0xff] %v6426_v38  ;;  %v14857_v53 = vadd.f32 %v17072_v32, %v17071_v0  ;;  %v5664_v2 = vand.u32 2147483647, %v17060_v30  ;;  %v5666_v26 = vand.u32 2147483648, %v17060_v30  ;;  %v17088_v38 = vld [vmem:[#allocation186_spill] sm:$0xff] }
 0x5bf   :  { %8253 = vrcp.f32 %v14819_v19  ;;  %v5701_v63 = vmul.f32 %v17074_v9, %v17073_v13  ;;  %v5659_v22 = vadd.f32 %v17061_v25, %v5658_v20  ;;  %vm5661_vm1 = vweird.f32 %v17061_v25  ;;  %v17089_v20 = vld [vmem:[#allocation245_spill] sm:$0xff] }
 0x5c0   :  { %v5679_v55 = vand.u32 2147483647, %v17062_v34  ;;  %v5681_v52 = vand.u32 2147483648, %v17062_v34  ;;  %8255 = vrcp.f32 %v14837_v59  ;;  %v5674_v39 = vadd.f32 %v17063_v41, %v5673_v4  ;;  %v14872_v50 = vpop.eup %8247 }
 0x5c1   :  { %vm5676_vm5 = vweird.f32 %v17063_v41  ;;  %v5688_v10 = vmul.f32 %v17069_v11, %v5687_v37  ;;  %vm5660_vm6 = vweird.f32 %v17060_v30  ;;  %vm5675_vm7 = vweird.f32 %v17062_v34 }
 0x5c2   :  { %v5702_v16 = vsub.f32 1.0, %v5701_v63  ;;  %v5960_v42 = vmul.f32 %v17076_v62, %v17075_v40  ;;  %v14878_v18 = vpop.eup %8249  ;;  %vm14880_vm8 = vmor %vm5660_vm6, %vm5661_vm1  ;;  %vm14884_vm9 = vcmp.eq.f32.partialorder %v5664_v2, 8.507059e+37  ;;  %v5667_v58 = vor.u32 1.1754944e-38, %v5666_v26  ;;  %v17092_v63 = vld [vmem:[#allocation193_spill] sm:$0xff] }
 0x5c3   :  { %vm5690_vm10 = vweird.f32 %v17068_v61  ;;  %vm5691_vm11 = vweird.f32 %v17069_v11  ;;  %v5663_v34 = vsel %vm14880_vm8, %v17061_v25, %v5659_v22  ;;  %vm14897_vm12 = vmor %vm5675_vm7, %vm5676_vm5  ;;  %vm14901_vm13 = vcmp.eq.f32.partialorder %v5679_v55, 8.507059e+37  ;;  %v17093_v22 = vld [vmem:[#allocation247_spill] sm:$0xff] }
 0x5c4   :  { %v14890_v30 = vpop.eup %8251  ;;  %v5682_v48 = vor.u32 1.1754944e-38, %v5681_v52  ;;  %v5975_v57 = vmul.f32 %v17086_v28, %v17085_v43  ;;  %v14910_v46 = vmul.f32 %v17087_v60, %v5007_v15  ;;  %v5678_v25 = vsel %vm14897_vm12, %v17063_v41, %v5674_v39  ;;  %vm14945_vm14 = vmor %vm5690_vm10, %vm5691_vm11 }
 0x5c5   :  { %v14907_v29 = vpop.eup %8253  ;;  %v5689_v14 = vadd.f32 %v17069_v11, %v5688_v10  ;;  %v5694_v17 = vand.u32 2147483647, %v17068_v61  ;;  %v14918_v21 = vmul.f32 %v17087_v60, %v5008_v44  ;;  %v14921_v12 = vmul.f32 %v17087_v60, %v5009_v8 }
 0x5c6   :  { %v5703_v24 = vmul.f32 %v17074_v9, %v5702_v16  ;;  %v5961_v51 = vsub.f32 1.0, %v5960_v42  ;;  %v14924_v23 = vpop.eup %8255  ;;  %v14928_v54 = vsel %vm14884_vm9, %v5667_v58, %v5663_v34  ;;  %v5696_v41 = vand.u32 2147483648, %v17068_v61 }
 0x5c7   :  { %v5709_v15 = vand.u32 2147483647, %v17073_v13  ;;  %v5990_v44 = vmul.f32 %v17089_v20, %v17088_v38  ;;  %v14935_v4 = vmul.f32 %v17087_v60, %v5010_v33  ;;  %v14939_v8 = vsel %vm14901_vm13, %v5682_v48, %v5678_v25 }
 0x5c8   :  { %vm5705_vm15 = vweird.f32 %v17073_v13  ;;  %v5976_v0 = vsub.f32 1.0, %v5975_v57  ;;  %v5693_v33 = vsel %vm14945_vm14, %v17069_v11, %v5689_v14  ;;  %vm5695_vm0 = vcmp.eq.f32.partialorder %v5694_v17, 8.507059e+37 }
 0x5c9   :  { %vm5706_vm2 = vweird.f32 %v17074_v9  ;;  %v5711_v32 = vand.u32 2147483648, %v17073_v13  ;;  %v5704_v2 = vadd.f32 %v17074_v9, %v5703_v24  ;;  %v5962_v61 = vmul.f32 %v17076_v62, %v5961_v51 }
 0x5ca   :  { %v5991_v26 = vsub.f32 1.0, %v5990_v44  ;;  %v6005_v55 = vmul.f32 %v17093_v22, %v17092_v63  ;;  %v5697_v52 = vor.u32 1.1754944e-38, %v5696_v41  ;;  %vm14959_vm3 = vcmp.eq.f32.partialorder %v5709_v15, 8.507059e+37  ;;  %vm14974_vm5 = vmor %vm5705_vm15, %vm5706_vm2 }
 0x5cb   :  { %vm5964_vm4 = vweird.f32 %v17075_v40  ;;  %vm5965_vm1 = vweird.f32 %v17076_v62  ;;  %v5968_v11 = vand.u32 2147483647, %v17075_v40  ;;  %v5970_v10 = vand.u32 2147483648, %v17075_v40 }
 0x5cc   :  { %v5977_v16 = vmul.f32 %v17086_v28, %v5976_v0  ;;  %v6006_v42 = vsub.f32 1.0, %v6005_v55  ;;  %v14968_v47 = vsel %vm5695_vm0, %v5697_v52, %v5693_v33  ;;  %v5983_v58 = vand.u32 2147483647, %v17085_v43  ;;  %vm15005_vm9 = vmor %vm5964_vm4, %vm5965_vm1  ;;  %v17117_v55 = vld [vmem:[#allocation24_spill] sm:$0xff] }
 0x5cd   :  { %v5985_v34 = vand.u32 2147483648, %v17085_v43  ;;  %v6280_v56 = vmul.f32 %v14878_v18, %v14560_v5  ;;  %v5708_v6 = vsel %vm14974_vm5, %v17074_v9, %v5704_v2  ;;  %v5712_v48 = vor.u32 1.1754944e-38, %v5711_v32 }
 0x5ce   :  { %v5963_v57 = vadd.f32 %v17076_v62, %v5962_v61  ;;  %v5992_v13 = vmul.f32 %v17089_v20, %v5991_v26  ;;  %vm5979_vm6 = vweird.f32 %v17085_v43  ;;  %vm5980_vm7 = vweird.f32 %v17086_v28 }
 0x5cf   :  { %v6007_v60 = vmul.f32 %v17093_v22, %v6006_v42  ;;  %v6281_v25 = vsub.f32 1.0, %v6280_v56  ;;  %vm14990_vm8 = vcmp.eq.f32.partialorder %v5968_v11, 8.507059e+37  ;;  %v5971_v17 = vor.u32 1.1754944e-38, %v5970_v10  ;;  %vm15024_vm13 = vmor %vm5979_vm6, %vm5980_vm7  ;;  %v17121_v56 = vld [vmem:[#allocation71_spill] sm:$0xff] }
 0x5d0   :  { %v5978_v24 = vadd.f32 %v17086_v28, %v5977_v16  ;;  %v6295_v9 = vmul.f32 %v14890_v30, %v14597_v36  ;;  %v14999_v51 = vsel %vm14959_vm3, %v5712_v48, %v5708_v6  ;;  %vm15009_vm10 = vcmp.eq.f32.partialorder %v5983_v58, 8.507059e+37  ;;  %v5261_v48 = vpop.permute.xlu1 %5260 }
 0x5d1   :  { %v5986_v44 = vor.u32 1.1754944e-38, %v5985_v34  ;;  %v6282_v37 = vmul.f32 %v14878_v18, %v6281_v25  ;;  %v5967_v0 = vsel %vm15005_vm9, %v17076_v62, %v5963_v57  ;;  %v5993_v33 = vadd.f32 %v17089_v20, %v5992_v13 }
 0x5d2   :  { %vm5994_vm11 = vweird.f32 %v17088_v38  ;;  %vm5995_vm12 = vweird.f32 %v17089_v20  ;;  %v5998_v32 = vand.u32 2147483647, %v17088_v38  ;;  %v6000_v2 = vand.u32 2147483648, %v17088_v38 }
 0x5d3   :  { %v6008_v62 = vadd.f32 %v17093_v22, %v6007_v60  ;;  %vm6010_vm14 = vweird.f32 %v17093_v22  ;;  %v5982_v61 = vsel %vm15024_vm13, %v17086_v28, %v5978_v24  ;;  %vm6009_vm15 = vweird.f32 %v17092_v63  ;;  %vm15037_vm0 = vmor %vm5994_vm11, %vm5995_vm12 }
 0x5d4   :  { %v6015_v43 = vand.u32 2147483648, %v17092_v63  ;;  %v6296_v26 = vsub.f32 1.0, %v6295_v9  ;;  %v6013_v52 = vand.u32 2147483647, %v17092_v63  ;;  %v6283_v38 = vadd.f32 %v14878_v18, %v6282_v37  ;;  %vm15053_vm3 = vmor %vm6009_vm15, %vm6010_vm14 }
 0x5d5   :  { %vm6285_vm2 = vweird.f32 %v14878_v18  ;;  %v6310_v39 = vmul.f32 %v14907_v29, %v14819_v19  ;;  %v15048_v28 = vsel %vm14990_vm8, %v5971_v17, %v5967_v0  ;;  %v5997_v11 = vsel %vm15037_vm0, %v17089_v20, %v5993_v33  ;;  %v17112_v33 = vld [vmem:[#allocation72_spill] sm:$0xff] }
 0x5d6   :  { %v6288_v63 = vand.u32 2147483647, %v14560_v5  ;;  %v6290_v16 = vand.u32 2147483648, %v14560_v5  ;;  %v6001_v42 = vor.u32 1.1754944e-38, %v6000_v2  ;;  %v6012_v1 = vsel %vm15053_vm3, %v17093_v22, %v6008_v62  ;;  %v17114_v2 = vld [vmem:[#allocation108_spill] sm:$0xff] }
 0x5d7   :  { %vm6284_vm4 = vweird.f32 %v14560_v5  ;;  %v6305_v58 = vand.u32 2147483648, %v14597_v36  ;;  %v15066_v20 = vsel %vm15009_vm10, %v5986_v44, %v5982_v61  ;;  %vm5999_vm1 = vcmp.eq.f32.partialorder %v5998_v32, 8.507059e+37  ;;  %v17113_v32 = vld [vmem:[#allocation178_spill] sm:$0xff] }
 0x5d8   :  { %v6016_v34 = vor.u32 1.1754944e-38, %v6015_v43  ;;  %vm15068_vm5 = vmor %vm6284_vm4, %vm6285_vm2  ;;  %v6297_v6 = vmul.f32 %v14890_v30, %v6296_v26  ;;  %v15073_v57 = vsel %vm5999_vm1, %v6001_v42, %v5997_v11  ;;  %vm6014_vm6 = vcmp.eq.f32.partialorder %v6013_v52, 8.507059e+37  ;;  %v17116_v43 = vld [vmem:[#allocation148_spill] sm:$0xff]  ;;  %v17120_v11 = vld [vmem:[#allocation111_spill] sm:$0xff] }
 0x5d9   :  { %v6287_v5 = vsel %vm15068_vm5, %v14878_v18, %v6283_v38  ;;  %v6311_v22 = vsub.f32 1.0, %v6310_v39  ;;  %vm6289_vm7 = vcmp.eq.f32.partialorder %v6288_v63, 8.507059e+37  ;;  %v6291_v60 = vor.u32 1.1754944e-38, %v6290_v16  ;;  %v17119_v38 = vld [vmem:[#allocation151_spill] sm:$0xff] }
 0x5da   :  { %v15078_v13 = vsel %vm6014_vm6, %v6016_v34, %v6012_v1  ;;  %v6303_v25 = vand.u32 2147483647, %v14597_v36  ;;  %v15081_v14 = vor.u32 1.1754944e-38, %v6305_v58  ;;  %v6318_v17 = vand.u32 2147483647, %v14819_v19  ;;  %v5256_v58 = vpop.permute.xlu0 %5255 }
 0x5db   :  { %v6325_v24 = vmul.f32 %v14924_v23, %v14837_v59  ;;  %v5327_v9 = vadd.f32 %v5261_v48, %v14910_v46  ;;  %v15087_v41 = vsel %vm6289_vm7, %v6291_v60, %v6287_v5  ;;  %v15090_v18 = vadd.f32 %v14890_v30, %v6297_v6  ;;  %v17115_v46 = vld [vmem:[#allocation150_spill] sm:$0xff] }
 0x5dc   :  { %v5328_v15 = vadd.f32 %v5261_v48, %v14918_v21  ;;  %v5329_v44 = vadd.f32 %v5261_v48, %v14921_v12  ;;  %v6312_v37 = vmul.f32 %v14907_v29, %v6311_v22  ;;  %v5330_v0 = vadd.f32 %v5261_v48, %v14935_v4  ;;  %v17118_v12 = vld [vmem:[#allocation154_spill] sm:$0xff]  ;;  %v17123_v22 = vld [vmem:[#allocation79_spill] sm:$0xff] }
 0x5dd   :  { %v5391_v40 = vadd.f32 %v5327_v9, %v17112_v33  ;;  %v4763_v62 = vsub.f32 %v17114_v2, %v17113_v32  ;;  %vm6300_vm8 = vweird.f32 %v14890_v30  ;;  %v4764_v21 = vsub.f32 %v17117_v55, %v17113_v32  ;;  %v17122_v6 = vld [vmem:[#allocation90_spill] sm:$0xff] }
 0x5de   :  { %v5392_v61 = vadd.f32 %v5328_v15, %v17115_v46  ;;  %v5393_v26 = vadd.f32 %v5329_v44, %v17116_v43  ;;  %v4765_v52 = vsub.f32 %v17118_v12, %v17113_v32  ;;  %vm6315_vm9 = vweird.f32 %v14907_v29  ;;  %v6351_v5 = vld [vmem:[%s15522_s10 + $0x60] sm:$0xff] }
 0x5df   :  { %v6326_v4 = vsub.f32 1.0, %v6325_v24  ;;  %v5394_v39 = vadd.f32 %v5330_v0, %v17119_v38  ;;  %8257 = vtanh.f32 %v5391_v40  ;;  %v4766_v10 = vsub.f32 %v17120_v11, %v17113_v32  ;;  %v6352_v0 = vld [vmem:[%s15522_s10 + $0x68] sm:$0xff]  ;;  %v17127_v55 = vld [vmem:[#allocation162_spill] sm:$0xff] }
 0x5e0   :  { %vm6299_vm10 = vweird.f32 %v14597_v36  ;;  %8259 = vtanh.f32 %v5392_v61  ;;  %v5003_v63 = vmul.f32 %v14846_v35, %v4763_v62  ;;  %v5004_v16 = vmul.f32 %v14846_v35, %v4764_v21  ;;  %v17130_v38 = vld [vmem:[#allocation163_spill] sm:$0xff] }
 0x5e1   :  { %v5005_v42 = vmul.f32 %v14846_v35, %v4765_v52  ;;  %vm6314_vm11 = vweird.f32 %v14819_v19  ;;  %v6320_v1 = vand.u32 2147483648, %v14819_v19  ;;  %8261 = vtanh.f32 %v5393_v26  ;;  %v17126_v26 = vld [vmem:[#allocation152_spill] sm:$0xff]  ;;  %vm15175_vm0 = vmor %vm6299_vm10, %vm6300_vm8 }
 0x5e2   :  { %v5006_v34 = vmul.f32 %v14846_v35, %v4766_v10  ;;  %v5596_v48 = vmul.f32 %v17122_v6, %v17121_v56  ;;  %8263 = vtanh.f32 %v5394_v39  ;;  %v5163_v60 = vmul.f32 %v17123_v22, %v5003_v63  ;;  %v17132_v10 = vld [vmem:[#allocation226_spill] sm:$0xff]  ;;  %vm15185_vm2 = vmor %vm6314_vm11, %vm6315_vm9 }
 0x5e3   :  { %v5164_v24 = vmul.f32 %v17123_v22, %v5004_v16  ;;  %v5165_v9 = vmul.f32 %v17123_v22, %v5005_v42  ;;  %v15126_v15 = vadd.f32 %v14907_v29, %v6312_v37  ;;  %vm6329_vm12 = vweird.f32 %v14837_v59  ;;  %v6353_v37 = vld [vmem:[%s15522_s10 + $0x70] sm:$0xff] }
 0x5e4   :  { %vm6330_vm13 = vweird.f32 %v14924_v23  ;;  %v5166_v35 = vmul.f32 %v17123_v22, %v5006_v34  ;;  %v6327_v44 = vmul.f32 %v14924_v23, %v6326_v4  ;;  %v5323_v33 = vadd.f32 %v5256_v58, %v5163_v60 }
 0x5e5   :  { %v5324_v40 = vadd.f32 %v5256_v58, %v5164_v24  ;;  %v5325_v32 = vadd.f32 %v5256_v58, %v5165_v9  ;;  %v8258_v2 = vpop.eup %8257  ;;  %vm15135_vm14 = vcmp.eq.f32.partialorder %v6303_v25, 8.507059e+37  ;;  %v6367_v46 = vmul.f32 %v6351_v5, %v15048_v28  ;;  %v6354_v25 = vld [vmem:[%s15522_s10 + $0x78] sm:$0xff]  ;;  %v17131_v28 = vld [vmem:[#allocation167_spill] sm:$0xff]  ;;  %vm15206_vm3 = vmor %vm6329_vm12, %vm6330_vm13 }
 0x5e6   :  { %v5326_v61 = vadd.f32 %v5256_v58, %v5166_v35  ;;  %v5597_v43 = vsub.f32 1.0, %v5596_v48  ;;  %v5611_v21 = vmul.f32 %v17127_v55, %v17126_v26  ;;  %v8260_v12 = vpop.eup %8259  ;;  %vm15145_vm15 = vcmp.eq.f32.partialorder %v6318_v17, 8.507059e+37 }
 0x5e7   :  { %v6383_v4 = vmul.f32 %v8258_v2, %v14928_v54  ;;  %v15154_v39 = vadd.f32 %v5323_v33, %v17130_v38  ;;  %v15157_v11 = vadd.f32 %v5324_v40, %v17131_v28  ;;  %v15160_v63 = vadd.f32 %v5325_v32, %v17132_v10  ;;  %v8262_v16 = vpop.eup %8261  ;;  %v17145_v28 = vld [vmem:[#allocation179_spill] sm:$0xff]  ;;  %v17146_v10 = vld [vmem:[#allocation53_spill] sm:$0xff] }
 0x5e8   :  { %v6335_v17 = vand.u32 2147483648, %v14837_v59  ;;  %v6368_v42 = vmul.f32 %v6352_v0, %v15066_v20  ;;  %v6384_v58 = vmul.f32 %v8260_v12, %v14939_v8  ;;  %v15166_v34 = vadd.f32 %v5326_v61, %v14857_v53  ;;  %v8264_v54 = vpop.eup %8263  ;;  %v17142_v61 = vld [vmem:[#allocation166_spill] sm:$0xff] }
 0x5e9   :  { %v6328_v48 = vadd.f32 %v14924_v23, %v6327_v44  ;;  %v6369_v5 = vmul.f32 %v6353_v37, %v15073_v57  ;;  %v6385_v22 = vmul.f32 %v8262_v16, %v14968_v47  ;;  %v6399_v60 = vadd.f32 %v6383_v4, %v6367_v46  ;;  %v17141_v46 = vld [vmem:[#allocation161_spill] sm:$0xff]  ;;  %v17149_v47 = vld [vmem:[#allocation183_spill] sm:$0xff] }
 0x5ea   :  { %v6370_v8 = vmul.f32 %v6354_v25, %v15078_v13  ;;  %v6386_v53 = vmul.f32 %v8264_v54, %v14999_v51  ;;  %v6400_v20 = vadd.f32 %v6384_v58, %v6368_v42  ;;  %v5612_v9 = vsub.f32 1.0, %v5611_v21 }
 0x5eb   :  { %v6333_v36 = vand.u32 2147483647, %v14837_v59  ;;  %v6401_v57 = vadd.f32 %v6385_v22, %v6369_v5  ;;  %8265 = vtanh.f32 %v6399_v60  ;;  %6447 = vst [vmem:[%s15523_s12 + $0x60] sm:$0xff] %v6399_v60  ;;  %v5598_v51 = vmul.f32 %v17122_v6, %v5597_v43 }
 0x5ec   :  { %v6302_v13 = vsel %vm15175_vm0, %v14890_v30, %v15090_v18  ;;  %v6317_v35 = vsel %vm15185_vm2, %v14907_v29, %v15126_v15  ;;  %v6402_v0 = vadd.f32 %v6386_v53, %v6370_v8  ;;  %8267 = vtanh.f32 %v6400_v20  ;;  %6448 = vst [vmem:[%s15523_s12 + $0x68] sm:$0xff] %v6400_v20  ;;  %v17139_v29 = vld [vmem:[#allocation159_spill] sm:$0xff]  ;;  %v17140_v18 = vld [vmem:[#allocation228_spill] sm:$0xff] }
 0x5ed   :  { %v6332_v30 = vsel %vm15206_vm3, %v14924_v23, %v6328_v48  ;;  %8269 = vtanh.f32 %v6401_v57  ;;  %6449 = vst [vmem:[%s15523_s12 + $0x70] sm:$0xff] %v6401_v57  ;;  %v5606_v59 = vand.u32 2147483648, %v17121_v56  ;;  %v5626_v15 = vmul.f32 %v17140_v18, %v17139_v29 }
 0x5ee   :  { %v6321_v33 = vor.u32 1.1754944e-38, %v6320_v1  ;;  %v6336_v40 = vor.u32 1.1754944e-38, %v6335_v17  ;;  %8271 = vtanh.f32 %v6402_v0  ;;  %6450 = vst [vmem:[%s15523_s12 + $0x78] sm:$0xff] %v6402_v0  ;;  %v5613_v23 = vmul.f32 %v17127_v55, %v5612_v9  ;;  %v17151_v0 = vld [vmem:[#allocation237_spill] sm:$0xff] }
 0x5ef   :  { %v6307_v32 = vsel %vm15135_vm14, %v15081_v14, %v6302_v13  ;;  %vm6334_vm4 = vcmp.eq.f32.partialorder %v6333_v36, 8.507059e+37  ;;  %v5599_v2 = vadd.f32 %v17122_v6, %v5598_v51  ;;  %vm5601_vm1 = vweird.f32 %v17122_v6  ;;  %v17150_v36 = vld [vmem:[#allocation241_spill] sm:$0xff] }
 0x5f0   :  { %v6322_v19 = vsel %vm15145_vm15, %v6321_v33, %v6317_v35  ;;  %v6337_v1 = vsel %vm6334_vm4, %v6336_v40, %v6332_v30  ;;  %v5627_v37 = vsub.f32 1.0, %v5626_v15  ;;  %v5641_v43 = vmul.f32 %v17142_v61, %v17141_v46  ;;  %v17152_v30 = vld [vmem:[#allocation191_spill] sm:$0xff] }
 0x5f1   :  { %v8266_v21 = vpop.eup %8265  ;;  %vm5600_vm5 = vweird.f32 %v17121_v56  ;;  %v5604_v12 = vand.u32 2147483647, %v17121_v56  ;;  %v5607_v62 = vor.u32 1.1754944e-38, %v5606_v59  ;;  %vm5616_vm6 = vweird.f32 %v17127_v55 }
 0x5f2   :  { %v8268_v14 = vpop.eup %8267  ;;  %v6431_v25 = vmul.f32 %v8266_v21, %v15087_v41  ;;  %vm15241_vm7 = vmor %vm5600_vm5, %vm5601_vm1  ;;  %v5614_v52 = vadd.f32 %v17127_v55, %v5613_v23  ;;  %v5642_v38 = vsub.f32 1.0, %v5641_v43  ;;  %v5900_v16 = vmul.f32 %v17146_v10, %v17145_v28  ;;  %v17158_v43 = vld [vmem:[#allocation242_spill] sm:$0xff] }
 0x5f3   :  { %v8270_v17 = vpop.eup %8269  ;;  %v6432_v42 = vmul.f32 %v8268_v14, %v6307_v32  ;;  %v5603_v56 = vsel %vm15241_vm7, %v17122_v6, %v5599_v2  ;;  %vm5615_vm8 = vweird.f32 %v17126_v26  ;;  %v5621_v41 = vand.u32 2147483648, %v17126_v26 }
 0x5f4   :  { %v8272_v58 = vpop.eup %8271  ;;  %v6433_v54 = vmul.f32 %v8270_v17, %v6322_v19  ;;  %6463 = vst [vmem:[%s15524_s11 + $0x60] sm:$0xff] %v6431_v25  ;;  %v5619_v48 = vand.u32 2147483647, %v17126_v26  ;;  %v5628_v5 = vmul.f32 %v17140_v18, %v5627_v37  ;;  %v5901_v22 = vsub.f32 1.0, %v5900_v16  ;;  %vm15264_vm10 = vmor %vm5615_vm8, %vm5616_vm6 }
 0x5f5   :  { %8273 = vrcp.f32 %v14849_v49  ;;  %v6434_v60 = vmul.f32 %v8272_v58, %v6337_v1  ;;  %6464 = vst [vmem:[%s15524_s11 + $0x68] sm:$0xff] %v6432_v42  ;;  %vm5605_vm9 = vcmp.eq.f32.partialorder %v5604_v12, 8.507059e+37  ;;  %v5618_v24 = vsel %vm15264_vm10, %v17127_v55, %v5614_v52 }
 0x5f6   :  { %6465 = vst [vmem:[%s15524_s11 + $0x70] sm:$0xff] %v6433_v54  ;;  %v15271_v26 = vsel %vm5605_vm9, %v5607_v62, %v5603_v56  ;;  %vm5630_vm11 = vweird.f32 %v17139_v29  ;;  %v5643_v8 = vmul.f32 %v17142_v61, %v5642_v38  ;;  %v5622_v53 = vor.u32 1.1754944e-38, %v5621_v41 }
 0x5f7   :  { %6466 = vst [vmem:[%s15524_s11 + $0x78] sm:$0xff] %v6434_v60  ;;  %v5634_v20 = vand.u32 2147483647, %v17139_v29  ;;  %v5902_v9 = vmul.f32 %v17146_v10, %v5901_v22  ;;  %v5915_v57 = vmul.f32 %v17150_v36, %v17149_v47  ;;  %vm5620_vm12 = vcmp.eq.f32.partialorder %v5619_v48, 8.507059e+37 }
 0x5f8   :  { %v5629_v51 = vadd.f32 %v17140_v18, %v5628_v5  ;;  %vm5631_vm13 = vweird.f32 %v17140_v18  ;;  %v5636_v55 = vand.u32 2147483648, %v17139_v29  ;;  %v15288_v13 = vsel %vm5620_vm12, %v5622_v53, %v5618_v24 }
 0x5f9   :  { %v5649_v35 = vand.u32 2147483647, %v17141_v46  ;;  %v5916_v44 = vsub.f32 1.0, %v5915_v57  ;;  %v5930_v59 = vmul.f32 %v17152_v30, %v17151_v0  ;;  %v5644_v15 = vadd.f32 %v17142_v61, %v5643_v8  ;;  %vm15301_vm0 = vmor %vm5630_vm11, %vm5631_vm13 }
 0x5fa   :  { %vm5645_vm14 = vweird.f32 %v17141_v46  ;;  %vm5646_vm15 = vweird.f32 %v17142_v61  ;;  %v5651_v33 = vand.u32 2147483648, %v17141_v46  ;;  %vm15305_vm2 = vcmp.eq.f32.partialorder %v5634_v20, 8.507059e+37  ;;  %v17157_v46 = vld [vmem:[#allocation37_spill] sm:$0xff] }
 0x5fb   :  { %v15297_v40 = vpop.eup %8273  ;;  %v5903_v2 = vadd.f32 %v17146_v10, %v5902_v9  ;;  %vm5905_vm3 = vweird.f32 %v17146_v10  ;;  %v5931_v19 = vsub.f32 1.0, %v5930_v59  ;;  %v5633_v1 = vsel %vm15301_vm0, %v17140_v18, %v5629_v51  ;;  %vm15318_vm4 = vmor %vm5645_vm14, %vm5646_vm15 }
 0x5fc   :  { %v5908_v37 = vand.u32 2147483647, %v17145_v28  ;;  %v5910_v29 = vand.u32 2147483648, %v17145_v28  ;;  %v5945_v21 = vmul.f32 %v17158_v43, %v17157_v46  ;;  %v5637_v12 = vor.u32 1.1754944e-38, %v5636_v55 }
 0x5fd   :  { %vm15322_vm1 = vcmp.eq.f32.partialorder %v5649_v35, 8.507059e+37  ;;  %vm5904_vm5 = vweird.f32 %v17145_v28  ;;  %v5917_v18 = vmul.f32 %v17150_v36, %v5916_v44  ;;  %v5648_v25 = vsel %vm15318_vm4, %v17142_v61, %v5644_v15 }
 0x5fe   :  { %v5652_v4 = vor.u32 1.1754944e-38, %v5651_v33  ;;  %vm15331_vm6 = vmor %vm5904_vm5, %vm5905_vm3  ;;  %v5923_v38 = vand.u32 2147483647, %v17149_v47  ;;  %v5946_v16 = vsub.f32 1.0, %v5945_v21  ;;  %v15338_v17 = vsel %vm15305_vm2, %v5637_v12, %v5633_v1  ;;  %v6347_v1 = vld [vmem:[%s15522_s10 + $0x40] sm:$0xff]  ;;  %v6349_v21 = vld [vmem:[%s15522_s10 + $0x50] sm:$0xff] }
 0x5ff   :  { %v5907_v28 = vsel %vm15331_vm6, %v17146_v10, %v5903_v2  ;;  %v5925_v42 = vand.u32 2147483648, %v17149_v47  ;;  %v5932_v61 = vmul.f32 %v17152_v30, %v5931_v19  ;;  %vm5909_vm7 = vcmp.eq.f32.partialorder %v5908_v37, 8.507059e+37 }
 0x600   :  { %v5911_v56 = vor.u32 1.1754944e-38, %v5910_v29  ;;  %vm5919_vm8 = vweird.f32 %v17149_v47  ;;  %vm5920_vm9 = vweird.f32 %v17150_v36  ;;  %v15349_v41 = vsel %vm15322_vm1, %v5652_v4, %v5648_v25  ;;  %v6350_v4 = vld [vmem:[%s15522_s10 + $0x58] sm:$0xff] }
 0x601   :  { %v5918_v58 = vadd.f32 %v17150_v36, %v5917_v18  ;;  %v5947_v54 = vmul.f32 %v17158_v43, %v5946_v16  ;;  %v6220_v10 = vmul.f32 %v14526_v7, %v14475_v45  ;;  %vm15355_vm10 = vcmp.eq.f32.partialorder %v5923_v38, 8.507059e+37  ;;  %vm15364_vm13 = vmor %vm5919_vm8, %vm5920_vm9 }
 0x602   :  { %v5912_v48 = vsel %vm5909_vm7, %v5911_v56, %v5907_v28  ;;  %vm5934_vm11 = vweird.f32 %v17151_v0  ;;  %vm5935_vm12 = vweird.f32 %v17152_v30  ;;  %v5926_v22 = vor.u32 1.1754944e-38, %v5925_v42 }
 0x603   :  { %v5933_v60 = vadd.f32 %v17152_v30, %v5932_v61  ;;  %v5938_v6 = vand.u32 2147483647, %v17151_v0  ;;  %v5940_v24 = vand.u32 2147483648, %v17151_v0  ;;  %vm5950_vm14 = vweird.f32 %v17158_v43  ;;  %vm15380_vm15 = vmor %vm5934_vm11, %vm5935_vm12 }
 0x604   :  { %v5953_v53 = vand.u32 2147483647, %v17157_v46  ;;  %8275 = vtanh.f32 %v15154_v39  ;;  %v6235_v20 = vmul.f32 %v14531_v3, %v14478_v31  ;;  %v5922_v9 = vsel %vm15364_vm13, %v17150_v36, %v5918_v58 }
 0x605   :  { %v5948_v47 = vadd.f32 %v17158_v43, %v5947_v54  ;;  %8277 = vtanh.f32 %v15157_v11  ;;  %v6221_v57 = vsub.f32 1.0, %v6220_v10  ;;  %vm5949_vm0 = vweird.f32 %v17157_v46 }
 0x606   :  { %v5955_v39 = vand.u32 2147483648, %v17157_v46  ;;  %8279 = vtanh.f32 %v15160_v63  ;;  %v6250_v36 = vmul.f32 %v14872_v50, %v14507_v27  ;;  %v5937_v11 = vsel %vm15380_vm15, %v17152_v30, %v5933_v60  ;;  %vm15397_vm3 = vmor %vm5949_vm0, %vm5950_vm14 }
 0x607   :  { %vm5939_vm2 = vcmp.eq.f32.partialorder %v5938_v6, 8.507059e+37  ;;  %v5941_v55 = vor.u32 1.1754944e-38, %v5940_v24  ;;  %8281 = vtanh.f32 %v15166_v34  ;;  %v5927_v35 = vsel %vm15355_vm10, %v5926_v22, %v5922_v9 }
 0x608   :  { %vm15401_vm4 = vcmp.eq.f32.partialorder %v5953_v53, 8.507059e+37  ;;  %v6230_v0 = vand.u32 2147483648, %v14475_v45  ;;  %v6236_v30 = vsub.f32 1.0, %v6235_v20  ;;  %v5952_v34 = vsel %vm15397_vm3, %v17158_v43, %v5948_v47  ;;  %v6348_v43 = vld [vmem:[%s15522_s10 + $0x48] sm:$0xff] }
 0x609   :  { %v6222_v59 = vmul.f32 %v14526_v7, %v6221_v57  ;;  %v6251_v15 = vsub.f32 1.0, %v6250_v36  ;;  %v6265_v33 = vmul.f32 %v15297_v40, %v14849_v49  ;;  %v5942_v32 = vsel %vm5939_vm2, %v5941_v55, %v5937_v11 }
 0x60a   :  { %v8276_v23 = vpop.eup %8275  ;;  %v5956_v2 = vor.u32 1.1754944e-38, %v5955_v39  ;;  %vm6224_vm1 = vweird.f32 %v14475_v45  ;;  %vm6225_vm5 = vweird.f32 %v14526_v7  ;;  %v6228_v37 = vand.u32 2147483647, %v14475_v45 }
 0x60b   :  { %v8278_v19 = vpop.eup %8277  ;;  %vm6239_vm6 = vweird.f32 %v14478_v31  ;;  %vm6240_vm7 = vweird.f32 %v14531_v3  ;;  %v6266_v29 = vsub.f32 1.0, %v6265_v33  ;;  %v6231_v62 = vor.u32 1.1754944e-38, %v6230_v0  ;;  %vm15450_vm10 = vmor %vm6224_vm1, %vm6225_vm5 }
 0x60c   :  { %v8280_v46 = vpop.eup %8279  ;;  %v5957_v12 = vsel %vm15401_vm4, %v5956_v2, %v5952_v34  ;;  %v6237_v14 = vmul.f32 %v14531_v3, %v6236_v30  ;;  %v6243_v18 = vand.u32 2147483647, %v14478_v31  ;;  %v6223_v52 = vadd.f32 %v14526_v7, %v6222_v59  ;;  %vm15466_vm12 = vmor %vm6239_vm6, %vm6240_vm7 }
 0x60d   :  { %v8282_v25 = vpop.eup %8281  ;;  %v6245_v38 = vand.u32 2147483648, %v14478_v31  ;;  %v6252_v16 = vmul.f32 %v14872_v50, %v6251_v15  ;;  %vm6254_vm8 = vweird.f32 %v14507_v27  ;;  %vm6255_vm9 = vweird.f32 %v14872_v50 }
 0x60e   :  { %v6267_v28 = vmul.f32 %v15297_v40, %v6266_v29  ;;  %v6363_v42 = vmul.f32 %v6347_v1, %v5912_v48  ;;  %v6379_v61 = vmul.f32 %v8276_v23, %v15271_v26  ;;  %v6364_v56 = vmul.f32 %v6348_v43, %v5927_v35  ;;  %vm15482_vm13 = vmor %vm6254_vm8, %vm6255_vm9 }
 0x60f   :  { %v6365_v58 = vmul.f32 %v6349_v21, %v5942_v32  ;;  %v6380_v54 = vmul.f32 %v8278_v19, %v15288_v13  ;;  %v6381_v10 = vmul.f32 %v8280_v46, %v15338_v17  ;;  %v6238_v5 = vadd.f32 %v14531_v3, %v6237_v14 }
 0x610   :  { %v6366_v22 = vmul.f32 %v6350_v4, %v5957_v12  ;;  %v6382_v60 = vmul.f32 %v8282_v25, %v15349_v41  ;;  %v6395_v6 = vadd.f32 %v6379_v61, %v6363_v42  ;;  %v6253_v24 = vadd.f32 %v14872_v50, %v6252_v16 }
 0x611   :  { %v6260_v8 = vand.u32 2147483648, %v14507_v27  ;;  %v6396_v53 = vadd.f32 %v6380_v54, %v6364_v56  ;;  %v6397_v48 = vadd.f32 %v6381_v10, %v6365_v58  ;;  %v6268_v13 = vadd.f32 %v15297_v40, %v6267_v28 }
 0x612   :  { %vm6270_vm11 = vweird.f32 %v15297_v40  ;;  %v6398_v17 = vadd.f32 %v6382_v60, %v6366_v22  ;;  %8283 = vtanh.f32 %v6395_v6  ;;  %6443 = vst [vmem:[%s15523_s12 + $0x40] sm:$0xff] %v6395_v6  ;;  %v6227_v41 = vsel %vm15450_vm10, %v14526_v7, %v6223_v52 }
 0x613   :  { %v6258_v20 = vand.u32 2147483647, %v14507_v27  ;;  %v6275_v9 = vand.u32 2147483648, %v14849_v49  ;;  %8285 = vtanh.f32 %v6396_v53  ;;  %6444 = vst [vmem:[%s15523_s12 + $0x48] sm:$0xff] %v6396_v53  ;;  %v6242_v7 = vsel %vm15466_vm12, %v14531_v3, %v6238_v5 }
 0x614   :  { %vm6269_vm14 = vweird.f32 %v14849_v49  ;;  %v6273_v47 = vand.u32 2147483647, %v14849_v49  ;;  %8287 = vtanh.f32 %v6397_v48  ;;  %6445 = vst [vmem:[%s15523_s12 + $0x50] sm:$0xff] %v6397_v48  ;;  %vm6229_vm15 = vcmp.eq.f32.partialorder %v6228_v37, 8.507059e+37 }
 0x615   :  { %v6246_v57 = vor.u32 1.1754944e-38, %v6245_v38  ;;  %v6257_v3 = vsel %vm15482_vm13, %v14872_v50, %v6253_v24  ;;  %vm6271_vm0 = vmor %vm6269_vm14, %vm6270_vm11  ;;  %8289 = vtanh.f32 %v6398_v17  ;;  %6446 = vst [vmem:[%s15523_s12 + $0x58] sm:$0xff] %v6398_v17  ;;  %v6232_v27 = vsel %vm6229_vm15, %v6231_v62, %v6227_v41 }
 0x616   :  { %vm6244_vm2 = vcmp.eq.f32.partialorder %v6243_v18, 8.507059e+37  ;;  %v6261_v49 = vor.u32 1.1754944e-38, %v6260_v8  ;;  %v6272_v51 = vsel %vm6271_vm0, %v15297_v40, %v6268_v13  ;;  %vm6259_vm3 = vcmp.eq.f32.partialorder %v6258_v20, 8.507059e+37 }
 0x617   :  { %v6247_v39 = vsel %vm6244_vm2, %v6246_v57, %v6242_v7  ;;  %v6276_v36 = vor.u32 1.1754944e-38, %v6275_v9  ;;  %vm6274_vm4 = vcmp.eq.f32.partialorder %v6273_v47, 8.507059e+37 }
 0x618   :  { %v8284_v11 = vpop.eup %8283  ;;  %v6262_v55 = vsel %vm6259_vm3, %v6261_v49, %v6257_v3 }
 0x619   :  { %v8286_v50 = vpop.eup %8285  ;;  %v6277_v35 = vsel %vm6274_vm4, %v6276_v36, %v6272_v51  ;;  %v6427_v44 = vmul.f32 %v8284_v11, %v6232_v27 }
 0x61a   :  { %v8288_v63 = vpop.eup %8287  ;;  %v6428_v0 = vmul.f32 %v8286_v50, %v6247_v39 }
 0x61b   :  { %v8290_v30 = vpop.eup %8289  ;;  %v6429_v34 = vmul.f32 %v8288_v63, %v6262_v55  ;;  %6459 = vst [vmem:[%s15524_s11 + $0x40] sm:$0xff] %v6427_v44 }
 0x61c   :  { %v6430_v59 = vmul.f32 %v8290_v30, %v6277_v35  ;;  %6460 = vst [vmem:[%s15524_s11 + $0x48] sm:$0xff] %v6428_v0 }
 0x61d   :  { %6461 = vst [vmem:[%s15524_s11 + $0x50] sm:$0xff] %v6429_v34 }
 0x61e   :  { %6462 = vst [vmem:[%s15524_s11 + $0x58] sm:$0xff] %v6430_v59 }

</bundles_post_ra>
